<compile_context>
chip_gen: v5e
topology: v5e:2x2
jax: 0.10.0
libtpu: 0.0.40
codegen_flags: <defaults>
</compile_context>

<pallas_src>
import jax
import jax.numpy as jnp
from jax.experimental import pallas as pl
from jax.experimental.pallas import tpu as pltpu

D_MODEL = 512
NHEAD = 8          # head split is a no-op for the degenerate seq_len==1 attention
NUM_LAYERS = 2
DIM_FF = 2048      # nn.TransformerEncoderLayer default
LN_EPS = 1e-5      # nn.LayerNorm default


# ----------------------------------------------------------------------------
# Fused kernel: runs one encoder layer per grid step along the inner axis,
# carrying the activations in the (resident) output VMEM block.
# ----------------------------------------------------------------------------
def _fused_encoder_kernel(x_ref, watt_ref, batt_ref, ln1g_ref, ln1b_ref,
                          w1_ref, b1_ref, w2_ref, b2_ref, ln2g_ref, ln2b_ref,
                          o_ref):
    layer = pl.program_id(1)

    # Seed the resident output block with the input on the first layer; for
    # later layers it already holds the previous layer's output.
    @pl.when(layer == 0)
    def _():
        o_ref[...] = x_ref[...]

    x = o_ref[...].astype(jnp.float32)

    # --- self-attention (seq_len==1: softmax weight == 1.0) ----------------
    # attn = x @ W_att + b_att, with W_att = Wv^T @ Wo^T folded offline (bf16
    # operands, f32 accumulation on the MXU).
    attn = jnp.dot(x.astype(jnp.bfloat16), watt_ref[...],
                   preferred_element_type=jnp.float32) + batt_ref[...]
    # TODO(synk): dropout(p=0.1) omitted (identity under eval/inference).
    h = x + attn

    # --- layernorm 1 (f32) --------------------------------------------------
    mu = jnp.mean(h, axis=-1, keepdims=True)
    var = jnp.mean(jnp.square(h - mu), axis=-1, keepdims=True)
    h = (h - mu) * jax.lax.rsqrt(var + LN_EPS) * ln1g_ref[...] + ln1b_ref[...]

    # --- feed-forward: linear1 -> relu -> linear2 (bf16 operands, f32 acc) ---
    f = jnp.dot(h.astype(jnp.bfloat16), w1_ref[...],
                preferred_element_type=jnp.float32) + b1_ref[...]
    f = jnp.maximum(f, 0.0)
    f = jnp.dot(f.astype(jnp.bfloat16), w2_ref[...],
                preferred_element_type=jnp.float32) + b2_ref[...]
    g = h + f

    # --- layernorm 2 (f32) --------------------------------------------------
    mu2 = jnp.mean(g, axis=-1, keepdims=True)
    var2 = jnp.mean(jnp.square(g - mu2), axis=-1, keepdims=True)
    o_ref[...] = ((g - mu2) * jax.lax.rsqrt(var2 + LN_EPS)
                  * ln2g_ref[...] + ln2b_ref[...]).astype(o_ref.dtype)


def simple_transformer_pallas(x, p, row_tile=None):
    """Equivalent of SimpleTransformer.forward: encoder(x.unsqueeze(0)).squeeze(0)."""
    N, D = x.shape
    L = p["w_att"].shape[0]
    F = p["w1"].shape[2]
    if row_tile is None:
        # Process the whole (small) sequence in one grid step; cap at 256 rows.
        row_tile = N if N <= 256 else 256
    assert N % row_tile == 0, "pad seq to a multiple of the row tile"
    assert row_tile == N or row_tile % 8 == 0
    grid = (N // row_tile, L)

    def act_spec():
        # Same block across the layer axis -> stays resident in VMEM.
        return pl.BlockSpec((row_tile, D), lambda i, l: (i, 0))

    def w_spec(s1, s2):
        # Per-layer weight slab; leading layer dim squeezed out of the kernel.
        return pl.BlockSpec((None, s1, s2), lambda i, l: (l, 0, 0))

    in_specs = [
        act_spec(),                    # x
        w_spec(D, D), w_spec(1, D),    # W_att (bf16), b_att
        w_spec(1, D), w_spec(1, D),    # ln1 gamma, beta
        w_spec(D, F), w_spec(1, F),    # W1^T (bf16), b1
        w_spec(F, D), w_spec(1, D),    # W2^T (bf16), b2
        w_spec(1, D), w_spec(1, D),    # ln2 gamma, beta
    ]

    return pl.pallas_call(
        _fused_encoder_kernel,
        out_shape=jax.ShapeDtypeStruct((N, D), x.dtype),
        grid_spec=pltpu.PrefetchScalarGridSpec(
            num_scalar_prefetch=0,
            grid=grid,
            in_specs=in_specs,
            out_specs=act_spec(),
        ),
        compiler_params=pltpu.CompilerParams(
            # rows are independent (parallel, shards across v7x cores);
            # layer axis carries the activation block (arbitrary).
            dimension_semantics=("parallel", "arbitrary"),
            vmem_limit_bytes=48 * 1024 * 1024,   # fits v7x's 64 MiB VMEM
        ),
    )(x, p["w_att"], p["b_att"], p["ln1_g"], p["ln1_b"],
      p["w1"], p["b1"], p["w2"], p["b2"], p["ln2_g"], p["ln2_b"])


# ----------------------------------------------------------------------------
# Deterministic parameter init (pre-folded attention, bf16 matmul weights,
# stacked along a leading layer axis) and a pure-JAX reference.
# ----------------------------------------------------------------------------
def init_params(key, d_model=D_MODEL, dim_ff=DIM_FF, num_layers=NUM_LAYERS):
    cols = {k: [] for k in ("w_att", "b_att", "ln1_g", "ln1_b",
                            "w1", "b1", "w2", "b2", "ln2_g", "ln2_b")}
    for _ in range(num_layers):
        key, *ks = jax.random.split(key, 13)
        # packed QKV in_proj as in nn.MultiheadAttention: (3*D, D)
        in_proj_w = 0.02 * jax.random.normal(ks[0], (3 * d_model, d_model), jnp.float32)
        in_proj_b = 0.01 * jax.random.normal(ks[1], (3 * d_model,), jnp.float32)
        wv = in_proj_w[2 * d_model:]          # V slice (only projection that matters)
        bv = in_proj_b[2 * d_model:]
        wo = 0.02 * jax.random.normal(ks[2], (d_model, d_model), jnp.float32)
        bo = 0.01 * jax.random.normal(ks[3], (d_model,), jnp.float32)
        # Fold the degenerate attention path offline (f32), cast weight to bf16.
        w_att = wv.T @ wo.T
        b_att = bv @ wo.T + bo
        w1 = 0.02 * jax.random.normal(ks[4], (dim_ff, d_model), jnp.float32)
        b1 = 0.01 * jax.random.normal(ks[5], (dim_ff,), jnp.float32)
        w2 = 0.02 * jax.random.normal(ks[6], (d_model, dim_ff), jnp.float32)
        b2 = 0.01 * jax.random.normal(ks[7], (d_model,), jnp.float32)
        ln1_g = 1.0 + 0.05 * jax.random.normal(ks[8], (d_model,), jnp.float32)
        ln1_b = 0.05 * jax.random.normal(ks[9], (d_model,), jnp.float32)
        ln2_g = 1.0 + 0.05 * jax.random.normal(ks[10], (d_model,), jnp.float32)
        ln2_b = 0.05 * jax.random.normal(ks[11], (d_model,), jnp.float32)

        cols["w_att"].append(w_att.astype(jnp.bfloat16))
        cols["b_att"].append(b_att.reshape(1, -1))
        cols["ln1_g"].append(ln1_g.reshape(1, -1))
        cols["ln1_b"].append(ln1_b.reshape(1, -1))
        cols["w1"].append(w1.T.astype(jnp.bfloat16))
        cols["b1"].append(b1.reshape(1, -1))
        cols["w2"].append(w2.T.astype(jnp.bfloat16))
        cols["b2"].append(b2.reshape(1, -1))
        cols["ln2_g"].append(ln2_g.reshape(1, -1))
        cols["ln2_b"].append(ln2_b.reshape(1, -1))

    return {k: jnp.stack(v, axis=0) for k, v in cols.items()}


def _reference(x, p):
    """Pure-JAX reference doing the same math (bf16 dot operands, f32 acc)."""
    h = x
    for l in range(p["w_att"].shape[0]):
        attn = jnp.dot(h.astype(jnp.bfloat16), p["w_att"][l],
                       preferred_element_type=jnp.float32) + p["b_att"][l]
        y = h + attn
        mu = jnp.mean(y, -1, keepdims=True)
        var = jnp.mean(jnp.square(y - mu), -1, keepdims=True)
        y = (y - mu) * jax.lax.rsqrt(var + LN_EPS) * p["ln1_g"][l] + p["ln1_b"][l]
        f = jnp.dot(y.astype(jnp.bfloat16), p["w1"][l],
                    preferred_element_type=jnp.float32) + p["b1"][l]
        f = jnp.maximum(f, 0.0)
        f = jnp.dot(f.astype(jnp.bfloat16), p["w2"][l],
                    preferred_element_type=jnp.float32) + p["b2"][l]
        g = y + f
        mu2 = jnp.mean(g, -1, keepdims=True)
        var2 = jnp.mean(jnp.square(g - mu2), -1, keepdims=True)
        h = (g - mu2) * jax.lax.rsqrt(var2 + LN_EPS) * p["ln2_g"][l] + p["ln2_b"][l]
    return h


if __name__ == "__main__":
    key = jax.random.PRNGKey(0)
    k_x, k_p = jax.random.split(key)

    SEQ = 8  # small sequence; d_model fixed at 512 by the module defaults
    x = jax.random.normal(k_x, (SEQ, D_MODEL), jnp.float32)
    params = init_params(k_p)

    out = jax.block_until_ready(simple_transformer_pallas(x, params))
    ref = jax.block_until_ready(_reference(x, params))

    assert out.shape == (SEQ, D_MODEL)
    assert bool(jnp.all(jnp.isfinite(out)))
    assert bool(jnp.allclose(out, ref, rtol=1e-2, atol=1e-2))

    print("KERNEL_OK")
</pallas_src>

<mosaic_0001>
module attributes {stable_mosaic.version = 11 : i64} {
  func.func @_fused_encoder_kernel(%arg0: i32, %arg1: i32, %arg2: memref<8x512xf32, #tpu.memory_space<vmem>>, %arg3: memref<1x512x512xbf16, #tpu.memory_space<vmem>>, %arg4: memref<1x1x512xf32, #tpu.memory_space<vmem>>, %arg5: memref<1x1x512xf32, #tpu.memory_space<vmem>>, %arg6: memref<1x1x512xf32, #tpu.memory_space<vmem>>, %arg7: memref<1x512x2048xbf16, #tpu.memory_space<vmem>>, %arg8: memref<1x1x2048xf32, #tpu.memory_space<vmem>>, %arg9: memref<1x2048x512xbf16, #tpu.memory_space<vmem>>, %arg10: memref<1x1x512xf32, #tpu.memory_space<vmem>>, %arg11: memref<1x1x512xf32, #tpu.memory_space<vmem>>, %arg12: memref<1x1x512xf32, #tpu.memory_space<vmem>>, %arg13: memref<8x512xf32, #tpu.memory_space<vmem>>) attributes {dimension_semantics = [#tpu.dimension_semantics<parallel>, #tpu.dimension_semantics<arbitrary>], iteration_bounds = array<i64: 1, 2>, scalar_prefetch = 0 : i64, scratch_operands = 0 : i64, tpu.core_type = #tpu.core_type<tc>, window_params = [{transform_indices = @transform_0, window_bounds = array<i64: 8, 512>}, {transform_indices = @transform_1, window_bounds = array<i64: 1, 512, 512>}, {transform_indices = @transform_2, window_bounds = array<i64: 1, 1, 512>}, {transform_indices = @transform_3, window_bounds = array<i64: 1, 1, 512>}, {transform_indices = @transform_4, window_bounds = array<i64: 1, 1, 512>}, {transform_indices = @transform_5, window_bounds = array<i64: 1, 512, 2048>}, {transform_indices = @transform_6, window_bounds = array<i64: 1, 1, 2048>}, {transform_indices = @transform_7, window_bounds = array<i64: 1, 2048, 512>}, {transform_indices = @transform_8, window_bounds = array<i64: 1, 1, 512>}, {transform_indices = @transform_9, window_bounds = array<i64: 1, 1, 512>}, {transform_indices = @transform_10, window_bounds = array<i64: 1, 1, 512>}, {transform_indices = @transform_11, window_bounds = array<i64: 8, 512>}]} {
    %c0_i32 = arith.constant 0 : i32
    %0 = arith.cmpi eq, %arg1, %c0_i32 : i32
    %1 = arith.extui %0 : i1 to i32
    %c0_i32_0 = arith.constant 0 : i32
    %2 = arith.cmpi ne, %1, %c0_i32_0 : i32
    scf.if %2 {
      %c0_47 = arith.constant 0 : index
      %c0_48 = arith.constant 0 : index
      %85 = vector.load %arg2[%c0_47, %c0_48] : memref<8x512xf32, #tpu.memory_space<vmem>>, vector<8x512xf32>
      %c0_49 = arith.constant 0 : index
      %c0_50 = arith.constant 0 : index
      %86 = vector.load %arg13[%c0_49, %c0_50] : memref<8x512xf32, #tpu.memory_space<vmem>>, vector<8x512xf32>
      tpu.vector_store %arg13[%c0_49, %c0_50], %85 {strides = array<i32>} : memref<8x512xf32, #tpu.memory_space<vmem>>, vector<8x512xf32>,
    } else {
    }
    %c0 = arith.constant 0 : index
    %c0_1 = arith.constant 0 : index
    %3 = vector.load %arg13[%c0, %c0_1] : memref<8x512xf32, #tpu.memory_space<vmem>>, vector<8x512xf32>
    %4 = arith.truncf %3 : vector<8x512xf32> to vector<8x512xbf16>
    %c0_2 = arith.constant 0 : index
    %c0_3 = arith.constant 0 : index
    %c0_4 = arith.constant 0 : index
    %5 = vector.load %arg3[%c0_2, %c0_3, %c0_4] : memref<1x512x512xbf16, #tpu.memory_space<vmem>>, vector<1x512x512xbf16>
    %6 = vector.shape_cast %5 : vector<1x512x512xbf16> to vector<512x512xbf16>
    %cst = arith.constant dense<0.000000e+00> : vector<8x512xf32>
    %7 = tpu.matmul %4, %6, %cst {dimension_numbers = #tpu.dot_dimension_numbers<[1], [0], [0], [1], [0, 0, 1, 1], [], []>} : vector<8x512xbf16>, vector<512x512xbf16>, vector<8x512xf32> -> vector<8x512xf32>
    %c0_5 = arith.constant 0 : index
    %c0_6 = arith.constant 0 : index
    %c0_7 = arith.constant 0 : index
    %8 = vector.load %arg4[%c0_5, %c0_6, %c0_7] : memref<1x1x512xf32, #tpu.memory_space<vmem>>, vector<1x1x512xf32>
    %9 = vector.shape_cast %8 : vector<1x1x512xf32> to vector<1x512xf32>
    %10 = vector.broadcast %9 : vector<1x512xf32> to vector<8x512xf32>
    %11 = arith.addf %7, %10 : vector<8x512xf32>
    %12 = arith.addf %3, %11 : vector<8x512xf32>
    %cst_8 = arith.constant dense<0.000000e+00> : vector<8xf32>
    %13 = vector.multi_reduction <add>, %12, %cst_8 [1] : vector<8x512xf32> to vector<8xf32>
    %14 = vector.shape_cast %13 : vector<8xf32> to vector<8x1xf32>
    %cst_9 = arith.constant 5.120000e+02 : f32
    %15 = vector.broadcast %cst_9 : f32 to vector<8x1xf32>
    %16 = arith.divf %14, %15 : vector<8x1xf32>
    %17 = vector.broadcast %16 : vector<8x1xf32> to vector<8x512xf32>
    %18 = arith.subf %12, %17 : vector<8x512xf32>
    %19 = arith.mulf %18, %18 : vector<8x512xf32>
    %cst_10 = arith.constant dense<0.000000e+00> : vector<8xf32>
    %20 = vector.multi_reduction <add>, %19, %cst_10 [1] : vector<8x512xf32> to vector<8xf32>
    %21 = vector.shape_cast %20 : vector<8xf32> to vector<8x1xf32>
    %cst_11 = arith.constant 5.120000e+02 : f32
    %22 = vector.broadcast %cst_11 : f32 to vector<8x1xf32>
    %23 = arith.divf %21, %22 : vector<8x1xf32>
    %24 = vector.broadcast %16 : vector<8x1xf32> to vector<8x512xf32>
    %25 = arith.subf %12, %24 : vector<8x512xf32>
    %cst_12 = arith.constant 9.99999974E-6 : f32
    %26 = vector.broadcast %cst_12 : f32 to vector<8x1xf32>
    %27 = arith.addf %23, %26 : vector<8x1xf32>
    %28 = math.rsqrt %27 : vector<8x1xf32>
    %29 = vector.broadcast %28 : vector<8x1xf32> to vector<8x512xf32>
    %30 = arith.mulf %25, %29 : vector<8x512xf32>
    %c0_13 = arith.constant 0 : index
    %c0_14 = arith.constant 0 : index
    %c0_15 = arith.constant 0 : index
    %31 = vector.load %arg5[%c0_13, %c0_14, %c0_15] : memref<1x1x512xf32, #tpu.memory_space<vmem>>, vector<1x1x512xf32>
    %32 = vector.shape_cast %31 : vector<1x1x512xf32> to vector<1x512xf32>
    %33 = vector.broadcast %32 : vector<1x512xf32> to vector<8x512xf32>
    %34 = arith.mulf %30, %33 : vector<8x512xf32>
    %c0_16 = arith.constant 0 : index
    %c0_17 = arith.constant 0 : index
    %c0_18 = arith.constant 0 : index
    %35 = vector.load %arg6[%c0_16, %c0_17, %c0_18] : memref<1x1x512xf32, #tpu.memory_space<vmem>>, vector<1x1x512xf32>
    %36 = vector.shape_cast %35 : vector<1x1x512xf32> to vector<1x512xf32>
    %37 = vector.broadcast %36 : vector<1x512xf32> to vector<8x512xf32>
    %38 = arith.addf %34, %37 : vector<8x512xf32>
    %39 = arith.truncf %38 : vector<8x512xf32> to vector<8x512xbf16>
    %c0_19 = arith.constant 0 : index
    %c0_20 = arith.constant 0 : index
    %c0_21 = arith.constant 0 : index
    %40 = vector.load %arg7[%c0_19, %c0_20, %c0_21] : memref<1x512x2048xbf16, #tpu.memory_space<vmem>>, vector<1x512x2048xbf16>
    %41 = vector.shape_cast %40 : vector<1x512x2048xbf16> to vector<512x2048xbf16>
    %cst_22 = arith.constant dense<0.000000e+00> : vector<8x2048xf32>
    %42 = tpu.matmul %39, %41, %cst_22 {dimension_numbers = #tpu.dot_dimension_numbers<[1], [0], [0], [1], [0, 0, 1, 1], [], []>} : vector<8x512xbf16>, vector<512x2048xbf16>, vector<8x2048xf32> -> vector<8x2048xf32>
    %c0_23 = arith.constant 0 : index
    %c0_24 = arith.constant 0 : index
    %c0_25 = arith.constant 0 : index
    %43 = vector.load %arg8[%c0_23, %c0_24, %c0_25] : memref<1x1x2048xf32, #tpu.memory_space<vmem>>, vector<1x1x2048xf32>
    %44 = vector.shape_cast %43 : vector<1x1x2048xf32> to vector<1x2048xf32>
    %45 = vector.broadcast %44 : vector<1x2048xf32> to vector<8x2048xf32>
    %46 = arith.addf %42, %45 : vector<8x2048xf32>
    %cst_26 = arith.constant 0.000000e+00 : f32
    %47 = vector.broadcast %cst_26 : f32 to vector<8x2048xf32>
    %48 = arith.maximumf %46, %47 : vector<8x2048xf32>
    %49 = arith.truncf %48 : vector<8x2048xf32> to vector<8x2048xbf16>
    %c0_27 = arith.constant 0 : index
    %c0_28 = arith.constant 0 : index
    %c0_29 = arith.constant 0 : index
    %50 = vector.load %arg9[%c0_27, %c0_28, %c0_29] : memref<1x2048x512xbf16, #tpu.memory_space<vmem>>, vector<1x2048x512xbf16>
    %51 = vector.shape_cast %50 : vector<1x2048x512xbf16> to vector<2048x512xbf16>
    %cst_30 = arith.constant dense<0.000000e+00> : vector<8x512xf32>
    %52 = tpu.matmul %49, %51, %cst_30 {dimension_numbers = #tpu.dot_dimension_numbers<[1], [0], [0], [1], [0, 0, 1, 1], [], []>} : vector<8x2048xbf16>, vector<2048x512xbf16>, vector<8x512xf32> -> vector<8x512xf32>
    %c0_31 = arith.constant 0 : index
    %c0_32 = arith.constant 0 : index
    %c0_33 = arith.constant 0 : index
    %53 = vector.load %arg10[%c0_31, %c0_32, %c0_33] : memref<1x1x512xf32, #tpu.memory_space<vmem>>, vector<1x1x512xf32>
    %54 = vector.shape_cast %53 : vector<1x1x512xf32> to vector<1x512xf32>
    %55 = vector.broadcast %54 : vector<1x512xf32> to vector<8x512xf32>
    %56 = arith.addf %52, %55 : vector<8x512xf32>
    %57 = arith.addf %38, %56 : vector<8x512xf32>
    %cst_34 = arith.constant dense<0.000000e+00> : vector<8xf32>
    %58 = vector.multi_reduction <add>, %57, %cst_34 [1] : vector<8x512xf32> to vector<8xf32>
    %59 = vector.shape_cast %58 : vector<8xf32> to vector<8x1xf32>
    %cst_35 = arith.constant 5.120000e+02 : f32
    %60 = vector.broadcast %cst_35 : f32 to vector<8x1xf32>
    %61 = arith.divf %59, %60 : vector<8x1xf32>
    %62 = vector.broadcast %61 : vector<8x1xf32> to vector<8x512xf32>
    %63 = arith.subf %57, %62 : vector<8x512xf32>
    %64 = arith.mulf %63, %63 : vector<8x512xf32>
    %cst_36 = arith.constant dense<0.000000e+00> : vector<8xf32>
    %65 = vector.multi_reduction <add>, %64, %cst_36 [1] : vector<8x512xf32> to vector<8xf32>
    %66 = vector.shape_cast %65 : vector<8xf32> to vector<8x1xf32>
    %cst_37 = arith.constant 5.120000e+02 : f32
    %67 = vector.broadcast %cst_37 : f32 to vector<8x1xf32>
    %68 = arith.divf %66, %67 : vector<8x1xf32>
    %69 = vector.broadcast %61 : vector<8x1xf32> to vector<8x512xf32>
    %70 = arith.subf %57, %69 : vector<8x512xf32>
    %cst_38 = arith.constant 9.99999974E-6 : f32
    %71 = vector.broadcast %cst_38 : f32 to vector<8x1xf32>
    %72 = arith.addf %68, %71 : vector<8x1xf32>
    %73 = math.rsqrt %72 : vector<8x1xf32>
    %74 = vector.broadcast %73 : vector<8x1xf32> to vector<8x512xf32>
    %75 = arith.mulf %70, %74 : vector<8x512xf32>
    %c0_39 = arith.constant 0 : index
    %c0_40 = arith.constant 0 : index
    %c0_41 = arith.constant 0 : index
    %76 = vector.load %arg11[%c0_39, %c0_40, %c0_41] : memref<1x1x512xf32, #tpu.memory_space<vmem>>, vector<1x1x512xf32>
    %77 = vector.shape_cast %76 : vector<1x1x512xf32> to vector<1x512xf32>
    %78 = vector.broadcast %77 : vector<1x512xf32> to vector<8x512xf32>
    %79 = arith.mulf %75, %78 : vector<8x512xf32>
    %c0_42 = arith.constant 0 : index
    %c0_43 = arith.constant 0 : index
    %c0_44 = arith.constant 0 : index
    %80 = vector.load %arg12[%c0_42, %c0_43, %c0_44] : memref<1x1x512xf32, #tpu.memory_space<vmem>>, vector<1x1x512xf32>
    %81 = vector.shape_cast %80 : vector<1x1x512xf32> to vector<1x512xf32>
    %82 = vector.broadcast %81 : vector<1x512xf32> to vector<8x512xf32>
    %83 = arith.addf %79, %82 : vector<8x512xf32>
    %c0_45 = arith.constant 0 : index
    %c0_46 = arith.constant 0 : index
    %84 = vector.load %arg13[%c0_45, %c0_46] : memref<8x512xf32, #tpu.memory_space<vmem>>, vector<8x512xf32>
    tpu.vector_store %arg13[%c0_45, %c0_46], %83 {strides = array<i32>} : memref<8x512xf32, #tpu.memory_space<vmem>>, vector<8x512xf32>,
    return
  }
  func.func @transform_0(%arg0: i32, %arg1: i32) -> (i32, i32) {
    %c0_i32 = arith.constant 0 : i32
    %c0_i32_0 = arith.constant 0 : i32
    return %arg0, %c0_i32 : i32, i32
  }
  func.func @transform_1(%arg0: i32, %arg1: i32) -> (i32, i32, i32) {
    %c0_i32 = arith.constant 0 : i32
    %c0_i32_0 = arith.constant 0 : i32
    %c0_i32_1 = arith.constant 0 : i32
    return %arg1, %c0_i32, %c0_i32_0 : i32, i32, i32
  }
  func.func @transform_2(%arg0: i32, %arg1: i32) -> (i32, i32, i32) {
    %c0_i32 = arith.constant 0 : i32
    %c0_i32_0 = arith.constant 0 : i32
    %c0_i32_1 = arith.constant 0 : i32
    return %arg1, %c0_i32, %c0_i32_0 : i32, i32, i32
  }
  func.func @transform_3(%arg0: i32, %arg1: i32) -> (i32, i32, i32) {
    %c0_i32 = arith.constant 0 : i32
    %c0_i32_0 = arith.constant 0 : i32
    %c0_i32_1 = arith.constant 0 : i32
    return %arg1, %c0_i32, %c0_i32_0 : i32, i32, i32
  }
  func.func @transform_4(%arg0: i32, %arg1: i32) -> (i32, i32, i32) {
    %c0_i32 = arith.constant 0 : i32
    %c0_i32_0 = arith.constant 0 : i32
    %c0_i32_1 = arith.constant 0 : i32
    return %arg1, %c0_i32, %c0_i32_0 : i32, i32, i32
  }
  func.func @transform_5(%arg0: i32, %arg1: i32) -> (i32, i32, i32) {
    %c0_i32 = arith.constant 0 : i32
    %c0_i32_0 = arith.constant 0 : i32
    %c0_i32_1 = arith.constant 0 : i32
    return %arg1, %c0_i32, %c0_i32_0 : i32, i32, i32
  }
  func.func @transform_6(%arg0: i32, %arg1: i32) -> (i32, i32, i32) {
    %c0_i32 = arith.constant 0 : i32
    %c0_i32_0 = arith.constant 0 : i32
    %c0_i32_1 = arith.constant 0 : i32
    return %arg1, %c0_i32, %c0_i32_0 : i32, i32, i32
  }
  func.func @transform_7(%arg0: i32, %arg1: i32) -> (i32, i32, i32) {
    %c0_i32 = arith.constant 0 : i32
    %c0_i32_0 = arith.constant 0 : i32
    %c0_i32_1 = arith.constant 0 : i32
    return %arg1, %c0_i32, %c0_i32_0 : i32, i32, i32
  }
  func.func @transform_8(%arg0: i32, %arg1: i32) -> (i32, i32, i32) {
    %c0_i32 = arith.constant 0 : i32
    %c0_i32_0 = arith.constant 0 : i32
    %c0_i32_1 = arith.constant 0 : i32
    return %arg1, %c0_i32, %c0_i32_0 : i32, i32, i32
  }
  func.func @transform_9(%arg0: i32, %arg1: i32) -> (i32, i32, i32) {
    %c0_i32 = arith.constant 0 : i32
    %c0_i32_0 = arith.constant 0 : i32
    %c0_i32_1 = arith.constant 0 : i32
    return %arg1, %c0_i32, %c0_i32_0 : i32, i32, i32
  }
  func.func @transform_10(%arg0: i32, %arg1: i32) -> (i32, i32, i32) {
    %c0_i32 = arith.constant 0 : i32
    %c0_i32_0 = arith.constant 0 : i32
    %c0_i32_1 = arith.constant 0 : i32
    return %arg1, %c0_i32, %c0_i32_0 : i32, i32, i32
  }
  func.func @transform_11(%arg0: i32, %arg1: i32) -> (i32, i32) {
    %c0_i32 = arith.constant 0 : i32
    %c0_i32_0 = arith.constant 0 : i32
    return %arg0, %c0_i32 : i32, i32
  }
}

</mosaic_0001>

<bundles_post_ra>
// kernel: tpu_custom_call.1
= control target key start
LH: loop header
LB: loop body
LE: loop exit
PB: predicated region body
PF: predicated region fallthrough
CT: control target
= control target key end

     0   :  { %s19519_s0 = inlined_call_operand.hbm [shape: f32[8,512], index: 0, kind: input, shape index: {}]   ;;  %s19520_s1 = inlined_call_operand.hbm [shape: bf16[2,512,512], index: 1, kind: input, shape index: {}]   ;;  %s19521_s2 = inlined_call_operand.hbm [shape: f32[2,1,512], index: 2, kind: input, shape index: {}]   ;;  %s19522_s3 = inlined_call_operand.hbm [shape: f32[2,1,512], index: 3, kind: input, shape index: {}]   ;;  %s19523_s4 = inlined_call_operand.hbm [shape: f32[2,1,512], index: 4, kind: input, shape index: {}]   ;;  %s19524_s5 = inlined_call_operand.hbm [shape: bf16[2,512,2048], index: 5, kind: input, shape index: {}]   ;;  %s19525_s6 = inlined_call_operand.hbm [shape: f32[2,1,2048], index: 6, kind: input, shape index: {}]   ;;  %s19526_s7 = inlined_call_operand.hbm [shape: bf16[2,2048,512], index: 7, kind: input, shape index: {}]   ;;  %s19527_s8 = inlined_call_operand.hbm [shape: f32[2,1,512], index: 8, kind: input, shape index: {}]   ;;  %s19528_s9 = inlined_call_operand.hbm [shape: f32[2,1,512], index: 9, kind: input, shape index: {}]   ;;  %s19529_s10 = inlined_call_operand.hbm [shape: f32[2,1,512], index: 10, kind: input, shape index: {}]   ;;  %s19530_s11 = inlined_call_operand.hbm [shape: f32[8,512], index: 11, kind: output, shape index: {}]  }
   0x1   :  { %19540 = sst [smem:[#allocation32_spill]] %s19519_s0 }
   0x2   :  { %19541 = sst [smem:[#allocation33_spill]] %s19520_s1 }
   0x3   :  { %19542 = sst [smem:[#allocation34_spill]] %s19521_s2 }
   0x4   :  { %19543 = sst [smem:[#allocation35_spill]] %s19522_s3 }
   0x5   :  { %19544 = sst [smem:[#allocation36_spill]] %s19523_s4 }
   0x6   :  { %19545 = sst [smem:[#allocation37_spill]] %s19524_s5 }
   0x7   :  { %19546 = sst [smem:[#allocation38_spill]] %s19529_s10 }
   0x8   :  { %19547 = sst [smem:[#allocation39_spill]] %s19530_s11 }
   0x9   :  { %16 = vsyncpa [#allocation3], 0 }
   0xa   :  { %17 = vsyncpa [#allocation6], 0 }
   0xb   :  { %19 = vsyncpa [#allocation6 + $0x1], 0 }
   0xc   :  { %20 = vsyncpa [#allocation9], 0 }
   0xd   :  { %22 = vsyncpa [#allocation9 + $0x1], 0 }
   0xe   :  { %23 = vsyncpa [#allocation12], 0 }
   0xf   :  { %25 = vsyncpa [#allocation12 + $0x1], 0 }
  0x10   :  { %26 = vsyncpa [#allocation15], 0 }
  0x11   :  { %28 = vsyncpa [#allocation15 + $0x1], 0 }
  0x12   :  { %29 = vsyncpa [#allocation18], 0 }
  0x13   :  { %31 = vsyncpa [#allocation18 + $0x1], 0 }
  0x14   :  { %32 = vsyncpa [#allocation4], 0  ;;  %s16538_s17 = smov 0   ;;  %s16540_s18 = smov 0  }
  0x15   :  { %s16542_s19 = smov 0   ;;  %s16544_s20 = smov 0  }
  0x16   :  { %s16546_s21 = smov 0   ;;  %s16548_s22 = smov 0  }
  0x17 LB: > { %19548 = sst [smem:[#allocation28_spill]] %s16457_s19  ;;  %s47_s23 = sadd.s32 1, %s16465_s21  ;;  %s16469_s22 = sphi %s16548_s22, %s38_s22   ;;  %s16465_s21 = sphi %s16546_s21, %s19578_s21   ;;  %s16461_s20 = sphi %s16544_s20, %s19577_s20   ;;  %s16457_s19 = sphi %s16542_s19, %s19573_s19   ;;  %s16453_s18 = sphi %s16540_s18, %s19576_s18   ;;  %s16449_s17 = sphi %s16538_s17, %s19575_s17  }
  0x18   : > { %19549 = sst [smem:[#allocation29_spill]] %s16461_s20  ;;  %s83_s24 = sadd.s32 1, %s16457_s19 }
  0x19   : > { %p48_p0 = scmp.ge.s32.totalorder %s47_s23, 2  ;;  %p90_p1 = scmp.ne.s32.totalorder %s16457_s19, %s16453_s18 }
  0x1a   : > { %p91_p2 = scmp.eq.s32.totalorder %s16469_s22, 0  ;;  %p15968_p4 = scmp.lt.s32.totalorder %s16469_s22, 2 }
  0x1b   : > { %s19580_s23 = smov (%p48_p0, %s47_s23), 0  ;;  %s16583_s27 = sand.u32 1, %s16469_s22  }
  0x1c   : > { %19550 = sst [smem:[#allocation30_spill]] %s19580_s23  ;;  %p16575_p3 = por %p91_p2, %p90_p1 }
  0x1d   : > { %s80_s26 = ssub.s32 %s16465_s21, %s19580_s23  ;;  %s16586_s28 = sand.u32 1, %s16457_s19  }
  0x1e   : > { %p81_p5 = scmp.eq.s32.totalorder %s80_s26, 0  ;;  %s14749_s29 = sshll.u32 %s16465_s21, 10 }
  0x1f   : > { %s10101_s12 = sshll.u32 %s16586_s28, 10  ;;  %s19553_s1 = sld [smem:[#allocation33_spill]] }
  0x20   : > { %s16590_s30 = scalar_select %p81_p5, %s16457_s19, %s83_s24  }
  0x21   : > { %s399_s23 = scalar_lea.vmem [#allocation5], %s10101_s12  ;;  %p16600_p6 = pnand %p15968_p4, %p16575_p3 }
  0x22   : > { %19552 = sst [smem:[#allocation31_spill]] %s16590_s30  ;;  %s407_s11 = sshll.u32 %s399_s23, 4  ;;  %s408_s11 = int_to_ptr.vmem [resolvable:$true] %s407_s11 }
  0x23   : > { %s16605_s24 = sshll.u32 %s16586_s28, 2  ;;  %s19534_s13 = smov 256  }
  0x24   : > { %s19535_s12 = smov 16   ;;  %s16616_s23 = sshll.u32 %s16465_s21, 2 }
  0x25   : > { %s404_s15 = scalar_lea.hbm %s19553_s1, %s14749_s29  ;;  %s19533_s29 = scalar_lea.sflag [#allocation6], %s16583_s27 }
  0x26   : > { %s405_s16 = sshll.u32 %s404_s15, 4  ;;  %s19555_s3 = sld [smem:[#allocation35_spill]]  ;;  %s406_s16 = int_to_ptr.hbm [resolvable:$true] %s405_s16 }
  0x27   : > { %15939 = dma.hbm_to_vmem [thread:$0]  (!%p16600_p6), %s406_s16, 16384, %s408_s11, %s19533_s29, %s19534_s13, %s19534_s13, %s19535_s12  }
  0x28   : > { %s440_s30 = scalar_lea.vmem [#allocation8], %s16605_s24  ;;  %s19536_s20 = scalar_lea.sflag [#allocation9], %s16583_s27 }
  0x29   : > { %s448_s19 = sshll.u32 %s440_s30, 4  ;;  %s10110_s11 = sshll.u32 %s16586_s28, 12  ;;  %s449_s19 = int_to_ptr.vmem [resolvable:$true] %s448_s19 }
  0x2a   : > { %s14750_s16 = sshll.u32 %s16465_s21, 12  ;;  %s19556_s5 = sld [smem:[#allocation37_spill]] }
  0x2b   : > { %s478_s25 = scalar_lea.vmem [#allocation11], %s10110_s11  ;;  %s16474_s10 = smov 64  }
  0x2c   : > { %s444_s15 = scalar_lea.hbm %s19555_s3, %s16616_s23  ;;  %s486_s14 = sshll.u32 %s478_s25, 4  ;;  %s487_s14 = int_to_ptr.vmem [resolvable:$true] %s486_s14 }
  0x2d   : > { %s446_s1 = sshll.u32 %s444_s15, 4  ;;  %s19539_s15 = scalar_lea.sflag [#allocation12], %s16583_s27  ;;  %s447_s1 = int_to_ptr.hbm [resolvable:$true] %s446_s1 }
  0x2e   : > { %15945 = dma.hbm_to_vmem [thread:$0]  (!%p16600_p6), %s447_s1, 64, %s449_s19, %s19536_s20  }
  0x2f   : > { %s16473_s3 = smov 1024   ;;  %s524_s29 = scalar_lea.hbm %s19526_s7, %s14750_s16 }
  0x30   : > { %s483_s12 = scalar_lea.hbm %s19556_s5, %s14750_s16  ;;  %s525_s13 = sshll.u32 %s524_s29, 4  ;;  %s526_s13 = int_to_ptr.hbm [resolvable:$true] %s525_s13 }
  0x31   : > { %s484_s30 = sshll.u32 %s483_s12, 4  ;;  %s519_s12 = scalar_lea.vmem [#allocation14], %s10110_s11  ;;  %s485_s30 = int_to_ptr.hbm [resolvable:$true] %s484_s30 }
  0x32   : > { %15951 = dma.hbm_to_vmem [thread:$0]  (!%p16600_p6), %s485_s30, 65536, %s487_s14, %s19539_s15, %s16473_s3, %s16473_s3, %s16474_s10  }
  0x33   : > { %s527_s25 = sshll.u32 %s519_s12, 4  ;;  %s19538_s20 = scalar_lea.sflag [#allocation15], %s16583_s27  ;;  %s528_s25 = int_to_ptr.vmem [resolvable:$true] %s527_s25 }
  0x34   : > { %s19557_s5 = smov 16   ;;  %s19558_s3 = smov 256  }
  0x35   : > { %15957 = dma.hbm_to_vmem [thread:$0]  (!%p16600_p6), %s526_s13, 65536, %s528_s25, %s19538_s20, %s19558_s3, %s19558_s3, %s19557_s5  }
  0x36   : > { %s564_s16 = scalar_lea.hbm %s19528_s9, %s16616_s23  ;;  %s560_s30 = scalar_lea.vmem [#allocation17], %s16605_s24 }
  0x37   : > { %s568_s1 = sshll.u32 %s560_s30, 4  ;;  %s566_s19 = sshll.u32 %s564_s16, 4  ;;  %s569_s1 = int_to_ptr.vmem [resolvable:$true] %s568_s1  ;;  %s567_s19 = int_to_ptr.hbm [resolvable:$true] %s566_s19 }
  0x38   : > { %s19537_s11 = scalar_lea.sflag [#allocation18], %s16583_s27  ;;  %s16660_s29 = sadd.s32 4294967295, %s16469_s22  }
  0x39   : > { %15963 = dma.hbm_to_vmem [thread:$0]  (!%p16600_p6), %s567_s19, 64, %s569_s1, %s19537_s11  }
  0x3a   : > { %p96_p7 = scmp.ne.s32.totalorder %s16453_s18, %s16449_s17  ;;  %p97_p8 = scmp.eq.s32.totalorder %s16660_s29, 0 }
  0x3b   : > { %p10098_p9 = scmp.ge.s32.totalorder %s16469_s22, 1  ;;  %p367_p10 = scmp.lt.s32.totalorder %s16469_s22, 3 }
  0x3c   : > { %p16669_p11 = por %p97_p8, %p96_p7  ;;  %s19561_s0 = sld [smem:[#allocation32_spill]] }
  0x3d   : > { %p16673_p12 = pnand %p10098_p9, %p367_p10  ;;  %s16475_s3 = smov [#allocation2]  }
  0x3e   : > { %s384_s10 = sshll.u32 %s16475_s3, 4  ;;  %s19562_s2 = sld [smem:[#allocation34_spill]]  ;;  %s385_s10 = int_to_ptr.vmem [resolvable:$true] %s384_s10 }
  0x3f   : > { %p15932_p13 = pneg %p16673_p12  ;;  %s421_s19 = scalar_lea.vmem [#allocation7], %s16605_s24 }
  0x40   : > { %s429_s12 = sshll.u32 %s421_s19, 4  ;;  %s19563_s25 = scalar_lea.sflag [#allocation6], %s16583_s27  ;;  %s430_s12 = int_to_ptr.vmem [resolvable:$true] %s429_s12 }
  0x41   : > { %p15933_p0 = pnand %p15932_p13, %p97_p8  ;;  %s19564_s4 = sld [smem:[#allocation36_spill]] }
  0x42   : > { %s382_s17 = sshll.u32 %s19561_s0, 4  ;;  %s459_s14 = scalar_lea.vmem [#allocation10], %s16605_s24  ;;  %s383_s17 = int_to_ptr.hbm [resolvable:$true] %s382_s17 }
  0x43   : > { %15935 = dma.hbm_to_vmem [thread:$0]  (!%p15933_p0), %s383_s17, 512, %s385_s10, [#allocation3]  }
  0x44   : > { %s425_s30 = scalar_lea.hbm %s19562_s2, %s16616_s23  ;;  %s467_s16 = sshll.u32 %s459_s14, 4  ;;  %s468_s16 = int_to_ptr.vmem [resolvable:$true] %s467_s16 }
  0x45   : > { %s427_s1 = sshll.u32 %s425_s30, 4  ;;  %s10113_s30 = sshll.u32 %s16586_s28, 4  ;;  %s428_s1 = int_to_ptr.hbm [resolvable:$true] %s427_s1 }
  0x46   : > { %15942 = dma.hbm_to_vmem [thread:$0]  (!%p16600_p6), %s428_s1, 64, %s430_s12, %s19563_s25  }
  0x47   : > { %s463_s20 = scalar_lea.hbm %s19564_s4, %s16616_s23  ;;  %s19565_s17 = scalar_lea.sflag [#allocation9], %s16583_s27 }
  0x48   : > { %s465_s15 = sshll.u32 %s463_s20, 4  ;;  %s10114_s10 = sshll.u32 %s16465_s21, 4  ;;  %s466_s15 = int_to_ptr.hbm [resolvable:$true] %s465_s15 }
  0x49   : > { %15948 = dma.hbm_to_vmem [thread:$0]  (!%p16600_p6), %s466_s15, 64, %s468_s16, %s19565_s17  }
  0x4a   : > { %s504_s19 = scalar_lea.hbm %s19525_s6, %s10114_s10  ;;  %s500_s12 = scalar_lea.vmem [#allocation13], %s10113_s30 }
  0x4b   : > { %s508_s25 = sshll.u32 %s500_s12, 4  ;;  %s506_s3 = sshll.u32 %s504_s19, 4  ;;  %s509_s25 = int_to_ptr.vmem [resolvable:$true] %s508_s25  ;;  %s507_s3 = int_to_ptr.hbm [resolvable:$true] %s506_s3 }
  0x4c   : > { %s19566_s20 = scalar_lea.sflag [#allocation12], %s16583_s27  ;;  %s545_s15 = scalar_lea.hbm %s19527_s8, %s16616_s23 }
  0x4d   : > { %15954 = dma.hbm_to_vmem [thread:$0]  (!%p16600_p6), %s507_s3, 256, %s509_s25, %s19566_s20  }
  0x4e   : > { %s541_s16 = scalar_lea.vmem [#allocation16], %s16605_s24  ;;  %s547_s0 = sshll.u32 %s545_s15, 4  ;;  %s548_s0 = int_to_ptr.hbm [resolvable:$true] %s547_s0 }
  0x4f   : > { %s549_s17 = sshll.u32 %s541_s16, 4  ;;  %s19567_s30 = scalar_lea.sflag [#allocation15], %s16583_s27  ;;  %s550_s17 = int_to_ptr.vmem [resolvable:$true] %s549_s17 }
  0x50   : > { %15960 = dma.hbm_to_vmem [thread:$0]  (!%p16600_p6), %s548_s0, 64, %s550_s17, %s19567_s30  }
  0x51   : > { %s19568_s11 = sld [smem:[#allocation38_spill]]  ;;  %s579_s12 = scalar_lea.vmem [#allocation19], %s16605_s24 }
  0x52   : > { %s587_s2 = sshll.u32 %s579_s12, 4  ;;  %s19569_s25 = scalar_lea.sflag [#allocation18], %s16583_s27  ;;  %s588_s2 = int_to_ptr.vmem [resolvable:$true] %s587_s2 }
  0x55   : > { %596 = sbr.rel (%p16673_p12) target bundleno = 2088 (0x828), region = 64 }
  0x57   : > { %s583_s19 = scalar_lea.hbm %s19568_s11, %s16616_s23 }
  0x58   : > { %s585_s4 = sshll.u32 %s583_s19, 4  ;;  %s586_s4 = int_to_ptr.hbm [resolvable:$true] %s585_s4 }
  0x59   : > { %15966 = dma.hbm_to_vmem [thread:$0]  (!%p16600_p6), %s586_s4, 64, %s588_s2, %s19569_s25  }
  0x5a   : > { %16420 = dma.done.wait (%p97_p8), [#allocation3], 512  }
  0x5b   : > { %16422 = vsyncadd (%p97_p8), [#allocation3], 4294966784  ;;  %s16736_s0 = sand.u32 1, %s16660_s29   ;;  %s605_s24 = sand.u32 1, %s16453_s18  }
  0x5c   : > { %s10126_s23 = sshll.u32 %s605_s24, 10  ;;  %s604_s26 = scalar_lea.sflag [#allocation6], %s16736_s0 }
  0x5d   : > { %s16740_s27 = scalar_lea.vmem [#allocation5], %s10126_s23 }
  0x5e   : > { %16424 = dma.done.wait (%p16669_p11), %s604_s26, 16448  }
  0x5f   : > { %16426 = vsyncadd (%p16669_p11), %s604_s26, 4294950848  ;;  %s16746_s2 = sshll.u32 %s605_s24, 2  ;;  %s624_s13 = scalar_lea.sflag [#allocation9], %s16736_s0 }
  0x60   : > { %s617_s4 = scalar_lea.vmem [#allocation7], %s16746_s2  ;;  %s627_s3 = scalar_lea.vmem [#allocation8], %s16746_s2 }
  0x61   : > { %16428 = dma.done.wait (%p16669_p11), %s624_s13, 128  }
  0x62   : > { %16430 = vsyncadd (%p16669_p11), %s624_s13, 4294967168  ;;  %s10130_s20 = sshll.u32 %s605_s24, 12  ;;  %s637_s28 = scalar_lea.vmem [#allocation10], %s16746_s2 }
  0x63   : > { %s644_s14 = scalar_lea.sflag [#allocation12], %s16736_s0  ;;  %s16757_s15 = scalar_lea.vmem [#allocation11], %s10130_s20 }
  0x64   : > { %16432 = dma.done.wait (%p16669_p11), %s644_s14, 65792  }
  0x65   : > { %16434 = vsyncadd (%p16669_p11), %s644_s14, 4294901504  ;;  %s10131_s16 = sshll.u32 %s605_s24, 4  ;;  %s664_s30 = scalar_lea.sflag [#allocation15], %s16736_s0 }
  0x66   : > { %s16763_s17 = scalar_lea.vmem [#allocation13], %s10131_s16  ;;  %s16766_s10 = scalar_lea.vmem [#allocation14], %s10130_s20 }
  0x67   : > { %16436 = dma.done.wait (%p16669_p11), %s664_s30, 65600  }
  0x68   : > { %16438 = vsyncadd (%p16669_p11), %s664_s30, 4294901696  ;;  %s16773_s1 = scalar_lea.vmem [#allocation16], %s16746_s2  ;;  %s684_s11 = scalar_lea.sflag [#allocation18], %s16736_s0 }
  0x69   : > { %s687_s19 = scalar_lea.vmem [#allocation17], %s16746_s2 }
  0x6a   : > { %16440 = dma.done.wait (%p16669_p11), %s684_s11, 128  }
  0x6b   : > { %16442 = vsyncadd (%p16669_p11), %s684_s11, 4294967168  ;;  %s697_s12 = scalar_lea.vmem [#allocation19], %s16746_s2  ;;  %s19570_s25 = sld [smem:[#allocation29_spill]] }
  0x71   : > { %p10136_p1 = scmp.ne.s32.totalorder %s19570_s25, 0 }
  0x73   : > { %780 = sbr.rel (%p10136_p1) target bundleno = 125 (0x7d), region = 112 }
  0x78   : > { %v781_v0 = vld [vmem:[#allocation2] sm:$0xff]  ;;  %v782_v1 = vld [vmem:[#allocation2 + $0x8] sm:$0xff]  ;;  %v783_v2 = vld [vmem:[#allocation2 + $0x10] sm:$0xff] }
  0x79   : > { %785 = vst [vmem:[#allocation20] sm:$0xff] %v781_v0  ;;  %v784_v3 = vld [vmem:[#allocation2 + $0x18] sm:$0xff] }
  0x7a   : > { %786 = vst [vmem:[#allocation20 + $0x8] sm:$0xff] %v782_v1 }
  0x7b   : > { %787 = vst [vmem:[#allocation20 + $0x10] sm:$0xff] %v783_v2 }
  0x7c   : > { %788 = vst [vmem:[#allocation20 + $0x18] sm:$0xff] %v784_v3 }
  0x7d PF: > { %v10251_v4 = vld [vmem:[%s16740_s27 + $0xe0] sm:$0xf]  ;;  %v14782_v5 = vld [vmem:[%s16740_s27 + $0xec] sm:$0xf0]  ;;  %s16477_s5 = smov [#allocation20]   ;;  %s19571_s26 = sld [smem:[#allocation39_spill]] }
  0x7e   : > { %v10379_v6 = vld [vmem:[%s16740_s27 + $0x1e0] sm:$0xf]  ;;  %v10252_v7 = vor.u32 %v14782_v5, %v10251_v4  ;;  %v14814_v8 = vld [vmem:[%s16740_s27 + $0x1ec] sm:$0xf0]  ;;  %s9827_s0 = sshll.u32 %s16477_s5, 4  ;;  %p15970_p2 = scmp.eq.s32.totalorder %s16660_s29, 1  ;;  %s9828_s0 = int_to_ptr.vmem [resolvable:$true] %s9827_s0 }
  0x7f   : > { %v10507_v9 = vld [vmem:[%s16740_s27 + $0x2e0] sm:$0xf]  ;;  %v14846_v10 = vld [vmem:[%s16740_s27 + $0x2ec] sm:$0xf0]  ;;  %v10380_v11 = vor.u32 %v14814_v8, %v10379_v6 }
  0x80   : > { %v10508_v12 = vor.u32 %v14846_v10, %v10507_v9  ;;  %v10635_v13 = vld [vmem:[%s16740_s27 + $0x3e0] sm:$0xf]  ;;  %v14878_v14 = vld [vmem:[%s16740_s27 + $0x3ec] sm:$0xf0]  ;;  %1575 = vmatpush.bf16.msra.mxu0 %v10252_v7 }
  0x81   : > { %v10235_v15 = vld [vmem:[%s16740_s27 + $0xc0] sm:$0xf]  ;;  %v10636_v16 = vor.u32 %v14878_v14, %v10635_v13  ;;  %v14778_v17 = vld [vmem:[%s16740_s27 + $0xcc] sm:$0xf0]  ;;  %1588 = vmatpush.bf16.msra.mxu1 %v10380_v11 }
  0x82   : > { %v10363_v18 = vld [vmem:[%s16740_s27 + $0x1c0] sm:$0xf]  ;;  %v14810_v19 = vld [vmem:[%s16740_s27 + $0x1cc] sm:$0xf0]  ;;  %1601 = vmatpush.bf16.msra.mxu2 %v10508_v12  ;;  %v10236_v20 = vor.u32 %v14778_v17, %v10235_v15 }
  0x83   : > { %v10364_v21 = vor.u32 %v14810_v19, %v10363_v18  ;;  %v10491_v22 = vld [vmem:[%s16740_s27 + $0x2c0] sm:$0xf]  ;;  %v14842_v23 = vld [vmem:[%s16740_s27 + $0x2cc] sm:$0xf0]  ;;  %1614 = vmatpush.bf16.msra.mxu3 %v10636_v16 }
  0x84   : > { %v10619_v24 = vld [vmem:[%s16740_s27 + $0x3c0] sm:$0xf]  ;;  %v10492_v25 = vor.u32 %v14842_v23, %v10491_v22  ;;  %v14874_v26 = vld [vmem:[%s16740_s27 + $0x3cc] sm:$0xf0]  ;;  %1576 = vmatpush.bf16.msra.mxu0 %v10236_v20 }
  0x85   : > { %v10219_v27 = vld [vmem:[%s16740_s27 + $0xa0] sm:$0xf]  ;;  %v14774_v28 = vld [vmem:[%s16740_s27 + $0xac] sm:$0xf0]  ;;  %v10620_v29 = vor.u32 %v14874_v26, %v10619_v24  ;;  %1589 = vmatpush.bf16.msra.mxu1 %v10364_v21 }
  0x86   : > { %v10347_v30 = vld [vmem:[%s16740_s27 + $0x1a0] sm:$0xf]  ;;  %v14806_v31 = vld [vmem:[%s16740_s27 + $0x1ac] sm:$0xf0]  ;;  %v10220_v33 = vor.u32 %v14774_v28, %v10219_v27  ;;  %1602 = vmatpush.bf16.msra.mxu2 %v10492_v25 }
  0x87   : > { %v10475_v32 = vld [vmem:[%s16740_s27 + $0x2a0] sm:$0xf]  ;;  %v14838_v34 = vld [vmem:[%s16740_s27 + $0x2ac] sm:$0xf0]  ;;  %v10348_v37 = vor.u32 %v14806_v31, %v10347_v30  ;;  %1615 = vmatpush.bf16.msra.mxu3 %v10620_v29 }
  0x88   : > { %v10603_v35 = vld [vmem:[%s16740_s27 + $0x3a0] sm:$0xf]  ;;  %v14870_v36 = vld [vmem:[%s16740_s27 + $0x3ac] sm:$0xf0]  ;;  %v10476_v38 = vor.u32 %v14838_v34, %v10475_v32  ;;  %1577 = vmatpush.bf16.msra.mxu0 %v10220_v33  ;;  %v14780_v32 = vld [vmem:[%s16740_s27 + $0xe4] sm:$0xf] }
  0x89   : > { %v10203_v39 = vld [vmem:[%s16740_s27 + $0x80] sm:$0xf]  ;;  %v14770_v40 = vld [vmem:[%s16740_s27 + $0x8c] sm:$0xf0]  ;;  %v10604_v42 = vor.u32 %v14870_v36, %v10603_v35  ;;  %1590 = vmatpush.bf16.msra.mxu1 %v10348_v37  ;;  %v10253_v33 = vld [vmem:[%s16740_s27 + $0xf0] sm:$0xf0] }
  0x8a   : > { %v10331_v41 = vld [vmem:[%s16740_s27 + $0x180] sm:$0xf]  ;;  %v14802_v43 = vld [vmem:[%s16740_s27 + $0x18c] sm:$0xf0]  ;;  %v10204_v48 = vor.u32 %v14770_v40, %v10203_v39  ;;  %1603 = vmatpush.bf16.msra.mxu2 %v10476_v38  ;;  %v14812_v34 = vld [vmem:[%s16740_s27 + $0x1e4] sm:$0xf] }
  0x8b   : > { %v10459_v44 = vld [vmem:[%s16740_s27 + $0x280] sm:$0xf]  ;;  %v14834_v45 = vld [vmem:[%s16740_s27 + $0x28c] sm:$0xf0]  ;;  %v10332_v49 = vor.u32 %v14802_v43, %v10331_v41  ;;  %1616 = vmatpush.bf16.msra.mxu3 %v10604_v42  ;;  %v10381_v36 = vld [vmem:[%s16740_s27 + $0x1f0] sm:$0xf0] }
  0x8c   : > { %v10587_v46 = vld [vmem:[%s16740_s27 + $0x380] sm:$0xf]  ;;  %v14866_v47 = vld [vmem:[%s16740_s27 + $0x38c] sm:$0xf0]  ;;  %v10460_v50 = vor.u32 %v14834_v45, %v10459_v44  ;;  %1578 = vmatpush.bf16.msra.mxu0 %v10204_v48  ;;  %v14844_v37 = vld [vmem:[%s16740_s27 + $0x2e4] sm:$0xf]  ;;  %v10256_v44 = vor.u32 %v14780_v32, %v10253_v33  ;;  %v10384_v45 = vor.u32 %v14812_v34, %v10381_v36 }
  0x8d   : > { %v10187_v51 = vld [vmem:[%s16740_s27 + $0x60] sm:$0xf]  ;;  %v14766_v52 = vld [vmem:[%s16740_s27 + $0x6c] sm:$0xf0]  ;;  %v10588_v54 = vor.u32 %v14866_v47, %v10587_v46  ;;  %1591 = vmatpush.bf16.msra.mxu1 %v10332_v49  ;;  %v10509_v38 = vld [vmem:[%s16740_s27 + $0x2f0] sm:$0xf0] }
  0x8e   : > { %v10315_v53 = vld [vmem:[%s16740_s27 + $0x160] sm:$0xf]  ;;  %v14798_v55 = vld [vmem:[%s16740_s27 + $0x16c] sm:$0xf0]  ;;  %v10188_v60 = vor.u32 %v14766_v52, %v10187_v51  ;;  %1604 = vmatpush.bf16.msra.mxu2 %v10460_v50  ;;  %v14876_v41 = vld [vmem:[%s16740_s27 + $0x3e4] sm:$0xf]  ;;  %v10512_v46 = vor.u32 %v14844_v37, %v10509_v38 }
  0x8f   : > { %v10443_v56 = vld [vmem:[%s16740_s27 + $0x260] sm:$0xf]  ;;  %v14830_v57 = vld [vmem:[%s16740_s27 + $0x26c] sm:$0xf0]  ;;  %v10316_v61 = vor.u32 %v14798_v55, %v10315_v53  ;;  %1617 = vmatpush.bf16.msra.mxu3 %v10588_v54  ;;  %v10637_v42 = vld [vmem:[%s16740_s27 + $0x3f0] sm:$0xf0] }
  0x90   : > { %v10571_v58 = vld [vmem:[%s16740_s27 + $0x360] sm:$0xf]  ;;  %v14862_v59 = vld [vmem:[%s16740_s27 + $0x36c] sm:$0xf0]  ;;  %v10444_v62 = vor.u32 %v14830_v57, %v10443_v56  ;;  %1579 = vmatpush.bf16.msra.mxu0 %v10188_v60  ;;  %v14776_v47 = vld [vmem:[%s16740_s27 + $0xc4] sm:$0xf]  ;;  %v10640_v50 = vor.u32 %v14876_v41, %v10637_v42 }
  0x91   : > { %v10171_v63 = vld [vmem:[%s16740_s27 + $0x40] sm:$0xf]  ;;  %v14762_v0 = vld [vmem:[%s16740_s27 + $0x4c] sm:$0xf0]  ;;  %v10572_v2 = vor.u32 %v14862_v59, %v10571_v58  ;;  %1592 = vmatpush.bf16.msra.mxu1 %v10316_v61  ;;  %v10237_v48 = vld [vmem:[%s16740_s27 + $0xd0] sm:$0xf0] }
  0x92   : > { %v10299_v1 = vld [vmem:[%s16740_s27 + $0x140] sm:$0xf]  ;;  %v14794_v3 = vld [vmem:[%s16740_s27 + $0x14c] sm:$0xf0]  ;;  %v10172_v8 = vor.u32 %v14762_v0, %v10171_v63  ;;  %1605 = vmatpush.bf16.msra.mxu2 %v10444_v62  ;;  %v14808_v49 = vld [vmem:[%s16740_s27 + $0x1c4] sm:$0xf]  ;;  %v10240_v57 = vor.u32 %v14776_v47, %v10237_v48 }
  0x93   : > { %v10427_v4 = vld [vmem:[%s16740_s27 + $0x240] sm:$0xf]  ;;  %v14826_v5 = vld [vmem:[%s16740_s27 + $0x24c] sm:$0xf0]  ;;  %v10300_v9 = vor.u32 %v14794_v3, %v10299_v1  ;;  %1618 = vmatpush.bf16.msra.mxu3 %v10572_v2  ;;  %v10365_v51 = vld [vmem:[%s16740_s27 + $0x1d0] sm:$0xf0] }
  0x94   : > { %v10555_v6 = vld [vmem:[%s16740_s27 + $0x340] sm:$0xf]  ;;  %v14858_v7 = vld [vmem:[%s16740_s27 + $0x34c] sm:$0xf0]  ;;  %v10428_v10 = vor.u32 %v14826_v5, %v10427_v4  ;;  %1580 = vmatpush.bf16.msra.mxu0 %v10172_v8  ;;  %v14840_v52 = vld [vmem:[%s16740_s27 + $0x2c4] sm:$0xf]  ;;  %v10368_v62 = vor.u32 %v14808_v49, %v10365_v51 }
  0x95   : > { %v10155_v11 = vld [vmem:[%s16740_s27 + $0x20] sm:$0xf]  ;;  %v14758_v12 = vld [vmem:[%s16740_s27 + $0x2c] sm:$0xf0]  ;;  %v10556_v14 = vor.u32 %v14858_v7, %v10555_v6  ;;  %1593 = vmatpush.bf16.msra.mxu1 %v10300_v9  ;;  %v10493_v53 = vld [vmem:[%s16740_s27 + $0x2d0] sm:$0xf0] }
  0x96   : > { %v10283_v13 = vld [vmem:[%s16740_s27 + $0x120] sm:$0xf]  ;;  %v14790_v15 = vld [vmem:[%s16740_s27 + $0x12c] sm:$0xf0]  ;;  %v10156_v20 = vor.u32 %v14758_v12, %v10155_v11  ;;  %1606 = vmatpush.bf16.msra.mxu2 %v10428_v10  ;;  %v14872_v54 = vld [vmem:[%s16740_s27 + $0x3c4] sm:$0xf]  ;;  %v10496_v63 = vor.u32 %v14840_v52, %v10493_v53 }
  0x97   : > { %v10411_v16 = vld [vmem:[%s16740_s27 + $0x220] sm:$0xf]  ;;  %v14822_v17 = vld [vmem:[%s16740_s27 + $0x22c] sm:$0xf0]  ;;  %v10284_v23 = vor.u32 %v14790_v15, %v10283_v13  ;;  %1619 = vmatpush.bf16.msra.mxu3 %v10556_v14  ;;  %v10621_v55 = vld [vmem:[%s16740_s27 + $0x3d0] sm:$0xf0] }
  0x98   : > { %v10539_v18 = vld [vmem:[%s16740_s27 + $0x320] sm:$0xf]  ;;  %v14854_v19 = vld [vmem:[%s16740_s27 + $0x32c] sm:$0xf0]  ;;  %v10412_v24 = vor.u32 %v14822_v17, %v10411_v16  ;;  %1581 = vmatpush.bf16.msra.mxu0 %v10156_v20  ;;  %v14772_v58 = vld [vmem:[%s16740_s27 + $0xa4] sm:$0xf]  ;;  %v10624_v3 = vor.u32 %v14872_v54, %v10621_v55 }
  0x99   : > { %v10139_v21 = vld [vmem:[%s16740_s27] sm:$0xf]  ;;  %v14754_v22 = vld [vmem:[%s16740_s27 + $0xc] sm:$0xf0]  ;;  %v10540_v28 = vor.u32 %v14854_v19, %v10539_v18  ;;  %1594 = vmatpush.bf16.msra.mxu1 %v10284_v23  ;;  %v10221_v59 = vld [vmem:[%s16740_s27 + $0xb0] sm:$0xf0] }
  0x9a   : > { %v10267_v25 = vld [vmem:[%s16740_s27 + $0x100] sm:$0xf]  ;;  %v14786_v26 = vld [vmem:[%s16740_s27 + $0x10c] sm:$0xf0]  ;;  %v10140_v35 = vor.u32 %v14754_v22, %v10139_v21  ;;  %1607 = vmatpush.bf16.msra.mxu2 %v10412_v24  ;;  %v14804_v60 = vld [vmem:[%s16740_s27 + $0x1a4] sm:$0xf]  ;;  %v10224_v12 = vor.u32 %v14772_v58, %v10221_v59 }
  0x9b   : > { %v10395_v27 = vld [vmem:[%s16740_s27 + $0x200] sm:$0xf]  ;;  %v14818_v29 = vld [vmem:[%s16740_s27 + $0x20c] sm:$0xf0]  ;;  %v10268_v39 = vor.u32 %v14786_v26, %v10267_v25  ;;  %1620 = vmatpush.bf16.msra.mxu3 %v10540_v28  ;;  %v10349_v0 = vld [vmem:[%s16740_s27 + $0x1b0] sm:$0xf0] }
  0x9c   : > { %v10523_v30 = vld [vmem:[%s16740_s27 + $0x300] sm:$0xf]  ;;  %v14850_v31 = vld [vmem:[%s16740_s27 + $0x30c] sm:$0xf0]  ;;  %v10396_v40 = vor.u32 %v14818_v29, %v10395_v27  ;;  %1582 = vmatpush.bf16.msra.mxu0 %v10140_v35  ;;  %v14836_v1 = vld [vmem:[%s16740_s27 + $0x2a4] sm:$0xf]  ;;  %v10352_v13 = vor.u32 %v14804_v60, %v10349_v0 }
  0x9d   : > { %v10524_v43 = vor.u32 %v14850_v31, %v10523_v30  ;;  %1595 = vmatpush.bf16.msra.mxu1 %v10268_v39  ;;  %v16863_v56 = vld [vmem:[#allocation20 + $0x10] sm:$0xff]  ;;  %v10477_v2 = vld [vmem:[%s16740_s27 + $0x2b0] sm:$0xf0]  ;;  %v16878_v5 = vld [vmem:[#allocation20 + $0x18] sm:$0xff] }
  0x9e   : > { %1608 = vmatpush.bf16.msra.mxu2 %v10396_v40  ;;  %v16870_v61 = vpack.c.bf16 %v16863_v56, %v16863_v56  ;;  %v16876_v4 = vld [vmem:[#allocation20] sm:$0xff]  ;;  %v16880_v6 = vld [vmem:[#allocation20 + $0x8] sm:$0xff]  ;;  %v14868_v7 = vld [vmem:[%s16740_s27 + $0x3a4] sm:$0xf]  ;;  %v16890_v10 = vpack.c.bf16 %v16878_v5, %v16878_v5  ;;  %v10480_v14 = vor.u32 %v14836_v1, %v10477_v2 }
  0x9f   : > { %1621 = vmatpush.bf16.msra.mxu3 %v10524_v43  ;;  %v10605_v8 = vld [vmem:[%s16740_s27 + $0x3b0] sm:$0xf0]  ;;  %v16886_v9 = vpack.c.bf16 %v16876_v4, %v16876_v4  ;;  %v16894_v11 = vpack.c.bf16 %v16880_v6, %v16880_v6  ;;  %v14768_v15 = vld [vmem:[%s16740_s27 + $0x84] sm:$0xf] }
  0xa0   : > { %1627 = vmatpush.bf16.msrb.mxu0 %v10256_v44  ;;  %v10205_v16 = vld [vmem:[%s16740_s27 + $0x90] sm:$0xf0]  ;;  %v14800_v17 = vld [vmem:[%s16740_s27 + $0x184] sm:$0xf]  ;;  %v10608_v18 = vor.u32 %v14868_v7, %v10605_v8 }
  0xa1   : > { %1640 = vmatpush.bf16.msrb.mxu1 %v10384_v45  ;;  %1609 = vmatmul.bf16.vlgmr.msra.gmra.mxu2 %v16870_v61  ;;  %v10333_v19 = vld [vmem:[%s16740_s27 + $0x190] sm:$0xf0]  ;;  %v14832_v20 = vld [vmem:[%s16740_s27 + $0x284] sm:$0xf]  ;;  %v10208_v24 = vor.u32 %v14768_v15, %v10205_v16  ;;  %v10259_v16 = vld [vmem:[%s16740_s27 + $0xe8] sm:$0xf] }
  0xa2   : > { %1653 = vmatpush.bf16.msrb.mxu2 %v10512_v46  ;;  %v10461_v21 = vld [vmem:[%s16740_s27 + $0x290] sm:$0xf0]  ;;  %1583 = vmatmul.bf16.vlgmr.msra.gmra.mxu0 %v16886_v9  ;;  %v14864_v22 = vld [vmem:[%s16740_s27 + $0x384] sm:$0xf]  ;;  %v10336_v25 = vor.u32 %v14800_v17, %v10333_v19  ;;  %v14783_v17 = vld [vmem:[%s16740_s27 + $0xf4] sm:$0xf0] }
  0xa3   : > { %1666 = vmatpush.bf16.msrb.mxu3 %v10640_v50  ;;  %v10589_v23 = vld [vmem:[%s16740_s27 + $0x390] sm:$0xf0]  ;;  %1596 = vmatmul.bf16.vlgmr.msra.gmra.mxu1 %v16894_v11  ;;  %v10464_v26 = vor.u32 %v14832_v20, %v10461_v21  ;;  %v14764_v27 = vld [vmem:[%s16740_s27 + $0x64] sm:$0xf]  ;;  %v14815_v20 = vld [vmem:[%s16740_s27 + $0x1f4] sm:$0xf0] }
  0xa4   : > { %1628 = vmatpush.bf16.msrb.mxu0 %v10240_v57  ;;  %1622 = vmatmul.bf16.vlgmr.msra.gmra.mxu3 %v16890_v10  ;;  %v10189_v28 = vld [vmem:[%s16740_s27 + $0x70] sm:$0xf0]  ;;  %v14796_v29 = vld [vmem:[%s16740_s27 + $0x164] sm:$0xf]  ;;  %v10592_v30 = vor.u32 %v14864_v22, %v10589_v23  ;;  %v10515_v21 = vld [vmem:[%s16740_s27 + $0x2e8] sm:$0xf] }
  0xa5   : > { %1641 = vmatpush.bf16.msrb.mxu1 %v10368_v62  ;;  %v10317_v31 = vld [vmem:[%s16740_s27 + $0x170] sm:$0xf0]  ;;  %v14828_v32 = vld [vmem:[%s16740_s27 + $0x264] sm:$0xf]  ;;  %v10192_v36 = vor.u32 %v14764_v27, %v10189_v28  ;;  %v14847_v22 = vld [vmem:[%s16740_s27 + $0x2f4] sm:$0xf0]  ;;  %v10260_v28 = vor.u32 %v14783_v17, %v10259_v16 }
  0xa6   : > { %1654 = vmatpush.bf16.msrb.mxu2 %v10496_v63  ;;  %v10445_v33 = vld [vmem:[%s16740_s27 + $0x270] sm:$0xf0]  ;;  %v14860_v34 = vld [vmem:[%s16740_s27 + $0x364] sm:$0xf]  ;;  %v10320_v37 = vor.u32 %v14796_v29, %v10317_v31  ;;  %v10243_v31 = vld [vmem:[%s16740_s27 + $0xc8] sm:$0xf] }
  0xa7   : > { %1667 = vmatpush.bf16.msrb.mxu3 %v10624_v3  ;;  %v10573_v35 = vld [vmem:[%s16740_s27 + $0x370] sm:$0xf0]  ;;  %v10448_v38 = vor.u32 %v14828_v32, %v10445_v33  ;;  %v14760_v39 = vld [vmem:[%s16740_s27 + $0x44] sm:$0xf]  ;;  %v14779_v32 = vld [vmem:[%s16740_s27 + $0xd4] sm:$0xf0] }
  0xa8   : > { %1629 = vmatpush.bf16.msrb.mxu0 %v10224_v12  ;;  %v10173_v40 = vld [vmem:[%s16740_s27 + $0x50] sm:$0xf0]  ;;  %v14792_v41 = vld [vmem:[%s16740_s27 + $0x144] sm:$0xf]  ;;  %v10576_v42 = vor.u32 %v14860_v34, %v10573_v35  ;;  %v10371_v33 = vld [vmem:[%s16740_s27 + $0x1c8] sm:$0xf] }
  0xa9   : > { %1642 = vmatpush.bf16.msrb.mxu1 %v10352_v13  ;;  %v10301_v43 = vld [vmem:[%s16740_s27 + $0x150] sm:$0xf0]  ;;  %v14824_v44 = vld [vmem:[%s16740_s27 + $0x244] sm:$0xf]  ;;  %v10176_v48 = vor.u32 %v14760_v39, %v10173_v40  ;;  %v14811_v35 = vld [vmem:[%s16740_s27 + $0x1d4] sm:$0xf0]  ;;  %v10244_v40 = vor.u32 %v14779_v32, %v10243_v31 }
  0xaa   : > { %1655 = vmatpush.bf16.msrb.mxu2 %v10480_v14  ;;  %v10429_v45 = vld [vmem:[%s16740_s27 + $0x250] sm:$0xf0]  ;;  %v14856_v46 = vld [vmem:[%s16740_s27 + $0x344] sm:$0xf]  ;;  %v10304_v49 = vor.u32 %v14792_v41, %v10301_v43  ;;  %v14875_v39 = vld [vmem:[%s16740_s27 + $0x3d4] sm:$0xf0]  ;;  %v10372_v41 = vor.u32 %v14811_v35, %v10371_v33 }
  0xab   : > { %1668 = vmatpush.bf16.msrb.mxu3 %v10608_v18  ;;  %v10557_v47 = vld [vmem:[%s16740_s27 + $0x350] sm:$0xf0]  ;;  %v10432_v50 = vor.u32 %v14824_v44, %v10429_v45  ;;  %v14756_v51 = vld [vmem:[%s16740_s27 + $0x24] sm:$0xf]  ;;  %v10387_v18 = vld [vmem:[%s16740_s27 + $0x1e8] sm:$0xf] }
  0xac   : > { %1630 = vmatpush.bf16.msrb.mxu0 %v10208_v24  ;;  %v10157_v52 = vld [vmem:[%s16740_s27 + $0x30] sm:$0xf0]  ;;  %v14788_v53 = vld [vmem:[%s16740_s27 + $0x124] sm:$0xf]  ;;  %v10560_v54 = vor.u32 %v14856_v46, %v10557_v47  ;;  %v10388_v29 = vor.u32 %v14815_v20, %v10387_v18  ;;  %v10227_v43 = vld [vmem:[%s16740_s27 + $0xa8] sm:$0xf] }
  0xad   : > { %1643 = vmatpush.bf16.msrb.mxu1 %v10336_v25  ;;  %v10285_v55 = vld [vmem:[%s16740_s27 + $0x130] sm:$0xf0]  ;;  %v14820_v57 = vld [vmem:[%s16740_s27 + $0x224] sm:$0xf]  ;;  %v10160_v62 = vor.u32 %v14756_v51, %v10157_v52  ;;  %v10643_v25 = vld [vmem:[%s16740_s27 + $0x3e8] sm:$0xf] }
  0xae   : > { %1656 = vmatpush.bf16.msrb.mxu2 %v10464_v26  ;;  %v10413_v58 = vld [vmem:[%s16740_s27 + $0x230] sm:$0xf0]  ;;  %v14852_v59 = vld [vmem:[%s16740_s27 + $0x324] sm:$0xf]  ;;  %v10288_v1 = vor.u32 %v14788_v53, %v10285_v55  ;;  %v14879_v26 = vld [vmem:[%s16740_s27 + $0x3f4] sm:$0xf0] }
  0xaf   : > { %1669 = vmatpush.bf16.msrb.mxu3 %v10592_v30  ;;  %v10541_v60 = vld [vmem:[%s16740_s27 + $0x330] sm:$0xf0]  ;;  %v14752_v63 = vld [vmem:[%s16740_s27 + $0x4] sm:$0xf]  ;;  %v10416_v2 = vor.u32 %v14820_v57, %v10413_v58  ;;  %v10516_v30 = vor.u32 %v14847_v22, %v10515_v21  ;;  %v10644_v34 = vor.u32 %v14879_v26, %v10643_v25  ;;  %v14775_v44 = vld [vmem:[%s16740_s27 + $0xb4] sm:$0xf0] }
  0xb0   : > { %1631 = vmatpush.bf16.msrb.mxu0 %v10192_v36  ;;  %v10141_v0 = vld [vmem:[%s16740_s27 + $0x10] sm:$0xf0]  ;;  %v14784_v3 = vld [vmem:[%s16740_s27 + $0x104] sm:$0xf]  ;;  %v10544_v12 = vor.u32 %v14852_v59, %v10541_v60  ;;  %v10499_v36 = vld [vmem:[%s16740_s27 + $0x2c8] sm:$0xf]  ;;  %v10228_v52 = vor.u32 %v14775_v44, %v10227_v43 }
  0xb1   : > { %1644 = vmatpush.bf16.msrb.mxu1 %v10320_v37  ;;  %v10269_v7 = vld [vmem:[%s16740_s27 + $0x110] sm:$0xf0]  ;;  %v14816_v8 = vld [vmem:[%s16740_s27 + $0x204] sm:$0xf]  ;;  %v10144_v19 = vor.u32 %v14752_v63, %v10141_v0  ;;  %v14843_v37 = vld [vmem:[%s16740_s27 + $0x2d4] sm:$0xf0] }
  0xb2   : > { %1657 = vmatpush.bf16.msrb.mxu2 %v10448_v38  ;;  %v10397_v13 = vld [vmem:[%s16740_s27 + $0x210] sm:$0xf0]  ;;  %v14848_v14 = vld [vmem:[%s16740_s27 + $0x304] sm:$0xf]  ;;  %v10272_v23 = vor.u32 %v14784_v3, %v10269_v7  ;;  %v10627_v38 = vld [vmem:[%s16740_s27 + $0x3c8] sm:$0xf] }
  0xb3   : > { %1670 = vmatpush.bf16.msrb.mxu3 %v10576_v42  ;;  %v10525_v15 = vld [vmem:[%s16740_s27 + $0x310] sm:$0xf0]  ;;  %v10400_v24 = vor.u32 %v14816_v8, %v10397_v13  ;;  %v10500_v42 = vor.u32 %v14843_v37, %v10499_v36  ;;  %v10355_v45 = vld [vmem:[%s16740_s27 + $0x1a8] sm:$0xf]  ;;  %v10628_v46 = vor.u32 %v14875_v39, %v10627_v38  ;;  %v14807_v47 = vld [vmem:[%s16740_s27 + $0x1b4] sm:$0xf0] }
  0xb4   : > { %1632 = vmatpush.bf16.msrb.mxu0 %v10176_v48  ;;  %v10528_v27 = vor.u32 %v14848_v14, %v10525_v15  ;;  %v10483_v48 = vld [vmem:[%s16740_s27 + $0x2a8] sm:$0xf]  ;;  %v14871_v51 = vld [vmem:[%s16740_s27 + $0x3b4] sm:$0xf0]  ;;  %v10356_v53 = vor.u32 %v14807_v47, %v10355_v45 }
  0xb5   : > { %1645 = vmatpush.bf16.msrb.mxu1 %v10304_v49  ;;  %v14839_v49 = vld [vmem:[%s16740_s27 + $0x2b4] sm:$0xf0]  ;;  %v10211_v55 = vld [vmem:[%s16740_s27 + $0x88] sm:$0xf] }
  0xb6   : > { %1658 = vmatpush.bf16.msrb.mxu2 %v10432_v50  ;;  %v10611_v50 = vld [vmem:[%s16740_s27 + $0x3a8] sm:$0xf]  ;;  %v14771_v57 = vld [vmem:[%s16740_s27 + $0x94] sm:$0xf0] }
  0xb7   : > { %1671 = vmatpush.bf16.msrb.mxu3 %v10560_v54  ;;  %v10484_v54 = vor.u32 %v14839_v49, %v10483_v48  ;;  %v10339_v58 = vld [vmem:[%s16740_s27 + $0x188] sm:$0xf]  ;;  %v10612_v59 = vor.u32 %v14871_v51, %v10611_v50  ;;  %v14803_v60 = vld [vmem:[%s16740_s27 + $0x194] sm:$0xf0] }
  0xb8   : > { %1633 = vmatpush.bf16.msrb.mxu0 %v10160_v62  ;;  %v10467_v62 = vld [vmem:[%s16740_s27 + $0x288] sm:$0xf]  ;;  %v14835_v63 = vld [vmem:[%s16740_s27 + $0x294] sm:$0xf0]  ;;  %v10340_v3 = vor.u32 %v14803_v60, %v10339_v58  ;;  %v10261_v58 = vld [vmem:[%s16740_s27 + $0xf8] sm:$0xf0] }
  0xb9   : > { %1646 = vmatpush.bf16.msrb.mxu1 %v10288_v1  ;;  %v10595_v0 = vld [vmem:[%s16740_s27 + $0x388] sm:$0xf]  ;;  %v14867_v1 = vld [vmem:[%s16740_s27 + $0x394] sm:$0xf0]  ;;  %v10468_v7 = vor.u32 %v14835_v63, %v10467_v62  ;;  %v10389_v62 = vld [vmem:[%s16740_s27 + $0x1f8] sm:$0xf0] }
  0xba   : > { %1659 = vmatpush.bf16.msrb.mxu2 %v10416_v2  ;;  %v10212_v2 = vor.u32 %v14771_v57, %v10211_v55  ;;  %v10195_v8 = vld [vmem:[%s16740_s27 + $0x68] sm:$0xf]  ;;  %v10596_v14 = vor.u32 %v14867_v1, %v10595_v0  ;;  %v14799_v15 = vld [vmem:[%s16740_s27 + $0x174] sm:$0xf0]  ;;  %v14781_v57 = vld [vmem:[%s16740_s27 + $0xec] sm:$0xf] }
  0xbb   : > { %1672 = vmatpush.bf16.msrb.mxu3 %v10544_v12  ;;  %v14767_v12 = vld [vmem:[%s16740_s27 + $0x74] sm:$0xf0]  ;;  %v10323_v13 = vld [vmem:[%s16740_s27 + $0x168] sm:$0xf]  ;;  %v14845_v63 = vld [vmem:[%s16740_s27 + $0x2ec] sm:$0xf] }
  0xbc   : > { %1634 = vmatpush.bf16.msrb.mxu0 %v10144_v19  ;;  %v10451_v16 = vld [vmem:[%s16740_s27 + $0x268] sm:$0xf]  ;;  %v14831_v17 = vld [vmem:[%s16740_s27 + $0x274] sm:$0xf0]  ;;  %v10196_v20 = vor.u32 %v14767_v12, %v10195_v8  ;;  %v10324_v21 = vor.u32 %v14799_v15, %v10323_v13  ;;  %v10517_v0 = vld [vmem:[%s16740_s27 + $0x2f8] sm:$0xf0]  ;;  %v10264_v12 = vor.u32 %v14781_v57, %v10261_v58 }
  0xbd   : > { %1647 = vmatpush.bf16.msrb.mxu1 %v10272_v23  ;;  %v10579_v18 = vld [vmem:[%s16740_s27 + $0x368] sm:$0xf]  ;;  %v14863_v19 = vld [vmem:[%s16740_s27 + $0x374] sm:$0xf0]  ;;  %v10452_v22 = vor.u32 %v14831_v17, %v10451_v16  ;;  %v14777_v15 = vld [vmem:[%s16740_s27 + $0xcc] sm:$0xf] }
  0xbe   : > { %1660 = vmatpush.bf16.msrb.mxu2 %v10400_v24  ;;  %v10179_v23 = vld [vmem:[%s16740_s27 + $0x48] sm:$0xf]  ;;  %v14763_v24 = vld [vmem:[%s16740_s27 + $0x54] sm:$0xf0]  ;;  %v10580_v26 = vor.u32 %v14863_v19, %v10579_v18  ;;  %v10245_v16 = vld [vmem:[%s16740_s27 + $0xd8] sm:$0xf0] }
  0xbf   : > { %1673 = vmatpush.bf16.msrb.mxu3 %v10528_v27  ;;  %1635 = vmatmul.bf16.vlgmr.msrb.gmra.mxu0 %v16886_v9  ;;  %v10307_v25 = vld [vmem:[%s16740_s27 + $0x148] sm:$0xf]  ;;  %v14795_v27 = vld [vmem:[%s16740_s27 + $0x154] sm:$0xf0]  ;;  %v10180_v32 = vor.u32 %v14763_v24, %v10179_v23  ;;  %v14809_v17 = vld [vmem:[%s16740_s27 + $0x1cc] sm:$0xf]  ;;  %v10248_v24 = vor.u32 %v14777_v15, %v10245_v16 }
  0xc0   : > { %1679 = vmatpush.bf16.msra.mxu0 %v10260_v28  ;;  %1648 = vmatmul.bf16.vlgmr.msrb.gmra.mxu1 %v16894_v11  ;;  %v10435_v28 = vld [vmem:[%s16740_s27 + $0x248] sm:$0xf]  ;;  %v14859_v31 = vld [vmem:[%s16740_s27 + $0x354] sm:$0xf0]  ;;  %v10308_v33 = vor.u32 %v14795_v27, %v10307_v25  ;;  %v10373_v19 = vld [vmem:[%s16740_s27 + $0x1d8] sm:$0xf0] }
  0xc1   : > { %1692 = vmatpush.bf16.msra.mxu1 %v10388_v29  ;;  %1661 = vmatmul.bf16.vlgmr.msrb.gmra.mxu2 %v16870_v61  ;;  %v14827_v29 = vld [vmem:[%s16740_s27 + $0x254] sm:$0xf0]  ;;  %v10163_v35 = vld [vmem:[%s16740_s27 + $0x28] sm:$0xf]  ;;  %v10629_v23 = vld [vmem:[%s16740_s27 + $0x3d8] sm:$0xf0]  ;;  %v10376_v25 = vor.u32 %v14809_v17, %v10373_v19 }
  0xc2   : > { %1705 = vmatpush.bf16.msra.mxu2 %v10516_v30  ;;  %1674 = vmatmul.bf16.vlgmr.msrb.gmra.mxu3 %v16890_v10  ;;  %v10563_v30 = vld [vmem:[%s16740_s27 + $0x348] sm:$0xf]  ;;  %v14759_v36 = vld [vmem:[%s16740_s27 + $0x34] sm:$0xf0]  ;;  %v14773_v27 = vld [vmem:[%s16740_s27 + $0xac] sm:$0xf] }
  0xc3   : > { %1718 = vmatpush.bf16.msra.mxu3 %v10644_v34  ;;  %v10436_v34 = vor.u32 %v14827_v29, %v10435_v28  ;;  %v10291_v37 = vld [vmem:[%s16740_s27 + $0x128] sm:$0xf]  ;;  %v10564_v38 = vor.u32 %v14859_v31, %v10563_v30  ;;  %v14791_v39 = vld [vmem:[%s16740_s27 + $0x134] sm:$0xf0]  ;;  %v10164_v44 = vor.u32 %v14759_v36, %v10163_v35  ;;  %v10229_v28 = vld [vmem:[%s16740_s27 + $0xb8] sm:$0xf0] }
  0xc4   : > { %1680 = vmatpush.bf16.msra.mxu0 %v10244_v40  ;;  %v10419_v40 = vld [vmem:[%s16740_s27 + $0x228] sm:$0xf]  ;;  %v14855_v43 = vld [vmem:[%s16740_s27 + $0x334] sm:$0xf0]  ;;  %v10292_v47 = vor.u32 %v14791_v39, %v10291_v37  ;;  %v14805_v29 = vld [vmem:[%s16740_s27 + $0x1ac] sm:$0xf]  ;;  %v10232_v36 = vor.u32 %v14773_v27, %v10229_v28 }
  0xc5   : > { %1693 = vmatpush.bf16.msra.mxu1 %v10372_v41  ;;  %v14823_v41 = vld [vmem:[%s16740_s27 + $0x234] sm:$0xf0]  ;;  %v10147_v45 = vld [vmem:[%s16740_s27 + $0x8] sm:$0xf]  ;;  %v10357_v31 = vld [vmem:[%s16740_s27 + $0x1b8] sm:$0xf0] }
  0xc6   : > { %1706 = vmatpush.bf16.msra.mxu2 %v10500_v42  ;;  %v10547_v42 = vld [vmem:[%s16740_s27 + $0x328] sm:$0xf]  ;;  %v10420_v48 = vor.u32 %v14823_v41, %v10419_v40  ;;  %v14787_v50 = vld [vmem:[%s16740_s27 + $0x114] sm:$0xf0]  ;;  %v10613_v35 = vld [vmem:[%s16740_s27 + $0x3b8] sm:$0xf0]  ;;  %v10360_v37 = vor.u32 %v14805_v29, %v10357_v31 }
  0xc7   : > { %1719 = vmatpush.bf16.msra.mxu3 %v10628_v46  ;;  %v14755_v46 = vld [vmem:[%s16740_s27 + $0x14] sm:$0xf0]  ;;  %v10275_v49 = vld [vmem:[%s16740_s27 + $0x108] sm:$0xf]  ;;  %v14769_v39 = vld [vmem:[%s16740_s27 + $0x8c] sm:$0xf] }
  0xc8   : > { %1681 = vmatpush.bf16.msra.mxu0 %v10228_v52  ;;  %v10403_v51 = vld [vmem:[%s16740_s27 + $0x208] sm:$0xf]  ;;  %v10548_v52 = vor.u32 %v14855_v43, %v10547_v42  ;;  %v14851_v55 = vld [vmem:[%s16740_s27 + $0x314] sm:$0xf0]  ;;  %v10148_v60 = vor.u32 %v14755_v46, %v10147_v45  ;;  %v10276_v1 = vor.u32 %v14787_v50, %v10275_v49  ;;  %v10213_v40 = vld [vmem:[%s16740_s27 + $0x98] sm:$0xf0] }
  0xc9   : > { %1694 = vmatpush.bf16.msra.mxu1 %v10356_v53  ;;  %v14819_v53 = vld [vmem:[%s16740_s27 + $0x214] sm:$0xf0]  ;;  %v14801_v41 = vld [vmem:[%s16740_s27 + $0x18c] sm:$0xf]  ;;  %v10341_v43 = vld [vmem:[%s16740_s27 + $0x198] sm:$0xf0] }
  0xca   : > { %1707 = vmatpush.bf16.msra.mxu2 %v10484_v54  ;;  %v10531_v54 = vld [vmem:[%s16740_s27 + $0x308] sm:$0xf]  ;;  %v10469_v45 = vld [vmem:[%s16740_s27 + $0x298] sm:$0xf0]  ;;  %v14865_v46 = vld [vmem:[%s16740_s27 + $0x38c] sm:$0xf]  ;;  %v10344_v49 = vor.u32 %v14801_v41, %v10341_v43 }
  0xcb   : > { %1720 = vmatpush.bf16.msra.mxu3 %v10612_v59  ;;  %v14813_v59 = vld [vmem:[%s16740_s27 + $0x1ec] sm:$0xf]  ;;  %v10532_v8 = vor.u32 %v14851_v55, %v10531_v54  ;;  %v10325_v55 = vld [vmem:[%s16740_s27 + $0x178] sm:$0xf0] }
  0xcc   : > { %1682 = vmatpush.bf16.msra.mxu0 %v10212_v2  ;;  %v10404_v2 = vor.u32 %v14819_v53, %v10403_v51  ;;  %v10392_v13 = vor.u32 %v14813_v59, %v10389_v62  ;;  %v14765_v51 = vld [vmem:[%s16740_s27 + $0x6c] sm:$0xf]  ;;  %v10453_v58 = vld [vmem:[%s16740_s27 + $0x278] sm:$0xf0] }
  0xcd   : > { %1695 = vmatpush.bf16.msra.mxu1 %v10340_v3  ;;  %v14877_v3 = vld [vmem:[%s16740_s27 + $0x3ec] sm:$0xf]  ;;  %v10565_v15 = vld [vmem:[%s16740_s27 + $0x358] sm:$0xf0] }
  0xce   : > { %1708 = vmatpush.bf16.msra.mxu2 %v10468_v7  ;;  %v10645_v7 = vld [vmem:[%s16740_s27 + $0x3f8] sm:$0xf0]  ;;  %v14797_v53 = vld [vmem:[%s16740_s27 + $0x16c] sm:$0xf] }
  0xcf   : > { %1721 = vmatpush.bf16.msra.mxu3 %v10596_v14  ;;  %v10520_v14 = vor.u32 %v14845_v63, %v10517_v0  ;;  %v10648_v18 = vor.u32 %v14877_v3, %v10645_v7  ;;  %v14829_v57 = vld [vmem:[%s16740_s27 + $0x26c] sm:$0xf]  ;;  %v10328_v63 = vor.u32 %v14797_v53, %v10325_v55  ;;  %v10549_v27 = vld [vmem:[%s16740_s27 + $0x338] sm:$0xf0] }
  0xd0   : > { %1683 = vmatpush.bf16.msra.mxu0 %v10196_v20  ;;  %v14841_v20 = vld [vmem:[%s16740_s27 + $0x2cc] sm:$0xf]  ;;  %v10456_v0 = vor.u32 %v14829_v57, %v10453_v58 }
  0xd1   : > { %1696 = vmatpush.bf16.msra.mxu1 %v10324_v21  ;;  %v10501_v21 = vld [vmem:[%s16740_s27 + $0x2d8] sm:$0xf0]  ;;  %v14861_v59 = vld [vmem:[%s16740_s27 + $0x36c] sm:$0xf] }
  0xd2   : > { %1709 = vmatpush.bf16.msra.mxu2 %v10452_v22  ;;  %v14873_v22 = vld [vmem:[%s16740_s27 + $0x3cc] sm:$0xf] }
  0xd3   : > { %1722 = vmatpush.bf16.msra.mxu3 %v10580_v26  ;;  %v10504_v26 = vor.u32 %v14841_v20, %v10501_v21  ;;  %v10632_v30 = vor.u32 %v14873_v22, %v10629_v23  ;;  %v14793_v3 = vld [vmem:[%s16740_s27 + $0x14c] sm:$0xf]  ;;  %v10165_v20 = vld [vmem:[%s16740_s27 + $0x38] sm:$0xf0] }
  0xd4   : > { %1684 = vmatpush.bf16.msra.mxu0 %v10180_v32  ;;  %v14837_v32 = vld [vmem:[%s16740_s27 + $0x2ac] sm:$0xf]  ;;  %v10293_v23 = vld [vmem:[%s16740_s27 + $0x138] sm:$0xf0] }
  0xd5   : > { %1697 = vmatpush.bf16.msra.mxu1 %v10308_v33  ;;  %v10485_v33 = vld [vmem:[%s16740_s27 + $0x2b8] sm:$0xf0]  ;;  %v14757_v19 = vld [vmem:[%s16740_s27 + $0x2c] sm:$0xf] }
  0xd6   : > { %1710 = vmatpush.bf16.msra.mxu2 %v10436_v34  ;;  %v14869_v34 = vld [vmem:[%s16740_s27 + $0x3ac] sm:$0xf]  ;;  %v10168_v28 = vor.u32 %v14757_v19, %v10165_v20 }
  0xd7   : > { %1723 = vmatpush.bf16.msra.mxu3 %v10564_v38  ;;  %v10488_v38 = vor.u32 %v14837_v32, %v10485_v33  ;;  %v10616_v42 = vor.u32 %v14869_v34, %v10613_v35  ;;  %v14789_v21 = vld [vmem:[%s16740_s27 + $0x12c] sm:$0xf]  ;;  %v10149_v32 = vld [vmem:[%s16740_s27 + $0x18] sm:$0xf0] }
  0xd8   : > { %1685 = vmatpush.bf16.msra.mxu0 %v10164_v44  ;;  %v14833_v44 = vld [vmem:[%s16740_s27 + $0x28c] sm:$0xf]  ;;  %v10296_v29 = vor.u32 %v14789_v21, %v10293_v23  ;;  %v10277_v35 = vld [vmem:[%s16740_s27 + $0x118] sm:$0xf0] }
  0xd9   : > { %1698 = vmatpush.bf16.msra.mxu1 %v10292_v47  ;;  %v10597_v47 = vld [vmem:[%s16740_s27 + $0x398] sm:$0xf0]  ;;  %v10472_v50 = vor.u32 %v14833_v44, %v10469_v45  ;;  %v14753_v31 = vld [vmem:[%s16740_s27 + $0xc] sm:$0xf]  ;;  %v925_v44 = vld [vmem:[%s617_s4] sm:$0xf] }
  0xda   : > { %1711 = vmatpush.bf16.msra.mxu2 %v10420_v48  ;;  %v10216_v48 = vor.u32 %v14769_v39, %v10213_v40  ;;  %v10600_v54 = vor.u32 %v14865_v46, %v10597_v47  ;;  %v14785_v33 = vld [vmem:[%s16740_s27 + $0x10c] sm:$0xf]  ;;  %v10533_v39 = vld [vmem:[%s16740_s27 + $0x318] sm:$0xf0]  ;;  %v10152_v40 = vor.u32 %v14753_v31, %v10149_v32  ;;  %v927_v45 = vperm.slane %v925_v44, 0 }
  0xdb   : > { %1724 = vmatpush.bf16.msra.mxu3 %v10548_v52  ;;  %v10197_v52 = vld [vmem:[%s16740_s27 + $0x78] sm:$0xf0]  ;;  %v10280_v41 = vor.u32 %v14785_v33, %v10277_v35  ;;  %v930_v20 = vperm.slane %v925_v44, 3 }
  0xdc   : > { %1686 = vmatpush.bf16.msra.mxu0 %v10148_v60  ;;  %v10581_v60 = vld [vmem:[%s16740_s27 + $0x378] sm:$0xf0]  ;;  %v10200_v62 = vor.u32 %v14765_v51, %v10197_v52 }
  0xdd   : > { %1699 = vmatpush.bf16.msra.mxu1 %v10276_v1  ;;  %v14761_v1 = vld [vmem:[%s16740_s27 + $0x4c] sm:$0xf]  ;;  %v10584_v7 = vor.u32 %v14861_v59, %v10581_v60 }
  0xde   : > { %1712 = vmatpush.bf16.msra.mxu2 %v10404_v2  ;;  %v10181_v2 = vld [vmem:[%s16740_s27 + $0x58] sm:$0xf0] }
  0xdf   : > { %1725 = vmatpush.bf16.msra.mxu3 %v10532_v8  ;;  %1687 = vmatmul.bf16.vlgmr.msra.gmra.mxu0 %v16886_v9  ;;  %v10309_v8 = vld [vmem:[%s16740_s27 + $0x158] sm:$0xf0]  ;;  %v10184_v16 = vor.u32 %v14761_v1, %v10181_v2 }
  0xe0   : > { %1731 = vmatpush.bf16.msrb.mxu0 %v10264_v12  ;;  %1700 = vmatmul.bf16.vlgmr.msra.gmra.mxu1 %v16894_v11  ;;  %v14825_v12 = vld [vmem:[%s16740_s27 + $0x24c] sm:$0xf]  ;;  %v10312_v17 = vor.u32 %v14793_v3, %v10309_v8 }
  0xe1   : > { %1744 = vmatpush.bf16.msrb.mxu1 %v10392_v13  ;;  %1713 = vmatmul.bf16.vlgmr.msra.gmra.mxu2 %v16870_v61  ;;  %v10437_v13 = vld [vmem:[%s16740_s27 + $0x258] sm:$0xf0] }
  0xe2   : > { %1757 = vmatpush.bf16.msrb.mxu2 %v10520_v14  ;;  %1726 = vmatmul.bf16.vlgmr.msra.gmra.mxu3 %v16890_v10  ;;  %v14857_v14 = vld [vmem:[%s16740_s27 + $0x34c] sm:$0xf] }
  0xe3   : > { %1770 = vmatpush.bf16.msrb.mxu3 %v10648_v18  ;;  %v10440_v18 = vor.u32 %v14825_v12, %v10437_v13  ;;  %v10568_v22 = vor.u32 %v14857_v14, %v10565_v15  ;;  %v928_v13 = vperm.slane %v925_v44, 1  ;;  %v929_v15 = vperm.slane %v925_v44, 2  ;;  %v11099_v44 = vld [vmem:[%s16757_s15 + $0x380] sm:$0xf] }
  0xe4   : > { %1732 = vmatpush.bf16.msrb.mxu0 %v10248_v24  ;;  %v14821_v24 = vld [vmem:[%s16740_s27 + $0x22c] sm:$0xf] }
  0xe5   : > { %1745 = vmatpush.bf16.msrb.mxu1 %v10376_v25  ;;  %v10421_v25 = vld [vmem:[%s16740_s27 + $0x238] sm:$0xf0] }
  0xe6   : > { %1758 = vmatpush.bf16.msrb.mxu2 %v10504_v26  ;;  %v14853_v26 = vld [vmem:[%s16740_s27 + $0x32c] sm:$0xf] }
  0xe7   : > { %1771 = vmatpush.bf16.msrb.mxu3 %v10632_v30  ;;  %v10424_v30 = vor.u32 %v14821_v24, %v10421_v25  ;;  %v10552_v34 = vor.u32 %v14853_v26, %v10549_v27 }
  0xe8   : > { %1733 = vmatpush.bf16.msrb.mxu0 %v10232_v36  ;;  %v14817_v36 = vld [vmem:[%s16740_s27 + $0x20c] sm:$0xf] }
  0xe9   : > { %1746 = vmatpush.bf16.msrb.mxu1 %v10360_v37  ;;  %v10405_v37 = vld [vmem:[%s16740_s27 + $0x218] sm:$0xf0] }
  0xea   : > { %1759 = vmatpush.bf16.msrb.mxu2 %v10488_v38  ;;  %v14849_v38 = vld [vmem:[%s16740_s27 + $0x30c] sm:$0xf]  ;;  %s9829_s27 = sshll.u32 %s19571_s26, 4  ;;  %s9830_s27 = int_to_ptr.hbm [resolvable:$true] %s9829_s27 }
  0xeb   : > { %1772 = vmatpush.bf16.msrb.mxu3 %v10616_v42  ;;  %v10408_v42 = vor.u32 %v14817_v36, %v10405_v37  ;;  %v10536_v43 = vor.u32 %v14849_v38, %v10533_v39 }
  0xec   : > { %1734 = vmatpush.bf16.msrb.mxu0 %v10216_v48 }
  0xed   : > { %1747 = vmatpush.bf16.msrb.mxu1 %v10344_v49 }
  0xee   : > { %1760 = vmatpush.bf16.msrb.mxu2 %v10472_v50 }
  0xef   : > { %1773 = vmatpush.bf16.msrb.mxu3 %v10600_v54 }
  0xf0   : > { %1735 = vmatpush.bf16.msrb.mxu0 %v10200_v62 }
  0xf1   : > { %1748 = vmatpush.bf16.msrb.mxu1 %v10328_v63 }
  0xf2   : > { %1761 = vmatpush.bf16.msrb.mxu2 %v10456_v0 }
  0xf3   : > { %1774 = vmatpush.bf16.msrb.mxu3 %v10584_v7 }
  0xf4   : > { %1736 = vmatpush.bf16.msrb.mxu0 %v10184_v16 }
  0xf5   : > { %1749 = vmatpush.bf16.msrb.mxu1 %v10312_v17 }
  0xf6   : > { %1762 = vmatpush.bf16.msrb.mxu2 %v10440_v18 }
  0xf7   : > { %1775 = vmatpush.bf16.msrb.mxu3 %v10568_v22 }
  0xf8   : > { %1737 = vmatpush.bf16.msrb.mxu0 %v10168_v28 }
  0xf9   : > { %1750 = vmatpush.bf16.msrb.mxu1 %v10296_v29 }
  0xfa   : > { %1763 = vmatpush.bf16.msrb.mxu2 %v10424_v30 }
  0xfb   : > { %1776 = vmatpush.bf16.msrb.mxu3 %v10552_v34 }
  0xfc   : > { %1738 = vmatpush.bf16.msrb.mxu0 %v10152_v40 }
  0xfd   : > { %1751 = vmatpush.bf16.msrb.mxu1 %v10280_v41  ;;  %v16476_v41 = vmov 512.0  }
  0xfe   : > { %1764 = vmatpush.bf16.msrb.mxu2 %v10408_v42  ;;  %16027 = vrcp.f32 %v16476_v41  ;;  %v12379_v41 = vld [vmem:[%s16757_s15 + $0xd80] sm:$0xf] }
  0xff   : > { %1777 = vmatpush.bf16.msrb.mxu3 %v10536_v43  ;;  %1739 = vmatmul.bf16.vlgmr.msrb.gmra.mxu0 %v16886_v9 }
 0x100   : > { %1752 = vmatmul.bf16.vlgmr.msrb.gmra.mxu1 %v16894_v11 }
 0x101   : > { %1765 = vmatmul.bf16.vlgmr.msrb.gmra.mxu2 %v16870_v61 }
 0x102   : > { %1778 = vmatmul.bf16.vlgmr.msrb.gmra.mxu3 %v16890_v10 }
 0x104   : > { %v17097_v42 = vpop.eup %16027 }
 0x105   : > { %v1793_v43 = vmul.f32 512.0, %v17097_v42  ;;  %vm1797_vm0 = vweird.f32 %v17097_v42 }
 0x11f   : > { %v1584_v46 = vpop.f32.mrf.mxu0 }
 0x120   : > { %v1585_v47 = vadd.f32 %v1584_v46, %v927_v45  ;;  %v1597_v48 = vpop.f32.mrf.mxu1  ;;  %v15000_v45 = vld [vmem:[%s16757_s15 + $0x3bc] sm:$0xf0] }
 0x121   : > { %v11611_v46 = vld [vmem:[%s16757_s15 + $0x780] sm:$0xf] }
 0x122   : > { %v1598_v50 = vadd.f32 %v1597_v48, %v1585_v47  ;;  %v11100_v47 = vor.u32 %v15000_v45, %v11099_v44  ;;  %v15128_v48 = vld [vmem:[%s16757_s15 + $0x7bc] sm:$0xf0] }
 0x124   : > { %v1610_v49 = vpop.f32.mrf.mxu2  ;;  %4969 = vmatpush.bf16.msra.mxu0 %v11100_v47  ;;  %v14920_v47 = vld [vmem:[%s16757_s15 + $0x13c] sm:$0xf0] }
 0x125   : > { %v1611_v51 = vadd.f32 %v1610_v49, %v1598_v50  ;;  %v12123_v49 = vld [vmem:[%s16757_s15 + $0xb80] sm:$0xf] }
 0x126   : > { %v15256_v50 = vld [vmem:[%s16757_s15 + $0xbbc] sm:$0xf0] }
 0x127   : > { %v1623_v52 = vpop.f32.mrf.mxu3  ;;  %v1586_v54 = vpop.f32.mrf.mxu0 }
 0x128   : > { %v1624_v53 = vadd.f32 %v1623_v52, %v1611_v51  ;;  %v1599_v55 = vpop.f32.mrf.mxu1  ;;  %v11612_v51 = vor.u32 %v15128_v48, %v11611_v46  ;;  %v12124_v52 = vor.u32 %v15256_v50, %v12123_v49  ;;  %v15384_v54 = vld [vmem:[%s16757_s15 + $0xfbc] sm:$0xf0] }
 0x129   : > { %v11035_v55 = vld [vmem:[%s16757_s15 + $0x300] sm:$0xf] }
 0x12a   : > { %v17085_v31 = vadd.f32 %v1624_v53, %v16876_v4  ;;  %v12635_v53 = vld [vmem:[%s16757_s15 + $0xf80] sm:$0xf]  ;;  %4982 = vmatpush.bf16.msra.mxu1 %v11612_v51  ;;  %4995 = vmatpush.bf16.msra.mxu2 %v12124_v52 }
 0x12b   : > { %v10779_v46 = vld [vmem:[%s16757_s15 + $0x100] sm:$0xf] }
 0x12c   : > { %v1612_v9 = vpop.f32.mrf.mxu2  ;;  %v11291_v50 = vld [vmem:[%s16757_s15 + $0x500] sm:$0xf] }
 0x12d   : > { %v12636_v9 = vor.u32 %v15384_v54, %v12635_v53  ;;  %v15048_v51 = vld [vmem:[%s16757_s15 + $0x53c] sm:$0xf0] }
 0x12e   : > { %v11803_v52 = vld [vmem:[%s16757_s15 + $0x900] sm:$0xf] }
 0x12f   : > { %v1625_v57 = vpop.f32.mrf.mxu3  ;;  %5008 = vmatpush.bf16.msra.mxu3 %v12636_v9  ;;  %v15176_v53 = vld [vmem:[%s16757_s15 + $0x93c] sm:$0xf0] }
 0x130   : > { %v14984_v57 = vld [vmem:[%s16757_s15 + $0x33c] sm:$0xf0] }
 0x131   : > { %v12315_v54 = vld [vmem:[%s16757_s15 + $0xd00] sm:$0xf] }
 0x13c   : > { %v1636_v11 = vpop.f32.mrf.mxu0 }
 0x13d   : > { %v1649_v58 = vpop.f32.mrf.mxu1  ;;  %v1637_v16 = vadd.f32 %v1636_v11, %v928_v13  ;;  %v11547_v11 = vld [vmem:[%s16757_s15 + $0x700] sm:$0xf] }
 0x13f   : > { %v1650_v18 = vadd.f32 %v1649_v58, %v1637_v16  ;;  %v15112_v58 = vld [vmem:[%s16757_s15 + $0x73c] sm:$0xf0] }
 0x140   : > { %v15352_v16 = vld [vmem:[%s16757_s15 + $0xebc] sm:$0xf0] }
 0x144   : > { %v1662_v61 = vpop.f32.mrf.mxu2  ;;  %v1638_v10 = vpop.f32.mrf.mxu0 }
 0x145   : > { %v1675_v59 = vpop.f32.mrf.mxu3  ;;  %v1651_v60 = vpop.f32.mrf.mxu1  ;;  %v1663_v21 = vadd.f32 %v1662_v61, %v1650_v18  ;;  %v11036_v61 = vor.u32 %v14984_v57, %v11035_v55  ;;  %v12059_v10 = vld [vmem:[%s16757_s15 + $0xb00] sm:$0xf]  ;;  %v10780_v57 = vor.u32 %v14920_v47, %v10779_v46 }
 0x146   : > { %v15240_v60 = vld [vmem:[%s16757_s15 + $0xb3c] sm:$0xf0] }
 0x147   : > { %v1676_v26 = vadd.f32 %v1675_v59, %v1663_v21  ;;  %v11548_v59 = vor.u32 %v15112_v58, %v11547_v11  ;;  %4970 = vmatpush.bf16.msra.mxu0 %v11036_v61  ;;  %v11419_v21 = vld [vmem:[%s16757_s15 + $0x600] sm:$0xf]  ;;  %v11292_v11 = vor.u32 %v15048_v51, %v11291_v50  ;;  %v11549_v50 = vld [vmem:[%s16757_s15 + $0x740] sm:$0xf0] }
 0x148   : > { %v15304_v55 = vld [vmem:[%s16757_s15 + $0xd3c] sm:$0xf0]  ;;  %v15232_v51 = vld [vmem:[%s16757_s15 + $0xb04] sm:$0xf] }
 0x149   : > { %v17082_v29 = vadd.f32 %v1676_v26, %v16880_v6  ;;  %4983 = vmatpush.bf16.msra.mxu1 %v11548_v59  ;;  %v15208_v26 = vld [vmem:[%s16757_s15 + $0xa3c] sm:$0xf0]  ;;  %v11804_v59 = vor.u32 %v15176_v53, %v11803_v52  ;;  %v12061_v53 = vld [vmem:[%s16757_s15 + $0xb40] sm:$0xf0] }
 0x14a   : > { %v10715_v58 = vld [vmem:[%s16757_s15 + $0x80] sm:$0xf] }
 0x14b   : > { %v1787_v38 = vadd.f32 %v17082_v29, %v17085_v31  ;;  %v14904_v61 = vld [vmem:[%s16757_s15 + $0xbc] sm:$0xf0] }
 0x14c   : > { %v1664_v62 = vpop.f32.mrf.mxu2 }
 0x14d   : > { %v1677_v63 = vpop.f32.mrf.mxu3  ;;  %v12571_v62 = vld [vmem:[%s16757_s15 + $0xf00] sm:$0xf] }
 0x14e   : > { %v12060_v63 = vor.u32 %v15240_v60, %v12059_v10  ;;  %v12316_v10 = vor.u32 %v15304_v55, %v12315_v54  ;;  %v11227_v60 = vld [vmem:[%s16757_s15 + $0x480] sm:$0xf]  ;;  %v15360_v54 = vld [vmem:[%s16757_s15 + $0xf04] sm:$0xf] }
 0x14f   : > { %v12573_v55 = vld [vmem:[%s16757_s15 + $0xf40] sm:$0xf0] }
 0x150   : > { %4996 = vmatpush.bf16.msra.mxu2 %v12060_v63  ;;  %v11739_v63 = vld [vmem:[%s16757_s15 + $0x880] sm:$0xf] }
 0x15c   : > { %v1688_v0 = vpop.f32.mrf.mxu0 }
 0x15d   : > { %v1701_v1 = vpop.f32.mrf.mxu1  ;;  %v1689_v17 = vadd.f32 %v1688_v0, %v929_v15  ;;  %v15368_v0 = vld [vmem:[%s16757_s15 + $0xf3c] sm:$0xf0] }
 0x15e   : > { %v12507_v15 = vld [vmem:[%s16757_s15 + $0xe80] sm:$0xf] }
 0x15f   : > { %v1702_v19 = vadd.f32 %v1701_v1, %v1689_v17  ;;  %v10971_v1 = vld [vmem:[%s16757_s15 + $0x280] sm:$0xf] }
 0x164   : > { %v1714_v2 = vpop.f32.mrf.mxu2  ;;  %v1690_v7 = vpop.f32.mrf.mxu0 }
 0x165   : > { %v1727_v3 = vpop.f32.mrf.mxu3  ;;  %v1703_v8 = vpop.f32.mrf.mxu1  ;;  %v1715_v22 = vadd.f32 %v1714_v2, %v1702_v19  ;;  %v14968_v2 = vld [vmem:[%s16757_s15 + $0x2bc] sm:$0xf0] }
 0x166   : > { %v11483_v7 = vld [vmem:[%s16757_s15 + $0x680] sm:$0xf]  ;;  %v10972_v13 = vor.u32 %v14968_v2, %v10971_v1 }
 0x167   : > { %v1728_v27 = vadd.f32 %v1727_v3, %v1715_v22  ;;  %v12572_v3 = vor.u32 %v15368_v0, %v12571_v62  ;;  %v15096_v8 = vld [vmem:[%s16757_s15 + $0x6bc] sm:$0xf0] }
 0x168   : > { %v11484_v17 = vor.u32 %v15096_v8, %v11483_v7  ;;  %v10907_v19 = vld [vmem:[%s16757_s15 + $0x200] sm:$0xf]  ;;  %4971 = vmatpush.bf16.msra.mxu0 %v10972_v13 }
 0x169   : > { %v17088_v32 = vadd.f32 %v1728_v27, %v16863_v56  ;;  %5009 = vmatpush.bf16.msra.mxu3 %v12572_v3  ;;  %v12443_v27 = vld [vmem:[%s16757_s15 + $0xe00] sm:$0xf] }
 0x16a   : > { %4984 = vmatpush.bf16.msra.mxu1 %v11484_v17  ;;  %v15032_v62 = vld [vmem:[%s16757_s15 + $0x4bc] sm:$0xf0] }
 0x16b   : > { %v1788_v4 = vadd.f32 %v1787_v38, %v17088_v32  ;;  %v15160_v3 = vld [vmem:[%s16757_s15 + $0x8bc] sm:$0xf0] }
 0x16c   : > { %v1716_v12 = vpop.f32.mrf.mxu2  ;;  %v12251_v7 = vld [vmem:[%s16757_s15 + $0xc80] sm:$0xf] }
 0x16d   : > { %v1729_v14 = vpop.f32.mrf.mxu3  ;;  %v11995_v12 = vld [vmem:[%s16757_s15 + $0xa80] sm:$0xf] }
 0x16e   : > { %v15224_v14 = vld [vmem:[%s16757_s15 + $0xabc] sm:$0xf0] }
 0x16f   : > { %v11996_v18 = vor.u32 %v15224_v14, %v11995_v12  ;;  %v15288_v8 = vld [vmem:[%s16757_s15 + $0xcbc] sm:$0xf0]  ;;  %v10716_v12 = vor.u32 %v14904_v61, %v10715_v58  ;;  %v15088_v58 = vld [vmem:[%s16757_s15 + $0x684] sm:$0xf] }
 0x171   : > { %4997 = vmatpush.bf16.msra.mxu2 %v11996_v18 }
 0x17c   : > { %v1740_v23 = vpop.f32.mrf.mxu0 }
 0x17d   : > { %v1741_v24 = vadd.f32 %v1740_v23, %v930_v20  ;;  %v1753_v25 = vpop.f32.mrf.mxu1  ;;  %v14952_v20 = vld [vmem:[%s16757_s15 + $0x23c] sm:$0xf0]  ;;  %v12508_v23 = vor.u32 %v15352_v16, %v12507_v15  ;;  %v12252_v15 = vor.u32 %v15288_v8, %v12251_v7  ;;  %v12509_v7 = vld [vmem:[%s16757_s15 + $0xec0] sm:$0xf0] }
 0x17f   : > { %v1754_v28 = vadd.f32 %v1753_v25, %v1741_v24  ;;  %v15080_v24 = vld [vmem:[%s16757_s15 + $0x63c] sm:$0xf0]  ;;  %5010 = vmatpush.bf16.msra.mxu3 %v12508_v23 }
 0x180   : > { %v11931_v25 = vld [vmem:[%s16757_s15 + $0xa00] sm:$0xf] }
 0x184   : > { %v1766_v30 = vpop.f32.mrf.mxu2  ;;  %v1742_v35 = vpop.f32.mrf.mxu0 }
 0x185   : > { %v1767_v33 = vadd.f32 %v1766_v30, %v1754_v28  ;;  %v1779_v34 = vpop.f32.mrf.mxu3  ;;  %v1755_v36 = vpop.f32.mrf.mxu1  ;;  %v15336_v28 = vld [vmem:[%s16757_s15 + $0xe3c] sm:$0xf0]  ;;  %v10908_v30 = vor.u32 %v14952_v20, %v10907_v19 }
 0x186   : > { %v10843_v35 = vld [vmem:[%s16757_s15 + $0x180] sm:$0xf] }
 0x187   : > { %v1780_v37 = vadd.f32 %v1779_v34, %v1767_v33  ;;  %v11420_v33 = vor.u32 %v15080_v24, %v11419_v21  ;;  %v11932_v34 = vor.u32 %v15208_v26, %v11931_v25  ;;  %v14936_v36 = vld [vmem:[%s16757_s15 + $0x1bc] sm:$0xf0]  ;;  %4972 = vmatpush.bf16.msra.mxu0 %v10908_v30 }
 0x188   : > { %v10651_v20 = vld [vmem:[%s16757_s15] sm:$0xf] }
 0x189   : > { %v17093_v6 = vadd.f32 %v1780_v37, %v16878_v5  ;;  %v1794_v5 = vsub.f32 1.0, %v1793_v43  ;;  %v11355_v37 = vld [vmem:[%s16757_s15 + $0x580] sm:$0xf]  ;;  %4985 = vmatpush.bf16.msra.mxu1 %v11420_v33  ;;  %4998 = vmatpush.bf16.msra.mxu2 %v11932_v34  ;;  %v14992_v34 = vld [vmem:[%s16757_s15 + $0x384] sm:$0xf] }
 0x18a   : > { %v15320_v43 = vld [vmem:[%s16757_s15 + $0xdbc] sm:$0xf0] }
 0x18b   : > { %v1789_v56 = vadd.f32 %v1788_v4, %v17093_v6  ;;  %v1795_v22 = vmul.f32 %v17097_v42, %v1794_v5  ;;  %v12444_v4 = vor.u32 %v15336_v28, %v12443_v27  ;;  %v10844_v5 = vor.u32 %v14936_v36, %v10843_v35  ;;  %v14888_v21 = vld [vmem:[%s16757_s15 + $0x3c] sm:$0xf0]  ;;  %v11101_v36 = vld [vmem:[%s16757_s15 + $0x3c0] sm:$0xf0] }
 0x18c   : > { %v1768_v39 = vpop.f32.mrf.mxu2  ;;  %v12380_v49 = vor.u32 %v15320_v43, %v12379_v41  ;;  %v10652_v23 = vor.u32 %v14888_v21, %v10651_v20  ;;  %v15016_v24 = vld [vmem:[%s16757_s15 + $0x43c] sm:$0xf0]  ;;  %v15376_v41 = vld [vmem:[%s16757_s15 + $0xf84] sm:$0xf] }
 0x18d   : > { %v1781_v40 = vpop.f32.mrf.mxu3  ;;  %1790 = vadd.xlane.f32.xlu0 %v1789_v56  ;;  %v1796_v38 = vadd.f32 %v17097_v42, %v1795_v22  ;;  %v15064_v56 = vld [vmem:[%s16757_s15 + $0x5bc] sm:$0xf0]  ;;  %5011 = vmatpush.bf16.msra.mxu3 %v12444_v4  ;;  %v11104_v4 = vor.u32 %v14992_v34, %v11101_v36  ;;  %v14928_v21 = vld [vmem:[%s16757_s15 + $0x184] sm:$0xf] }
 0x18e   : > { %v11867_v39 = vld [vmem:[%s16757_s15 + $0x980] sm:$0xf]  ;;  %v11356_v44 = vor.u32 %v15064_v56, %v11355_v37  ;;  %4973 = vmatpush.bf16.msra.mxu0 %v10844_v5  ;;  %v15120_v37 = vld [vmem:[%s16757_s15 + $0x784] sm:$0xf] }
 0x18f   : > { %v15192_v40 = vld [vmem:[%s16757_s15 + $0x9bc] sm:$0xf0]  ;;  %v17146_v48 = vsel %vm1797_vm0, %v17097_v42, %v1796_v38  ;;  %v11613_v38 = vld [vmem:[%s16757_s15 + $0x7c0] sm:$0xf0] }
 0x190   : > { %v11868_v45 = vor.u32 %v15192_v40, %v11867_v39  ;;  %4986 = vmatpush.bf16.msra.mxu1 %v11356_v44  ;;  %v11163_v22 = vld [vmem:[%s16757_s15 + $0x400] sm:$0xf]  ;;  %v11616_v56 = vor.u32 %v15120_v37, %v11613_v38  ;;  %v15248_v39 = vld [vmem:[%s16757_s15 + $0xb84] sm:$0xf] }
 0x191   : > { %5012 = vmatpush.bf16.msra.mxu3 %v12380_v49  ;;  %v11675_v25 = vld [vmem:[%s16757_s15 + $0x800] sm:$0xf]  ;;  %v11164_v27 = vor.u32 %v15016_v24, %v11163_v22  ;;  %v12125_v40 = vld [vmem:[%s16757_s15 + $0xbc0] sm:$0xf0] }
 0x192   : > { %4999 = vmatpush.bf16.msra.mxu2 %v11868_v45  ;;  %4974 = vmatpush.bf16.msra.mxu0 %v10780_v57  ;;  %v15144_v26 = vld [vmem:[%s16757_s15 + $0x83c] sm:$0xf0]  ;;  %v12128_v43 = vor.u32 %v15248_v39, %v12125_v40  ;;  %v12637_v5 = vld [vmem:[%s16757_s15 + $0xfc0] sm:$0xf0]  ;;  %v12576_v57 = vor.u32 %v15360_v54, %v12573_v55 }
 0x193   : > { %v11676_v28 = vor.u32 %v15144_v26, %v11675_v25  ;;  %v12187_v30 = vld [vmem:[%s16757_s15 + $0xc00] sm:$0xf]  ;;  %v14976_v44 = vld [vmem:[%s16757_s15 + $0x304] sm:$0xf]  ;;  %v12640_v46 = vor.u32 %v15376_v41, %v12637_v5 }
 0x194   : > { %4987 = vmatpush.bf16.msra.mxu1 %v11292_v11  ;;  %v15272_v33 = vld [vmem:[%s16757_s15 + $0xc3c] sm:$0xf0]  ;;  %v11037_v45 = vld [vmem:[%s16757_s15 + $0x340] sm:$0xf0] }
 0x195   : > { %5013 = vmatpush.bf16.msra.mxu3 %v12316_v10  ;;  %v12188_v35 = vor.u32 %v15272_v33, %v12187_v30  ;;  %v11040_v47 = vor.u32 %v14976_v44, %v11037_v45  ;;  %v15104_v49 = vld [vmem:[%s16757_s15 + $0x704] sm:$0xf] }
 0x196   : > { %5000 = vmatpush.bf16.msra.mxu2 %v11804_v59  ;;  %4975 = vmatpush.bf16.msra.mxu0 %v10716_v12  ;;  %v11552_v52 = vor.u32 %v15104_v49, %v11549_v50  ;;  %v10973_v11 = vld [vmem:[%s16757_s15 + $0x2c0] sm:$0xf0] }
 0x197   : > { %v11485_v59 = vld [vmem:[%s16757_s15 + $0x6c0] sm:$0xf0] }
 0x198   : > { %v15216_v10 = vld [vmem:[%s16757_s15 + $0xa84] sm:$0xf] }
 0x199   : > { %5014 = vmatpush.bf16.msra.mxu3 %v12252_v15  ;;  %v14944_v12 = vld [vmem:[%s16757_s15 + $0x204] sm:$0xf] }
 0x19a   : > { %4976 = vmatpush.bf16.msra.mxu0 %v10652_v23  ;;  %v15200_v15 = vld [vmem:[%s16757_s15 + $0xa04] sm:$0xf] }
 0x19b   : > { %v10845_v22 = vld [vmem:[%s16757_s15 + $0x1c0] sm:$0xf0] }
 0x19c   : > { %v15056_v23 = vld [vmem:[%s16757_s15 + $0x584] sm:$0xf]  ;;  %v10848_v24 = vor.u32 %v14928_v21, %v10845_v22 }
 0x19d   : > { %5015 = vmatpush.bf16.msra.mxu3 %v12188_v35  ;;  %v11357_v25 = vld [vmem:[%s16757_s15 + $0x5c0] sm:$0xf0] }
 0x19e   : > { %5021 = vmatpush.bf16.msrb.mxu0 %v11104_v4  ;;  %v15184_v26 = vld [vmem:[%s16757_s15 + $0x984] sm:$0xf] }
 0x19f   : > { %v15312_v33 = vld [vmem:[%s16757_s15 + $0xd84] sm:$0xf] }
 0x1a0   : > { %v12381_v34 = vld [vmem:[%s16757_s15 + $0xdc0] sm:$0xf0] }
 0x1a1   : > { %5060 = vmatpush.bf16.msrb.mxu3 %v12640_v46  ;;  %v12384_v35 = vor.u32 %v15312_v33, %v12381_v34  ;;  %v14912_v36 = vld [vmem:[%s16757_s15 + $0x104] sm:$0xf] }
 0x1a2   : > { %5022 = vmatpush.bf16.msrb.mxu0 %v11040_v47  ;;  %v10781_v37 = vld [vmem:[%s16757_s15 + $0x140] sm:$0xf0] }
 0x1a3   : > { %v15040_v38 = vld [vmem:[%s16757_s15 + $0x504] sm:$0xf]  ;;  %v10784_v4 = vor.u32 %v14912_v36, %v10781_v37  ;;  %v11107_v37 = vld [vmem:[%s16757_s15 + $0x388] sm:$0xf] }
 0x1a4   : > { %v15168_v39 = vld [vmem:[%s16757_s15 + $0x904] sm:$0xf] }
 0x1a5   : > { %5061 = vmatpush.bf16.msrb.mxu3 %v12576_v57  ;;  %v11805_v40 = vld [vmem:[%s16757_s15 + $0x940] sm:$0xf0] }
 0x1a6   : > { %v15296_v5 = vld [vmem:[%s16757_s15 + $0xd04] sm:$0xf] }
 0x1a7   : > { %v12317_v44 = vld [vmem:[%s16757_s15 + $0xd40] sm:$0xf0] }
 0x1a8   : > { %v12320_v45 = vor.u32 %v15296_v5, %v12317_v44  ;;  %v14896_v46 = vld [vmem:[%s16757_s15 + $0x84] sm:$0xf]  ;;  %v15257_v44 = vld [vmem:[%s16757_s15 + $0xbc4] sm:$0xf0] }
 0x1a9   : > { %v10717_v47 = vld [vmem:[%s16757_s15 + $0xc0] sm:$0xf0] }
 0x1aa   : > { %v15024_v49 = vld [vmem:[%s16757_s15 + $0x484] sm:$0xf]  ;;  %v10720_v50 = vor.u32 %v14896_v46, %v10717_v47  ;;  %v15385_v46 = vld [vmem:[%s16757_s15 + $0xfc4] sm:$0xf0] }
 0x1ab   : > { %v12253_v57 = vld [vmem:[%s16757_s15 + $0xcc0] sm:$0xf0] }
 0x200   : > { %v1791_v9 = vpop.xlane.xlu0 %1790 }
 0x201   : > { %v1799_v42 = vmul.f32 %v17146_v48, %v1791_v9  ;;  %v12064_v9 = vor.u32 %v15232_v51, %v12061_v53  ;;  %v11229_v51 = vld [vmem:[%s16757_s15 + $0x4c0] sm:$0xf0] }
 0x202   : > { %v11741_v53 = vld [vmem:[%s16757_s15 + $0x8c0] sm:$0xf0]  ;;  %v11232_v54 = vor.u32 %v15024_v49, %v11229_v51 }
 0x203   : > { %v17161_v0 = vsub.f32 %v17085_v31, %v1799_v42  ;;  %v17164_v1 = vsub.f32 %v17082_v29, %v1799_v42  ;;  %v17167_v2 = vsub.f32 %v17088_v32, %v1799_v42  ;;  %v17173_v13 = vsub.f32 %v17093_v6, %v1799_v42  ;;  %v14960_v42 = vld [vmem:[%s16757_s15 + $0x284] sm:$0xf] }
 0x204   : > { %v11228_v29 = vor.u32 %v15032_v62, %v11227_v60  ;;  %v11740_v32 = vor.u32 %v15160_v3, %v11739_v63  ;;  %v10976_v61 = vor.u32 %v14960_v42, %v10973_v11  ;;  %v11997_v60 = vld [vmem:[%s16757_s15 + $0xac0] sm:$0xf0]  ;;  %v11488_v62 = vor.u32 %v15088_v58, %v11485_v59 }
 0x205   : > { %v1804_v14 = vmul.f32 %v17161_v0, %v17161_v0  ;;  %v1805_v31 = vmul.f32 %v17164_v1, %v17164_v1  ;;  %v1806_v6 = vmul.f32 %v17167_v2, %v17167_v2  ;;  %v1807_v17 = vmul.f32 %v17173_v13, %v17173_v13  ;;  %v15344_v3 = vld [vmem:[%s16757_s15 + $0xe84] sm:$0xf] }
 0x206   : > { %4988 = vmatpush.bf16.msra.mxu1 %v11228_v29  ;;  %5001 = vmatpush.bf16.msra.mxu2 %v11740_v32  ;;  %v12000_v63 = vor.u32 %v15216_v10, %v11997_v60  ;;  %v12512_v8 = vor.u32 %v15344_v3, %v12509_v7  ;;  %v11421_v32 = vld [vmem:[%s16757_s15 + $0x640] sm:$0xf0] }
 0x207   : > { %v1808_v16 = vadd.f32 %v1805_v31, %v1804_v14  ;;  %v10909_v14 = vld [vmem:[%s16757_s15 + $0x240] sm:$0xf0]  ;;  %5023 = vmatpush.bf16.msrb.mxu0 %v10976_v61 }
 0x208   : > { %v15072_v31 = vld [vmem:[%s16757_s15 + $0x604] sm:$0xf]  ;;  %v10912_v29 = vor.u32 %v14944_v12, %v10909_v14  ;;  %5062 = vmatpush.bf16.msrb.mxu3 %v12512_v8 }
 0x209   : > { %v1809_v18 = vadd.f32 %v1808_v16, %v1806_v6  ;;  %v11933_v6 = vld [vmem:[%s16757_s15 + $0xa40] sm:$0xf0]  ;;  %v11424_v16 = vor.u32 %v15072_v31, %v11421_v32 }
 0x20a   : > { %4989 = vmatpush.bf16.msra.mxu1 %v11164_v27  ;;  %5002 = vmatpush.bf16.msra.mxu2 %v11676_v28  ;;  %v11869_v27 = vld [vmem:[%s16757_s15 + $0x9c0] sm:$0xf0]  ;;  %v11360_v28 = vor.u32 %v15056_v23, %v11357_v25 }
 0x20b   : > { %v1810_v19 = vadd.f32 %v1809_v18, %v1807_v17  ;;  %v11936_v17 = vor.u32 %v15200_v15, %v11933_v6  ;;  %v15328_v18 = vld [vmem:[%s16757_s15 + $0xe04] sm:$0xf]  ;;  %5024 = vmatpush.bf16.msrb.mxu0 %v10912_v29  ;;  %v11872_v30 = vor.u32 %v15184_v26, %v11869_v27 }
 0x20c   : > { %v14880_v11 = vld [vmem:[%s16757_s15 + $0x4] sm:$0xf] }
 0x20d   : > { %1811 = vadd.xlane.f32.xlu0 %v1810_v19  ;;  %v12445_v19 = vld [vmem:[%s16757_s15 + $0xe40] sm:$0xf0] }
 0x20e   : > { %5034 = vmatpush.bf16.msrb.mxu1 %v11616_v56  ;;  %5047 = vmatpush.bf16.msrb.mxu2 %v12128_v43  ;;  %v12448_v20 = vor.u32 %v15328_v18, %v12445_v19  ;;  %v11293_v56 = vld [vmem:[%s16757_s15 + $0x540] sm:$0xf0]  ;;  %v11808_v43 = vor.u32 %v15168_v39, %v11805_v40  ;;  %v1843_v18 = vld [vmem:[%s637_s28] sm:$0xf]  ;;  %v15001_v40 = vld [vmem:[%s16757_s15 + $0x3c4] sm:$0xf0] }
 0x20f   : > { %5025 = vmatpush.bf16.msrb.mxu0 %v10848_v24  ;;  %v11296_v41 = vor.u32 %v15040_v38, %v11293_v56  ;;  %v10653_v58 = vld [vmem:[%s16757_s15 + $0x40] sm:$0xf0]  ;;  %v1845_v25 = vperm.slane %v1843_v18, 0  ;;  %v1846_v26 = vperm.slane %v1843_v18, 1  ;;  %v1847_v27 = vperm.slane %v1843_v18, 2 }
 0x210   : > { %5063 = vmatpush.bf16.msrb.mxu3 %v12448_v20  ;;  %v15008_v61 = vld [vmem:[%s16757_s15 + $0x404] sm:$0xf]  ;;  %v10656_v59 = vor.u32 %v14880_v11, %v10653_v58  ;;  %v11108_v47 = vor.u32 %v15001_v40, %v11107_v37  ;;  %v15113_v11 = vld [vmem:[%s16757_s15 + $0x744] sm:$0xf0] }
 0x211   : > { %v11165_v10 = vld [vmem:[%s16757_s15 + $0x440] sm:$0xf0]  ;;  %v12067_v58 = vld [vmem:[%s16757_s15 + $0xb08] sm:$0xf] }
 0x212   : > { %5035 = vmatpush.bf16.msrb.mxu1 %v11552_v52  ;;  %5048 = vmatpush.bf16.msrb.mxu2 %v12064_v9  ;;  %v15152_v52 = vld [vmem:[%s16757_s15 + $0x884] sm:$0xf]  ;;  %v15065_v37 = vld [vmem:[%s16757_s15 + $0x5c4] sm:$0xf0] }
 0x213   : > { %5026 = vmatpush.bf16.msrb.mxu0 %v10784_v4  ;;  %v11744_v55 = vor.u32 %v15152_v52, %v11741_v53  ;;  %v15280_v9 = vld [vmem:[%s16757_s15 + $0xc84] sm:$0xf] }
 0x214   : > { %5064 = vmatpush.bf16.msrb.mxu3 %v12384_v35  ;;  %v12256_v42 = vor.u32 %v15280_v9, %v12253_v57  ;;  %v15136_v60 = vld [vmem:[%s16757_s15 + $0x804] sm:$0xf] }
 0x215   : > { %v15264_v7 = vld [vmem:[%s16757_s15 + $0xc04] sm:$0xf] }
 0x216   : > { %5036 = vmatpush.bf16.msrb.mxu1 %v11488_v62  ;;  %5049 = vmatpush.bf16.msrb.mxu2 %v12000_v63  ;;  %v11677_v62 = vld [vmem:[%s16757_s15 + $0x840] sm:$0xf0]  ;;  %v11168_v63 = vor.u32 %v15008_v61, %v11165_v10  ;;  %v15241_v61 = vld [vmem:[%s16757_s15 + $0xb44] sm:$0xf0] }
 0x217   : > { %5027 = vmatpush.bf16.msrb.mxu0 %v10720_v50  ;;  %v11680_v3 = vor.u32 %v15136_v60, %v11677_v62  ;;  %v12189_v8 = vld [vmem:[%s16757_s15 + $0xc40] sm:$0xf0]  ;;  %v15369_v10 = vld [vmem:[%s16757_s15 + $0xf44] sm:$0xf0] }
 0x218   : > { %5065 = vmatpush.bf16.msrb.mxu3 %v12320_v45  ;;  %v12192_v12 = vor.u32 %v15264_v7, %v12189_v8  ;;  %v12643_v45 = vld [vmem:[%s16757_s15 + $0xf88] sm:$0xf]  ;;  %v12068_v7 = vor.u32 %v15241_v61, %v12067_v58 }
 0x219   : > { %v12644_v57 = vor.u32 %v15385_v46, %v12643_v45  ;;  %v11299_v46 = vld [vmem:[%s16757_s15 + $0x508] sm:$0xf] }
 0x21a   : > { %5037 = vmatpush.bf16.msrb.mxu1 %v11424_v16  ;;  %5050 = vmatpush.bf16.msrb.mxu2 %v11936_v17  ;;  %v1829_v17 = vld [vmem:[%s627_s3] sm:$0xf]  ;;  %v14905_v58 = vld [vmem:[%s16757_s15 + $0xc4] sm:$0xf0] }
 0x21b   : > { %5028 = vmatpush.bf16.msrb.mxu0 %v10656_v59  ;;  %v1831_v20 = vperm.slane %v1829_v17, 0  ;;  %v1832_v22 = vperm.slane %v1829_v17, 1  ;;  %v1833_v23 = vperm.slane %v1829_v17, 2  ;;  %v1834_v24 = vperm.slane %v1829_v17, 3  ;;  %v12579_v59 = vld [vmem:[%s16757_s15 + $0xf08] sm:$0xf] }
 0x21c   : > { %5066 = vmatpush.bf16.msrb.mxu3 %v12256_v42  ;;  %v11555_v42 = vld [vmem:[%s16757_s15 + $0x708] sm:$0xf]  ;;  %v12580_v8 = vor.u32 %v15369_v10, %v12579_v59 }
 0x21d   : > { %v11556_v62 = vor.u32 %v15113_v11, %v11555_v42  ;;  %v10915_v17 = vld [vmem:[%s16757_s15 + $0x208] sm:$0xf] }
 0x21e   : > { %5038 = vmatpush.bf16.msrb.mxu1 %v11360_v28  ;;  %5051 = vmatpush.bf16.msrb.mxu2 %v11872_v30  ;;  %v1848_v28 = vperm.slane %v1843_v18, 3  ;;  %v14953_v18 = vld [vmem:[%s16757_s15 + $0x244] sm:$0xf0] }
 0x21f   : > { %v10723_v11 = vld [vmem:[%s16757_s15 + $0x88] sm:$0xf] }
 0x220   : > { %5067 = vmatpush.bf16.msrb.mxu3 %v12192_v12  ;;  %v11491_v12 = vld [vmem:[%s16757_s15 + $0x688] sm:$0xf] }
 0x221   : > { %v11235_v10 = vld [vmem:[%s16757_s15 + $0x488] sm:$0xf] }
 0x222   : > { %5039 = vmatpush.bf16.msrb.mxu1 %v11296_v41  ;;  %5052 = vmatpush.bf16.msrb.mxu2 %v11808_v43  ;;  %v11619_v41 = vld [vmem:[%s16757_s15 + $0x788] sm:$0xf] }
 0x223   : > { %v15129_v43 = vld [vmem:[%s16757_s15 + $0x7c4] sm:$0xf0] }
 0x224   : > { %v11620_v49 = vor.u32 %v15129_v43, %v11619_v41  ;;  %v10787_v43 = vld [vmem:[%s16757_s15 + $0x108] sm:$0xf] }
 0x226   : > { %5040 = vmatpush.bf16.msrb.mxu1 %v11232_v54  ;;  %5053 = vmatpush.bf16.msrb.mxu2 %v11744_v55  ;;  %v11043_v54 = vld [vmem:[%s16757_s15 + $0x308] sm:$0xf] }
 0x227   : > { %v14985_v55 = vld [vmem:[%s16757_s15 + $0x344] sm:$0xf0] }
 0x228   : > { %v11044_v60 = vor.u32 %v14985_v55, %v11043_v54  ;;  %v15177_v54 = vld [vmem:[%s16757_s15 + $0x944] sm:$0xf0] }
 0x229   : > { %v12323_v55 = vld [vmem:[%s16757_s15 + $0xd08] sm:$0xf] }
 0x22a   : > { %5041 = vmatpush.bf16.msrb.mxu1 %v11168_v63  ;;  %5054 = vmatpush.bf16.msrb.mxu2 %v11680_v3  ;;  %v10979_v63 = vld [vmem:[%s16757_s15 + $0x288] sm:$0xf] }
 0x22b   : > { %v14969_v3 = vld [vmem:[%s16757_s15 + $0x2c4] sm:$0xf0] }
 0x280   : > { %v1812_v14 = vpop.xlane.xlu0 %1811 }
 0x281   : > { %v1813_v31 = vmul.f32 %v1812_v14, %v17146_v48  ;;  %v15097_v14 = vld [vmem:[%s16757_s15 + $0x6c4] sm:$0xf0] }
 0x283   : > { %v1814_v29 = vadd.f32 1e-05, %v1813_v31  ;;  %v12003_v31 = vld [vmem:[%s16757_s15 + $0xa88] sm:$0xf] }
 0x285   : > { %16029 = vrsqrt.f32 %v1814_v29  ;;  %vm1821_vm2 = vweird.f32 %v1814_v29 }
 0x28b   : > { %v16030_v32 = vpop.eup %16029 }
 0x28c   : > { %v1816_v15 = vmul.f32 %v16030_v32, %v1814_v29  ;;  %vm1822_vm1 = vweird.f32 %v16030_v32  ;;  %v15225_v29 = vld [vmem:[%s16757_s15 + $0xac4] sm:$0xf0] }
 0x28d   : > { %vm1823_vm3 = vmor %vm1821_vm2, %vm1822_vm1 }
 0x28e   : > { %v1817_v6 = vmul.f32 %v16030_v32, %v1816_v15  ;;  %v15353_v15 = vld [vmem:[%s16757_s15 + $0xec4] sm:$0xf0] }
 0x290   : > { %v1818_v16 = vmul.f32 0.5, %v1817_v6  ;;  %v10980_v6 = vor.u32 %v14969_v3, %v10979_v63  ;;  %v15161_v63 = vld [vmem:[%s16757_s15 + $0x8c4] sm:$0xf0] }
 0x291   : > { %v12259_v3 = vld [vmem:[%s16757_s15 + $0xc88] sm:$0xf] }
 0x292   : > { %v1819_v19 = vsub.f32 1.5, %v1818_v16  ;;  %v11492_v16 = vor.u32 %v15097_v14, %v11491_v12  ;;  %v10724_v12 = vor.u32 %v14905_v58, %v10723_v11  ;;  %v12005_v11 = vld [vmem:[%s16757_s15 + $0xac8] sm:$0xf0] }
 0x293   : > { %v15345_v58 = vld [vmem:[%s16757_s15 + $0xe8c] sm:$0xf] }
 0x294   : > { %v1820_v21 = vmul.f32 %v16030_v32, %v1819_v19  ;;  %v12004_v19 = vor.u32 %v15225_v29, %v12003_v31  ;;  %v14889_v31 = vld [vmem:[%s16757_s15 + $0x44] sm:$0xf0] }
 0x295   : > { %v11171_v29 = vld [vmem:[%s16757_s15 + $0x408] sm:$0xf] }
 0x296   : > { %v1824_v30 = vsel %vm1823_vm3, %v16030_v32, %v1820_v21  ;;  %v12515_v32 = vld [vmem:[%s16757_s15 + $0xe88] sm:$0xf] }
 0x297   : > { %v1825_v33 = vmul.f32 %v1824_v30, %v17161_v0  ;;  %v1826_v34 = vmul.f32 %v1824_v30, %v17164_v1  ;;  %v1827_v35 = vmul.f32 %v1824_v30, %v17167_v2  ;;  %v1828_v36 = vmul.f32 %v1824_v30, %v17173_v13  ;;  %v12131_v0 = vld [vmem:[%s16757_s15 + $0xb88] sm:$0xf] }
 0x298   : > { %v12132_v9 = vor.u32 %v15257_v44, %v12131_v0  ;;  %v11427_v21 = vld [vmem:[%s16757_s15 + $0x608] sm:$0xf] }
 0x299   : > { %v1839_v38 = vmul.f32 %v1831_v20, %v1825_v33  ;;  %v1840_v4 = vmul.f32 %v1832_v22, %v1826_v34  ;;  %v1841_v56 = vmul.f32 %v1833_v23, %v1827_v35  ;;  %v1842_v39 = vmul.f32 %v1834_v24, %v1828_v36  ;;  %v15081_v22 = vld [vmem:[%s16757_s15 + $0x644] sm:$0xf0] }
 0x29a   : > { %v12516_v20 = vor.u32 %v15353_v15, %v12515_v32  ;;  %v11939_v23 = vld [vmem:[%s16757_s15 + $0xa08] sm:$0xf] }
 0x29b   : > { %v17269_v5 = vadd.f32 %v1845_v25, %v1839_v38  ;;  %v17271_v1 = vadd.f32 %v1846_v26, %v1840_v4  ;;  %v17273_v2 = vadd.f32 %v1847_v27, %v1841_v56  ;;  %v17275_v13 = vadd.f32 %v1848_v28, %v1842_v39  ;;  %v15209_v24 = vld [vmem:[%s16757_s15 + $0xa44] sm:$0xf0] }
 0x29c   : > { %v12451_v25 = vld [vmem:[%s16757_s15 + $0xe08] sm:$0xf]  ;;  %v10916_v27 = vor.u32 %v14953_v18, %v10915_v17  ;;  %v11428_v28 = vor.u32 %v15081_v22, %v11427_v21  ;;  %v11940_v34 = vor.u32 %v15209_v24, %v11939_v23  ;;  %v11109_v21 = vld [vmem:[%s16757_s15 + $0x3c8] sm:$0xf0] }
 0x29d   : > { %v17282_v50 = vpack.c.bf16 %v17269_v5, %v17269_v5  ;;  %v17286_v51 = vpack.c.bf16 %v17271_v1, %v17271_v1  ;;  %v17290_v52 = vpack.c.bf16 %v17273_v2, %v17273_v2  ;;  %v17294_v53 = vpack.c.bf16 %v17275_v13, %v17275_v13  ;;  %v15337_v26 = vld [vmem:[%s16757_s15 + $0xe44] sm:$0xf0]  ;;  %v15121_v22 = vld [vmem:[%s16757_s15 + $0x78c] sm:$0xf] }
 0x29e   : > { %v10851_v30 = vld [vmem:[%s16757_s15 + $0x188] sm:$0xf]  ;;  %v12452_v35 = vor.u32 %v15337_v26, %v12451_v25  ;;  %v11621_v23 = vld [vmem:[%s16757_s15 + $0x7c8] sm:$0xf0] }
 0x29f   : > { %4977 = vmatmul.bf16.vlgmr.msra.gmra.mxu0 %v17282_v50  ;;  %4990 = vmatmul.bf16.vlgmr.msra.gmra.mxu1 %v17286_v51  ;;  %v14937_v33 = vld [vmem:[%s16757_s15 + $0x1c4] sm:$0xf0]  ;;  %v15249_v24 = vld [vmem:[%s16757_s15 + $0xb8c] sm:$0xf] }
 0x2a0   : > { %5003 = vmatmul.bf16.vlgmr.msra.gmra.mxu2 %v17290_v52  ;;  %5016 = vmatmul.bf16.vlgmr.msra.gmra.mxu3 %v17294_v53  ;;  %v11363_v36 = vld [vmem:[%s16757_s15 + $0x588] sm:$0xf]  ;;  %v10852_v40 = vor.u32 %v14937_v33, %v10851_v30  ;;  %v12645_v30 = vld [vmem:[%s16757_s15 + $0xfc8] sm:$0xf0] }
 0x2a1   : > { %5073 = vmatpush.bf16.msra.mxu0 %v11108_v47  ;;  %5086 = vmatpush.bf16.msra.mxu1 %v11620_v49  ;;  %v11875_v38 = vld [vmem:[%s16757_s15 + $0x988] sm:$0xf]  ;;  %v11364_v41 = vor.u32 %v15065_v37, %v11363_v36  ;;  %v11624_v36 = vor.u32 %v15121_v22, %v11621_v23  ;;  %v14977_v37 = vld [vmem:[%s16757_s15 + $0x30c] sm:$0xf] }
 0x2a2   : > { %5099 = vmatpush.bf16.msra.mxu2 %v12132_v9  ;;  %5112 = vmatpush.bf16.msra.mxu3 %v12644_v57  ;;  %v15193_v4 = vld [vmem:[%s16757_s15 + $0x9c4] sm:$0xf0]  ;;  %v11877_v22 = vld [vmem:[%s16757_s15 + $0x9c8] sm:$0xf0] }
 0x2a3   : > { %v12387_v56 = vld [vmem:[%s16757_s15 + $0xd88] sm:$0xf]  ;;  %v11876_v44 = vor.u32 %v15193_v4, %v11875_v38  ;;  %v11045_v38 = vld [vmem:[%s16757_s15 + $0x348] sm:$0xf0] }
 0x2a4   : > { %v15321_v39 = vld [vmem:[%s16757_s15 + $0xdc4] sm:$0xf0]  ;;  %v15313_v23 = vld [vmem:[%s16757_s15 + $0xd8c] sm:$0xf] }
 0x2a5   : > { %5074 = vmatpush.bf16.msra.mxu0 %v11044_v60  ;;  %5087 = vmatpush.bf16.msra.mxu1 %v11556_v62  ;;  %v14921_v0 = vld [vmem:[%s16757_s15 + $0x144] sm:$0xf0]  ;;  %v12388_v45 = vor.u32 %v15321_v39, %v12387_v56  ;;  %v15105_v39 = vld [vmem:[%s16757_s15 + $0x70c] sm:$0xf] }
 0x2a6   : > { %5100 = vmatpush.bf16.msra.mxu2 %v12068_v7  ;;  %5113 = vmatpush.bf16.msra.mxu3 %v12580_v8  ;;  %v15049_v47 = vld [vmem:[%s16757_s15 + $0x544] sm:$0xf0]  ;;  %v10788_v57 = vor.u32 %v14921_v0, %v10787_v43  ;;  %v12069_v43 = vld [vmem:[%s16757_s15 + $0xb48] sm:$0xf0] }
 0x2a7   : > { %v11811_v49 = vld [vmem:[%s16757_s15 + $0x908] sm:$0xf]  ;;  %v11300_v42 = vor.u32 %v15049_v47, %v11299_v46  ;;  %v15361_v0 = vld [vmem:[%s16757_s15 + $0xf0c] sm:$0xf] }
 0x2a8   : > { %v15305_v9 = vld [vmem:[%s16757_s15 + $0xd44] sm:$0xf0]  ;;  %v11812_v61 = vor.u32 %v15177_v54, %v11811_v49  ;;  %v14961_v47 = vld [vmem:[%s16757_s15 + $0x28c] sm:$0xf] }
 0x2a9   : > { %5075 = vmatpush.bf16.msra.mxu0 %v10980_v6  ;;  %5088 = vmatpush.bf16.msra.mxu1 %v11492_v16  ;;  %v12324_v59 = vor.u32 %v15305_v9, %v12323_v55  ;;  %v15033_v60 = vld [vmem:[%s16757_s15 + $0x4c4] sm:$0xf0]  ;;  %v10981_v49 = vld [vmem:[%s16757_s15 + $0x2c8] sm:$0xf0] }
 0x2aa   : > { %5101 = vmatpush.bf16.msra.mxu2 %v12004_v19  ;;  %5114 = vmatpush.bf16.msra.mxu3 %v12516_v20  ;;  %v11747_v62 = vld [vmem:[%s16757_s15 + $0x888] sm:$0xf]  ;;  %v11236_v14 = vor.u32 %v15033_v60, %v11235_v10  ;;  %v14993_v20 = vld [vmem:[%s16757_s15 + $0x38c] sm:$0xf] }
 0x2ab   : > { %v15289_v7 = vld [vmem:[%s16757_s15 + $0xcc4] sm:$0xf0]  ;;  %v11748_v15 = vor.u32 %v15161_v63, %v11747_v62  ;;  %v15089_v9 = vld [vmem:[%s16757_s15 + $0x68c] sm:$0xf] }
 0x2ac   : > { %v10659_v8 = vld [vmem:[%s16757_s15 + $0x8] sm:$0xf]  ;;  %v12260_v6 = vor.u32 %v15289_v7, %v12259_v3  ;;  %v14945_v60 = vld [vmem:[%s16757_s15 + $0x20c] sm:$0xf] }
 0x2ad   : > { %5076 = vmatpush.bf16.msra.mxu0 %v10916_v27  ;;  %5089 = vmatpush.bf16.msra.mxu1 %v11428_v28  ;;  %v15017_v32 = vld [vmem:[%s16757_s15 + $0x444] sm:$0xf0]  ;;  %v10660_v25 = vor.u32 %v14889_v31, %v10659_v8  ;;  %v12133_v27 = vld [vmem:[%s16757_s15 + $0xbc8] sm:$0xf0] }
 0x2ae   : > { %5102 = vmatpush.bf16.msra.mxu2 %v11940_v34  ;;  %5115 = vmatpush.bf16.msra.mxu3 %v12452_v35  ;;  %v11683_v16 = vld [vmem:[%s16757_s15 + $0x808] sm:$0xf]  ;;  %v11172_v26 = vor.u32 %v15017_v32, %v11171_v29  ;;  %v15377_v28 = vld [vmem:[%s16757_s15 + $0xf8c] sm:$0xf]  ;;  %v11112_v35 = vor.u32 %v14993_v20, %v11109_v21  ;;  %v12136_v4 = vor.u32 %v15249_v24, %v12133_v27 }
 0x2af   : > { %5029 = vmatmul.bf16.vlgmr.msrb.gmra.mxu0 %v17282_v50  ;;  %5042 = vmatmul.bf16.vlgmr.msrb.gmra.mxu1 %v17286_v51  ;;  %v15145_v17 = vld [vmem:[%s16757_s15 + $0x844] sm:$0xf0]  ;;  %v12648_v56 = vor.u32 %v15377_v28, %v12645_v30  ;;  %v10917_v62 = vld [vmem:[%s16757_s15 + $0x248] sm:$0xf0] }
 0x2b0   : > { %5055 = vmatmul.bf16.vlgmr.msrb.gmra.mxu2 %v17290_v52  ;;  %5068 = vmatmul.bf16.vlgmr.msrb.gmra.mxu3 %v17294_v53  ;;  %v12195_v18 = vld [vmem:[%s16757_s15 + $0xc08] sm:$0xf]  ;;  %v11684_v33 = vor.u32 %v15145_v17, %v11683_v16  ;;  %v15073_v7 = vld [vmem:[%s16757_s15 + $0x60c] sm:$0xf]  ;;  %v10920_v32 = vor.u32 %v14945_v60, %v10917_v62 }
 0x2b1   : > { %5077 = vmatpush.bf16.msra.mxu0 %v10852_v40  ;;  %5090 = vmatpush.bf16.msra.mxu1 %v11364_v41  ;;  %v15273_v19 = vld [vmem:[%s16757_s15 + $0xc44] sm:$0xf0]  ;;  %v11557_v40 = vld [vmem:[%s16757_s15 + $0x748] sm:$0xf0] }
 0x2b2   : > { %5103 = vmatpush.bf16.msra.mxu2 %v11876_v44  ;;  %5116 = vmatpush.bf16.msra.mxu3 %v12388_v45  ;;  %v12196_v34 = vor.u32 %v15273_v19, %v12195_v18  ;;  %v15233_v41 = vld [vmem:[%s16757_s15 + $0xb0c] sm:$0xf]  ;;  %v11048_v45 = vor.u32 %v14977_v37, %v11045_v38  ;;  %v11560_v46 = vor.u32 %v15105_v39, %v11557_v40 }
 0x2b3   : > { %v12581_v44 = vld [vmem:[%s16757_s15 + $0xf48] sm:$0xf0]  ;;  %v12072_v54 = vor.u32 %v15233_v41, %v12069_v43 }
 0x2b4   : > { %v12584_v55 = vor.u32 %v15361_v0, %v12581_v44  ;;  %v11429_v8 = vld [vmem:[%s16757_s15 + $0x648] sm:$0xf0] }
 0x2b5   : > { %5078 = vmatpush.bf16.msra.mxu0 %v10788_v57  ;;  %5091 = vmatpush.bf16.msra.mxu1 %v11300_v42  ;;  %v11493_v57 = vld [vmem:[%s16757_s15 + $0x6c8] sm:$0xf0] }
 0x2b6   : > { %5104 = vmatpush.bf16.msra.mxu2 %v11812_v61  ;;  %5117 = vmatpush.bf16.msra.mxu3 %v12324_v59  ;;  %v15217_v42 = vld [vmem:[%s16757_s15 + $0xa8c] sm:$0xf]  ;;  %v10984_v59 = vor.u32 %v14961_v47, %v10981_v49  ;;  %v11496_v10 = vor.u32 %v15089_v9, %v11493_v57 }
 0x2b7   : > { %v12517_v61 = vld [vmem:[%s16757_s15 + $0xec8] sm:$0xf0]  ;;  %v12008_v63 = vor.u32 %v15217_v42, %v12005_v11 }
 0x2b8   : > { %v12520_v3 = vor.u32 %v15345_v58, %v12517_v61  ;;  %v15329_v31 = vld [vmem:[%s16757_s15 + $0xe0c] sm:$0xf] }
 0x2b9   : > { %5079 = vmatpush.bf16.msra.mxu0 %v10724_v12  ;;  %5092 = vmatpush.bf16.msra.mxu1 %v11236_v14  ;;  %v15201_v12 = vld [vmem:[%s16757_s15 + $0xa0c] sm:$0xf] }
 0x2ba   : > { %5105 = vmatpush.bf16.msra.mxu2 %v11748_v15  ;;  %5118 = vmatpush.bf16.msra.mxu3 %v12260_v6  ;;  %v11941_v14 = vld [vmem:[%s16757_s15 + $0xa48] sm:$0xf0]  ;;  %v11432_v15 = vor.u32 %v15073_v7, %v11429_v8  ;;  %v15002_v7 = vld [vmem:[%s16757_s15 + $0x3cc] sm:$0xf0] }
 0x2bb   : > { %v12453_v29 = vld [vmem:[%s16757_s15 + $0xe48] sm:$0xf0]  ;;  %v11944_v17 = vor.u32 %v15201_v12, %v11941_v14  ;;  %v11627_v8 = vld [vmem:[%s16757_s15 + $0x790] sm:$0xf] }
 0x2bc   : > { %v14929_v6 = vld [vmem:[%s16757_s15 + $0x18c] sm:$0xf]  ;;  %v12456_v18 = vor.u32 %v15329_v31, %v12453_v29  ;;  %v15130_v12 = vld [vmem:[%s16757_s15 + $0x7cc] sm:$0xf0] }
 0x2bd   : > { %5080 = vmatpush.bf16.msra.mxu0 %v10660_v25  ;;  %5093 = vmatpush.bf16.msra.mxu1 %v11172_v26  ;;  %v10853_v16 = vld [vmem:[%s16757_s15 + $0x1c8] sm:$0xf0]  ;;  %v12139_v14 = vld [vmem:[%s16757_s15 + $0xb90] sm:$0xf] }
 0x2be   : > { %5106 = vmatpush.bf16.msra.mxu2 %v11684_v33  ;;  %5119 = vmatpush.bf16.msra.mxu3 %v12196_v34  ;;  %v15057_v19 = vld [vmem:[%s16757_s15 + $0x58c] sm:$0xf]  ;;  %v10856_v25 = vor.u32 %v14929_v6, %v10853_v16  ;;  %v15386_v6 = vld [vmem:[%s16757_s15 + $0xfcc] sm:$0xf0] }
 0x2bf   : > { %v11365_v20 = vld [vmem:[%s16757_s15 + $0x5c8] sm:$0xf0] }
 0x2c0   : > { %5081 = vmatmul.bf16.vlgmr.msra.gmra.mxu0 %v17282_v50  ;;  %5094 = vmatmul.bf16.vlgmr.msra.gmra.mxu1 %v17286_v51  ;;  %v15185_v21 = vld [vmem:[%s16757_s15 + $0x98c] sm:$0xf]  ;;  %v11368_v26 = vor.u32 %v15057_v19, %v11365_v20  ;;  %v11628_v19 = vor.u32 %v15130_v12, %v11627_v8  ;;  %v11051_v20 = vld [vmem:[%s16757_s15 + $0x310] sm:$0xf] }
 0x2c1   : > { %5125 = vmatpush.bf16.msrb.mxu0 %v11112_v35  ;;  %5138 = vmatpush.bf16.msrb.mxu1 %v11624_v36  ;;  %v12389_v24 = vld [vmem:[%s16757_s15 + $0xdc8] sm:$0xf0]  ;;  %v11880_v30 = vor.u32 %v15185_v21, %v11877_v22  ;;  %v14986_v21 = vld [vmem:[%s16757_s15 + $0x34c] sm:$0xf0] }
 0x2c2   : > { %5151 = vmatpush.bf16.msrb.mxu2 %v12136_v4  ;;  %5164 = vmatpush.bf16.msrb.mxu3 %v12648_v56  ;;  %v14913_v27 = vld [vmem:[%s16757_s15 + $0x10c] sm:$0xf]  ;;  %v12392_v33 = vor.u32 %v15313_v23, %v12389_v24  ;;  %v11563_v24 = vld [vmem:[%s16757_s15 + $0x710] sm:$0xf] }
 0x2c3   : > { %5107 = vmatmul.bf16.vlgmr.msra.gmra.mxu2 %v17290_v52  ;;  %5120 = vmatmul.bf16.vlgmr.msra.gmra.mxu3 %v17294_v53  ;;  %v10789_v28 = vld [vmem:[%s16757_s15 + $0x148] sm:$0xf0]  ;;  %v15194_v8 = vld [vmem:[%s16757_s15 + $0x9cc] sm:$0xf0] }
 0x2c4   : > { %v15041_v34 = vld [vmem:[%s16757_s15 + $0x50c] sm:$0xf]  ;;  %v10792_v56 = vor.u32 %v14913_v27, %v10789_v28  ;;  %v15242_v27 = vld [vmem:[%s16757_s15 + $0xb4c] sm:$0xf0] }
 0x2c5   : > { %5126 = vmatpush.bf16.msrb.mxu0 %v11048_v45  ;;  %5139 = vmatpush.bf16.msrb.mxu1 %v11560_v46  ;;  %v11301_v35 = vld [vmem:[%s16757_s15 + $0x548] sm:$0xf0]  ;;  %v12587_v28 = vld [vmem:[%s16757_s15 + $0xf10] sm:$0xf] }
 0x2c6   : > { %5152 = vmatpush.bf16.msrb.mxu2 %v12072_v54  ;;  %5165 = vmatpush.bf16.msrb.mxu3 %v12584_v55  ;;  %v15169_v36 = vld [vmem:[%s16757_s15 + $0x90c] sm:$0xf]  ;;  %v11304_v39 = vor.u32 %v15041_v34, %v11301_v35  ;;  %v10987_v35 = vld [vmem:[%s16757_s15 + $0x290] sm:$0xf] }
 0x2c7   : > { %v11813_v37 = vld [vmem:[%s16757_s15 + $0x948] sm:$0xf0]  ;;  %v12395_v12 = vld [vmem:[%s16757_s15 + $0xd90] sm:$0xf] }
 0x2c8   : > { %v15297_v38 = vld [vmem:[%s16757_s15 + $0xd0c] sm:$0xf]  ;;  %v11816_v43 = vor.u32 %v15169_v36, %v11813_v37  ;;  %v14970_v36 = vld [vmem:[%s16757_s15 + $0x2cc] sm:$0xf0] }
 0x2c9   : > { %5127 = vmatpush.bf16.msrb.mxu0 %v10984_v59  ;;  %5140 = vmatpush.bf16.msrb.mxu1 %v11496_v10  ;;  %v12325_v4 = vld [vmem:[%s16757_s15 + $0xd48] sm:$0xf0] }
 0x2ca   : > { %5153 = vmatpush.bf16.msrb.mxu2 %v12008_v63  ;;  %5166 = vmatpush.bf16.msrb.mxu3 %v12520_v3  ;;  %v14897_v40 = vld [vmem:[%s16757_s15 + $0x8c] sm:$0xf]  ;;  %v12328_v0 = vor.u32 %v15297_v38, %v12325_v4  ;;  %v11115_v3 = vld [vmem:[%s16757_s15 + $0x390] sm:$0xf] }
 0x2cb   : > { %v10725_v41 = vld [vmem:[%s16757_s15 + $0xc8] sm:$0xf0]  ;;  %v11499_v4 = vld [vmem:[%s16757_s15 + $0x690] sm:$0xf] }
 0x2cc   : > { %v15025_v44 = vld [vmem:[%s16757_s15 + $0x48c] sm:$0xf]  ;;  %v10728_v9 = vor.u32 %v14897_v40, %v10725_v41  ;;  %v15226_v40 = vld [vmem:[%s16757_s15 + $0xacc] sm:$0xf0] }
 0x2cd   : > { %5128 = vmatpush.bf16.msrb.mxu0 %v10920_v32  ;;  %5141 = vmatpush.bf16.msrb.mxu1 %v11432_v15  ;;  %v11237_v45 = vld [vmem:[%s16757_s15 + $0x4c8] sm:$0xf0]  ;;  %v15258_v32 = vld [vmem:[%s16757_s15 + $0xbcc] sm:$0xf0] }
 0x2ce   : > { %5154 = vmatpush.bf16.msrb.mxu2 %v11944_v17  ;;  %5167 = vmatpush.bf16.msrb.mxu3 %v12456_v18  ;;  %v15153_v46 = vld [vmem:[%s16757_s15 + $0x88c] sm:$0xf]  ;;  %v11240_v57 = vor.u32 %v15025_v44, %v11237_v45  ;;  %v12651_v15 = vld [vmem:[%s16757_s15 + $0xf90] sm:$0xf]  ;;  %v11116_v18 = vor.u32 %v15002_v7, %v11115_v3  ;;  %v12140_v22 = vor.u32 %v15258_v32, %v12139_v14 }
 0x2cf   : > { %v11749_v47 = vld [vmem:[%s16757_s15 + $0x8c8] sm:$0xf0]  ;;  %v12652_v23 = vor.u32 %v15386_v6, %v12651_v15  ;;  %v12523_v41 = vld [vmem:[%s16757_s15 + $0xe90] sm:$0xf] }
 0x2d0   : > { %v15281_v49 = vld [vmem:[%s16757_s15 + $0xc8c] sm:$0xf]  ;;  %v11752_v61 = vor.u32 %v15153_v46, %v11749_v47  ;;  %v10923_v45 = vld [vmem:[%s16757_s15 + $0x210] sm:$0xf] }
 0x2d1   : > { %5129 = vmatpush.bf16.msrb.mxu0 %v10856_v25  ;;  %5142 = vmatpush.bf16.msrb.mxu1 %v11368_v26  ;;  %v12261_v54 = vld [vmem:[%s16757_s15 + $0xcc8] sm:$0xf0]  ;;  %v15114_v25 = vld [vmem:[%s16757_s15 + $0x74c] sm:$0xf0] }
 0x2d2   : > { %5155 = vmatpush.bf16.msrb.mxu2 %v11880_v30  ;;  %5168 = vmatpush.bf16.msrb.mxu3 %v12392_v33  ;;  %v14881_v55 = vld [vmem:[%s16757_s15 + $0xc] sm:$0xf]  ;;  %v12264_v59 = vor.u32 %v15281_v49, %v12261_v54  ;;  %v12075_v26 = vld [vmem:[%s16757_s15 + $0xb10] sm:$0xf]  ;;  %v11052_v33 = vor.u32 %v14986_v21, %v11051_v20  ;;  %v11564_v34 = vor.u32 %v15114_v25, %v11563_v24 }
 0x2d3   : > { %v10661_v42 = vld [vmem:[%s16757_s15 + $0x48] sm:$0xf0]  ;;  %v15370_v30 = vld [vmem:[%s16757_s15 + $0xf4c] sm:$0xf0]  ;;  %v12076_v37 = vor.u32 %v15242_v27, %v12075_v26 }
 0x2d4   : > { %v15009_v11 = vld [vmem:[%s16757_s15 + $0x40c] sm:$0xf]  ;;  %v10664_v31 = vor.u32 %v14881_v55, %v10661_v42  ;;  %v12588_v38 = vor.u32 %v15370_v30, %v12587_v28  ;;  %v14954_v46 = vld [vmem:[%s16757_s15 + $0x24c] sm:$0xf0] }
 0x2d5   : > { %5130 = vmatpush.bf16.msrb.mxu0 %v10792_v56  ;;  %5143 = vmatpush.bf16.msrb.mxu1 %v11304_v39  ;;  %v11173_v58 = vld [vmem:[%s16757_s15 + $0x448] sm:$0xf0]  ;;  %v15098_v56 = vld [vmem:[%s16757_s15 + $0x6cc] sm:$0xf0] }
 0x2d6   : > { %5156 = vmatpush.bf16.msrb.mxu2 %v11816_v43  ;;  %5169 = vmatpush.bf16.msrb.mxu3 %v12328_v0  ;;  %v15137_v10 = vld [vmem:[%s16757_s15 + $0x80c] sm:$0xf]  ;;  %v11176_v29 = vor.u32 %v15009_v11, %v11173_v58  ;;  %v12011_v39 = vld [vmem:[%s16757_s15 + $0xa90] sm:$0xf]  ;;  %v10988_v0 = vor.u32 %v14970_v36, %v10987_v35  ;;  %v11500_v44 = vor.u32 %v15098_v56, %v11499_v4 }
 0x2d7   : > { %v11685_v60 = vld [vmem:[%s16757_s15 + $0x848] sm:$0xf0]  ;;  %v15354_v43 = vld [vmem:[%s16757_s15 + $0xecc] sm:$0xf0]  ;;  %v12012_v47 = vor.u32 %v15226_v40, %v12011_v39  ;;  %v10924_v58 = vor.u32 %v14954_v46, %v10923_v45 }
 0x2d8   : > { %v15265_v62 = vld [vmem:[%s16757_s15 + $0xc0c] sm:$0xf]  ;;  %v11688_v16 = vor.u32 %v15137_v10, %v11685_v60  ;;  %v12524_v49 = vor.u32 %v15354_v43, %v12523_v41  ;;  %v11435_v54 = vld [vmem:[%s16757_s15 + $0x610] sm:$0xf] }
 0x2d9   : > { %v12197_v63 = vld [vmem:[%s16757_s15 + $0xc48] sm:$0xf0]  ;;  %5131 = vmatpush.bf16.msrb.mxu0 %v10728_v9  ;;  %5144 = vmatpush.bf16.msrb.mxu1 %v11240_v57  ;;  %v15082_v55 = vld [vmem:[%s16757_s15 + $0x64c] sm:$0xf0] }
 0x2da   : > { %5157 = vmatpush.bf16.msrb.mxu2 %v11752_v61  ;;  %5170 = vmatpush.bf16.msrb.mxu3 %v12264_v59  ;;  %v12200_v17 = vor.u32 %v15265_v62, %v12197_v63  ;;  %v11947_v9 = vld [vmem:[%s16757_s15 + $0xa10] sm:$0xf]  ;;  %v11436_v61 = vor.u32 %v15082_v55, %v11435_v54  ;;  %v11117_v54 = vld [vmem:[%s16757_s15 + $0x3d0] sm:$0xf0] }
 0x2db   : > { %v15210_v57 = vld [vmem:[%s16757_s15 + $0xa4c] sm:$0xf0]  ;;  %v15122_v55 = vld [vmem:[%s16757_s15 + $0x794] sm:$0xf] }
 0x2dc   : > { %v12459_v42 = vld [vmem:[%s16757_s15 + $0xe10] sm:$0xf]  ;;  %v11948_v60 = vor.u32 %v15210_v57, %v11947_v9  ;;  %v11629_v9 = vld [vmem:[%s16757_s15 + $0x7d0] sm:$0xf0] }
 0x2dd   : > { %5132 = vmatpush.bf16.msrb.mxu0 %v10664_v31  ;;  %5145 = vmatpush.bf16.msrb.mxu1 %v11176_v29  ;;  %v15338_v11 = vld [vmem:[%s16757_s15 + $0xe4c] sm:$0xf0]  ;;  %v15250_v57 = vld [vmem:[%s16757_s15 + $0xb94] sm:$0xf] }
 0x2de   : > { %5158 = vmatpush.bf16.msrb.mxu2 %v11688_v16  ;;  %5171 = vmatpush.bf16.msrb.mxu3 %v12200_v17  ;;  %v10859_v59 = vld [vmem:[%s16757_s15 + $0x190] sm:$0xf]  ;;  %v12460_v62 = vor.u32 %v15338_v11, %v12459_v42 }
 0x2df   : > { %v14938_v10 = vld [vmem:[%s16757_s15 + $0x1cc] sm:$0xf0] }
 0x2e0   : > { %5133 = vmatmul.bf16.vlgmr.msrb.gmra.mxu0 %v17282_v50  ;;  %5146 = vmatmul.bf16.vlgmr.msrb.gmra.mxu1 %v17286_v51  ;;  %v11371_v63 = vld [vmem:[%s16757_s15 + $0x590] sm:$0xf]  ;;  %v10860_v31 = vor.u32 %v14938_v10, %v10859_v59  ;;  %v12653_v59 = vld [vmem:[%s16757_s15 + $0xfd0] sm:$0xf0] }
 0x2e1   : > { %5177 = vmatpush.bf16.msra.mxu0 %v11116_v18  ;;  %5190 = vmatpush.bf16.msra.mxu1 %v11628_v19  ;;  %v15066_v3 = vld [vmem:[%s16757_s15 + $0x5cc] sm:$0xf0] }
 0x2e2   : > { %5203 = vmatpush.bf16.msra.mxu2 %v12140_v22  ;;  %5216 = vmatpush.bf16.msra.mxu3 %v12652_v23  ;;  %v11883_v7 = vld [vmem:[%s16757_s15 + $0x990] sm:$0xf]  ;;  %v11372_v29 = vor.u32 %v15066_v3, %v11371_v63  ;;  %v11632_v63 = vor.u32 %v15122_v55, %v11629_v9  ;;  %v14978_v3 = vld [vmem:[%s16757_s15 + $0x314] sm:$0xf] }
 0x2e3   : > { %5159 = vmatmul.bf16.vlgmr.msrb.gmra.mxu2 %v17290_v52  ;;  %5172 = vmatmul.bf16.vlgmr.msrb.gmra.mxu3 %v17294_v53  ;;  %v15322_v14 = vld [vmem:[%s16757_s15 + $0xdcc] sm:$0xf0]  ;;  %v11884_v6 = vor.u32 %v15194_v8, %v11883_v7  ;;  %v11053_v7 = vld [vmem:[%s16757_s15 + $0x350] sm:$0xf0] }
 0x2e4   : > { %v10795_v32 = vld [vmem:[%s16757_s15 + $0x110] sm:$0xf]  ;;  %v12396_v16 = vor.u32 %v15322_v14, %v12395_v12  ;;  %v15106_v14 = vld [vmem:[%s16757_s15 + $0x714] sm:$0xf] }
 0x2e5   : > { %5178 = vmatpush.bf16.msra.mxu0 %v11052_v33  ;;  %5191 = vmatpush.bf16.msra.mxu1 %v11564_v34  ;;  %v14922_v15 = vld [vmem:[%s16757_s15 + $0x14c] sm:$0xf0]  ;;  %v11885_v55 = vld [vmem:[%s16757_s15 + $0x9d0] sm:$0xf0] }
 0x2e6   : > { %5204 = vmatpush.bf16.msra.mxu2 %v12076_v37  ;;  %5217 = vmatpush.bf16.msra.mxu3 %v12588_v38  ;;  %v11307_v17 = vld [vmem:[%s16757_s15 + $0x510] sm:$0xf]  ;;  %v10796_v23 = vor.u32 %v14922_v15, %v10795_v32  ;;  %v12077_v32 = vld [vmem:[%s16757_s15 + $0xb50] sm:$0xf0] }
 0x2e7   : > { %v15050_v18 = vld [vmem:[%s16757_s15 + $0x54c] sm:$0xf0]  ;;  %v15362_v15 = vld [vmem:[%s16757_s15 + $0xf14] sm:$0xf] }
 0x2e8   : > { %v11819_v19 = vld [vmem:[%s16757_s15 + $0x910] sm:$0xf]  ;;  %v11308_v24 = vor.u32 %v15050_v18, %v11307_v17  ;;  %v14962_v18 = vld [vmem:[%s16757_s15 + $0x294] sm:$0xf] }
 0x2e9   : > { %5179 = vmatpush.bf16.msra.mxu0 %v10988_v0  ;;  %5192 = vmatpush.bf16.msra.mxu1 %v11500_v44  ;;  %v15178_v20 = vld [vmem:[%s16757_s15 + $0x94c] sm:$0xf0]  ;;  %v15314_v9 = vld [vmem:[%s16757_s15 + $0xd94] sm:$0xf] }
 0x2ea   : > { %5205 = vmatpush.bf16.msra.mxu2 %v12012_v47  ;;  %5218 = vmatpush.bf16.msra.mxu3 %v12524_v49  ;;  %v12331_v21 = vld [vmem:[%s16757_s15 + $0xd10] sm:$0xf]  ;;  %v11820_v27 = vor.u32 %v15178_v20, %v11819_v19  ;;  %v14994_v49 = vld [vmem:[%s16757_s15 + $0x394] sm:$0xf] }
 0x2eb   : > { %v15306_v22 = vld [vmem:[%s16757_s15 + $0xd4c] sm:$0xf0]  ;;  %v10989_v19 = vld [vmem:[%s16757_s15 + $0x2d0] sm:$0xf0] }
 0x2ec   : > { %v10731_v25 = vld [vmem:[%s16757_s15 + $0x90] sm:$0xf]  ;;  %v12332_v28 = vor.u32 %v15306_v22, %v12331_v21  ;;  %v15090_v22 = vld [vmem:[%s16757_s15 + $0x694] sm:$0xf] }
 0x2ed   : > { %5180 = vmatpush.bf16.msra.mxu0 %v10924_v58  ;;  %5193 = vmatpush.bf16.msra.mxu1 %v11436_v61  ;;  %v14906_v26 = vld [vmem:[%s16757_s15 + $0xcc] sm:$0xf0]  ;;  %v12141_v58 = vld [vmem:[%s16757_s15 + $0xbd0] sm:$0xf0] }
 0x2ee   : > { %5206 = vmatpush.bf16.msra.mxu2 %v11948_v60  ;;  %5219 = vmatpush.bf16.msra.mxu3 %v12460_v62  ;;  %v11243_v30 = vld [vmem:[%s16757_s15 + $0x490] sm:$0xf]  ;;  %v10732_v4 = vor.u32 %v14906_v26, %v10731_v25  ;;  %v15378_v61 = vld [vmem:[%s16757_s15 + $0xf94] sm:$0xf]  ;;  %v11120_v62 = vor.u32 %v14994_v49, %v11117_v54  ;;  %v12144_v8 = vor.u32 %v15250_v57, %v12141_v58 }
 0x2ef   : > { %v15034_v33 = vld [vmem:[%s16757_s15 + $0x4cc] sm:$0xf0]  ;;  %v12656_v12 = vor.u32 %v15378_v61, %v12653_v59  ;;  %v12013_v25 = vld [vmem:[%s16757_s15 + $0xad0] sm:$0xf0] }
 0x2f0   : > { %v11755_v34 = vld [vmem:[%s16757_s15 + $0x890] sm:$0xf]  ;;  %v11244_v56 = vor.u32 %v15034_v33, %v11243_v30  ;;  %v15346_v26 = vld [vmem:[%s16757_s15 + $0xe94] sm:$0xf] }
 0x2f1   : > { %5181 = vmatpush.bf16.msra.mxu0 %v10860_v31  ;;  %5194 = vmatpush.bf16.msra.mxu1 %v11372_v29  ;;  %v15162_v35 = vld [vmem:[%s16757_s15 + $0x8cc] sm:$0xf0]  ;;  %v11565_v31 = vld [vmem:[%s16757_s15 + $0x750] sm:$0xf0] }
 0x2f2   : > { %5207 = vmatpush.bf16.msra.mxu2 %v11884_v6  ;;  %5220 = vmatpush.bf16.msra.mxu3 %v12396_v16  ;;  %v12267_v36 = vld [vmem:[%s16757_s15 + $0xc90] sm:$0xf]  ;;  %v11756_v43 = vor.u32 %v15162_v35, %v11755_v34  ;;  %v15234_v29 = vld [vmem:[%s16757_s15 + $0xb14] sm:$0xf]  ;;  %v11056_v16 = vor.u32 %v14978_v3, %v11053_v7  ;;  %v11568_v17 = vor.u32 %v15106_v14, %v11565_v31 }
 0x2f3   : > { %v15290_v37 = vld [vmem:[%s16757_s15 + $0xccc] sm:$0xf0]  ;;  %v12589_v6 = vld [vmem:[%s16757_s15 + $0xf50] sm:$0xf0]  ;;  %v12080_v20 = vor.u32 %v15234_v29, %v12077_v32 }
 0x2f4   : > { %v10667_v38 = vld [vmem:[%s16757_s15 + $0x10] sm:$0xf]  ;;  %v12268_v0 = vor.u32 %v15290_v37, %v12267_v36  ;;  %v12592_v21 = vor.u32 %v15362_v15, %v12589_v6  ;;  %v14946_v33 = vld [vmem:[%s16757_s15 + $0x214] sm:$0xf] }
 0x2f5   : > { %5182 = vmatpush.bf16.msra.mxu0 %v10796_v23  ;;  %5195 = vmatpush.bf16.msra.mxu1 %v11308_v24  ;;  %v14890_v39 = vld [vmem:[%s16757_s15 + $0x4c] sm:$0xf0]  ;;  %v11501_v23 = vld [vmem:[%s16757_s15 + $0x6d0] sm:$0xf0] }
 0x2f6   : > { %v11179_v40 = vld [vmem:[%s16757_s15 + $0x410] sm:$0xf]  ;;  %5208 = vmatpush.bf16.msra.mxu2 %v11820_v27  ;;  %5221 = vmatpush.bf16.msra.mxu3 %v12332_v28  ;;  %v10668_v42 = vor.u32 %v14890_v39, %v10667_v38  ;;  %v15218_v24 = vld [vmem:[%s16757_s15 + $0xa94] sm:$0xf]  ;;  %v10992_v28 = vor.u32 %v14962_v18, %v10989_v19  ;;  %v11504_v30 = vor.u32 %v15090_v22, %v11501_v23 }
 0x2f7   : > { %v15018_v41 = vld [vmem:[%s16757_s15 + $0x44c] sm:$0xf0]  ;;  %v12525_v27 = vld [vmem:[%s16757_s15 + $0xed0] sm:$0xf0]  ;;  %v12016_v35 = vor.u32 %v15218_v24, %v12013_v25 }
 0x2f8   : > { %v11691_v44 = vld [vmem:[%s16757_s15 + $0x810] sm:$0xf]  ;;  %v11180_v11 = vor.u32 %v15018_v41, %v11179_v40  ;;  %v10925_v34 = vld [vmem:[%s16757_s15 + $0x250] sm:$0xf0]  ;;  %v12528_v36 = vor.u32 %v15346_v26, %v12525_v27 }
 0x2f9   : > { %v15146_v45 = vld [vmem:[%s16757_s15 + $0x84c] sm:$0xf0]  ;;  %5183 = vmatpush.bf16.msra.mxu0 %v10732_v4  ;;  %5196 = vmatpush.bf16.msra.mxu1 %v11244_v56  ;;  %v15074_v37 = vld [vmem:[%s16757_s15 + $0x614] sm:$0xf]  ;;  %v10928_v41 = vor.u32 %v14946_v33, %v10925_v34 }
 0x2fa   : > { %v12203_v46 = vld [vmem:[%s16757_s15 + $0xc10] sm:$0xf]  ;;  %5209 = vmatpush.bf16.msra.mxu2 %v11756_v43  ;;  %5222 = vmatpush.bf16.msra.mxu3 %v12268_v0  ;;  %v11692_v10 = vor.u32 %v15146_v45, %v11691_v44  ;;  %v11437_v38 = vld [vmem:[%s16757_s15 + $0x650] sm:$0xf0] }
 0x2fb   : > { %v15274_v47 = vld [vmem:[%s16757_s15 + $0xc4c] sm:$0xf0]  ;;  %v15202_v4 = vld [vmem:[%s16757_s15 + $0xa14] sm:$0xf]  ;;  %v11440_v43 = vor.u32 %v15074_v37, %v11437_v38  ;;  %v15003_v37 = vld [vmem:[%s16757_s15 + $0x3d4] sm:$0xf0] }
 0x2fc   : > { %v12204_v60 = vor.u32 %v15274_v47, %v12203_v46  ;;  %v11949_v56 = vld [vmem:[%s16757_s15 + $0xa50] sm:$0xf0]  ;;  %v11635_v38 = vld [vmem:[%s16757_s15 + $0x798] sm:$0xf] }
 0x2fd   : > { %5184 = vmatpush.bf16.msra.mxu0 %v10668_v42  ;;  %5197 = vmatpush.bf16.msra.mxu1 %v11180_v11  ;;  %v15330_v39 = vld [vmem:[%s16757_s15 + $0xe14] sm:$0xf]  ;;  %v11952_v45 = vor.u32 %v15202_v4, %v11949_v56  ;;  %v15131_v4 = vld [vmem:[%s16757_s15 + $0x7d4] sm:$0xf0] }
 0x2fe   : > { %5210 = vmatpush.bf16.msra.mxu2 %v11692_v10  ;;  %5223 = vmatpush.bf16.msra.mxu3 %v12204_v60  ;;  %v12461_v40 = vld [vmem:[%s16757_s15 + $0xe50] sm:$0xf0]  ;;  %v12147_v56 = vld [vmem:[%s16757_s15 + $0xb98] sm:$0xf] }
 0x2ff   : > { %v14930_v0 = vld [vmem:[%s16757_s15 + $0x194] sm:$0xf]  ;;  %v12464_v46 = vor.u32 %v15330_v39, %v12461_v40 }
 0x300   : > { %5185 = vmatmul.bf16.vlgmr.msra.gmra.mxu0 %v17282_v50  ;;  %5198 = vmatmul.bf16.vlgmr.msra.gmra.mxu1 %v17286_v51  ;;  %v10861_v44 = vld [vmem:[%s16757_s15 + $0x1d0] sm:$0xf0] }
 0x301   : > { %5229 = vmatpush.bf16.msrb.mxu0 %v11120_v62  ;;  %5242 = vmatpush.bf16.msrb.mxu1 %v11632_v63  ;;  %v15058_v47 = vld [vmem:[%s16757_s15 + $0x594] sm:$0xf]  ;;  %v10864_v42 = vor.u32 %v14930_v0, %v10861_v44  ;;  %v15387_v0 = vld [vmem:[%s16757_s15 + $0xfd4] sm:$0xf0] }
 0x302   : > { %5255 = vmatpush.bf16.msrb.mxu2 %v12144_v8  ;;  %5268 = vmatpush.bf16.msrb.mxu3 %v12656_v12  ;;  %v11373_v49 = vld [vmem:[%s16757_s15 + $0x5d0] sm:$0xf0] }
 0x303   : > { %5211 = vmatmul.bf16.vlgmr.msra.gmra.mxu2 %v17290_v52  ;;  %5224 = vmatmul.bf16.vlgmr.msra.gmra.mxu3 %v17294_v53  ;;  %v15186_v54 = vld [vmem:[%s16757_s15 + $0x994] sm:$0xf]  ;;  %v11376_v11 = vor.u32 %v15058_v47, %v11373_v49  ;;  %v11636_v47 = vor.u32 %v15131_v4, %v11635_v38  ;;  %v11059_v49 = vld [vmem:[%s16757_s15 + $0x318] sm:$0xf] }
 0x304   : > { %v12397_v57 = vld [vmem:[%s16757_s15 + $0xdd0] sm:$0xf0]  ;;  %v11888_v59 = vor.u32 %v15186_v54, %v11885_v55  ;;  %v14987_v54 = vld [vmem:[%s16757_s15 + $0x354] sm:$0xf0] }
 0x305   : > { %5230 = vmatpush.bf16.msrb.mxu0 %v11056_v16  ;;  %5243 = vmatpush.bf16.msrb.mxu1 %v11568_v17  ;;  %v14914_v58 = vld [vmem:[%s16757_s15 + $0x114] sm:$0xf]  ;;  %v12400_v10 = vor.u32 %v15314_v9, %v12397_v57  ;;  %v11571_v55 = vld [vmem:[%s16757_s15 + $0x718] sm:$0xf] }
 0x306   : > { %5256 = vmatpush.bf16.msrb.mxu2 %v12080_v20  ;;  %5269 = vmatpush.bf16.msrb.mxu3 %v12592_v21  ;;  %v10797_v61 = vld [vmem:[%s16757_s15 + $0x150] sm:$0xf0]  ;;  %v14939_v38 = vld [vmem:[%s16757_s15 + $0x1d4] sm:$0xf0] }
 0x307   : > { %v15042_v60 = vld [vmem:[%s16757_s15 + $0x514] sm:$0xf]  ;;  %v10800_v12 = vor.u32 %v14914_v58, %v10797_v61  ;;  %v15243_v61 = vld [vmem:[%s16757_s15 + $0xb54] sm:$0xf0] }
 0x308   : > { %v11309_v62 = vld [vmem:[%s16757_s15 + $0x550] sm:$0xf0] }
 0x309   : > { %5231 = vmatpush.bf16.msrb.mxu0 %v10992_v28  ;;  %5244 = vmatpush.bf16.msrb.mxu1 %v11504_v30  ;;  %v15170_v63 = vld [vmem:[%s16757_s15 + $0x914] sm:$0xf]  ;;  %v11312_v14 = vor.u32 %v15042_v60, %v11309_v62  ;;  %v11060_v60 = vor.u32 %v14987_v54, %v11059_v49 }
 0x30a   : > { %5257 = vmatpush.bf16.msrb.mxu2 %v12016_v35  ;;  %5270 = vmatpush.bf16.msrb.mxu3 %v12528_v36  ;;  %v11821_v3 = vld [vmem:[%s16757_s15 + $0x950] sm:$0xf0]  ;;  %v11123_v36 = vld [vmem:[%s16757_s15 + $0x398] sm:$0xf] }
 0x30b   : > { %v15298_v7 = vld [vmem:[%s16757_s15 + $0xd14] sm:$0xf]  ;;  %v11824_v32 = vor.u32 %v15170_v63, %v11821_v3  ;;  %v10995_v63 = vld [vmem:[%s16757_s15 + $0x298] sm:$0xf] }
 0x30c   : > { %v12333_v8 = vld [vmem:[%s16757_s15 + $0xd50] sm:$0xf0]  ;;  %v14971_v3 = vld [vmem:[%s16757_s15 + $0x2d4] sm:$0xf0] }
 0x30d   : > { %5232 = vmatpush.bf16.msrb.mxu0 %v10928_v41  ;;  %5245 = vmatpush.bf16.msrb.mxu1 %v11440_v43  ;;  %v14898_v31 = vld [vmem:[%s16757_s15 + $0x94] sm:$0xf]  ;;  %v12336_v15 = vor.u32 %v15298_v7, %v12333_v8  ;;  %v15259_v41 = vld [vmem:[%s16757_s15 + $0xbd4] sm:$0xf0] }
 0x30e   : > { %5258 = vmatpush.bf16.msrb.mxu2 %v11952_v45  ;;  %5271 = vmatpush.bf16.msrb.mxu3 %v12464_v46  ;;  %v10733_v29 = vld [vmem:[%s16757_s15 + $0xd0] sm:$0xf0]  ;;  %v12659_v43 = vld [vmem:[%s16757_s15 + $0xf98] sm:$0xf]  ;;  %v11124_v46 = vor.u32 %v15003_v37, %v11123_v36  ;;  %v12148_v9 = vor.u32 %v15259_v41, %v12147_v56 }
 0x30f   : > { %v15026_v6 = vld [vmem:[%s16757_s15 + $0x494] sm:$0xf]  ;;  %v10736_v22 = vor.u32 %v14898_v31, %v10733_v29  ;;  %v12660_v57 = vor.u32 %v15387_v0, %v12659_v43  ;;  %v15099_v31 = vld [vmem:[%s16757_s15 + $0x6d4] sm:$0xf0] }
 0x310   : > { %v11245_v16 = vld [vmem:[%s16757_s15 + $0x4d0] sm:$0xf0]  ;;  %v12019_v29 = vld [vmem:[%s16757_s15 + $0xa98] sm:$0xf] }
 0x311   : > { %5233 = vmatpush.bf16.msrb.mxu0 %v10864_v42  ;;  %5246 = vmatpush.bf16.msrb.mxu1 %v11376_v11  ;;  %v15154_v17 = vld [vmem:[%s16757_s15 + $0x894] sm:$0xf]  ;;  %v11248_v23 = vor.u32 %v15026_v6, %v11245_v16  ;;  %v15115_v42 = vld [vmem:[%s16757_s15 + $0x754] sm:$0xf0] }
 0x312   : > { %5259 = vmatpush.bf16.msrb.mxu2 %v11888_v59  ;;  %5272 = vmatpush.bf16.msrb.mxu3 %v12400_v10  ;;  %v11757_v18 = vld [vmem:[%s16757_s15 + $0x8d0] sm:$0xf0]  ;;  %v12083_v11 = vld [vmem:[%s16757_s15 + $0xb18] sm:$0xf]  ;;  %v11572_v62 = vor.u32 %v15115_v42, %v11571_v55 }
 0x313   : > { %v15282_v19 = vld [vmem:[%s16757_s15 + $0xc94] sm:$0xf]  ;;  %v11760_v27 = vor.u32 %v15154_v17, %v11757_v18  ;;  %v12595_v59 = vld [vmem:[%s16757_s15 + $0xf18] sm:$0xf]  ;;  %v12084_v8 = vor.u32 %v15243_v61, %v12083_v11  ;;  %v10996_v18 = vor.u32 %v14971_v3, %v10995_v63 }
 0x314   : > { %v12269_v20 = vld [vmem:[%s16757_s15 + $0xcd0] sm:$0xf0]  ;;  %v15371_v10 = vld [vmem:[%s16757_s15 + $0xf54] sm:$0xf0] }
 0x315   : > { %v14882_v21 = vld [vmem:[%s16757_s15 + $0x14] sm:$0xf]  ;;  %5234 = vmatpush.bf16.msrb.mxu0 %v10800_v12  ;;  %5247 = vmatpush.bf16.msrb.mxu1 %v11312_v14  ;;  %v12272_v28 = vor.u32 %v15282_v19, %v12269_v20  ;;  %v12596_v12 = vor.u32 %v15371_v10, %v12595_v59  ;;  %v11507_v14 = vld [vmem:[%s16757_s15 + $0x698] sm:$0xf] }
 0x316   : > { %v10669_v24 = vld [vmem:[%s16757_s15 + $0x50] sm:$0xf0]  ;;  %5260 = vmatpush.bf16.msrb.mxu2 %v11824_v32  ;;  %5273 = vmatpush.bf16.msrb.mxu3 %v12336_v15  ;;  %v15227_v32 = vld [vmem:[%s16757_s15 + $0xad4] sm:$0xf0]  ;;  %v11508_v19 = vor.u32 %v15099_v31, %v11507_v14 }
 0x317   : > { %v15010_v25 = vld [vmem:[%s16757_s15 + $0x414] sm:$0xf]  ;;  %v10672_v39 = vor.u32 %v14882_v21, %v10669_v24  ;;  %v12531_v15 = vld [vmem:[%s16757_s15 + $0xe98] sm:$0xf] }
 0x318   : > { %v11181_v26 = vld [vmem:[%s16757_s15 + $0x450] sm:$0xf0]  ;;  %v15355_v6 = vld [vmem:[%s16757_s15 + $0xed4] sm:$0xf0] }
 0x319   : > { %v15138_v30 = vld [vmem:[%s16757_s15 + $0x814] sm:$0xf]  ;;  %5235 = vmatpush.bf16.msrb.mxu0 %v10736_v22  ;;  %5248 = vmatpush.bf16.msrb.mxu1 %v11248_v23  ;;  %v11184_v40 = vor.u32 %v15010_v25, %v11181_v26  ;;  %v10931_v21 = vld [vmem:[%s16757_s15 + $0x218] sm:$0xf]  ;;  %v12020_v23 = vor.u32 %v15227_v32, %v12019_v29  ;;  %v12532_v24 = vor.u32 %v15355_v6, %v12531_v15 }
 0x31a   : > { %v11693_v33 = vld [vmem:[%s16757_s15 + $0x850] sm:$0xf0]  ;;  %5261 = vmatpush.bf16.msrb.mxu2 %v11760_v27  ;;  %5274 = vmatpush.bf16.msrb.mxu3 %v12272_v28  ;;  %v14955_v22 = vld [vmem:[%s16757_s15 + $0x254] sm:$0xf0] }
 0x31b   : > { %v15266_v34 = vld [vmem:[%s16757_s15 + $0xc14] sm:$0xf]  ;;  %v11696_v44 = vor.u32 %v15138_v30, %v11693_v33  ;;  %v11443_v25 = vld [vmem:[%s16757_s15 + $0x618] sm:$0xf] }
 0x31c   : > { %v12205_v35 = vld [vmem:[%s16757_s15 + $0xc50] sm:$0xf0]  ;;  %v4978_v16 = vpop.f32.mrf.mxu0  ;;  %v4991_v17 = vpop.f32.mrf.mxu1  ;;  %v15083_v26 = vld [vmem:[%s16757_s15 + $0x654] sm:$0xf0] }
 0x31d   : > { %v12208_v45 = vor.u32 %v15266_v34, %v12205_v35  ;;  %v17578_v58 = vld [vmem:[%s16763_s17] sm:$0xff]  ;;  %5236 = vmatpush.bf16.msrb.mxu0 %v10672_v39  ;;  %5249 = vmatpush.bf16.msrb.mxu1 %v11184_v40  ;;  %v11955_v27 = vld [vmem:[%s16757_s15 + $0xa18] sm:$0xf]  ;;  %v10932_v35 = vor.u32 %v14955_v22, %v10931_v21  ;;  %v11444_v36 = vor.u32 %v15083_v26, %v11443_v25 }
 0x31e   : > { %5262 = vmatpush.bf16.msrb.mxu2 %v11696_v44  ;;  %v2377_v7 = vperm.slane %v17578_v58, 0  ;;  %v15211_v30 = vld [vmem:[%s16757_s15 + $0xa54] sm:$0xf0]  ;;  %v2378_v29 = vperm.slane %v17578_v58, 1 }
 0x31f   : > { %5275 = vmatpush.bf16.msrb.mxu3 %v12208_v45  ;;  %v12467_v33 = vld [vmem:[%s16757_s15 + $0xe18] sm:$0xf]  ;;  %v11956_v4 = vor.u32 %v15211_v30, %v11955_v27 }
 0x320   : > { %5237 = vmatmul.bf16.vlgmr.msrb.gmra.mxu0 %v17282_v50  ;;  %5250 = vmatmul.bf16.vlgmr.msrb.gmra.mxu1 %v17286_v51  ;;  %v4979_v20 = vadd.f32 %v4978_v16, %v2377_v7  ;;  %v15339_v34 = vld [vmem:[%s16757_s15 + $0xe54] sm:$0xf0] }
 0x321   : > { %5281 = vmatpush.bf16.msra.mxu0 %v11124_v46  ;;  %5294 = vmatpush.bf16.msra.mxu1 %v11636_v47  ;;  %v10867_v37 = vld [vmem:[%s16757_s15 + $0x198] sm:$0xf]  ;;  %v12468_v56 = vor.u32 %v15339_v34, %v12467_v33 }
 0x322   : > { %5307 = vmatpush.bf16.msra.mxu2 %v12148_v9  ;;  %5276 = vmatmul.bf16.vlgmr.msrb.gmra.mxu3 %v17294_v53  ;;  %v4992_v28 = vadd.f32 %v4991_v17, %v4979_v20  ;;  %v11379_v39 = vld [vmem:[%s16757_s15 + $0x598] sm:$0xf]  ;;  %v10868_v55 = vor.u32 %v14939_v38, %v10867_v37 }
 0x323   : > { %5320 = vmatpush.bf16.msra.mxu3 %v12660_v57  ;;  %5263 = vmatmul.bf16.vlgmr.msrb.gmra.mxu2 %v17290_v52  ;;  %v15067_v40 = vld [vmem:[%s16757_s15 + $0x5d4] sm:$0xf0]  ;;  %v5004_v43 = vpop.f32.mrf.mxu2  ;;  %v5017_v0 = vpop.f32.mrf.mxu3 }
 0x324   : > { %v11891_v41 = vld [vmem:[%s16757_s15 + $0x998] sm:$0xf]  ;;  %v5005_v47 = vadd.f32 %v5004_v43, %v4992_v28  ;;  %v4980_v49 = vpop.f32.mrf.mxu0  ;;  %v4993_v54 = vpop.f32.mrf.mxu1  ;;  %v11380_v9 = vor.u32 %v15067_v40, %v11379_v39  ;;  %v14995_v40 = vld [vmem:[%s16757_s15 + $0x39c] sm:$0xf] }
 0x325   : > { %5282 = vmatpush.bf16.msra.mxu0 %v11060_v60  ;;  %5295 = vmatpush.bf16.msra.mxu1 %v11572_v62  ;;  %v15195_v44 = vld [vmem:[%s16757_s15 + $0x9d4] sm:$0xf0]  ;;  %v15123_v43 = vld [vmem:[%s16757_s15 + $0x79c] sm:$0xf] }
 0x326   : > { %5308 = vmatpush.bf16.msra.mxu2 %v12084_v8  ;;  %v12403_v45 = vld [vmem:[%s16757_s15 + $0xd98] sm:$0xf]  ;;  %v17614_v11 = vadd.f32 %v5017_v0, %v5005_v47  ;;  %v11892_v61 = vor.u32 %v15195_v44, %v11891_v41  ;;  %v11125_v41 = vld [vmem:[%s16757_s15 + $0x3d8] sm:$0xf0] }
 0x327   : > { %5321 = vmatpush.bf16.msra.mxu3 %v12596_v12  ;;  %v15323_v46 = vld [vmem:[%s16757_s15 + $0xdd4] sm:$0xf0]  ;;  %v11637_v0 = vld [vmem:[%s16757_s15 + $0x7d8] sm:$0xf0] }
 0x328   : > { %v10803_v57 = vld [vmem:[%s16757_s15 + $0x118] sm:$0xf]  ;;  %v12404_v59 = vor.u32 %v15323_v46, %v12403_v45  ;;  %v15251_v44 = vld [vmem:[%s16757_s15 + $0xb9c] sm:$0xf] }
 0x329   : > { %5283 = vmatpush.bf16.msra.mxu0 %v10996_v18  ;;  %5296 = vmatpush.bf16.msra.mxu1 %v11508_v19  ;;  %v14923_v42 = vld [vmem:[%s16757_s15 + $0x154] sm:$0xf0]  ;;  %v12149_v47 = vld [vmem:[%s16757_s15 + $0xbd8] sm:$0xf0] }
 0x32a   : > { %5309 = vmatpush.bf16.msra.mxu2 %v12020_v23  ;;  %v11315_v10 = vld [vmem:[%s16757_s15 + $0x518] sm:$0xf]  ;;  %v10804_v8 = vor.u32 %v14923_v42, %v10803_v57  ;;  %v15379_v49 = vld [vmem:[%s16757_s15 + $0xf9c] sm:$0xf]  ;;  %v11128_v57 = vor.u32 %v14995_v40, %v11125_v41  ;;  %v11640_v42 = vor.u32 %v15123_v43, %v11637_v0 }
 0x32b   : > { %5322 = vmatpush.bf16.msra.mxu3 %v12532_v24  ;;  %v15051_v60 = vld [vmem:[%s16757_s15 + $0x554] sm:$0xf0]  ;;  %v5006_v18 = vpop.f32.mrf.mxu2  ;;  %v5019_v19 = vpop.f32.mrf.mxu3  ;;  %v12661_v54 = vld [vmem:[%s16757_s15 + $0xfd8] sm:$0xf0] }
 0x32c   : > { %v11827_v62 = vld [vmem:[%s16757_s15 + $0x918] sm:$0xf]  ;;  %v11316_v12 = vor.u32 %v15051_v60, %v11315_v10  ;;  %v5030_v23 = vpop.f32.mrf.mxu0  ;;  %v5043_v24 = vpop.f32.mrf.mxu1  ;;  %v14979_v10 = vld [vmem:[%s16757_s15 + $0x31c] sm:$0xf] }
 0x32d   : > { %5284 = vmatpush.bf16.msra.mxu0 %v10932_v35  ;;  %5297 = vmatpush.bf16.msra.mxu1 %v11444_v36  ;;  %v15179_v63 = vld [vmem:[%s16757_s15 + $0x954] sm:$0xf0]  ;;  %v5031_v28 = vadd.f32 %v5030_v23, %v2378_v29  ;;  %v11061_v60 = vld [vmem:[%s16757_s15 + $0x358] sm:$0xf0] }
 0x32e   : > { %5310 = vmatpush.bf16.msra.mxu2 %v11956_v4  ;;  %v12339_v3 = vld [vmem:[%s16757_s15 + $0xd18] sm:$0xf]  ;;  %v11828_v32 = vor.u32 %v15179_v63, %v11827_v62  ;;  %v12152_v62 = vor.u32 %v15251_v44, %v12149_v47  ;;  %v12664_v63 = vor.u32 %v15379_v49, %v12661_v54  ;;  %v12085_v29 = vld [vmem:[%s16757_s15 + $0xb58] sm:$0xf0] }
 0x32f   : > { %5323 = vmatpush.bf16.msra.mxu3 %v12468_v56  ;;  %v15307_v7 = vld [vmem:[%s16757_s15 + $0xd54] sm:$0xf0]  ;;  %v5044_v56 = vadd.f32 %v5043_v24, %v5031_v28  ;;  %v14963_v18 = vld [vmem:[%s16757_s15 + $0x29c] sm:$0xf] }
 0x330   : > { %v10739_v14 = vld [vmem:[%s16757_s15 + $0x98] sm:$0xf]  ;;  %v12340_v15 = vor.u32 %v15307_v7, %v12339_v3  ;;  %v10997_v19 = vld [vmem:[%s16757_s15 + $0x2d8] sm:$0xf0] }
 0x331   : > { %5285 = vmatpush.bf16.msra.mxu0 %v10868_v55  ;;  %5298 = vmatpush.bf16.msra.mxu1 %v11380_v9  ;;  %v14907_v31 = vld [vmem:[%s16757_s15 + $0xd4] sm:$0xf0]  ;;  %v11509_v23 = vld [vmem:[%s16757_s15 + $0x6d8] sm:$0xf0]  ;;  %v11000_v28 = vor.u32 %v14963_v18, %v10997_v19 }
 0x332   : > { %5311 = vmatpush.bf16.msra.mxu2 %v11892_v61  ;;  %v11251_v6 = vld [vmem:[%s16757_s15 + $0x498] sm:$0xf]  ;;  %v10740_v26 = vor.u32 %v14907_v31, %v10739_v14  ;;  %v11573_v14 = vld [vmem:[%s16757_s15 + $0x758] sm:$0xf0] }
 0x333   : > { %5324 = vmatpush.bf16.msra.mxu3 %v12404_v59  ;;  %v15035_v16 = vld [vmem:[%s16757_s15 + $0x4d4] sm:$0xf0]  ;;  %v5056_v61 = vpop.f32.mrf.mxu2  ;;  %v5069_v59 = vpop.f32.mrf.mxu3  ;;  %v15235_v31 = vld [vmem:[%s16757_s15 + $0xb1c] sm:$0xf] }
 0x334   : > { %v11763_v17 = vld [vmem:[%s16757_s15 + $0x898] sm:$0xf]  ;;  %v11252_v27 = vor.u32 %v15035_v16, %v11251_v6  ;;  %v5057_v3 = vadd.f32 %v5056_v61, %v5044_v56  ;;  %v5032_v7 = vpop.f32.mrf.mxu0  ;;  %v11064_v16 = vor.u32 %v14979_v10, %v11061_v60  ;;  %v15219_v24 = vld [vmem:[%s16757_s15 + $0xa9c] sm:$0xf] }
 0x335   : > { %v15163_v20 = vld [vmem:[%s16757_s15 + $0x8d4] sm:$0xf0]  ;;  %5286 = vmatpush.bf16.msra.mxu0 %v10804_v8  ;;  %5299 = vmatpush.bf16.msra.mxu1 %v11316_v12  ;;  %v5045_v8 = vpop.f32.mrf.mxu1  ;;  %v15107_v12 = vld [vmem:[%s16757_s15 + $0x71c] sm:$0xf] }
 0x336   : > { %v12275_v21 = vld [vmem:[%s16757_s15 + $0xc98] sm:$0xf]  ;;  %5312 = vmatpush.bf16.msra.mxu2 %v11828_v32  ;;  %v11764_v35 = vor.u32 %v15163_v20, %v11763_v17  ;;  %v15363_v32 = vld [vmem:[%s16757_s15 + $0xf1c] sm:$0xf]  ;;  %v17655_v6 = vadd.f32 %v5069_v59, %v5057_v3  ;;  %v11576_v17 = vor.u32 %v15107_v12, %v11573_v14  ;;  %v12088_v20 = vor.u32 %v15235_v31, %v12085_v29 }
 0x337   : > { %v15291_v22 = vld [vmem:[%s16757_s15 + $0xcd4] sm:$0xf0]  ;;  %5325 = vmatpush.bf16.msra.mxu3 %v12340_v15  ;;  %v12597_v15 = vld [vmem:[%s16757_s15 + $0xf58] sm:$0xf0] }
 0x338   : > { %v10675_v25 = vld [vmem:[%s16757_s15 + $0x18] sm:$0xf]  ;;  %v12276_v36 = vor.u32 %v15291_v22, %v12275_v21  ;;  %v12600_v21 = vor.u32 %v15363_v32, %v12597_v15  ;;  %v15091_v22 = vld [vmem:[%s16757_s15 + $0x69c] sm:$0xf] }
 0x339   : > { %v14891_v30 = vld [vmem:[%s16757_s15 + $0x54] sm:$0xf0]  ;;  %5287 = vmatpush.bf16.msra.mxu0 %v10740_v26  ;;  %5300 = vmatpush.bf16.msra.mxu1 %v11252_v27  ;;  %v15347_v26 = vld [vmem:[%s16757_s15 + $0xe9c] sm:$0xf] }
 0x33a   : > { %v11187_v33 = vld [vmem:[%s16757_s15 + $0x418] sm:$0xf]  ;;  %v10676_v45 = vor.u32 %v14891_v30, %v10675_v25  ;;  %5313 = vmatpush.bf16.msra.mxu2 %v11764_v35  ;;  %v12021_v25 = vld [vmem:[%s16757_s15 + $0xad8] sm:$0xf0]  ;;  %v11512_v30 = vor.u32 %v15091_v22, %v11509_v23  ;;  %v2379_v35 = vperm.slane %v17578_v58, 2 }
 0x33b   : > { %v15019_v34 = vld [vmem:[%s16757_s15 + $0x454] sm:$0xf0]  ;;  %5326 = vmatpush.bf16.msra.mxu3 %v12276_v36  ;;  %v12533_v27 = vld [vmem:[%s16757_s15 + $0xed8] sm:$0xf0] }
 0x33c   : > { %v11699_v37 = vld [vmem:[%s16757_s15 + $0x818] sm:$0xf]  ;;  %v11188_v46 = vor.u32 %v15019_v34, %v11187_v33  ;;  %v5058_v33 = vpop.f32.mrf.mxu2  ;;  %v5071_v34 = vpop.f32.mrf.mxu3  ;;  %v14947_v36 = vld [vmem:[%s16757_s15 + $0x21c] sm:$0xf] }
 0x33d   : > { %v15147_v38 = vld [vmem:[%s16757_s15 + $0x854] sm:$0xf0]  ;;  %5288 = vmatpush.bf16.msra.mxu0 %v10676_v45  ;;  %v15075_v56 = vld [vmem:[%s16757_s15 + $0x61c] sm:$0xf]  ;;  %v5082_v44 = vpop.f32.mrf.mxu0  ;;  %v5095_v45 = vpop.f32.mrf.mxu1 }
 0x33e   : > { %v12211_v4 = vld [vmem:[%s16757_s15 + $0xc18] sm:$0xf]  ;;  %v11700_v55 = vor.u32 %v15147_v38, %v11699_v37  ;;  %5301 = vmatpush.bf16.msra.mxu1 %v11188_v46  ;;  %v10933_v37 = vld [vmem:[%s16757_s15 + $0x258] sm:$0xf0]  ;;  %v12024_v38 = vor.u32 %v15219_v24, %v12021_v25  ;;  %v5083_v46 = vadd.f32 %v5082_v44, %v2379_v35 }
 0x33f   : > { %v15275_v39 = vld [vmem:[%s16757_s15 + $0xc54] sm:$0xf0]  ;;  %v15203_v40 = vld [vmem:[%s16757_s15 + $0xa1c] sm:$0xf]  ;;  %v10936_v47 = vor.u32 %v14947_v36, %v10933_v37 }
 0x340   : > { %v12212_v9 = vor.u32 %v15275_v39, %v12211_v4  ;;  %5314 = vmatpush.bf16.msra.mxu2 %v11700_v55  ;;  %5289 = vmatmul.bf16.vlgmr.msra.gmra.mxu0 %v17282_v50  ;;  %v12536_v4 = vor.u32 %v15347_v26, %v12533_v27  ;;  %v11445_v39 = vld [vmem:[%s16757_s15 + $0x658] sm:$0xf0]  ;;  %v5096_v10 = vadd.f32 %v5095_v45, %v5083_v46 }
 0x341   : > { %5333 = vmatpush.bf16.msrb.mxu0 %v11128_v57  ;;  %5302 = vmatmul.bf16.vlgmr.msra.gmra.mxu1 %v17286_v51  ;;  %v11957_v41 = vld [vmem:[%s16757_s15 + $0xa58] sm:$0xf0]  ;;  %v11448_v49 = vor.u32 %v15075_v56, %v11445_v39 }
 0x342   : > { %5327 = vmatpush.bf16.msra.mxu3 %v12212_v9  ;;  %5346 = vmatpush.bf16.msrb.mxu1 %v11640_v42  ;;  %v15331_v43 = vld [vmem:[%s16757_s15 + $0xe1c] sm:$0xf]  ;;  %v11960_v9 = vor.u32 %v15203_v40, %v11957_v41 }
 0x343   : > { %5315 = vmatmul.bf16.vlgmr.msra.gmra.mxu2 %v17290_v52  ;;  %v12469_v0 = vld [vmem:[%s16757_s15 + $0xe58] sm:$0xf0] }
 0x344   : > { %5359 = vmatpush.bf16.msrb.mxu2 %v12152_v62  ;;  %v14931_v54 = vld [vmem:[%s16757_s15 + $0x19c] sm:$0xf]  ;;  %v12472_v57 = vor.u32 %v15331_v43, %v12469_v0 }
 0x345   : > { %5328 = vmatmul.bf16.vlgmr.msra.gmra.mxu3 %v17294_v53  ;;  %5334 = vmatpush.bf16.msrb.mxu0 %v11064_v16  ;;  %v10869_v55 = vld [vmem:[%s16757_s15 + $0x1d8] sm:$0xf0]  ;;  %v5084_v22 = vpop.f32.mrf.mxu0  ;;  %v5097_v23 = vpop.f32.mrf.mxu1 }
 0x346   : > { %5372 = vmatpush.bf16.msrb.mxu3 %v12664_v63  ;;  %5347 = vmatpush.bf16.msrb.mxu1 %v11576_v17  ;;  %v15059_v42 = vld [vmem:[%s16757_s15 + $0x59c] sm:$0xf]  ;;  %v10872_v3 = vor.u32 %v14931_v54, %v10869_v55  ;;  %v5108_v16 = vpop.f32.mrf.mxu2  ;;  %v5121_v17 = vpop.f32.mrf.mxu3  ;;  %v15372_v22 = vld [vmem:[%s16757_s15 + $0xf5c] sm:$0xf0] }
 0x347   : > { %v11381_v61 = vld [vmem:[%s16757_s15 + $0x5d8] sm:$0xf0] }
 0x348   : > { %5360 = vmatpush.bf16.msrb.mxu2 %v12088_v20  ;;  %v15187_v59 = vld [vmem:[%s16757_s15 + $0x99c] sm:$0xf]  ;;  %v11384_v7 = vor.u32 %v15059_v42, %v11381_v61  ;;  %v15004_v42 = vld [vmem:[%s16757_s15 + $0x3dc] sm:$0xf0] }
 0x349   : > { %5335 = vmatpush.bf16.msrb.mxu0 %v11000_v28  ;;  %v11893_v60 = vld [vmem:[%s16757_s15 + $0x9d8] sm:$0xf0]  ;;  %v11643_v61 = vld [vmem:[%s16757_s15 + $0x7a0] sm:$0xf] }
 0x34a   : > { %5373 = vmatpush.bf16.msrb.mxu3 %v12600_v21  ;;  %5348 = vmatpush.bf16.msrb.mxu1 %v11512_v30  ;;  %v15315_v62 = vld [vmem:[%s16757_s15 + $0xd9c] sm:$0xf]  ;;  %v11896_v14 = vor.u32 %v15187_v59, %v11893_v60  ;;  %v5109_v21 = vadd.f32 %v5108_v16, %v5096_v10  ;;  %v15132_v59 = vld [vmem:[%s16757_s15 + $0x7dc] sm:$0xf0] }
 0x34b   : > { %v12405_v63 = vld [vmem:[%s16757_s15 + $0xdd8] sm:$0xf0]  ;;  %v12155_v10 = vld [vmem:[%s16757_s15 + $0xba0] sm:$0xf] }
 0x34c   : > { %5361 = vmatpush.bf16.msrb.mxu2 %v12024_v38  ;;  %v14915_v8 = vld [vmem:[%s16757_s15 + $0x11c] sm:$0xf]  ;;  %v12408_v31 = vor.u32 %v15315_v62, %v12405_v63  ;;  %v17696_v28 = vadd.f32 %v5121_v17, %v5109_v21  ;;  %v15260_v63 = vld [vmem:[%s16757_s15 + $0xbdc] sm:$0xf0] }
 0x34d   : > { %5336 = vmatpush.bf16.msrb.mxu0 %v10936_v47  ;;  %v10805_v12 = vld [vmem:[%s16757_s15 + $0x158] sm:$0xf0]  ;;  %v11579_v17 = vld [vmem:[%s16757_s15 + $0x720] sm:$0xf] }
 0x34e   : > { %5374 = vmatpush.bf16.msrb.mxu3 %v12536_v4  ;;  %5349 = vmatpush.bf16.msrb.mxu1 %v11448_v49  ;;  %v15043_v29 = vld [vmem:[%s16757_s15 + $0x51c] sm:$0xf]  ;;  %v10808_v24 = vor.u32 %v14915_v8, %v10805_v12  ;;  %v5110_v54 = vpop.f32.mrf.mxu2  ;;  %v5123_v55 = vpop.f32.mrf.mxu3  ;;  %v12603_v21 = vld [vmem:[%s16757_s15 + $0xf20] sm:$0xf] }
 0x34f   : > { %v11317_v32 = vld [vmem:[%s16757_s15 + $0x558] sm:$0xf0]  ;;  %v15340_v54 = vld [vmem:[%s16757_s15 + $0xe5c] sm:$0xf0] }
 0x350   : > { %5362 = vmatpush.bf16.msrb.mxu2 %v11960_v9  ;;  %v15171_v15 = vld [vmem:[%s16757_s15 + $0x91c] sm:$0xf]  ;;  %v11320_v25 = vor.u32 %v15043_v29, %v11317_v32  ;;  %v11067_v29 = vld [vmem:[%s16757_s15 + $0x320] sm:$0xf] }
 0x351   : > { %v11829_v18 = vld [vmem:[%s16757_s15 + $0x958] sm:$0xf0]  ;;  %5337 = vmatpush.bf16.msrb.mxu0 %v10872_v3  ;;  %v12667_v3 = vld [vmem:[%s16757_s15 + $0xfa0] sm:$0xf] }
 0x352   : > { %5375 = vmatpush.bf16.msrb.mxu3 %v12472_v57  ;;  %v15299_v19 = vld [vmem:[%s16757_s15 + $0xd1c] sm:$0xf]  ;;  %5350 = vmatpush.bf16.msrb.mxu1 %v11384_v7  ;;  %v11832_v30 = vor.u32 %v15171_v15, %v11829_v18  ;;  %v11131_v57 = vld [vmem:[%s16757_s15 + $0x3a0] sm:$0xf]  ;;  %v12156_v15 = vor.u32 %v15260_v63, %v12155_v10 }
 0x353   : > { %v12341_v20 = vld [vmem:[%s16757_s15 + $0xd58] sm:$0xf0]  ;;  %v15388_v7 = vld [vmem:[%s16757_s15 + $0xfdc] sm:$0xf0] }
 0x354   : > { %v14899_v26 = vld [vmem:[%s16757_s15 + $0x9c] sm:$0xf]  ;;  %5363 = vmatpush.bf16.msrb.mxu2 %v11896_v14  ;;  %v12344_v33 = vor.u32 %v15299_v19, %v12341_v20  ;;  %v11132_v14 = vor.u32 %v15004_v42, %v11131_v57  ;;  %v14988_v32 = vld [vmem:[%s16757_s15 + $0x35c] sm:$0xf0]  ;;  %v12668_v16 = vor.u32 %v15388_v7, %v12667_v3 }
 0x355   : > { %v10741_v27 = vld [vmem:[%s16757_s15 + $0xd8] sm:$0xf0]  ;;  %5338 = vmatpush.bf16.msrb.mxu0 %v10808_v24  ;;  %v15116_v18 = vld [vmem:[%s16757_s15 + $0x75c] sm:$0xf0]  ;;  %v11068_v23 = vor.u32 %v14988_v32, %v11067_v29 }
 0x356   : > { %5376 = vmatpush.bf16.msrb.mxu3 %v12408_v31  ;;  %v15027_v34 = vld [vmem:[%s16757_s15 + $0x49c] sm:$0xf]  ;;  %5351 = vmatpush.bf16.msrb.mxu1 %v11320_v25  ;;  %v10744_v39 = vor.u32 %v14899_v26, %v10741_v27  ;;  %v11644_v31 = vor.u32 %v15132_v59, %v11643_v61  ;;  %v12091_v19 = vld [vmem:[%s16757_s15 + $0xb20] sm:$0xf]  ;;  %v11580_v24 = vor.u32 %v15116_v18, %v11579_v17 }
 0x357   : > { %v11253_v35 = vld [vmem:[%s16757_s15 + $0x4d8] sm:$0xf0]  ;;  %v15244_v20 = vld [vmem:[%s16757_s15 + $0xb5c] sm:$0xf0] }
 0x358   : > { %v15155_v36 = vld [vmem:[%s16757_s15 + $0x89c] sm:$0xf]  ;;  %v11256_v40 = vor.u32 %v15027_v34, %v11253_v35  ;;  %5364 = vmatpush.bf16.msrb.mxu2 %v11832_v30  ;;  %v11003_v25 = vld [vmem:[%s16757_s15 + $0x2a0] sm:$0xf]  ;;  %v12092_v27 = vor.u32 %v15244_v20, %v12091_v19  ;;  %v12604_v30 = vor.u32 %v15372_v22, %v12603_v21 }
 0x359   : > { %v11765_v37 = vld [vmem:[%s16757_s15 + $0x8d8] sm:$0xf0]  ;;  %5339 = vmatpush.bf16.msrb.mxu0 %v10744_v39  ;;  %v14972_v26 = vld [vmem:[%s16757_s15 + $0x2dc] sm:$0xf0]  ;;  %v2380_v39 = vperm.slane %v17578_v58, 3 }
 0x35a   : > { %v15283_v38 = vld [vmem:[%s16757_s15 + $0xc9c] sm:$0xf]  ;;  %5377 = vmatpush.bf16.msrb.mxu3 %v12344_v33  ;;  %v11768_v44 = vor.u32 %v15155_v36, %v11765_v37  ;;  %5352 = vmatpush.bf16.msrb.mxu1 %v11256_v40  ;;  %v11515_v33 = vld [vmem:[%s16757_s15 + $0x6a0] sm:$0xf] }
 0x35b   : > { %v12277_v4 = vld [vmem:[%s16757_s15 + $0xcd8] sm:$0xf0]  ;;  %v15100_v34 = vld [vmem:[%s16757_s15 + $0x6dc] sm:$0xf0] }
 0x35c   : > { %v14883_v56 = vld [vmem:[%s16757_s15 + $0x1c] sm:$0xf]  ;;  %v12280_v45 = vor.u32 %v15283_v38, %v12277_v4  ;;  %5365 = vmatpush.bf16.msrb.mxu2 %v11768_v44  ;;  %v12027_v35 = vld [vmem:[%s16757_s15 + $0xaa0] sm:$0xf]  ;;  %v11004_v4 = vor.u32 %v14972_v26, %v11003_v25 }
 0x35d   : > { %v10677_v41 = vld [vmem:[%s16757_s15 + $0x58] sm:$0xf0]  ;;  %v15228_v36 = vld [vmem:[%s16757_s15 + $0xadc] sm:$0xf0]  ;;  %v5134_v55 = vpop.f32.mrf.mxu0 }
 0x35e   : > { %v15011_v43 = vld [vmem:[%s16757_s15 + $0x41c] sm:$0xf]  ;;  %v10680_v60 = vor.u32 %v14883_v56, %v10677_v41  ;;  %5378 = vmatpush.bf16.msrb.mxu3 %v12280_v45  ;;  %v12539_v37 = vld [vmem:[%s16757_s15 + $0xea0] sm:$0xf]  ;;  %v11516_v56 = vor.u32 %v15100_v34, %v11515_v33  ;;  %v5135_v57 = vadd.f32 %v5134_v55, %v2380_v39 }
 0x35f   : > { %v11189_v0 = vld [vmem:[%s16757_s15 + $0x458] sm:$0xf0]  ;;  %v15356_v38 = vld [vmem:[%s16757_s15 + $0xedc] sm:$0xf0] }
 0x360   : > { %v15139_v46 = vld [vmem:[%s16757_s15 + $0x81c] sm:$0xf]  ;;  %v11192_v62 = vor.u32 %v15011_v43, %v11189_v0  ;;  %5340 = vmatpush.bf16.msrb.mxu0 %v10680_v60  ;;  %v10939_v40 = vld [vmem:[%s16757_s15 + $0x220] sm:$0xf]  ;;  %v12028_v43 = vor.u32 %v15228_v36, %v12027_v35  ;;  %v12540_v0 = vor.u32 %v15356_v38, %v12539_v37 }
 0x361   : > { %v11701_v47 = vld [vmem:[%s16757_s15 + $0x858] sm:$0xf0]  ;;  %v14956_v41 = vld [vmem:[%s16757_s15 + $0x25c] sm:$0xf0] }
 0x362   : > { %v15267_v49 = vld [vmem:[%s16757_s15 + $0xc1c] sm:$0xf]  ;;  %v11704_v8 = vor.u32 %v15139_v46, %v11701_v47  ;;  %5353 = vmatpush.bf16.msrb.mxu1 %v11192_v62  ;;  %v11451_v44 = vld [vmem:[%s16757_s15 + $0x620] sm:$0xf]  ;;  %v10940_v42 = vor.u32 %v14956_v41, %v10939_v40 }
 0x363   : > { %v12213_v9 = vld [vmem:[%s16757_s15 + $0xc58] sm:$0xf0]  ;;  %5341 = vmatmul.bf16.vlgmr.msrb.gmra.mxu0 %v17282_v50  ;;  %v15084_v45 = vld [vmem:[%s16757_s15 + $0x65c] sm:$0xf0] }
 0x364   : > { %v12216_v12 = vor.u32 %v15267_v49, %v12213_v9  ;;  %5366 = vmatpush.bf16.msrb.mxu2 %v11704_v8  ;;  %5385 = vmatpush.bf16.msra.mxu0 %v11132_v14  ;;  %v11963_v46 = vld [vmem:[%s16757_s15 + $0xa20] sm:$0xf]  ;;  %v5147_v9 = vpop.f32.mrf.mxu1  ;;  %v11452_v61 = vor.u32 %v15084_v45, %v11451_v44 }
 0x365   : > { %5354 = vmatmul.bf16.vlgmr.msrb.gmra.mxu1 %v17286_v51  ;;  %v15212_v47 = vld [vmem:[%s16757_s15 + $0xa5c] sm:$0xf0]  ;;  %v5148_v8 = vadd.f32 %v5147_v9, %v5135_v57 }
 0x366   : > { %5379 = vmatpush.bf16.msrb.mxu3 %v12216_v12  ;;  %5398 = vmatpush.bf16.msra.mxu1 %v11644_v31  ;;  %v12475_v49 = vld [vmem:[%s16757_s15 + $0xe20] sm:$0xf]  ;;  %v11964_v60 = vor.u32 %v15212_v47, %v11963_v46  ;;  %v5160_v22 = vpop.f32.mrf.mxu2 }
 0x367   : > { %5367 = vmatmul.bf16.vlgmr.msrb.gmra.mxu2 %v17290_v52  ;;  %v10875_v59 = vld [vmem:[%s16757_s15 + $0x1a0] sm:$0xf]  ;;  %v12476_v62 = vor.u32 %v15340_v54, %v12475_v49 }
 0x368   : > { %5411 = vmatpush.bf16.msra.mxu2 %v12156_v15  ;;  %5386 = vmatpush.bf16.msra.mxu0 %v11068_v23  ;;  %v14940_v10 = vld [vmem:[%s16757_s15 + $0x1dc] sm:$0xf0]  ;;  %v5173_v23 = vpop.f32.mrf.mxu3 }
 0x369   : > { %5380 = vmatmul.bf16.vlgmr.msrb.gmra.mxu3 %v17294_v53  ;;  %v11387_v63 = vld [vmem:[%s16757_s15 + $0x5a0] sm:$0xf]  ;;  %v10876_v29 = vor.u32 %v14940_v10, %v10875_v59 }
 0x36a   : > { %5424 = vmatpush.bf16.msra.mxu3 %v12668_v16  ;;  %5399 = vmatpush.bf16.msra.mxu1 %v11580_v24  ;;  %v15068_v3 = vld [vmem:[%s16757_s15 + $0x5dc] sm:$0xf0] }
 0x36b   : > { %v11899_v7 = vld [vmem:[%s16757_s15 + $0x9a0] sm:$0xf]  ;;  %v11388_v32 = vor.u32 %v15068_v3, %v11387_v63  ;;  %v14996_v63 = vld [vmem:[%s16757_s15 + $0x3a4] sm:$0xf] }
 0x36c   : > { %5412 = vmatpush.bf16.msra.mxu2 %v12092_v27  ;;  %5387 = vmatpush.bf16.msra.mxu0 %v11004_v4  ;;  %v15196_v12 = vld [vmem:[%s16757_s15 + $0x9dc] sm:$0xf0]  ;;  %v5161_v27 = vadd.f32 %v5160_v22, %v5148_v8  ;;  %v5149_v33 = vpop.f32.mrf.mxu1  ;;  %v11133_v3 = vld [vmem:[%s16757_s15 + $0x3e0] sm:$0xf0] }
 0x36d   : > { %v12411_v14 = vld [vmem:[%s16757_s15 + $0xda0] sm:$0xf]  ;;  %v11900_v17 = vor.u32 %v15196_v12, %v11899_v7  ;;  %v15124_v7 = vld [vmem:[%s16757_s15 + $0x7a4] sm:$0xf] }
 0x36e   : > { %5425 = vmatpush.bf16.msra.mxu3 %v12604_v30  ;;  %5400 = vmatpush.bf16.msra.mxu1 %v11516_v56  ;;  %v15324_v31 = vld [vmem:[%s16757_s15 + $0xddc] sm:$0xf0]  ;;  %v5136_v30 = vpop.f32.mrf.mxu0  ;;  %v17767_v38 = vadd.f32 %v5173_v23, %v5161_v27  ;;  %v5162_v10 = vpop.f32.mrf.mxu2  ;;  %v11645_v8 = vld [vmem:[%s16757_s15 + $0x7e0] sm:$0xf0] }
 0x36f   : > { %v10811_v15 = vld [vmem:[%s16757_s15 + $0x120] sm:$0xf]  ;;  %v12412_v18 = vor.u32 %v15324_v31, %v12411_v14  ;;  %v15252_v12 = vld [vmem:[%s16757_s15 + $0xba4] sm:$0xf] }
 0x370   : > { %5413 = vmatpush.bf16.msra.mxu2 %v12028_v43  ;;  %5388 = vmatpush.bf16.msra.mxu0 %v10940_v42  ;;  %v14924_v16 = vld [vmem:[%s16757_s15 + $0x15c] sm:$0xf0]  ;;  %v12093_v27 = vld [vmem:[%s16757_s15 + $0xb60] sm:$0xf0] }
 0x371   : > { %v11323_v19 = vld [vmem:[%s16757_s15 + $0x520] sm:$0xf]  ;;  %v10812_v34 = vor.u32 %v14924_v16, %v10811_v15  ;;  %v12669_v15 = vld [vmem:[%s16757_s15 + $0xfe0] sm:$0xf0] }
 0x372   : > { %5426 = vmatpush.bf16.msra.mxu3 %v12540_v0  ;;  %5401 = vmatpush.bf16.msra.mxu1 %v11452_v61  ;;  %v15052_v20 = vld [vmem:[%s16757_s15 + $0x55c] sm:$0xf0]  ;;  %v15364_v30 = vld [vmem:[%s16757_s15 + $0xf24] sm:$0xf] }
 0x373   : > { %v11835_v21 = vld [vmem:[%s16757_s15 + $0x920] sm:$0xf]  ;;  %v11324_v35 = vor.u32 %v15052_v20, %v11323_v19  ;;  %v11648_v19 = vor.u32 %v15124_v7, %v11645_v8  ;;  %v14980_v20 = vld [vmem:[%s16757_s15 + $0x324] sm:$0xf] }
 0x374   : > { %5414 = vmatpush.bf16.msra.mxu2 %v11964_v60  ;;  %v15180_v24 = vld [vmem:[%s16757_s15 + $0x95c] sm:$0xf0]  ;;  %5389 = vmatpush.bf16.msra.mxu0 %v10876_v29  ;;  %v5175_v60 = vpop.f32.mrf.mxu3  ;;  %v12157_v29 = vld [vmem:[%s16757_s15 + $0xbe0] sm:$0xf0] }
 0x375   : > { %v12347_v25 = vld [vmem:[%s16757_s15 + $0xd20] sm:$0xf]  ;;  %v11836_v4 = vor.u32 %v15180_v24, %v11835_v21  ;;  %v11069_v21 = vld [vmem:[%s16757_s15 + $0x360] sm:$0xf0]  ;;  %v12160_v22 = vor.u32 %v15252_v12, %v12157_v29 }
 0x376   : > { %5427 = vmatpush.bf16.msra.mxu3 %v12476_v62  ;;  %v15308_v26 = vld [vmem:[%s16757_s15 + $0xd5c] sm:$0xf0]  ;;  %5402 = vmatpush.bf16.msra.mxu1 %v11388_v32  ;;  %v15380_v32 = vld [vmem:[%s16757_s15 + $0xfa4] sm:$0xf] }
 0x377   : > { %v10747_v36 = vld [vmem:[%s16757_s15 + $0xa0] sm:$0xf]  ;;  %v12348_v56 = vor.u32 %v15308_v26, %v12347_v25  ;;  %v12672_v23 = vor.u32 %v15380_v32, %v12669_v15  ;;  %v15108_v24 = vld [vmem:[%s16757_s15 + $0x724] sm:$0xf] }
 0x378   : > { %v14908_v37 = vld [vmem:[%s16757_s15 + $0xdc] sm:$0xf0]  ;;  %5415 = vmatpush.bf16.msra.mxu2 %v11900_v17  ;;  %5390 = vmatpush.bf16.msra.mxu0 %v10812_v34  ;;  %v11581_v25 = vld [vmem:[%s16757_s15 + $0x760] sm:$0xf0]  ;;  %v11072_v34 = vor.u32 %v14980_v20, %v11069_v21 }
 0x379   : > { %v11259_v39 = vld [vmem:[%s16757_s15 + $0x4a0] sm:$0xf]  ;;  %v10748_v46 = vor.u32 %v14908_v37, %v10747_v36  ;;  %v15236_v26 = vld [vmem:[%s16757_s15 + $0xb24] sm:$0xf] }
 0x37a   : > { %5428 = vmatpush.bf16.msra.mxu3 %v12412_v18  ;;  %v15036_v40 = vld [vmem:[%s16757_s15 + $0x4dc] sm:$0xf0]  ;;  %5403 = vmatpush.bf16.msra.mxu1 %v11324_v35  ;;  %v11136_v18 = vor.u32 %v14996_v63, %v11133_v3  ;;  %v12605_v33 = vld [vmem:[%s16757_s15 + $0xf60] sm:$0xf0]  ;;  %v11584_v35 = vor.u32 %v15108_v24, %v11581_v25 }
 0x37b   : > { %v11771_v41 = vld [vmem:[%s16757_s15 + $0x8a0] sm:$0xf]  ;;  %v11260_v47 = vor.u32 %v15036_v40, %v11259_v39  ;;  %v14964_v36 = vld [vmem:[%s16757_s15 + $0x2a4] sm:$0xf] }
 0x37c   : > { %v15164_v43 = vld [vmem:[%s16757_s15 + $0x8dc] sm:$0xf0]  ;;  %5416 = vmatpush.bf16.msra.mxu2 %v11836_v4  ;;  %5391 = vmatpush.bf16.msra.mxu0 %v10748_v46  ;;  %v11005_v37 = vld [vmem:[%s16757_s15 + $0x2e0] sm:$0xf0]  ;;  %v12096_v4 = vor.u32 %v15236_v26, %v12093_v27 }
 0x37d   : > { %v12283_v0 = vld [vmem:[%s16757_s15 + $0xca0] sm:$0xf]  ;;  %v11772_v9 = vor.u32 %v15164_v43, %v11771_v41  ;;  %v15092_v39 = vld [vmem:[%s16757_s15 + $0x6a4] sm:$0xf]  ;;  %v5199_v63 = vpop.f32.mrf.mxu1 }
 0x37e   : > { %v15292_v44 = vld [vmem:[%s16757_s15 + $0xcdc] sm:$0xf0]  ;;  %5429 = vmatpush.bf16.msra.mxu3 %v12348_v56  ;;  %5404 = vmatpush.bf16.msra.mxu1 %v11260_v47  ;;  %v12608_v56 = vor.u32 %v15364_v30, %v12605_v33  ;;  %v11517_v40 = vld [vmem:[%s16757_s15 + $0x6e0] sm:$0xf0]  ;;  %v2381_v47 = vperm.slane %v17578_v58, 4 }
 0x37f   : > { %v10683_v45 = vld [vmem:[%s16757_s15 + $0x20] sm:$0xf]  ;;  %v12284_v57 = vor.u32 %v15292_v44, %v12283_v0  ;;  %v15220_v41 = vld [vmem:[%s16757_s15 + $0xaa4] sm:$0xf]  ;;  %v11520_v46 = vor.u32 %v15092_v39, %v11517_v40 }
 0x380   : > { %v14892_v49 = vld [vmem:[%s16757_s15 + $0x5c] sm:$0xf0]  ;;  %5417 = vmatpush.bf16.msra.mxu2 %v11772_v9  ;;  %v12029_v43 = vld [vmem:[%s16757_s15 + $0xae0] sm:$0xf0] }
 0x381   : > { %v11195_v54 = vld [vmem:[%s16757_s15 + $0x420] sm:$0xf]  ;;  %v10684_v14 = vor.u32 %v14892_v49, %v10683_v45  ;;  %v15348_v0 = vld [vmem:[%s16757_s15 + $0xea4] sm:$0xf]  ;;  %v11008_v45 = vor.u32 %v14964_v36, %v11005_v37 }
 0x382   : > { %v15020_v55 = vld [vmem:[%s16757_s15 + $0x45c] sm:$0xf0]  ;;  %5430 = vmatpush.bf16.msra.mxu3 %v12284_v57  ;;  %v12541_v44 = vld [vmem:[%s16757_s15 + $0xee0] sm:$0xf0] }
 0x383   : > { %v11707_v42 = vld [vmem:[%s16757_s15 + $0x820] sm:$0xf]  ;;  %v11196_v31 = vor.u32 %v15020_v55, %v11195_v54  ;;  %5392 = vmatpush.bf16.msra.mxu0 %v10684_v14  ;;  %v14948_v49 = vld [vmem:[%s16757_s15 + $0x224] sm:$0xf]  ;;  %v12032_v55 = vor.u32 %v15220_v41, %v12029_v43  ;;  %v12544_v9 = vor.u32 %v15348_v0, %v12541_v44 }
 0x384   : > { %v15148_v61 = vld [vmem:[%s16757_s15 + $0x85c] sm:$0xf0]  ;;  %v10941_v54 = vld [vmem:[%s16757_s15 + $0x260] sm:$0xf0] }
 0x385   : > { %v12219_v59 = vld [vmem:[%s16757_s15 + $0xc20] sm:$0xf]  ;;  %v11708_v16 = vor.u32 %v15148_v61, %v11707_v42  ;;  %5405 = vmatpush.bf16.msra.mxu1 %v11196_v31  ;;  %v15076_v57 = vld [vmem:[%s16757_s15 + $0x624] sm:$0xf]  ;;  %v10944_v3 = vor.u32 %v14948_v49, %v10941_v54  ;;  %v5201_v39 = vpop.f32.mrf.mxu1 }
 0x386   : > { %v15276_v62 = vld [vmem:[%s16757_s15 + $0xc5c] sm:$0xf0]  ;;  %5393 = vmatmul.bf16.vlgmr.msra.gmra.mxu0 %v17282_v50  ;;  %v11453_v42 = vld [vmem:[%s16757_s15 + $0x660] sm:$0xf0]  ;;  %v5212_v33 = vpop.f32.mrf.mxu2  ;;  %v15373_v39 = vld [vmem:[%s16757_s15 + $0xf64] sm:$0xf0] }
 0x387   : > { %v12220_v17 = vor.u32 %v15276_v62, %v12219_v59  ;;  %5418 = vmatpush.bf16.msra.mxu2 %v11708_v16  ;;  %5437 = vmatpush.bf16.msrb.mxu0 %v11136_v18  ;;  %v15204_v61 = vld [vmem:[%s16757_s15 + $0xa24] sm:$0xf]  ;;  %v5186_v62 = vpop.f32.mrf.mxu0  ;;  %v11456_v7 = vor.u32 %v15076_v57, %v11453_v42 }
 0x388   : > { %5406 = vmatmul.bf16.vlgmr.msra.gmra.mxu1 %v17286_v51  ;;  %v11965_v59 = vld [vmem:[%s16757_s15 + $0xa60] sm:$0xf0]  ;;  %v5187_v58 = vadd.f32 %v5186_v62, %v2381_v47 }
 0x389   : > { %5431 = vmatpush.bf16.msra.mxu3 %v12220_v17  ;;  %5450 = vmatpush.bf16.msrb.mxu1 %v11648_v19  ;;  %v15332_v10 = vld [vmem:[%s16757_s15 + $0xe24] sm:$0xf]  ;;  %v11968_v14 = vor.u32 %v15204_v61, %v11965_v59 }
 0x38a   : > { %5419 = vmatmul.bf16.vlgmr.msra.gmra.mxu2 %v17290_v52  ;;  %v12477_v60 = vld [vmem:[%s16757_s15 + $0xe60] sm:$0xf0]  ;;  %v5200_v16 = vadd.f32 %v5199_v63, %v5187_v58 }
 0x38b   : > { %5463 = vmatpush.bf16.msrb.mxu2 %v12160_v22  ;;  %5438 = vmatpush.bf16.msrb.mxu0 %v11072_v34  ;;  %v14932_v8 = vld [vmem:[%s16757_s15 + $0x1a4] sm:$0xf]  ;;  %v12480_v31 = vor.u32 %v15332_v10, %v12477_v60  ;;  %v5225_v34 = vpop.f32.mrf.mxu3 }
 0x38c   : > { %5432 = vmatmul.bf16.vlgmr.msra.gmra.mxu3 %v17294_v53  ;;  %v10877_v12 = vld [vmem:[%s16757_s15 + $0x1e0] sm:$0xf0] }
 0x38d   : > { %5476 = vmatpush.bf16.msrb.mxu3 %v12672_v23  ;;  %5451 = vmatpush.bf16.msrb.mxu1 %v11584_v35  ;;  %v15060_v29 = vld [vmem:[%s16757_s15 + $0x5a4] sm:$0xf]  ;;  %v10880_v20 = vor.u32 %v14932_v8, %v10877_v12 }
 0x38e   : > { %v11389_v32 = vld [vmem:[%s16757_s15 + $0x5e0] sm:$0xf0]  ;;  %v5214_v12 = vpop.f32.mrf.mxu2 }
 0x38f   : > { %5464 = vmatpush.bf16.msrb.mxu2 %v12096_v4  ;;  %5439 = vmatpush.bf16.msrb.mxu0 %v11008_v45  ;;  %v15188_v15 = vld [vmem:[%s16757_s15 + $0x9a4] sm:$0xf]  ;;  %v11392_v21 = vor.u32 %v15060_v29, %v11389_v32  ;;  %v5213_v4 = vadd.f32 %v5212_v33, %v5200_v16  ;;  %v11139_v29 = vld [vmem:[%s16757_s15 + $0x3a8] sm:$0xf] }
 0x390   : > { %v11901_v17 = vld [vmem:[%s16757_s15 + $0x9e0] sm:$0xf0]  ;;  %v15005_v32 = vld [vmem:[%s16757_s15 + $0x3e4] sm:$0xf0] }
 0x391   : > { %5477 = vmatpush.bf16.msrb.mxu3 %v12608_v56  ;;  %5452 = vmatpush.bf16.msrb.mxu1 %v11520_v46  ;;  %v15316_v18 = vld [vmem:[%s16757_s15 + $0xda4] sm:$0xf]  ;;  %v11904_v24 = vor.u32 %v15188_v15, %v11901_v17  ;;  %v5188_v56 = vpop.f32.mrf.mxu0  ;;  %v17838_v44 = vadd.f32 %v5225_v34, %v5213_v4  ;;  %v11651_v15 = vld [vmem:[%s16757_s15 + $0x7a8] sm:$0xf] }
 0x392   : > { %v12413_v19 = vld [vmem:[%s16757_s15 + $0xde0] sm:$0xf0]  ;;  %v15133_v16 = vld [vmem:[%s16757_s15 + $0x7e4] sm:$0xf0] }
 0x393   : > { %5465 = vmatpush.bf16.msrb.mxu2 %v12032_v55  ;;  %5440 = vmatpush.bf16.msrb.mxu0 %v10944_v3  ;;  %v14916_v22 = vld [vmem:[%s16757_s15 + $0x124] sm:$0xf]  ;;  %v12416_v25 = vor.u32 %v15316_v18, %v12413_v19  ;;  %v12163_v17 = vld [vmem:[%s16757_s15 + $0xba8] sm:$0xf] }
 0x394   : > { %v10813_v23 = vld [vmem:[%s16757_s15 + $0x160] sm:$0xf0]  ;;  %v15245_v4 = vld [vmem:[%s16757_s15 + $0xb64] sm:$0xf0] }
 0x395   : > { %5478 = vmatpush.bf16.msrb.mxu3 %v12544_v9  ;;  %5453 = vmatpush.bf16.msrb.mxu1 %v11456_v7  ;;  %v15044_v26 = vld [vmem:[%s16757_s15 + $0x524] sm:$0xf]  ;;  %v10816_v40 = vor.u32 %v14916_v22, %v10813_v23  ;;  %v15389_v22 = vld [vmem:[%s16757_s15 + $0xfe4] sm:$0xf0] }
 0x396   : > { %v11325_v27 = vld [vmem:[%s16757_s15 + $0x560] sm:$0xf0]  ;;  %v12611_v56 = vld [vmem:[%s16757_s15 + $0xf28] sm:$0xf] }
 0x397   : > { %5466 = vmatpush.bf16.msrb.mxu2 %v11968_v14  ;;  %v15172_v30 = vld [vmem:[%s16757_s15 + $0x924] sm:$0xf]  ;;  %5441 = vmatpush.bf16.msrb.mxu0 %v10880_v20  ;;  %v11328_v41 = vor.u32 %v15044_v26, %v11325_v27  ;;  %v5227_v14 = vpop.f32.mrf.mxu3  ;;  %v15261_v20 = vld [vmem:[%s16757_s15 + $0xbe4] sm:$0xf0]  ;;  %v11652_v26 = vor.u32 %v15133_v16, %v11651_v15 }
 0x398   : > { %v11837_v35 = vld [vmem:[%s16757_s15 + $0x960] sm:$0xf0]  ;;  %v11075_v27 = vld [vmem:[%s16757_s15 + $0x328] sm:$0xf]  ;;  %v12164_v33 = vor.u32 %v15261_v20, %v12163_v17 }
 0x399   : > { %5479 = vmatpush.bf16.msrb.mxu3 %v12480_v31  ;;  %v15300_v36 = vld [vmem:[%s16757_s15 + $0xd24] sm:$0xf]  ;;  %5454 = vmatpush.bf16.msrb.mxu1 %v11392_v21  ;;  %v11840_v45 = vor.u32 %v15172_v30, %v11837_v35  ;;  %v12675_v21 = vld [vmem:[%s16757_s15 + $0xfa8] sm:$0xf] }
 0x39a   : > { %v12349_v37 = vld [vmem:[%s16757_s15 + $0xd60] sm:$0xf0]  ;;  %v14989_v30 = vld [vmem:[%s16757_s15 + $0x364] sm:$0xf0]  ;;  %v12676_v34 = vor.u32 %v15389_v22, %v12675_v21 }
 0x39b   : > { %v14900_v43 = vld [vmem:[%s16757_s15 + $0xa4] sm:$0xf]  ;;  %5467 = vmatpush.bf16.msrb.mxu2 %v11904_v24  ;;  %v12352_v46 = vor.u32 %v15300_v36, %v12349_v37  ;;  %5442 = vmatpush.bf16.msrb.mxu0 %v10816_v40  ;;  %v11587_v35 = vld [vmem:[%s16757_s15 + $0x728] sm:$0xf]  ;;  %v11076_v40 = vor.u32 %v14989_v30, %v11075_v27 }
 0x39c   : > { %v10749_v0 = vld [vmem:[%s16757_s15 + $0xe0] sm:$0xf0]  ;;  %v15117_v36 = vld [vmem:[%s16757_s15 + $0x764] sm:$0xf0] }
 0x39d   : > { %5480 = vmatpush.bf16.msrb.mxu3 %v12416_v25  ;;  %v15028_v47 = vld [vmem:[%s16757_s15 + $0x4a4] sm:$0xf]  ;;  %5455 = vmatpush.bf16.msrb.mxu1 %v11328_v41  ;;  %v10752_v61 = vor.u32 %v14900_v43, %v10749_v0  ;;  %v11140_v25 = vor.u32 %v15005_v32, %v11139_v29  ;;  %v12099_v37 = vld [vmem:[%s16757_s15 + $0xb28] sm:$0xf]  ;;  %v11588_v41 = vor.u32 %v15117_v36, %v11587_v35  ;;  %v5238_v29 = vpop.f32.mrf.mxu0  ;;  %v5251_v32 = vpop.f32.mrf.mxu1 }
 0x39e   : > { %v11261_v49 = vld [vmem:[%s16757_s15 + $0x4e0] sm:$0xf0]  ;;  %v11011_v43 = vld [vmem:[%s16757_s15 + $0x2a8] sm:$0xf] }
 0x39f   : > { %v15156_v54 = vld [vmem:[%s16757_s15 + $0x8a4] sm:$0xf]  ;;  %v11264_v59 = vor.u32 %v15028_v47, %v11261_v49  ;;  %5468 = vmatpush.bf16.msrb.mxu2 %v11840_v45  ;;  %5443 = vmatpush.bf16.msrb.mxu0 %v10752_v61  ;;  %v14973_v0 = vld [vmem:[%s16757_s15 + $0x2e4] sm:$0xf0]  ;;  %v12100_v45 = vor.u32 %v15245_v4, %v12099_v37 }
 0x3a0   : > { %v11773_v55 = vld [vmem:[%s16757_s15 + $0x8e0] sm:$0xf0]  ;;  %v11523_v47 = vld [vmem:[%s16757_s15 + $0x6a8] sm:$0xf] }
 0x3a1   : > { %v15284_v9 = vld [vmem:[%s16757_s15 + $0xca4] sm:$0xf]  ;;  %5481 = vmatpush.bf16.msrb.mxu3 %v12352_v46  ;;  %v11776_v63 = vor.u32 %v15156_v54, %v11773_v55  ;;  %5456 = vmatpush.bf16.msrb.mxu1 %v11264_v59  ;;  %v12612_v46 = vor.u32 %v15373_v39, %v12611_v56  ;;  %v15101_v49 = vld [vmem:[%s16757_s15 + $0x6e4] sm:$0xf0] }
 0x3a2   : > { %v12285_v57 = vld [vmem:[%s16757_s15 + $0xce0] sm:$0xf0]  ;;  %v12035_v54 = vld [vmem:[%s16757_s15 + $0xaa8] sm:$0xf]  ;;  %v11524_v61 = vor.u32 %v15101_v49, %v11523_v47 }
 0x3a3   : > { %v14884_v42 = vld [vmem:[%s16757_s15 + $0x24] sm:$0xf]  ;;  %v12288_v58 = vor.u32 %v15284_v9, %v12285_v57  ;;  %5469 = vmatpush.bf16.msrb.mxu2 %v11776_v63  ;;  %v15229_v55 = vld [vmem:[%s16757_s15 + $0xae4] sm:$0xf0] }
 0x3a4   : > { %v10685_v10 = vld [vmem:[%s16757_s15 + $0x60] sm:$0xf0]  ;;  %v12547_v9 = vld [vmem:[%s16757_s15 + $0xea8] sm:$0xf]  ;;  %v12036_v63 = vor.u32 %v15229_v55, %v12035_v54 }
 0x3a5   : > { %v15012_v60 = vld [vmem:[%s16757_s15 + $0x424] sm:$0xf]  ;;  %v10688_v18 = vor.u32 %v14884_v42, %v10685_v10  ;;  %5482 = vmatpush.bf16.msrb.mxu3 %v12288_v58  ;;  %v15357_v57 = vld [vmem:[%s16757_s15 + $0xee4] sm:$0xf0]  ;;  %v11012_v42 = vor.u32 %v14973_v0, %v11011_v43  ;;  %v5277_v43 = vpop.f32.mrf.mxu3  ;;  %v5240_v49 = vpop.f32.mrf.mxu0 }
 0x3a6   : > { %v11197_v62 = vld [vmem:[%s16757_s15 + $0x460] sm:$0xf0]  ;;  %v12548_v58 = vor.u32 %v15357_v57, %v12547_v9  ;;  %v15213_v12 = vld [vmem:[%s16757_s15 + $0xa64] sm:$0xf0]  ;;  %v5253_v54 = vpop.f32.mrf.mxu1  ;;  %v15237_v49 = vld [vmem:[%s16757_s15 + $0xb2c] sm:$0xf] }
 0x3a7   : > { %v15140_v3 = vld [vmem:[%s16757_s15 + $0x824] sm:$0xf]  ;;  %v11200_v19 = vor.u32 %v15012_v60, %v11197_v62  ;;  %5444 = vmatpush.bf16.msrb.mxu0 %v10688_v18  ;;  %v10947_v60 = vld [vmem:[%s16757_s15 + $0x228] sm:$0xf]  ;;  %v12101_v54 = vld [vmem:[%s16757_s15 + $0xb68] sm:$0xf0] }
 0x3a8   : > { %v11709_v7 = vld [vmem:[%s16757_s15 + $0x860] sm:$0xf0]  ;;  %v14957_v62 = vld [vmem:[%s16757_s15 + $0x264] sm:$0xf0] }
 0x3a9   : > { %v15268_v8 = vld [vmem:[%s16757_s15 + $0xc24] sm:$0xf]  ;;  %v11712_v23 = vor.u32 %v15140_v3, %v11709_v7  ;;  %5457 = vmatpush.bf16.msrb.mxu1 %v11200_v19  ;;  %v11459_v3 = vld [vmem:[%s16757_s15 + $0x628] sm:$0xf]  ;;  %v10948_v16 = vor.u32 %v14957_v62, %v10947_v60 }
 0x3aa   : > { %v12221_v31 = vld [vmem:[%s16757_s15 + $0xc60] sm:$0xf0]  ;;  %5445 = vmatmul.bf16.vlgmr.msrb.gmra.mxu0 %v17282_v50  ;;  %v15085_v7 = vld [vmem:[%s16757_s15 + $0x664] sm:$0xf0] }
 0x3ab   : > { %v12224_v24 = vor.u32 %v15268_v8, %v12221_v31  ;;  %5470 = vmatpush.bf16.msrb.mxu2 %v11712_v23  ;;  %5489 = vmatpush.bf16.msra.mxu0 %v11140_v25  ;;  %v17883_v59 = vld [vmem:[%s16763_s17] sm:$0xff]  ;;  %v11971_v8 = vld [vmem:[%s16757_s15 + $0xa28] sm:$0xf]  ;;  %v11460_v17 = vor.u32 %v15085_v7, %v11459_v3 }
 0x3ac   : > { %5458 = vmatmul.bf16.vlgmr.msrb.gmra.mxu1 %v17286_v51  ;;  %v2382_v10 = vperm.slane %v17883_v59, 5  ;;  %v12483_v14 = vld [vmem:[%s16757_s15 + $0xe28] sm:$0xf]  ;;  %v11972_v20 = vor.u32 %v15213_v12, %v11971_v8 }
 0x3ad   : > { %5483 = vmatpush.bf16.msrb.mxu3 %v12224_v24  ;;  %5502 = vmatpush.bf16.msra.mxu1 %v11652_v26  ;;  %v15341_v31 = vld [vmem:[%s16757_s15 + $0xe64] sm:$0xf0] }
 0x3ae   : > { %5471 = vmatmul.bf16.vlgmr.msrb.gmra.mxu2 %v17290_v52  ;;  %v5239_v15 = vadd.f32 %v5238_v29, %v2382_v10  ;;  %v10883_v18 = vld [vmem:[%s16757_s15 + $0x1a8] sm:$0xf]  ;;  %v12484_v21 = vor.u32 %v15341_v31, %v12483_v14 }
 0x3af   : > { %5515 = vmatpush.bf16.msra.mxu2 %v12164_v33  ;;  %5490 = vmatpush.bf16.msra.mxu0 %v11076_v40  ;;  %v14941_v19 = vld [vmem:[%s16757_s15 + $0x1e4] sm:$0xf0] }
 0x3b0   : > { %5484 = vmatmul.bf16.vlgmr.msrb.gmra.mxu3 %v17294_v53  ;;  %v11395_v22 = vld [vmem:[%s16757_s15 + $0x5a8] sm:$0xf]  ;;  %v5252_v25 = vadd.f32 %v5251_v32, %v5239_v15  ;;  %v10884_v33 = vor.u32 %v14941_v19, %v10883_v18 }
 0x3b1   : > { %5528 = vmatpush.bf16.msra.mxu3 %v12676_v34  ;;  %5503 = vmatpush.bf16.msra.mxu1 %v11588_v41  ;;  %v15069_v23 = vld [vmem:[%s16757_s15 + $0x5e4] sm:$0xf0]  ;;  %v5264_v41 = vpop.f32.mrf.mxu2 }
 0x3b2   : > { %v11907_v24 = vld [vmem:[%s16757_s15 + $0x9a8] sm:$0xf]  ;;  %v11396_v34 = vor.u32 %v15069_v23, %v11395_v22  ;;  %v5265_v47 = vadd.f32 %v5264_v41, %v5252_v25  ;;  %v5279_v22 = vpop.f32.mrf.mxu3  ;;  %v11141_v25 = vld [vmem:[%s16757_s15 + $0x3e8] sm:$0xf0] }
 0x3b3   : > { %5516 = vmatpush.bf16.msra.mxu2 %v12100_v45  ;;  %5491 = vmatpush.bf16.msra.mxu0 %v11012_v42  ;;  %v15197_v26 = vld [vmem:[%s16757_s15 + $0x9e4] sm:$0xf0]  ;;  %v14981_v41 = vld [vmem:[%s16757_s15 + $0x32c] sm:$0xf] }
 0x3b4   : > { %v12419_v27 = vld [vmem:[%s16757_s15 + $0xda8] sm:$0xf]  ;;  %v11908_v37 = vor.u32 %v15197_v26, %v11907_v24  ;;  %v14997_v24 = vld [vmem:[%s16757_s15 + $0x3ac] sm:$0xf] }
 0x3b5   : > { %5529 = vmatpush.bf16.msra.mxu3 %v12612_v46  ;;  %5504 = vmatpush.bf16.msra.mxu1 %v11524_v61  ;;  %v15325_v30 = vld [vmem:[%s16757_s15 + $0xde4] sm:$0xf0]  ;;  %v17912_v61 = vadd.f32 %v5277_v43, %v5265_v47  ;;  %v15125_v26 = vld [vmem:[%s16757_s15 + $0x7ac] sm:$0xf] }
 0x3b6   : > { %v10819_v35 = vld [vmem:[%s16757_s15 + $0x128] sm:$0xf]  ;;  %v12420_v4 = vor.u32 %v15325_v30, %v12419_v27  ;;  %v11653_v27 = vld [vmem:[%s16757_s15 + $0x7e8] sm:$0xf0] }
 0x3b7   : > { %5517 = vmatpush.bf16.msra.mxu2 %v12036_v63  ;;  %5492 = vmatpush.bf16.msra.mxu0 %v10948_v16  ;;  %v14925_v36 = vld [vmem:[%s16757_s15 + $0x164] sm:$0xf0]  ;;  %v15253_v30 = vld [vmem:[%s16757_s15 + $0xbac] sm:$0xf] }
 0x3b8   : > { %v11331_v56 = vld [vmem:[%s16757_s15 + $0x528] sm:$0xf]  ;;  %v10820_v55 = vor.u32 %v14925_v36, %v10819_v35  ;;  %v12165_v35 = vld [vmem:[%s16757_s15 + $0xbe8] sm:$0xf0] }
 0x3b9   : > { %5530 = vmatpush.bf16.msra.mxu3 %v12548_v58  ;;  %5505 = vmatpush.bf16.msra.mxu1 %v11460_v17  ;;  %v15053_v39 = vld [vmem:[%s16757_s15 + $0x564] sm:$0xf0]  ;;  %v15381_v36 = vld [vmem:[%s16757_s15 + $0xfac] sm:$0xf] }
 0x3ba   : > { %v11843_v40 = vld [vmem:[%s16757_s15 + $0x928] sm:$0xf]  ;;  %v11332_v9 = vor.u32 %v15053_v39, %v11331_v56  ;;  %v11144_v39 = vor.u32 %v14997_v24, %v11141_v25  ;;  %v11077_v43 = vld [vmem:[%s16757_s15 + $0x368] sm:$0xf0] }
 0x3bb   : > { %5518 = vmatpush.bf16.msra.mxu2 %v11972_v20  ;;  %v15181_v0 = vld [vmem:[%s16757_s15 + $0x964] sm:$0xf0]  ;;  %5493 = vmatpush.bf16.msra.mxu0 %v10884_v33  ;;  %v11589_v47 = vld [vmem:[%s16757_s15 + $0x768] sm:$0xf0] }
 0x3bc   : > { %v12355_v45 = vld [vmem:[%s16757_s15 + $0xd28] sm:$0xf]  ;;  %v11844_v10 = vor.u32 %v15181_v0, %v11843_v40  ;;  %v11656_v40 = vor.u32 %v15125_v26, %v11653_v27  ;;  %v12168_v0 = vor.u32 %v15253_v30, %v12165_v35  ;;  %v11973_v22 = vld [vmem:[%s16757_s15 + $0xa68] sm:$0xf0] }
 0x3bd   : > { %5531 = vmatpush.bf16.msra.mxu3 %v12484_v21  ;;  %v15309_v46 = vld [vmem:[%s16757_s15 + $0xd64] sm:$0xf0]  ;;  %5506 = vmatpush.bf16.msra.mxu1 %v11396_v34  ;;  %v5266_v21 = vpop.f32.mrf.mxu2  ;;  %v12485_v24 = vld [vmem:[%s16757_s15 + $0xe68] sm:$0xf0]  ;;  %v5290_v25 = vpop.f32.mrf.mxu0 }
 0x3be   : > { %v10755_v57 = vld [vmem:[%s16757_s15 + $0xa8] sm:$0xf]  ;;  %v12356_v60 = vor.u32 %v15309_v46, %v12355_v45  ;;  %v15109_v46 = vld [vmem:[%s16757_s15 + $0x72c] sm:$0xf]  ;;  %v5303_v26 = vpop.f32.mrf.mxu1 }
 0x3bf   : > { %v14909_v42 = vld [vmem:[%s16757_s15 + $0xe4] sm:$0xf0]  ;;  %5519 = vmatpush.bf16.msra.mxu2 %v11908_v37  ;;  %5494 = vmatpush.bf16.msra.mxu0 %v10820_v55  ;;  %v12677_v37 = vld [vmem:[%s16757_s15 + $0xfe8] sm:$0xf0] }
 0x3c0   : > { %v11267_v62 = vld [vmem:[%s16757_s15 + $0x4a8] sm:$0xf]  ;;  %v10756_v14 = vor.u32 %v14909_v42, %v10755_v57  ;;  %v12680_v45 = vor.u32 %v15381_v36, %v12677_v37  ;;  %v15365_v55 = vld [vmem:[%s16757_s15 + $0xf2c] sm:$0xf]  ;;  %v11080_v57 = vor.u32 %v14981_v41, %v11077_v43  ;;  %v11592_v42 = vor.u32 %v15109_v46, %v11589_v47 }
 0x3c1   : > { %5532 = vmatpush.bf16.msra.mxu3 %v12420_v4  ;;  %v15037_v63 = vld [vmem:[%s16757_s15 + $0x4e4] sm:$0xf0]  ;;  %5507 = vmatpush.bf16.msra.mxu1 %v11332_v9  ;;  %v12613_v9 = vld [vmem:[%s16757_s15 + $0xf68] sm:$0xf0] }
 0x3c2   : > { %v11779_v58 = vld [vmem:[%s16757_s15 + $0x8a8] sm:$0xf]  ;;  %v11268_v31 = vor.u32 %v15037_v63, %v11267_v62  ;;  %v12104_v62 = vor.u32 %v15237_v49, %v12101_v54  ;;  %v12616_v63 = vor.u32 %v15365_v55, %v12613_v9  ;;  %v15205_v21 = vld [vmem:[%s16757_s15 + $0xa2c] sm:$0xf] }
 0x3c3   : > { %v15165_v3 = vld [vmem:[%s16757_s15 + $0x8e4] sm:$0xf0]  ;;  %5520 = vmatpush.bf16.msra.mxu2 %v11844_v10  ;;  %5495 = vmatpush.bf16.msra.mxu0 %v10756_v14  ;;  %v14965_v10 = vld [vmem:[%s16757_s15 + $0x2ac] sm:$0xf]  ;;  %v11976_v36 = vor.u32 %v15205_v21, %v11973_v22 }
 0x3c4   : > { %v12291_v7 = vld [vmem:[%s16757_s15 + $0xca8] sm:$0xf]  ;;  %v11780_v16 = vor.u32 %v15165_v3, %v11779_v58  ;;  %v15093_v58 = vld [vmem:[%s16757_s15 + $0x6ac] sm:$0xf] }
 0x3c5   : > { %v15293_v8 = vld [vmem:[%s16757_s15 + $0xce4] sm:$0xf0]  ;;  %5533 = vmatpush.bf16.msra.mxu3 %v12356_v60  ;;  %5508 = vmatpush.bf16.msra.mxu1 %v11268_v31  ;;  %v11013_v60 = vld [vmem:[%s16757_s15 + $0x2e8] sm:$0xf0] }
 0x3c6   : > { %v10691_v12 = vld [vmem:[%s16757_s15 + $0x28] sm:$0xf]  ;;  %v12292_v17 = vor.u32 %v15293_v8, %v12291_v7  ;;  %v11525_v3 = vld [vmem:[%s16757_s15 + $0x6e8] sm:$0xf0]  ;;  %v11016_v31 = vor.u32 %v14965_v10, %v11013_v60  ;;  %v5316_v10 = vpop.f32.mrf.mxu2 }
 0x3c7   : > { %v14893_v29 = vld [vmem:[%s16757_s15 + $0x64] sm:$0xf0]  ;;  %5521 = vmatpush.bf16.msra.mxu2 %v11780_v16  ;;  %v15221_v7 = vld [vmem:[%s16757_s15 + $0xaac] sm:$0xf] }
 0x3c8   : > { %v11203_v32 = vld [vmem:[%s16757_s15 + $0x428] sm:$0xf]  ;;  %v10692_v33 = vor.u32 %v14893_v29, %v10691_v12  ;;  %v12037_v8 = vld [vmem:[%s16757_s15 + $0xae8] sm:$0xf0]  ;;  %v11528_v29 = vor.u32 %v15093_v58, %v11525_v3  ;;  %v5329_v60 = vpop.f32.mrf.mxu3 }
 0x3c9   : > { %v15021_v15 = vld [vmem:[%s16757_s15 + $0x464] sm:$0xf0]  ;;  %5534 = vmatpush.bf16.msra.mxu3 %v12292_v17  ;;  %v15349_v12 = vld [vmem:[%s16757_s15 + $0xeac] sm:$0xf]  ;;  %v12040_v17 = vor.u32 %v15221_v7, %v12037_v8  ;;  %v5292_v7 = vpop.f32.mrf.mxu0  ;;  %v5305_v8 = vpop.f32.mrf.mxu1 }
 0x3ca   : > { %v11715_v18 = vld [vmem:[%s16757_s15 + $0x828] sm:$0xf]  ;;  %v11204_v34 = vor.u32 %v15021_v15, %v11203_v32  ;;  %5496 = vmatpush.bf16.msra.mxu0 %v10692_v33  ;;  %v12549_v14 = vld [vmem:[%s16757_s15 + $0xee8] sm:$0xf0]  ;;  %v2383_v32 = vperm.slane %v17883_v59, 6 }
 0x3cb   : > { %v15149_v19 = vld [vmem:[%s16757_s15 + $0x864] sm:$0xf0]  ;;  %v14949_v15 = vld [vmem:[%s16757_s15 + $0x22c] sm:$0xf]  ;;  %v15118_v7 = vld [vmem:[%s16757_s15 + $0x76c] sm:$0xf0] }
 0x3cc   : > { %v12227_v20 = vld [vmem:[%s16757_s15 + $0xc28] sm:$0xf]  ;;  %v11716_v4 = vor.u32 %v15149_v19, %v11715_v18  ;;  %5509 = vmatpush.bf16.msra.mxu1 %v11204_v34  ;;  %v10949_v16 = vld [vmem:[%s16757_s15 + $0x268] sm:$0xf0]  ;;  %v12552_v18 = vor.u32 %v15349_v12, %v12549_v14  ;;  %v5291_v27 = vadd.f32 %v5290_v25, %v2383_v32  ;;  %v12107_v8 = vld [vmem:[%s16757_s15 + $0xb30] sm:$0xf] }
 0x3cd   : > { %v15277_v23 = vld [vmem:[%s16757_s15 + $0xc64] sm:$0xf0]  ;;  %5497 = vmatmul.bf16.vlgmr.msra.gmra.mxu0 %v17282_v50  ;;  %v15077_v19 = vld [vmem:[%s16757_s15 + $0x62c] sm:$0xf]  ;;  %v10952_v30 = vor.u32 %v14949_v15, %v10949_v16 }
 0x3ce   : > { %v12228_v56 = vor.u32 %v15277_v23, %v12227_v20  ;;  %5522 = vmatpush.bf16.msra.mxu2 %v11716_v4  ;;  %5541 = vmatpush.bf16.msrb.mxu0 %v11144_v39  ;;  %v11461_v20 = vld [vmem:[%s16757_s15 + $0x668] sm:$0xf0] }
 0x3cf   : > { %5510 = vmatmul.bf16.vlgmr.msra.gmra.mxu1 %v17286_v51  ;;  %v15333_v23 = vld [vmem:[%s16757_s15 + $0xe2c] sm:$0xf]  ;;  %v11464_v33 = vor.u32 %v15077_v19, %v11461_v20 }
 0x3d0   : > { %5535 = vmatpush.bf16.msra.mxu3 %v12228_v56  ;;  %5554 = vmatpush.bf16.msrb.mxu1 %v11656_v40  ;;  %v14933_v34 = vld [vmem:[%s16757_s15 + $0x1ac] sm:$0xf]  ;;  %v12488_v37 = vor.u32 %v15333_v23, %v12485_v24  ;;  %v5304_v40 = vadd.f32 %v5303_v26, %v5291_v27 }
 0x3d1   : > { %5523 = vmatmul.bf16.vlgmr.msra.gmra.mxu2 %v17290_v52  ;;  %v10885_v35 = vld [vmem:[%s16757_s15 + $0x1e8] sm:$0xf0] }
 0x3d2   : > { %5567 = vmatpush.bf16.msrb.mxu2 %v12168_v0  ;;  %5542 = vmatpush.bf16.msrb.mxu0 %v11080_v57  ;;  %v15061_v4 = vld [vmem:[%s16757_s15 + $0x5ac] sm:$0xf]  ;;  %v5317_v3 = vadd.f32 %v5316_v10, %v5304_v40  ;;  %v11147_v40 = vld [vmem:[%s16757_s15 + $0x3b0] sm:$0xf] }
 0x3d3   : > { %5536 = vmatmul.bf16.vlgmr.msra.gmra.mxu3 %v17294_v53  ;;  %v11397_v56 = vld [vmem:[%s16757_s15 + $0x5e8] sm:$0xf0] }
 0x3d4   : > { %5580 = vmatpush.bf16.msrb.mxu3 %v12680_v45  ;;  %5555 = vmatpush.bf16.msrb.mxu1 %v11592_v42  ;;  %v15189_v39 = vld [vmem:[%s16757_s15 + $0x9ac] sm:$0xf]  ;;  %v10888_v45 = vor.u32 %v14933_v34, %v10885_v35  ;;  %v11400_v46 = vor.u32 %v15061_v4, %v11397_v56  ;;  %v17983_v32 = vadd.f32 %v5329_v60, %v5317_v3  ;;  %v5318_v4 = vpop.f32.mrf.mxu2  ;;  %v5331_v56 = vpop.f32.mrf.mxu3  ;;  %v11083_v60 = vld [vmem:[%s16757_s15 + $0x330] sm:$0xf] }
 0x3d5   : > { %v11909_v41 = vld [vmem:[%s16757_s15 + $0x9e8] sm:$0xf0]  ;;  %v11595_v3 = vld [vmem:[%s16757_s15 + $0x730] sm:$0xf] }
 0x3d6   : > { %5568 = vmatpush.bf16.msrb.mxu2 %v12104_v62  ;;  %5543 = vmatpush.bf16.msrb.mxu0 %v11016_v31  ;;  %v15317_v43 = vld [vmem:[%s16757_s15 + $0xdac] sm:$0xf]  ;;  %v11912_v54 = vor.u32 %v15189_v39, %v11909_v41  ;;  %v15006_v41 = vld [vmem:[%s16757_s15 + $0x3ec] sm:$0xf0] }
 0x3d7   : > { %v12421_v0 = vld [vmem:[%s16757_s15 + $0xde8] sm:$0xf0]  ;;  %v15086_v4 = vld [vmem:[%s16757_s15 + $0x66c] sm:$0xf0] }
 0x3d8   : > { %5581 = vmatpush.bf16.msrb.mxu3 %v12616_v63  ;;  %5556 = vmatpush.bf16.msrb.mxu1 %v11528_v29  ;;  %v14917_v47 = vld [vmem:[%s16757_s15 + $0x12c] sm:$0xf]  ;;  %v12424_v55 = vor.u32 %v15317_v43, %v12421_v0  ;;  %v11659_v43 = vld [vmem:[%s16757_s15 + $0x7b0] sm:$0xf] }
 0x3d9   : > { %v10821_v49 = vld [vmem:[%s16757_s15 + $0x168] sm:$0xf0]  ;;  %v15134_v0 = vld [vmem:[%s16757_s15 + $0x7ec] sm:$0xf0] }
 0x3da   : > { %5569 = vmatpush.bf16.msrb.mxu2 %v12040_v17  ;;  %5544 = vmatpush.bf16.msrb.mxu0 %v10952_v30  ;;  %v15045_v9 = vld [vmem:[%s16757_s15 + $0x52c] sm:$0xf]  ;;  %v10824_v12 = vor.u32 %v14917_v47, %v10821_v49  ;;  %v15262_v49 = vld [vmem:[%s16757_s15 + $0xbec] sm:$0xf0]  ;;  %v11660_v10 = vor.u32 %v15134_v0, %v11659_v43 }
 0x3db   : > { %v11333_v57 = vld [vmem:[%s16757_s15 + $0x568] sm:$0xf0]  ;;  %v11979_v56 = vld [vmem:[%s16757_s15 + $0xa30] sm:$0xf] }
 0x3dc   : > { %5582 = vmatpush.bf16.msrb.mxu3 %v12552_v18  ;;  %5557 = vmatpush.bf16.msrb.mxu1 %v11464_v33  ;;  %v15173_v42 = vld [vmem:[%s16757_s15 + $0x92c] sm:$0xf]  ;;  %v11336_v14 = vor.u32 %v15045_v9, %v11333_v57 }
 0x3dd   : > { %v11845_v62 = vld [vmem:[%s16757_s15 + $0x968] sm:$0xf0] }
 0x3de   : > { %5570 = vmatpush.bf16.msrb.mxu2 %v11976_v36  ;;  %v15301_v63 = vld [vmem:[%s16757_s15 + $0xd2c] sm:$0xf]  ;;  %5545 = vmatpush.bf16.msrb.mxu0 %v10888_v45  ;;  %v11848_v15 = vor.u32 %v15173_v42, %v11845_v62  ;;  %v12171_v45 = vld [vmem:[%s16757_s15 + $0xbb0] sm:$0xf]  ;;  %v11148_v42 = vor.u32 %v15006_v41, %v11147_v40 }
 0x3df   : > { %v12357_v58 = vld [vmem:[%s16757_s15 + $0xd68] sm:$0xf0]  ;;  %v14990_v62 = vld [vmem:[%s16757_s15 + $0x36c] sm:$0xf0] }
 0x3e0   : > { %5583 = vmatpush.bf16.msrb.mxu3 %v12488_v37  ;;  %5558 = vmatpush.bf16.msrb.mxu1 %v11400_v46  ;;  %v14901_v31 = vld [vmem:[%s16757_s15 + $0xac] sm:$0xf]  ;;  %v12360_v16 = vor.u32 %v15301_v63, %v12357_v58  ;;  %v12172_v63 = vor.u32 %v15262_v49, %v12171_v45  ;;  %v12491_v40 = vld [vmem:[%s16757_s15 + $0xe30] sm:$0xf]  ;;  %v5342_v43 = vpop.f32.mrf.mxu0 }
 0x3e1   : > { %v10757_v29 = vld [vmem:[%s16757_s15 + $0xe8] sm:$0xf0]  ;;  %v15342_v41 = vld [vmem:[%s16757_s15 + $0xe6c] sm:$0xf0] }
 0x3e2   : > { %5571 = vmatpush.bf16.msrb.mxu2 %v11912_v54  ;;  %v15029_v17 = vld [vmem:[%s16757_s15 + $0x4ac] sm:$0xf]  ;;  %5546 = vmatpush.bf16.msrb.mxu0 %v10824_v12  ;;  %v10760_v24 = vor.u32 %v14901_v31, %v10757_v29  ;;  %v12683_v54 = vld [vmem:[%s16757_s15 + $0xfb0] sm:$0xf]  ;;  %v11084_v29 = vor.u32 %v14990_v62, %v11083_v60  ;;  %v5355_v0 = vpop.f32.mrf.mxu1 }
 0x3e3   : > { %v11269_v18 = vld [vmem:[%s16757_s15 + $0x4e8] sm:$0xf0]  ;;  %v15246_v12 = vld [vmem:[%s16757_s15 + $0xb6c] sm:$0xf0] }
 0x3e4   : > { %5584 = vmatpush.bf16.msrb.mxu3 %v12424_v55  ;;  %v15157_v19 = vld [vmem:[%s16757_s15 + $0x8ac] sm:$0xf]  ;;  %5559 = vmatpush.bf16.msrb.mxu1 %v11336_v14  ;;  %v11272_v25 = vor.u32 %v15029_v17, %v11269_v18  ;;  %v15390_v55 = vld [vmem:[%s16757_s15 + $0xfec] sm:$0xf0]  ;;  %v12108_v18 = vor.u32 %v15246_v12, %v12107_v8 }
 0x3e5   : > { %v11781_v20 = vld [vmem:[%s16757_s15 + $0x8e8] sm:$0xf0]  ;;  %v12684_v58 = vor.u32 %v15390_v55, %v12683_v54  ;;  %v12619_v14 = vld [vmem:[%s16757_s15 + $0xf30] sm:$0xf]  ;;  %v12492_v55 = vor.u32 %v15342_v41, %v12491_v40 }
 0x3e6   : > { %v15285_v21 = vld [vmem:[%s16757_s15 + $0xcac] sm:$0xf]  ;;  %5572 = vmatpush.bf16.msrb.mxu2 %v11848_v15  ;;  %v11784_v33 = vor.u32 %v15157_v19, %v11781_v20  ;;  %5547 = vmatpush.bf16.msrb.mxu0 %v10760_v24  ;;  %v15374_v31 = vld [vmem:[%s16757_s15 + $0xf6c] sm:$0xf0]  ;;  %v11596_v15 = vor.u32 %v15118_v7, %v11595_v3 }
 0x3e7   : > { %v12293_v22 = vld [vmem:[%s16757_s15 + $0xce8] sm:$0xf0]  ;;  %v14974_v17 = vld [vmem:[%s16757_s15 + $0x2ec] sm:$0xf0]  ;;  %v12620_v19 = vor.u32 %v15374_v31, %v12619_v14 }
 0x3e8   : > { %v14885_v23 = vld [vmem:[%s16757_s15 + $0x2c] sm:$0xf]  ;;  %5585 = vmatpush.bf16.msrb.mxu3 %v12360_v16  ;;  %v12296_v34 = vor.u32 %v15285_v21, %v12293_v22  ;;  %5560 = vmatpush.bf16.msrb.mxu1 %v11272_v25  ;;  %v11019_v16 = vld [vmem:[%s16757_s15 + $0x2b0] sm:$0xf] }
 0x3e9   : > { %v10693_v26 = vld [vmem:[%s16757_s15 + $0x68] sm:$0xf0]  ;;  %v11531_v20 = vld [vmem:[%s16757_s15 + $0x6b0] sm:$0xf] }
 0x3ea   : > { %v15013_v27 = vld [vmem:[%s16757_s15 + $0x42c] sm:$0xf]  ;;  %v10696_v46 = vor.u32 %v14885_v23, %v10693_v26  ;;  %5573 = vmatpush.bf16.msrb.mxu2 %v11784_v33  ;;  %v15102_v21 = vld [vmem:[%s16757_s15 + $0x6ec] sm:$0xf0]  ;;  %v11020_v26 = vor.u32 %v14974_v17, %v11019_v16  ;;  %v5368_v16 = vpop.f32.mrf.mxu2 }
 0x3eb   : > { %v11205_v30 = vld [vmem:[%s16757_s15 + $0x468] sm:$0xf0]  ;;  %v12043_v22 = vld [vmem:[%s16757_s15 + $0xab0] sm:$0xf] }
 0x3ec   : > { %v15141_v35 = vld [vmem:[%s16757_s15 + $0x82c] sm:$0xf]  ;;  %v11208_v47 = vor.u32 %v15013_v27, %v11205_v30  ;;  %5586 = vmatpush.bf16.msrb.mxu3 %v12296_v34  ;;  %5548 = vmatpush.bf16.msrb.mxu0 %v10696_v46  ;;  %v15230_v23 = vld [vmem:[%s16757_s15 + $0xaec] sm:$0xf0]  ;;  %v11532_v27 = vor.u32 %v15102_v21, %v11531_v20  ;;  %v2384_v30 = vperm.slane %v17883_v59, 7  ;;  %v5381_v17 = vpop.f32.mrf.mxu3 }
 0x3ed   : > { %v11717_v36 = vld [vmem:[%s16757_s15 + $0x868] sm:$0xf0]  ;;  %v12555_v24 = vld [vmem:[%s16757_s15 + $0xeb0] sm:$0xf] }
 0x3ee   : > { %v15269_v37 = vld [vmem:[%s16757_s15 + $0xc2c] sm:$0xf]  ;;  %v11720_v9 = vor.u32 %v15141_v35, %v11717_v36  ;;  %5561 = vmatpush.bf16.msrb.mxu1 %v11208_v47  ;;  %v15358_v25 = vld [vmem:[%s16757_s15 + $0xeec] sm:$0xf0]  ;;  %v12044_v35 = vor.u32 %v15230_v23, %v12043_v22  ;;  %v5343_v59 = vadd.f32 %v5342_v43, %v2384_v30  ;;  %v5344_v22 = vpop.f32.mrf.mxu0  ;;  %v5357_v23 = vpop.f32.mrf.mxu1 }
 0x3ef   : > { %v12229_v39 = vld [vmem:[%s16757_s15 + $0xc68] sm:$0xf0]  ;;  %5549 = vmatmul.bf16.vlgmr.msrb.gmra.mxu0 %v17282_v50  ;;  %v10955_v33 = vld [vmem:[%s16757_s15 + $0x230] sm:$0xf]  ;;  %v12556_v36 = vor.u32 %v15358_v25, %v12555_v24  ;;  %v11597_v22 = vld [vmem:[%s16757_s15 + $0x770] sm:$0xf0] }
 0x3f0   : > { %v12232_v57 = vor.u32 %v15269_v37, %v12229_v39  ;;  %5574 = vmatpush.bf16.msrb.mxu2 %v11720_v9  ;;  %5593 = vmatpush.bf16.msra.mxu0 %v11148_v42  ;;  %v14958_v34 = vld [vmem:[%s16757_s15 + $0x26c] sm:$0xf0]  ;;  %v15238_v23 = vld [vmem:[%s16757_s15 + $0xb34] sm:$0xf] }
 0x3f1   : > { %5562 = vmatmul.bf16.vlgmr.msrb.gmra.mxu1 %v17286_v51  ;;  %v11467_v37 = vld [vmem:[%s16757_s15 + $0x630] sm:$0xf]  ;;  %v10956_v45 = vor.u32 %v14958_v34, %v10955_v33 }
 0x3f2   : > { %5587 = vmatpush.bf16.msrb.mxu3 %v12232_v57  ;;  %5606 = vmatpush.bf16.msra.mxu1 %v11660_v10  ;;  %v15214_v39 = vld [vmem:[%s16757_s15 + $0xa6c] sm:$0xf0]  ;;  %v11468_v46 = vor.u32 %v15086_v4, %v11467_v37  ;;  %v5356_v10 = vadd.f32 %v5355_v0, %v5343_v59 }
 0x3f3   : > { %5575 = vmatmul.bf16.vlgmr.msrb.gmra.mxu2 %v17290_v52  ;;  %v10891_v47 = vld [vmem:[%s16757_s15 + $0x1b0] sm:$0xf]  ;;  %v11980_v54 = vor.u32 %v15214_v39, %v11979_v56 }
 0x3f4   : > { %5619 = vmatpush.bf16.msra.mxu2 %v12172_v63  ;;  %5594 = vmatpush.bf16.msra.mxu0 %v11084_v29  ;;  %v14942_v49 = vld [vmem:[%s16757_s15 + $0x1ec] sm:$0xf0]  ;;  %v5369_v21 = vadd.f32 %v5368_v16, %v5356_v10  ;;  %v14998_v10 = vld [vmem:[%s16757_s15 + $0x3b4] sm:$0xf] }
 0x3f5   : > { %5588 = vmatmul.bf16.vlgmr.msrb.gmra.mxu3 %v17294_v53  ;;  %v11403_v9 = vld [vmem:[%s16757_s15 + $0x5b0] sm:$0xf] }
 0x3f6   : > { %5632 = vmatpush.bf16.msra.mxu3 %v12684_v58  ;;  %5607 = vmatpush.bf16.msra.mxu1 %v11596_v15  ;;  %v15070_v57 = vld [vmem:[%s16757_s15 + $0x5ec] sm:$0xf0]  ;;  %v10892_v58 = vor.u32 %v14942_v49, %v10891_v47  ;;  %v18054_v30 = vadd.f32 %v5381_v17, %v5369_v21  ;;  %v14982_v17 = vld [vmem:[%s16757_s15 + $0x334] sm:$0xf] }
 0x3f7   : > { %v11915_v42 = vld [vmem:[%s16757_s15 + $0x9b0] sm:$0xf]  ;;  %v11404_v3 = vor.u32 %v15070_v57, %v11403_v9  ;;  %v5370_v9 = vpop.f32.mrf.mxu2  ;;  %v5383_v57 = vpop.f32.mrf.mxu3  ;;  %v15110_v21 = vld [vmem:[%s16757_s15 + $0x734] sm:$0xf] }
 0x3f8   : > { %5620 = vmatpush.bf16.msra.mxu2 %v12108_v18  ;;  %5595 = vmatpush.bf16.msra.mxu0 %v11020_v26  ;;  %v15198_v60 = vld [vmem:[%s16757_s15 + $0x9ec] sm:$0xf0]  ;;  %v15078_v9 = vld [vmem:[%s16757_s15 + $0x634] sm:$0xf] }
 0x3f9   : > { %v12427_v62 = vld [vmem:[%s16757_s15 + $0xdb0] sm:$0xf]  ;;  %v11916_v12 = vor.u32 %v15198_v60, %v11915_v42  ;;  %v11149_v60 = vld [vmem:[%s16757_s15 + $0x3f0] sm:$0xf0] }
 0x3fa   : > { %5633 = vmatpush.bf16.msra.mxu3 %v12620_v19  ;;  %5608 = vmatpush.bf16.msra.mxu1 %v11532_v27  ;;  %v15326_v63 = vld [vmem:[%s16757_s15 + $0xdec] sm:$0xf0]  ;;  %v11469_v57 = vld [vmem:[%s16757_s15 + $0x670] sm:$0xf0] }
 0x3fb   : > { %v10827_v7 = vld [vmem:[%s16757_s15 + $0x130] sm:$0xf]  ;;  %v12428_v14 = vor.u32 %v15326_v63, %v12427_v62  ;;  %v15126_v62 = vld [vmem:[%s16757_s15 + $0x7b4] sm:$0xf] }
 0x3fc   : > { %5621 = vmatpush.bf16.msra.mxu2 %v12044_v35  ;;  %5596 = vmatpush.bf16.msra.mxu0 %v10956_v45  ;;  %v14926_v8 = vld [vmem:[%s16757_s15 + $0x16c] sm:$0xf0]  ;;  %v11661_v63 = vld [vmem:[%s16757_s15 + $0x7f0] sm:$0xf0] }
 0x3fd   : > { %v11339_v31 = vld [vmem:[%s16757_s15 + $0x530] sm:$0xf]  ;;  %v10828_v24 = vor.u32 %v14926_v8, %v10827_v7  ;;  %v12173_v8 = vld [vmem:[%s16757_s15 + $0xbf0] sm:$0xf0]  ;;  %v11664_v16 = vor.u32 %v15126_v62, %v11661_v63 }
 0x3fe   : > { %5634 = vmatpush.bf16.msra.mxu3 %v12556_v36  ;;  %5609 = vmatpush.bf16.msra.mxu1 %v11468_v46  ;;  %v15054_v29 = vld [vmem:[%s16757_s15 + $0x56c] sm:$0xf0]  ;;  %v12493_v62 = vld [vmem:[%s16757_s15 + $0xe70] sm:$0xf0] }
 0x3ff   : > { %v11851_v15 = vld [vmem:[%s16757_s15 + $0x930] sm:$0xf]  ;;  %v11340_v25 = vor.u32 %v15054_v29, %v11339_v31 }
 0x400   : > { %5622 = vmatpush.bf16.msra.mxu2 %v11980_v54  ;;  %v15182_v18 = vld [vmem:[%s16757_s15 + $0x96c] sm:$0xf0]  ;;  %5597 = vmatpush.bf16.msra.mxu0 %v10892_v58  ;;  %v15254_v58 = vld [vmem:[%s16757_s15 + $0xbb4] sm:$0xf] }
 0x401   : > { %v12363_v19 = vld [vmem:[%s16757_s15 + $0xd30] sm:$0xf]  ;;  %v11852_v33 = vor.u32 %v15182_v18, %v11851_v15  ;;  %v11152_v15 = vor.u32 %v14998_v10, %v11149_v60  ;;  %v11085_v18 = vld [vmem:[%s16757_s15 + $0x370] sm:$0xf0] }
 0x402   : > { %5635 = vmatpush.bf16.msra.mxu3 %v12492_v55  ;;  %v15310_v20 = vld [vmem:[%s16757_s15 + $0xd6c] sm:$0xf0]  ;;  %5610 = vmatpush.bf16.msra.mxu1 %v11404_v3  ;;  %v11981_v10 = vld [vmem:[%s16757_s15 + $0xa70] sm:$0xf0] }
 0x403   : > { %v10763_v26 = vld [vmem:[%s16757_s15 + $0xb0] sm:$0xf]  ;;  %v12364_v34 = vor.u32 %v15310_v20, %v12363_v19  ;;  %v12176_v19 = vor.u32 %v15254_v58, %v12173_v8  ;;  %v15334_v60 = vld [vmem:[%s16757_s15 + $0xe34] sm:$0xf]  ;;  %v5394_v63 = vpop.f32.mrf.mxu0  ;;  %v11472_v8 = vor.u32 %v15078_v9, %v11469_v57 }
 0x404   : > { %v14910_v27 = vld [vmem:[%s16757_s15 + $0xec] sm:$0xf0]  ;;  %5623 = vmatpush.bf16.msra.mxu2 %v11916_v12  ;;  %5598 = vmatpush.bf16.msra.mxu0 %v10828_v24  ;;  %v15382_v12 = vld [vmem:[%s16757_s15 + $0xfb4] sm:$0xf] }
 0x405   : > { %v11275_v35 = vld [vmem:[%s16757_s15 + $0x4b0] sm:$0xf]  ;;  %v10764_v41 = vor.u32 %v14910_v27, %v10763_v26  ;;  %v12109_v24 = vld [vmem:[%s16757_s15 + $0xb70] sm:$0xf0]  ;;  %v11088_v27 = vor.u32 %v14982_v17, %v11085_v18  ;;  %v5407_v58 = vpop.f32.mrf.mxu1 }
 0x406   : > { %5636 = vmatpush.bf16.msra.mxu3 %v12428_v14  ;;  %v15038_v36 = vld [vmem:[%s16757_s15 + $0x4ec] sm:$0xf0]  ;;  %5611 = vmatpush.bf16.msra.mxu1 %v11340_v25  ;;  %v12685_v14 = vld [vmem:[%s16757_s15 + $0xff0] sm:$0xf0] }
 0x407   : > { %v11787_v37 = vld [vmem:[%s16757_s15 + $0x8b0] sm:$0xf]  ;;  %v11276_v43 = vor.u32 %v15038_v36, %v11275_v35  ;;  %v12688_v20 = vor.u32 %v15382_v12, %v12685_v14  ;;  %v15366_v25 = vld [vmem:[%s16757_s15 + $0xf34] sm:$0xf] }
 0x408   : > { %v15166_v4 = vld [vmem:[%s16757_s15 + $0x8ec] sm:$0xf0]  ;;  %5624 = vmatpush.bf16.msra.mxu2 %v11852_v33  ;;  %5599 = vmatpush.bf16.msra.mxu0 %v10764_v41  ;;  %v12621_v26 = vld [vmem:[%s16757_s15 + $0xf70] sm:$0xf0]  ;;  %v11600_v33 = vor.u32 %v15110_v21, %v11597_v22 }
 0x409   : > { %v12299_v56 = vld [vmem:[%s16757_s15 + $0xcb0] sm:$0xf]  ;;  %v11788_v46 = vor.u32 %v15166_v4, %v11787_v37  ;;  %v11021_v35 = vld [vmem:[%s16757_s15 + $0x2f0] sm:$0xf0]  ;;  %v12112_v37 = vor.u32 %v15238_v23, %v12109_v24  ;;  %v12624_v4 = vor.u32 %v15366_v25, %v12621_v26 }
 0x40a   : > { %v15294_v39 = vld [vmem:[%s16757_s15 + $0xcec] sm:$0xf0]  ;;  %5637 = vmatpush.bf16.msra.mxu3 %v12364_v34  ;;  %5612 = vmatpush.bf16.msra.mxu1 %v11276_v43  ;;  %v14966_v34 = vld [vmem:[%s16757_s15 + $0x2b4] sm:$0xf] }
 0x40b   : > { %v10699_v40 = vld [vmem:[%s16757_s15 + $0x30] sm:$0xf]  ;;  %v12300_v47 = vor.u32 %v15294_v39, %v12299_v56  ;;  %v15094_v36 = vld [vmem:[%s16757_s15 + $0x6b4] sm:$0xf] }
 0x40c   : > { %v14894_v0 = vld [vmem:[%s16757_s15 + $0x6c] sm:$0xf0]  ;;  %5625 = vmatpush.bf16.msra.mxu2 %v11788_v46  ;;  %v11533_v56 = vld [vmem:[%s16757_s15 + $0x6f0] sm:$0xf0] }
 0x40d   : > { %v11211_v59 = vld [vmem:[%s16757_s15 + $0x430] sm:$0xf]  ;;  %v10700_v3 = vor.u32 %v14894_v0, %v10699_v40  ;;  %v15222_v39 = vld [vmem:[%s16757_s15 + $0xab4] sm:$0xf]  ;;  %v18092_v40 = vld [vmem:[%s16763_s17 + $0x8] sm:$0xff] }
 0x40e   : > { %v15022_v45 = vld [vmem:[%s16757_s15 + $0x46c] sm:$0xf0]  ;;  %5638 = vmatpush.bf16.msra.mxu3 %v12300_v47  ;;  %v12045_v41 = vld [vmem:[%s16757_s15 + $0xaf0] sm:$0xf0]  ;;  %v2385_v46 = vperm.slane %v18092_v40, 0 }
 0x40f   : > { %v11723_v49 = vld [vmem:[%s16757_s15 + $0x830] sm:$0xf]  ;;  %v11212_v7 = vor.u32 %v15022_v45, %v11211_v59  ;;  %5600 = vmatpush.bf16.msra.mxu0 %v10700_v3  ;;  %v15350_v43 = vld [vmem:[%s16757_s15 + $0xeb4] sm:$0xf]  ;;  %v11024_v59 = vor.u32 %v14966_v34, %v11021_v35  ;;  %v11536_v45 = vor.u32 %v15094_v36, %v11533_v56  ;;  %v5420_v36 = vpop.f32.mrf.mxu2 }
 0x410   : > { %v15150_v54 = vld [vmem:[%s16757_s15 + $0x86c] sm:$0xf0]  ;;  %v12557_v0 = vld [vmem:[%s16757_s15 + $0xef0] sm:$0xf0]  ;;  %v5395_v3 = vadd.f32 %v5394_v63, %v2385_v46 }
 0x411   : > { %v12235_v55 = vld [vmem:[%s16757_s15 + $0xc30] sm:$0xf]  ;;  %v11724_v31 = vor.u32 %v15150_v54, %v11723_v49  ;;  %5613 = vmatpush.bf16.msra.mxu1 %v11212_v7  ;;  %v14950_v47 = vld [vmem:[%s16757_s15 + $0x234] sm:$0xf]  ;;  %v12048_v54 = vor.u32 %v15222_v39, %v12045_v41 }
 0x412   : > { %v15278_v42 = vld [vmem:[%s16757_s15 + $0xc6c] sm:$0xf0]  ;;  %5601 = vmatmul.bf16.vlgmr.msra.gmra.mxu0 %v17282_v50  ;;  %v10957_v49 = vld [vmem:[%s16757_s15 + $0x270] sm:$0xf0]  ;;  %v5408_v18 = vadd.f32 %v5407_v58, %v5395_v3 }
 0x413   : > { %v12236_v29 = vor.u32 %v15278_v42, %v12235_v55  ;;  %5626 = vmatpush.bf16.msra.mxu2 %v11724_v31  ;;  %5645 = vmatpush.bf16.msrb.mxu0 %v11152_v15  ;;  %v12560_v55 = vor.u32 %v15350_v43, %v12557_v0  ;;  %v15206_v42 = vld [vmem:[%s16757_s15 + $0xa34] sm:$0xf]  ;;  %v10960_v7 = vor.u32 %v14950_v47, %v10957_v49  ;;  %v5396_v43 = vpop.f32.mrf.mxu0  ;;  %v5409_v0 = vpop.f32.mrf.mxu1 }
 0x414   : > { %5614 = vmatmul.bf16.vlgmr.msra.gmra.mxu1 %v17286_v51  ;;  %v14934_v12 = vld [vmem:[%s16757_s15 + $0x1b4] sm:$0xf]  ;;  %v11984_v31 = vor.u32 %v15206_v42, %v11981_v10  ;;  %v5421_v41 = vadd.f32 %v5420_v36, %v5408_v18  ;;  %v11603_v0 = vld [vmem:[%s16757_s15 + $0x738] sm:$0xf] }
 0x415   : > { %5639 = vmatpush.bf16.msra.mxu3 %v12236_v29  ;;  %5658 = vmatpush.bf16.msrb.mxu1 %v11664_v16  ;;  %v10893_v14 = vld [vmem:[%s16757_s15 + $0x1f0] sm:$0xf0]  ;;  %v12496_v29 = vor.u32 %v15334_v60, %v12493_v62 }
 0x416   : > { %5627 = vmatmul.bf16.vlgmr.msra.gmra.mxu2 %v17290_v52  ;;  %v15062_v15 = vld [vmem:[%s16757_s15 + $0x5b4] sm:$0xf]  ;;  %v10896_v22 = vor.u32 %v14934_v12, %v10893_v14 }
 0x417   : > { %5671 = vmatpush.bf16.msrb.mxu2 %v12176_v19  ;;  %5646 = vmatpush.bf16.msrb.mxu0 %v11088_v27  ;;  %v11405_v16 = vld [vmem:[%s16757_s15 + $0x5f0] sm:$0xf0] }
 0x418   : > { %5640 = vmatmul.bf16.vlgmr.msra.gmra.mxu3 %v17294_v53  ;;  %v15190_v17 = vld [vmem:[%s16757_s15 + $0x9b4] sm:$0xf]  ;;  %v11408_v23 = vor.u32 %v15062_v15, %v11405_v16 }
 0x419   : > { %5684 = vmatpush.bf16.msrb.mxu3 %v12688_v20  ;;  %5659 = vmatpush.bf16.msrb.mxu1 %v11600_v33  ;;  %v11917_v19 = vld [vmem:[%s16757_s15 + $0x9f0] sm:$0xf0] }
 0x41a   : > { %v15318_v20 = vld [vmem:[%s16757_s15 + $0xdb4] sm:$0xf]  ;;  %v11920_v26 = vor.u32 %v15190_v17, %v11917_v19  ;;  %v5422_v17 = vpop.f32.mrf.mxu2 }
 0x41b   : > { %5672 = vmatpush.bf16.msrb.mxu2 %v12112_v37  ;;  %5647 = vmatpush.bf16.msrb.mxu0 %v11024_v59  ;;  %v12429_v21 = vld [vmem:[%s16757_s15 + $0xdf0] sm:$0xf0]  ;;  %v5433_v37 = vpop.f32.mrf.mxu3 }
 0x41c   : > { %v14918_v24 = vld [vmem:[%s16757_s15 + $0x134] sm:$0xf]  ;;  %v12432_v27 = vor.u32 %v15318_v20, %v12429_v21  ;;  %v18128_v49 = vadd.f32 %v5433_v37, %v5421_v41  ;;  %v11155_v20 = vld [vmem:[%s16757_s15 + $0x3b8] sm:$0xf] }
 0x41d   : > { %5685 = vmatpush.bf16.msrb.mxu3 %v12624_v4  ;;  %5660 = vmatpush.bf16.msrb.mxu1 %v11536_v45  ;;  %v10829_v25 = vld [vmem:[%s16757_s15 + $0x170] sm:$0xf0]  ;;  %v15007_v21 = vld [vmem:[%s16757_s15 + $0x3f4] sm:$0xf0] }
 0x41e   : > { %v15046_v33 = vld [vmem:[%s16757_s15 + $0x534] sm:$0xf]  ;;  %v10832_v59 = vor.u32 %v14918_v24, %v10829_v25  ;;  %v12179_v24 = vld [vmem:[%s16757_s15 + $0xbb8] sm:$0xf]  ;;  %v11156_v37 = vor.u32 %v15007_v21, %v11155_v20 }
 0x41f   : > { %5673 = vmatpush.bf16.msrb.mxu2 %v12048_v54  ;;  %5648 = vmatpush.bf16.msrb.mxu0 %v10960_v7  ;;  %v11341_v34 = vld [vmem:[%s16757_s15 + $0x570] sm:$0xf0]  ;;  %v11987_v20 = vld [vmem:[%s16757_s15 + $0xa38] sm:$0xf] }
 0x420   : > { %v15174_v35 = vld [vmem:[%s16757_s15 + $0x934] sm:$0xf]  ;;  %v11344_v45 = vor.u32 %v15046_v33, %v11341_v34  ;;  %v12691_v33 = vld [vmem:[%s16757_s15 + $0xfb8] sm:$0xf] }
 0x421   : > { %5686 = vmatpush.bf16.msrb.mxu3 %v12560_v55  ;;  %5661 = vmatpush.bf16.msrb.mxu1 %v11472_v8  ;;  %v11853_v4 = vld [vmem:[%s16757_s15 + $0x970] sm:$0xf0]  ;;  %v15391_v34 = vld [vmem:[%s16757_s15 + $0xff4] sm:$0xf0] }
 0x422   : > { %v15302_v56 = vld [vmem:[%s16757_s15 + $0xd34] sm:$0xf]  ;;  %v11856_v54 = vor.u32 %v15174_v35, %v11853_v4  ;;  %v12692_v43 = vor.u32 %v15391_v34, %v12691_v33  ;;  %v15215_v21 = vld [vmem:[%s16757_s15 + $0xa74] sm:$0xf0] }
 0x423   : > { %5674 = vmatpush.bf16.msrb.mxu2 %v11984_v31  ;;  %v12365_v39 = vld [vmem:[%s16757_s15 + $0xd70] sm:$0xf0]  ;;  %5649 = vmatpush.bf16.msrb.mxu0 %v10896_v22  ;;  %v5435_v18 = vpop.f32.mrf.mxu3  ;;  %v11667_v22 = vld [vmem:[%s16757_s15 + $0x7b8] sm:$0xf] }
 0x424   : > { %v14902_v46 = vld [vmem:[%s16757_s15 + $0xb4] sm:$0xf]  ;;  %v12368_v55 = vor.u32 %v15302_v56, %v12365_v39  ;;  %v11091_v56 = vld [vmem:[%s16757_s15 + $0x338] sm:$0xf] }
 0x425   : > { %5687 = vmatpush.bf16.msrb.mxu3 %v12496_v29  ;;  %5662 = vmatpush.bf16.msrb.mxu1 %v11408_v23  ;;  %v10765_v47 = vld [vmem:[%s16757_s15 + $0xf0] sm:$0xf0]  ;;  %v15135_v23 = vld [vmem:[%s16757_s15 + $0x7f4] sm:$0xf0] }
 0x426   : > { %v15030_v9 = vld [vmem:[%s16757_s15 + $0x4b4] sm:$0xf]  ;;  %v10768_v58 = vor.u32 %v14902_v46, %v10765_v47  ;;  %v11668_v4 = vor.u32 %v15135_v23, %v11667_v22  ;;  %v14991_v39 = vld [vmem:[%s16757_s15 + $0x374] sm:$0xf0] }
 0x427   : > { %5675 = vmatpush.bf16.msrb.mxu2 %v11920_v26  ;;  %v11277_v57 = vld [vmem:[%s16757_s15 + $0x4f0] sm:$0xf0]  ;;  %5650 = vmatpush.bf16.msrb.mxu0 %v10832_v59  ;;  %v15119_v59 = vld [vmem:[%s16757_s15 + $0x774] sm:$0xf0] }
 0x428   : > { %v15158_v42 = vld [vmem:[%s16757_s15 + $0x8b4] sm:$0xf]  ;;  %v11280_v3 = vor.u32 %v15030_v9, %v11277_v57  ;;  %v15247_v46 = vld [vmem:[%s16757_s15 + $0xb74] sm:$0xf0]  ;;  %v11604_v9 = vor.u32 %v15119_v59, %v11603_v0 }
 0x429   : > { %5688 = vmatpush.bf16.msrb.mxu3 %v12432_v27  ;;  %v11789_v10 = vld [vmem:[%s16757_s15 + $0x8f0] sm:$0xf0]  ;;  %5663 = vmatpush.bf16.msrb.mxu1 %v11344_v45  ;;  %v15263_v27 = vld [vmem:[%s16757_s15 + $0xbf4] sm:$0xf0] }
 0x42a   : > { %v15286_v60 = vld [vmem:[%s16757_s15 + $0xcb4] sm:$0xf]  ;;  %v11792_v14 = vor.u32 %v15158_v42, %v11789_v10  ;;  %v12180_v41 = vor.u32 %v15263_v27, %v12179_v24  ;;  %v12115_v45 = vld [vmem:[%s16757_s15 + $0xb38] sm:$0xf]  ;;  %v5446_v24 = vpop.f32.mrf.mxu0 }
 0x42b   : > { %v12301_v62 = vld [vmem:[%s16757_s15 + $0xcf0] sm:$0xf0]  ;;  %5676 = vmatpush.bf16.msrb.mxu2 %v11856_v54  ;;  %5651 = vmatpush.bf16.msrb.mxu0 %v10768_v58  ;;  %v12627_v47 = vld [vmem:[%s16757_s15 + $0xf38] sm:$0xf]  ;;  %v12116_v10 = vor.u32 %v15247_v46, %v12115_v45 }
 0x42c   : > { %v14886_v63 = vld [vmem:[%s16757_s15 + $0x34] sm:$0xf]  ;;  %v12304_v31 = vor.u32 %v15286_v60, %v12301_v62  ;;  %v15375_v54 = vld [vmem:[%s16757_s15 + $0xf74] sm:$0xf0] }
 0x42d   : > { %v10701_v7 = vld [vmem:[%s16757_s15 + $0x70] sm:$0xf0]  ;;  %5689 = vmatpush.bf16.msrb.mxu3 %v12368_v55  ;;  %5664 = vmatpush.bf16.msrb.mxu1 %v11280_v3  ;;  %v11092_v55 = vor.u32 %v14991_v39, %v11091_v56  ;;  %v11027_v57 = vld [vmem:[%s16757_s15 + $0x2b8] sm:$0xf]  ;;  %v12628_v60 = vor.u32 %v15375_v54, %v12627_v47 }
 0x42e   : > { %v15014_v8 = vld [vmem:[%s16757_s15 + $0x434] sm:$0xf]  ;;  %v10704_v25 = vor.u32 %v14886_v63, %v10701_v7  ;;  %v14975_v42 = vld [vmem:[%s16757_s15 + $0x2f4] sm:$0xf0] }
 0x42f   : > { %v11213_v12 = vld [vmem:[%s16757_s15 + $0x470] sm:$0xf0]  ;;  %5677 = vmatpush.bf16.msrb.mxu2 %v11792_v14  ;;  %v11539_v62 = vld [vmem:[%s16757_s15 + $0x6b8] sm:$0xf] }
 0x430   : > { %v15142_v29 = vld [vmem:[%s16757_s15 + $0x834] sm:$0xf]  ;;  %v11216_v26 = vor.u32 %v15014_v8, %v11213_v12  ;;  %5652 = vmatpush.bf16.msrb.mxu0 %v10704_v25  ;;  %v15103_v63 = vld [vmem:[%s16757_s15 + $0x6f4] sm:$0xf0]  ;;  %v11028_v12 = vor.u32 %v14975_v42, %v11027_v57  ;;  %v5459_v25 = vpop.f32.mrf.mxu1 }
 0x431   : > { %v11725_v15 = vld [vmem:[%s16757_s15 + $0x870] sm:$0xf0]  ;;  %5690 = vmatpush.bf16.msrb.mxu3 %v12304_v31  ;;  %v12051_v58 = vld [vmem:[%s16757_s15 + $0xab8] sm:$0xf]  ;;  %v11540_v14 = vor.u32 %v15103_v63, %v11539_v62  ;;  %v2386_v31 = vperm.slane %v18092_v40, 1 }
 0x432   : > { %v15270_v16 = vld [vmem:[%s16757_s15 + $0xc34] sm:$0xf]  ;;  %v11728_v35 = vor.u32 %v15142_v29, %v11725_v15  ;;  %5665 = vmatpush.bf16.msrb.mxu1 %v11216_v26  ;;  %v15231_v3 = vld [vmem:[%s16757_s15 + $0xaf4] sm:$0xf0] }
 0x433   : > { %v12237_v19 = vld [vmem:[%s16757_s15 + $0xc70] sm:$0xf0]  ;;  %5653 = vmatmul.bf16.vlgmr.msrb.gmra.mxu0 %v17282_v50  ;;  %v12563_v7 = vld [vmem:[%s16757_s15 + $0xeb8] sm:$0xf]  ;;  %v5447_v26 = vadd.f32 %v5446_v24, %v2386_v31  ;;  %v5485_v62 = vpop.f32.mrf.mxu3 }
 0x434   : > { %v12240_v36 = vor.u32 %v15270_v16, %v12237_v19  ;;  %5678 = vmatpush.bf16.msrb.mxu2 %v11728_v35  ;;  %5697 = vmatpush.bf16.msra.mxu0 %v11156_v37  ;;  %v15359_v8 = vld [vmem:[%s16757_s15 + $0xef4] sm:$0xf0]  ;;  %v12052_v16 = vor.u32 %v15231_v3, %v12051_v58 }
 0x435   : > { %5666 = vmatmul.bf16.vlgmr.msrb.gmra.mxu1 %v17286_v51  ;;  %v10963_v29 = vld [vmem:[%s16757_s15 + $0x238] sm:$0xf]  ;;  %v12564_v17 = vor.u32 %v15359_v8, %v12563_v7  ;;  %v5448_v8 = vpop.f32.mrf.mxu0 }
 0x436   : > { %5691 = vmatpush.bf16.msrb.mxu3 %v12240_v36  ;;  %5710 = vmatpush.bf16.msra.mxu1 %v11668_v4  ;;  %v14959_v15 = vld [vmem:[%s16757_s15 + $0x274] sm:$0xf0]  ;;  %v11988_v36 = vor.u32 %v15215_v21, %v11987_v20 }
 0x437   : > { %5679 = vmatmul.bf16.vlgmr.msrb.gmra.mxu2 %v17290_v52  ;;  %v11475_v18 = vld [vmem:[%s16757_s15 + $0x638] sm:$0xf]  ;;  %v10964_v27 = vor.u32 %v14959_v15, %v10963_v29 }
 0x438   : > { %5723 = vmatpush.bf16.msra.mxu2 %v12180_v41  ;;  %5698 = vmatpush.bf16.msra.mxu0 %v11092_v55  ;;  %v15087_v19 = vld [vmem:[%s16757_s15 + $0x674] sm:$0xf0]  ;;  %v5460_v41 = vadd.f32 %v5459_v25, %v5447_v26 }
 0x439   : > { %5692 = vmatmul.bf16.vlgmr.msrb.gmra.mxu3 %v17294_v53  ;;  %v12499_v22 = vld [vmem:[%s16757_s15 + $0xe38] sm:$0xf]  ;;  %v11476_v33 = vor.u32 %v15087_v19, %v11475_v18 }
 0x43a   : > { %5736 = vmatpush.bf16.msra.mxu3 %v12692_v43  ;;  %5711 = vmatpush.bf16.msra.mxu1 %v11604_v9  ;;  %v15343_v23 = vld [vmem:[%s16757_s15 + $0xe74] sm:$0xf0] }
 0x43b   : > { %v10899_v34 = vld [vmem:[%s16757_s15 + $0x1b8] sm:$0xf]  ;;  %v12500_v37 = vor.u32 %v15343_v23, %v12499_v22 }
 0x43c   : > { %5724 = vmatpush.bf16.msra.mxu2 %v12116_v10  ;;  %5699 = vmatpush.bf16.msra.mxu0 %v11028_v12  ;;  %v14943_v35 = vld [vmem:[%s16757_s15 + $0x1f4] sm:$0xf0]  ;;  %v5461_v12 = vpop.f32.mrf.mxu1 }
 0x43d   : > { %v11411_v4 = vld [vmem:[%s16757_s15 + $0x5b8] sm:$0xf]  ;;  %v10900_v45 = vor.u32 %v14943_v35, %v10899_v34 }
 0x43e   : > { %5737 = vmatpush.bf16.msra.mxu3 %v12628_v60  ;;  %5712 = vmatpush.bf16.msra.mxu1 %v11540_v14  ;;  %v15071_v56 = vld [vmem:[%s16757_s15 + $0x5f4] sm:$0xf0]  ;;  %v5472_v60 = vpop.f32.mrf.mxu2 }
 0x43f   : > { %v11923_v39 = vld [vmem:[%s16757_s15 + $0x9b8] sm:$0xf]  ;;  %v11412_v46 = vor.u32 %v15071_v56, %v11411_v4  ;;  %v5473_v7 = vadd.f32 %v5472_v60, %v5460_v41 }
 0x440   : > { %5725 = vmatpush.bf16.msra.mxu2 %v12052_v16  ;;  %v15199_v43 = vld [vmem:[%s16757_s15 + $0x9f4] sm:$0xf0]  ;;  %5700 = vmatpush.bf16.msra.mxu0 %v10964_v27 }
 0x441   : > { %v12435_v0 = vld [vmem:[%s16757_s15 + $0xdb8] sm:$0xf]  ;;  %v11924_v55 = vor.u32 %v15199_v43, %v11923_v39  ;;  %v18199_v16 = vadd.f32 %v5485_v62, %v5473_v7  ;;  %v5487_v43 = vpop.f32.mrf.mxu3  ;;  %v11093_v7 = vld [vmem:[%s16757_s15 + $0x378] sm:$0xf0] }
 0x442   : > { %5738 = vmatpush.bf16.msra.mxu3 %v12564_v17  ;;  %v15327_v59 = vld [vmem:[%s16757_s15 + $0xdf4] sm:$0xf0]  ;;  %5713 = vmatpush.bf16.msra.mxu1 %v11476_v33 }
 0x443   : > { %v10835_v47 = vld [vmem:[%s16757_s15 + $0x138] sm:$0xf]  ;;  %v12436_v9 = vor.u32 %v15327_v59, %v12435_v0  ;;  %v14999_v59 = vld [vmem:[%s16757_s15 + $0x3bc] sm:$0xf] }
 0x444   : > { %v14927_v54 = vld [vmem:[%s16757_s15 + $0x174] sm:$0xf0]  ;;  %5726 = vmatpush.bf16.msra.mxu2 %v11988_v36  ;;  %5701 = vmatpush.bf16.msra.mxu0 %v10900_v45  ;;  %v11157_v45 = vld [vmem:[%s16757_s15 + $0x3f8] sm:$0xf0] }
 0x445   : > { %v11347_v57 = vld [vmem:[%s16757_s15 + $0x538] sm:$0xf]  ;;  %v10836_v14 = vor.u32 %v14927_v54, %v10835_v47  ;;  %v11669_v47 = vld [vmem:[%s16757_s15 + $0x7f8] sm:$0xf0] }
 0x446   : > { %5739 = vmatpush.bf16.msra.mxu3 %v12500_v37  ;;  %v15055_v42 = vld [vmem:[%s16757_s15 + $0x574] sm:$0xf0]  ;;  %5714 = vmatpush.bf16.msra.mxu1 %v11412_v46  ;;  %v5474_v41 = vpop.f32.mrf.mxu2  ;;  %v15127_v46 = vld [vmem:[%s16757_s15 + $0x7bc] sm:$0xf] }
 0x447   : > { %v11859_v10 = vld [vmem:[%s16757_s15 + $0x938] sm:$0xf]  ;;  %v11348_v31 = vor.u32 %v15055_v42, %v11347_v57  ;;  %v15255_v54 = vld [vmem:[%s16757_s15 + $0xbbc] sm:$0xf] }
 0x448   : > { %v15183_v63 = vld [vmem:[%s16757_s15 + $0x974] sm:$0xf0]  ;;  %5727 = vmatpush.bf16.msra.mxu2 %v11924_v55  ;;  %5702 = vmatpush.bf16.msra.mxu0 %v10836_v14  ;;  %v12181_v57 = vld [vmem:[%s16757_s15 + $0xbf8] sm:$0xf0] }
 0x449   : > { %v12371_v58 = vld [vmem:[%s16757_s15 + $0xd38] sm:$0xf]  ;;  %v11860_v17 = vor.u32 %v15183_v63, %v11859_v10  ;;  %v15383_v42 = vld [vmem:[%s16757_s15 + $0xfbc] sm:$0xf]  ;;  %v11160_v63 = vor.u32 %v14999_v59, %v11157_v45  ;;  %v12184_v8 = vor.u32 %v15255_v54, %v12181_v57 }
 0x44a   : > { %v15311_v3 = vld [vmem:[%s16757_s15 + $0xd74] sm:$0xf0]  ;;  %5740 = vmatpush.bf16.msra.mxu3 %v12436_v9  ;;  %5715 = vmatpush.bf16.msra.mxu1 %v11348_v31  ;;  %v12693_v10 = vld [vmem:[%s16757_s15 + $0xff8] sm:$0xf0] }
 0x44b   : > { %v10771_v29 = vld [vmem:[%s16757_s15 + $0xb8] sm:$0xf]  ;;  %v12372_v18 = vor.u32 %v15311_v3, %v12371_v58  ;;  %v11672_v58 = vor.u32 %v15127_v46, %v11669_v47  ;;  %v14983_v3 = vld [vmem:[%s16757_s15 + $0x33c] sm:$0xf]  ;;  %v12696_v12 = vor.u32 %v15383_v42, %v12693_v10 }
 0x44c   : > { %v14911_v15 = vld [vmem:[%s16757_s15 + $0xf4] sm:$0xf0]  ;;  %5728 = vmatpush.bf16.msra.mxu2 %v11860_v17  ;;  %v15111_v14 = vld [vmem:[%s16757_s15 + $0x73c] sm:$0xf] }
 0x44d   : > { %v11283_v19 = vld [vmem:[%s16757_s15 + $0x4b8] sm:$0xf]  ;;  %v10772_v26 = vor.u32 %v14911_v15, %v10771_v29  ;;  %v11605_v31 = vld [vmem:[%s16757_s15 + $0x778] sm:$0xf0] }
 0x44e   : > { %v15039_v20 = vld [vmem:[%s16757_s15 + $0x4f4] sm:$0xf0]  ;;  %5741 = vmatpush.bf16.msra.mxu3 %v12372_v18  ;;  %v15239_v29 = vld [vmem:[%s16757_s15 + $0xb3c] sm:$0xf] }
 0x44f   : > { %v11795_v21 = vld [vmem:[%s16757_s15 + $0x8b8] sm:$0xf]  ;;  %v11284_v27 = vor.u32 %v15039_v20, %v11283_v19  ;;  %5703 = vmatpush.bf16.msra.mxu0 %v10772_v26  ;;  %v12117_v15 = vld [vmem:[%s16757_s15 + $0xb78] sm:$0xf0]  ;;  %v11096_v19 = vor.u32 %v14983_v3, %v11093_v7  ;;  %v11608_v20 = vor.u32 %v15111_v14, %v11605_v31 }
 0x450   : > { %v15167_v22 = vld [vmem:[%s16757_s15 + $0x8f4] sm:$0xf0]  ;;  %v15367_v17 = vld [vmem:[%s16757_s15 + $0xf3c] sm:$0xf] }
 0x451   : > { %v12307_v23 = vld [vmem:[%s16757_s15 + $0xcb8] sm:$0xf]  ;;  %v11796_v36 = vor.u32 %v15167_v22, %v11795_v21  ;;  %5716 = vmatpush.bf16.msra.mxu1 %v11284_v27  ;;  %v12629_v18 = vld [vmem:[%s16757_s15 + $0xf78] sm:$0xf0] }
 0x452   : > { %v15295_v24 = vld [vmem:[%s16757_s15 + $0xcf4] sm:$0xf0]  ;;  %v14967_v21 = vld [vmem:[%s16757_s15 + $0x2bc] sm:$0xf] }
 0x453   : > { %v10707_v25 = vld [vmem:[%s16757_s15 + $0x38] sm:$0xf]  ;;  %v12308_v37 = vor.u32 %v15295_v24, %v12307_v23  ;;  %5729 = vmatpush.bf16.msra.mxu2 %v11796_v36  ;;  %v11029_v22 = vld [vmem:[%s16757_s15 + $0x2f8] sm:$0xf0]  ;;  %v12120_v23 = vor.u32 %v15239_v29, %v12117_v15  ;;  %v12632_v24 = vor.u32 %v15367_v17, %v12629_v18 }
 0x454   : > { %v14895_v33 = vld [vmem:[%s16757_s15 + $0x74] sm:$0xf0]  ;;  %v11541_v26 = vld [vmem:[%s16757_s15 + $0x6f8] sm:$0xf0]  ;;  %v11032_v36 = vor.u32 %v14967_v21, %v11029_v22 }
 0x455   : > { %v11219_v34 = vld [vmem:[%s16757_s15 + $0x438] sm:$0xf]  ;;  %v10708_v55 = vor.u32 %v14895_v33, %v10707_v25  ;;  %5742 = vmatpush.bf16.msra.mxu3 %v12308_v37  ;;  %v15095_v25 = vld [vmem:[%s16757_s15 + $0x6bc] sm:$0xf] }
 0x456   : > { %v15023_v35 = vld [vmem:[%s16757_s15 + $0x474] sm:$0xf0]  ;;  %v15223_v27 = vld [vmem:[%s16757_s15 + $0xabc] sm:$0xf]  ;;  %v11544_v37 = vor.u32 %v15095_v25, %v11541_v26  ;;  %v5524_v25 = vpop.f32.mrf.mxu2  ;;  %v5537_v26 = vpop.f32.mrf.mxu3 }
 0x457   : > { %v11731_v4 = vld [vmem:[%s16757_s15 + $0x838] sm:$0xf]  ;;  %v11220_v9 = vor.u32 %v15023_v35, %v11219_v34  ;;  %5704 = vmatpush.bf16.msra.mxu0 %v10708_v55  ;;  %v12053_v33 = vld [vmem:[%s16757_s15 + $0xaf8] sm:$0xf0]  ;;  %v5498_v55 = vpop.f32.mrf.mxu0 }
 0x458   : > { %v15151_v56 = vld [vmem:[%s16757_s15 + $0x874] sm:$0xf0]  ;;  %v15351_v34 = vld [vmem:[%s16757_s15 + $0xebc] sm:$0xf]  ;;  %v12056_v41 = vor.u32 %v15223_v27, %v12053_v33 }
 0x459   : > { %v12243_v39 = vld [vmem:[%s16757_s15 + $0xc38] sm:$0xf]  ;;  %v11732_v60 = vor.u32 %v15151_v56, %v11731_v4  ;;  %5717 = vmatpush.bf16.msra.mxu1 %v11220_v9  ;;  %v12565_v35 = vld [vmem:[%s16757_s15 + $0xef8] sm:$0xf0]  ;;  %v2387_v4 = vperm.slane %v18092_v40, 2  ;;  %v5511_v9 = vpop.f32.mrf.mxu1 }
 0x45a   : > { %v15279_v0 = vld [vmem:[%s16757_s15 + $0xc74] sm:$0xf0]  ;;  %5705 = vmatmul.bf16.vlgmr.msra.gmra.mxu0 %v17282_v50  ;;  %v14951_v56 = vld [vmem:[%s16757_s15 + $0x23c] sm:$0xf]  ;;  %v12568_v43 = vor.u32 %v15351_v34, %v12565_v35 }
 0x45b   : > { %v12244_v62 = vor.u32 %v15279_v0, %v12243_v39  ;;  %5730 = vmatpush.bf16.msra.mxu2 %v11732_v60  ;;  %5749 = vmatpush.bf16.msrb.mxu0 %v11160_v63  ;;  %v10965_v39 = vld [vmem:[%s16757_s15 + $0x278] sm:$0xf0]  ;;  %v5499_v57 = vadd.f32 %v5498_v55, %v2387_v4 }
 0x45c   : > { %5718 = vmatmul.bf16.vlgmr.msra.gmra.mxu1 %v17286_v51  ;;  %v15079_v0 = vld [vmem:[%s16757_s15 + $0x63c] sm:$0xf]  ;;  %v10968_v42 = vor.u32 %v14951_v56, %v10965_v39 }
 0x45d   : > { %5743 = vmatpush.bf16.msra.mxu3 %v12244_v62  ;;  %5762 = vmatpush.bf16.msrb.mxu1 %v11672_v58  ;;  %v11477_v59 = vld [vmem:[%s16757_s15 + $0x678] sm:$0xf0] }
 0x45e   : > { %5731 = vmatmul.bf16.vlgmr.msra.gmra.mxu2 %v17290_v52  ;;  %v15207_v45 = vld [vmem:[%s16757_s15 + $0xa3c] sm:$0xf]  ;;  %v11480_v10 = vor.u32 %v15079_v0, %v11477_v59 }
 0x45f   : > { %5775 = vmatpush.bf16.msrb.mxu2 %v12184_v8  ;;  %5750 = vmatpush.bf16.msrb.mxu0 %v11096_v19  ;;  %v11989_v46 = vld [vmem:[%s16757_s15 + $0xa78] sm:$0xf0] }
 0x460   : > { %5744 = vmatmul.bf16.vlgmr.msra.gmra.mxu3 %v17294_v53  ;;  %v15335_v47 = vld [vmem:[%s16757_s15 + $0xe3c] sm:$0xf]  ;;  %v11992_v63 = vor.u32 %v15207_v45, %v11989_v46 }
 0x461   : > { %5788 = vmatpush.bf16.msrb.mxu3 %v12696_v12  ;;  %5763 = vmatpush.bf16.msrb.mxu1 %v11608_v20  ;;  %v12501_v54 = vld [vmem:[%s16757_s15 + $0xe78] sm:$0xf0]  ;;  %v5512_v12 = vadd.f32 %v5511_v9, %v5499_v57 }
 0x462   : > { %v14935_v60 = vld [vmem:[%s16757_s15 + $0x1bc] sm:$0xf]  ;;  %v12504_v58 = vor.u32 %v15335_v47, %v12501_v54 }
 0x463   : > { %5776 = vmatpush.bf16.msrb.mxu2 %v12120_v23  ;;  %5751 = vmatpush.bf16.msrb.mxu0 %v11032_v36  ;;  %v10901_v62 = vld [vmem:[%s16757_s15 + $0x1f8] sm:$0xf0]  ;;  %v5525_v35 = vadd.f32 %v5524_v25, %v5512_v12  ;;  %v5500_v36 = vpop.f32.mrf.mxu0  ;;  %v15518_v25 = vld [vmem:[%s16766_s10 + $0x3ec] sm:$0xf0] }
 0x464   : > { %v15063_v3 = vld [vmem:[%s16757_s15 + $0x5bc] sm:$0xf]  ;;  %v10904_v15 = vor.u32 %v14935_v60, %v10901_v62  ;;  %v15418_v36 = vld [vmem:[%s16766_s10 + $0xcc] sm:$0xf0] }
 0x465   : > { %5789 = vmatpush.bf16.msrb.mxu3 %v12632_v24  ;;  %5764 = vmatpush.bf16.msrb.mxu1 %v11544_v37  ;;  %v11413_v7 = vld [vmem:[%s16757_s15 + $0x5f8] sm:$0xf0]  ;;  %v5513_v37 = vpop.f32.mrf.mxu1 }
 0x466   : > { %v15191_v8 = vld [vmem:[%s16757_s15 + $0x9bc] sm:$0xf]  ;;  %v11416_v17 = vor.u32 %v15063_v3, %v11413_v7 }
 0x467   : > { %5777 = vmatpush.bf16.msrb.mxu2 %v12056_v41  ;;  %v11925_v14 = vld [vmem:[%s16757_s15 + $0x9f8] sm:$0xf0]  ;;  %5752 = vmatpush.bf16.msrb.mxu0 %v10968_v42 }
 0x468   : > { %v15319_v31 = vld [vmem:[%s16757_s15 + $0xdbc] sm:$0xf]  ;;  %v11928_v20 = vor.u32 %v15191_v8, %v11925_v14  ;;  %v5526_v14 = vpop.f32.mrf.mxu2 }
 0x469   : > { %5790 = vmatpush.bf16.msrb.mxu3 %v12568_v43  ;;  %v12437_v29 = vld [vmem:[%s16757_s15 + $0xdf8] sm:$0xf0]  ;;  %5765 = vmatpush.bf16.msrb.mxu1 %v11480_v10  ;;  %v18270_v43 = vadd.f32 %v5537_v26, %v5525_v35  ;;  %v12795_v35 = vld [vmem:[%s16766_s10 + $0xc0] sm:$0xf] }
 0x46a   : > { %v14919_v18 = vld [vmem:[%s16757_s15 + $0x13c] sm:$0xf]  ;;  %v12440_v21 = vor.u32 %v15319_v31, %v12437_v29  ;;  %v5539_v31 = vpop.f32.mrf.mxu3 }
 0x46b   : > { %v10837_v19 = vld [vmem:[%s16757_s15 + $0x178] sm:$0xf0]  ;;  %5778 = vmatpush.bf16.msrb.mxu2 %v11992_v63  ;;  %5753 = vmatpush.bf16.msrb.mxu0 %v10904_v15  ;;  %v12811_v15 = vld [vmem:[%s16766_s10 + $0xe0] sm:$0xf]  ;;  %v15442_v31 = vld [vmem:[%s16766_s10 + $0x18c] sm:$0xf0] }
 0x46c   : > { %v15047_v22 = vld [vmem:[%s16757_s15 + $0x53c] sm:$0xf]  ;;  %v10840_v4 = vor.u32 %v14919_v18, %v10837_v19  ;;  %v12939_v18 = vld [vmem:[%s16766_s10 + $0x1e0] sm:$0xf]  ;;  %v15454_v19 = vld [vmem:[%s16766_s10 + $0x1ec] sm:$0xf0] }
 0x46d   : > { %5791 = vmatpush.bf16.msrb.mxu3 %v12504_v58  ;;  %v11349_v23 = vld [vmem:[%s16757_s15 + $0x578] sm:$0xf0]  ;;  %5766 = vmatpush.bf16.msrb.mxu1 %v11416_v17  ;;  %v15422_v17 = vld [vmem:[%s16766_s10 + $0xec] sm:$0xf0] }
 0x46e   : > { %v15175_v24 = vld [vmem:[%s16757_s15 + $0x93c] sm:$0xf]  ;;  %v11352_v56 = vor.u32 %v15047_v22, %v11349_v23  ;;  %v15486_v23 = vld [vmem:[%s16766_s10 + $0x2ec] sm:$0xf0] }
 0x46f   : > { %v11861_v27 = vld [vmem:[%s16757_s15 + $0x978] sm:$0xf0]  ;;  %5779 = vmatpush.bf16.msrb.mxu2 %v11928_v20  ;;  %5754 = vmatpush.bf16.msrb.mxu0 %v10840_v4  ;;  %v13067_v20 = vld [vmem:[%s16766_s10 + $0x2e0] sm:$0xf] }
 0x470   : > { %v15303_v33 = vld [vmem:[%s16757_s15 + $0xd3c] sm:$0xf]  ;;  %v11864_v0 = vor.u32 %v15175_v24, %v11861_v27  ;;  %v13195_v24 = vld [vmem:[%s16766_s10 + $0x3e0] sm:$0xf]  ;;  %v13068_v37 = vor.u32 %v15486_v23, %v13067_v20  ;;  %v15406_v23 = vld [vmem:[%s16766_s10 + $0x6c] sm:$0xf0] }
 0x471   : > { %v12373_v34 = vld [vmem:[%s16757_s15 + $0xd78] sm:$0xf0]  ;;  %5792 = vmatpush.bf16.msrb.mxu3 %v12440_v21  ;;  %5767 = vmatpush.bf16.msrb.mxu1 %v11352_v56  ;;  %v13196_v4 = vor.u32 %v15518_v25, %v13195_v24  ;;  %v12923_v56 = vld [vmem:[%s16766_s10 + $0x1c0] sm:$0xf] }
 0x472   : > { %v14903_v39 = vld [vmem:[%s16757_s15 + $0xbc] sm:$0xf]  ;;  %v12376_v59 = vor.u32 %v15303_v33, %v12373_v34  ;;  %v12812_v33 = vor.u32 %v15422_v17, %v12811_v15  ;;  %v12940_v34 = vor.u32 %v15454_v19, %v12939_v18  ;;  %v13147_v15 = vld [vmem:[%s16766_s10 + $0x380] sm:$0xf]  ;;  %v15506_v17 = vld [vmem:[%s16766_s10 + $0x38c] sm:$0xf0]  ;;  %v5550_v18 = vpop.f32.mrf.mxu0  ;;  %v5563_v19 = vpop.f32.mrf.mxu1 }
 0x473   : > { %v10773_v41 = vld [vmem:[%s16757_s15 + $0xf8] sm:$0xf0]  ;;  %5780 = vmatpush.bf16.msrb.mxu2 %v11864_v0  ;;  %v15482_v0 = vld [vmem:[%s16766_s10 + $0x2cc] sm:$0xf0]  ;;  %v13148_v25 = vor.u32 %v15506_v17, %v13147_v15  ;;  %v12699_v15 = vld [vmem:[%s16766_s10] sm:$0xf] }
 0x474   : > { %v15031_v45 = vld [vmem:[%s16757_s15 + $0x4bc] sm:$0xf]  ;;  %v10776_v42 = vor.u32 %v14903_v39, %v10773_v41  ;;  %v15450_v39 = vld [vmem:[%s16766_s10 + $0x1cc] sm:$0xf0]  ;;  %v13051_v41 = vld [vmem:[%s16766_s10 + $0x2c0] sm:$0xf] }
 0x475   : > { %v11285_v46 = vld [vmem:[%s16757_s15 + $0x4f8] sm:$0xf0]  ;;  %5793 = vmatpush.bf16.msrb.mxu3 %v12376_v59  ;;  %v13179_v59 = vld [vmem:[%s16766_s10 + $0x3c0] sm:$0xf] }
 0x476   : > { %v15159_v47 = vld [vmem:[%s16757_s15 + $0x8bc] sm:$0xf]  ;;  %v11288_v10 = vor.u32 %v15031_v45, %v11285_v46  ;;  %5755 = vmatpush.bf16.msrb.mxu0 %v10776_v42  ;;  %v15514_v45 = vld [vmem:[%s16766_s10 + $0x3cc] sm:$0xf0]  ;;  %v12796_v46 = vor.u32 %v15418_v36, %v12795_v35  ;;  %v12907_v42 = vld [vmem:[%s16766_s10 + $0x1a0] sm:$0xf] }
 0x477   : > { %v11797_v54 = vld [vmem:[%s16757_s15 + $0x8f8] sm:$0xf0]  ;;  %v15470_v35 = vld [vmem:[%s16766_s10 + $0x26c] sm:$0xf0]  ;;  %v13131_v36 = vld [vmem:[%s16766_s10 + $0x360] sm:$0xf] }
 0x478   : > { %v15287_v55 = vld [vmem:[%s16757_s15 + $0xcbc] sm:$0xf]  ;;  %v11800_v58 = vor.u32 %v15159_v47, %v11797_v54  ;;  %5768 = vmatpush.bf16.msrb.mxu1 %v11288_v10  ;;  %v12924_v47 = vor.u32 %v15450_v39, %v12923_v56  ;;  %v12779_v54 = vld [vmem:[%s16766_s10 + $0xa0] sm:$0xf]  ;;  %v15446_v10 = vld [vmem:[%s16766_s10 + $0x1ac] sm:$0xf0] }
 0x479   : > { %v12309_v9 = vld [vmem:[%s16757_s15 + $0xcf8] sm:$0xf0]  ;;  %v12731_v39 = vld [vmem:[%s16766_s10 + $0x40] sm:$0xf] }
 0x47a   : > { %v14887_v57 = vld [vmem:[%s16757_s15 + $0x3c] sm:$0xf]  ;;  %v12312_v3 = vor.u32 %v15287_v55, %v12309_v9  ;;  %5781 = vmatpush.bf16.msrb.mxu2 %v11800_v58  ;;  %v15414_v55 = vld [vmem:[%s16766_s10 + $0xac] sm:$0xf0]  ;;  %v13052_v9 = vor.u32 %v15482_v0, %v13051_v41 }
 0x47b   : > { %v10709_v60 = vld [vmem:[%s16757_s15 + $0x78] sm:$0xf0]  ;;  %v15510_v58 = vld [vmem:[%s16766_s10 + $0x3ac] sm:$0xf0] }
 0x47c   : > { %v15015_v62 = vld [vmem:[%s16757_s15 + $0x43c] sm:$0xf]  ;;  %v10712_v21 = vor.u32 %v14887_v57, %v10709_v60  ;;  %5794 = vmatpush.bf16.msrb.mxu3 %v12312_v3  ;;  %v13180_v57 = vor.u32 %v15514_v45, %v13179_v59  ;;  %v13035_v60 = vld [vmem:[%s16766_s10 + $0x2a0] sm:$0xf]  ;;  %v12780_v3 = vor.u32 %v15414_v55, %v12779_v54  ;;  %v15402_v41 = vld [vmem:[%s16766_s10 + $0x4c] sm:$0xf0]  ;;  %v5576_v54 = vpop.f32.mrf.mxu2  ;;  %v5589_v55 = vpop.f32.mrf.mxu3 }
 0x47d   : > { %v11221_v63 = vld [vmem:[%s16757_s15 + $0x478] sm:$0xf0]  ;;  %v12859_v45 = vld [vmem:[%s16766_s10 + $0x140] sm:$0xf] }
 0x47e   : > { %v15143_v7 = vld [vmem:[%s16757_s15 + $0x83c] sm:$0xf]  ;;  %v11224_v22 = vor.u32 %v15015_v62, %v11221_v63  ;;  %5756 = vmatpush.bf16.msrb.mxu0 %v10712_v21  ;;  %v15478_v62 = vld [vmem:[%s16766_s10 + $0x2ac] sm:$0xf0]  ;;  %v13163_v63 = vld [vmem:[%s16766_s10 + $0x3a0] sm:$0xf] }
 0x47f   : > { %v11733_v8 = vld [vmem:[%s16757_s15 + $0x878] sm:$0xf0]  ;;  %v13164_v14 = vor.u32 %v15510_v58, %v13163_v63  ;;  %v12732_v63 = vor.u32 %v15402_v41, %v12731_v39  ;;  %v15614_v41 = vld [vmem:[%s16766_s10 + $0x6ec] sm:$0xf0] }
 0x480   : > { %v15271_v12 = vld [vmem:[%s16757_s15 + $0xc3c] sm:$0xf]  ;;  %v11736_v26 = vor.u32 %v15143_v7, %v11733_v8  ;;  %5769 = vmatpush.bf16.msrb.mxu1 %v11224_v22  ;;  %v12908_v7 = vor.u32 %v15446_v10, %v12907_v42  ;;  %v15410_v8 = vld [vmem:[%s16766_s10 + $0x8c] sm:$0xf0]  ;;  %v12747_v22 = vld [vmem:[%s16766_s10 + $0x60] sm:$0xf] }
 0x481   : > { %v12245_v29 = vld [vmem:[%s16757_s15 + $0xc78] sm:$0xf0]  ;;  %5757 = vmatmul.bf16.vlgmr.msrb.gmra.mxu0 %v17282_v50  ;;  %v2388_v50 = vperm.slane %v18092_v40, 3  ;;  %v15498_v42 = vld [vmem:[%s16766_s10 + $0x34c] sm:$0xf0] }
 0x482   : > { %v12248_v27 = vor.u32 %v15271_v12, %v12245_v29  ;;  %5782 = vmatpush.bf16.msrb.mxu2 %v11736_v26  ;;  %8915 = vmatpush.bf16.msra.mxu0 %v12812_v33  ;;  %v13036_v12 = vor.u32 %v15478_v62, %v13035_v60  ;;  %v13019_v29 = vld [vmem:[%s16766_s10 + $0x280] sm:$0xf]  ;;  %v5552_v60 = vpop.f32.mrf.mxu0  ;;  %v5565_v62 = vpop.f32.mrf.mxu1 }
 0x483   : > { %5770 = vmatmul.bf16.vlgmr.msrb.gmra.mxu1 %v17286_v51  ;;  %v12763_v51 = vld [vmem:[%s16766_s10 + $0x80] sm:$0xf]  ;;  %v5551_v40 = vadd.f32 %v5550_v18, %v2388_v50  ;;  %v15546_v60 = vld [vmem:[%s16766_s10 + $0x4cc] sm:$0xf0] }
 0x484   : > { %5795 = vmatpush.bf16.msrb.mxu3 %v12248_v27  ;;  %8928 = vmatpush.bf16.msra.mxu1 %v12940_v34  ;;  %v12764_v20 = vor.u32 %v15410_v8, %v12763_v51  ;;  %v12875_v26 = vld [vmem:[%s16766_s10 + $0x160] sm:$0xf]  ;;  %v15438_v27 = vld [vmem:[%s16766_s10 + $0x16c] sm:$0xf0] }
 0x485   : > { %5783 = vmatmul.bf16.vlgmr.msrb.gmra.mxu2 %v17290_v52  ;;  %v12891_v52 = vld [vmem:[%s16766_s10 + $0x180] sm:$0xf]  ;;  %v5564_v34 = vadd.f32 %v5563_v19, %v5551_v40  ;;  %v12876_v56 = vor.u32 %v15438_v27, %v12875_v26  ;;  %v15394_v19 = vld [vmem:[%s16766_s10 + $0xc] sm:$0xf0]  ;;  %v5578_v26 = vpop.f32.mrf.mxu2  ;;  %v5591_v27 = vpop.f32.mrf.mxu3 }
 0x486   : > { %8941 = vmatpush.bf16.msra.mxu2 %v13068_v37  ;;  %8916 = vmatpush.bf16.msra.mxu0 %v12796_v46  ;;  %v12892_v21 = vor.u32 %v15442_v31, %v12891_v52  ;;  %v13003_v33 = vld [vmem:[%s16766_s10 + $0x260] sm:$0xf]  ;;  %v15502_v37 = vld [vmem:[%s16766_s10 + $0x36c] sm:$0xf0] }
 0x487   : > { %5796 = vmatmul.bf16.vlgmr.msrb.gmra.mxu3 %v17294_v53  ;;  %v15474_v53 = vld [vmem:[%s16766_s10 + $0x28c] sm:$0xf0]  ;;  %v13004_v0 = vor.u32 %v15470_v35, %v13003_v33  ;;  %v13132_v59 = vor.u32 %v15502_v37, %v13131_v36  ;;  %v5577_v10 = vadd.f32 %v5576_v54, %v5564_v34  ;;  %v12971_v52 = vld [vmem:[%s16766_s10 + $0x220] sm:$0xf] }
 0x488   : > { %8954 = vmatpush.bf16.msra.mxu3 %v13196_v4  ;;  %8929 = vmatpush.bf16.msra.mxu1 %v12924_v47  ;;  %v13020_v24 = vor.u32 %v15474_v53, %v13019_v29  ;;  %v12748_v4 = vor.u32 %v15406_v23, %v12747_v22  ;;  %v15434_v46 = vld [vmem:[%s16766_s10 + $0x14c] sm:$0xf0]  ;;  %v12987_v47 = vld [vmem:[%s16766_s10 + $0x240] sm:$0xf] }
 0x489   : > { %v12860_v58 = vor.u32 %v15434_v46, %v12859_v45  ;;  %v18341_v50 = vadd.f32 %v5589_v55, %v5577_v10  ;;  %v15462_v31 = vld [vmem:[%s16766_s10 + $0x22c] sm:$0xf0]  ;;  %v13099_v29 = vld [vmem:[%s16766_s10 + $0x320] sm:$0xf]  ;;  %v5801_v45 = vmax.f32 %v17614_v11, 0.0  ;;  %v5802_v46 = vmax.f32 %v17655_v6, 0.0 }
 0x48a   : > { %8942 = vmatpush.bf16.msra.mxu2 %v13052_v9  ;;  %8917 = vmatpush.bf16.msra.mxu0 %v12780_v3  ;;  %v15466_v9 = vld [vmem:[%s16766_s10 + $0x24c] sm:$0xf0]  ;;  %v12715_v3 = vld [vmem:[%s16766_s10 + $0x20] sm:$0xf]  ;;  %v5803_v55 = vmax.f32 %v17696_v28, 0.0 }
 0x48b   : > { %v12988_v51 = vor.u32 %v15466_v9, %v12987_v47  ;;  %v15494_v53 = vld [vmem:[%s16766_s10 + $0x32c] sm:$0xf0]  ;;  %v12827_v40 = vld [vmem:[%s16766_s10 + $0x100] sm:$0xf]  ;;  %v5804_v9 = vmax.f32 %v17767_v38, 0.0  ;;  %v18379_v28 = vpack.c.bf16 %v5802_v46, %v5802_v46 }
 0x48c   : > { %8955 = vmatpush.bf16.msra.mxu3 %v13180_v57  ;;  %8930 = vmatpush.bf16.msra.mxu1 %v12908_v7  ;;  %v13115_v57 = vld [vmem:[%s16766_s10 + $0x340] sm:$0xf]  ;;  %v15398_v7 = vld [vmem:[%s16766_s10 + $0x2c] sm:$0xf0]  ;;  %v13100_v22 = vor.u32 %v15494_v53, %v13099_v29  ;;  %v18381_v38 = vpack.c.bf16 %v5803_v55, %v5803_v55 }
 0x48d   : > { %v13116_v8 = vor.u32 %v15498_v42, %v13115_v57  ;;  %v12716_v17 = vor.u32 %v15398_v7, %v12715_v3  ;;  %v12955_v23 = vld [vmem:[%s16766_s10 + $0x200] sm:$0xf]  ;;  %v15490_v33 = vld [vmem:[%s16766_s10 + $0x30c] sm:$0xf0]  ;;  %v18385_v29 = vpack.c.bf16 %v5804_v9, %v5804_v9 }
 0x48e   : > { %8943 = vmatpush.bf16.msra.mxu2 %v13036_v12  ;;  %8918 = vmatpush.bf16.msra.mxu0 %v12764_v20  ;;  %v12843_v12 = vld [vmem:[%s16766_s10 + $0x120] sm:$0xf]  ;;  %v15426_v20 = vld [vmem:[%s16766_s10 + $0x10c] sm:$0xf0] }
 0x48f   : > { %v13323_v34 = vld [vmem:[%s16766_s10 + $0x4e0] sm:$0xf]  ;;  %v15550_v35 = vld [vmem:[%s16766_s10 + $0x4ec] sm:$0xf0]  ;;  %v12828_v39 = vor.u32 %v15426_v20, %v12827_v40 }
 0x490   : > { %8956 = vmatpush.bf16.msra.mxu3 %v13164_v14  ;;  %8931 = vmatpush.bf16.msra.mxu1 %v12892_v21  ;;  %v15430_v14 = vld [vmem:[%s16766_s10 + $0x12c] sm:$0xf0]  ;;  %v12972_v21 = vor.u32 %v15462_v31, %v12971_v52  ;;  %v13451_v36 = vld [vmem:[%s16766_s10 + $0x5e0] sm:$0xf]  ;;  %v13324_v57 = vor.u32 %v15550_v35, %v13323_v34 }
 0x491   : > { %v12844_v18 = vor.u32 %v15430_v14, %v12843_v12  ;;  %v15582_v37 = vld [vmem:[%s16766_s10 + $0x5ec] sm:$0xf0]  ;;  %v13307_v10 = vld [vmem:[%s16766_s10 + $0x4c0] sm:$0xf] }
 0x492   : > { %8944 = vmatpush.bf16.msra.mxu2 %v13020_v24  ;;  %8919 = vmatpush.bf16.msra.mxu0 %v12748_v4  ;;  %v15458_v24 = vld [vmem:[%s16766_s10 + $0x20c] sm:$0xf0]  ;;  %v13579_v4 = vld [vmem:[%s16766_s10 + $0x6e0] sm:$0xf]  ;;  %v13452_v42 = vor.u32 %v15582_v37, %v13451_v36  ;;  %v13308_v12 = vor.u32 %v15546_v60, %v13307_v10 }
 0x493   : > { %v12956_v47 = vor.u32 %v15458_v24, %v12955_v23  ;;  %v13580_v62 = vor.u32 %v15614_v41, %v13579_v4  ;;  %v13563_v6 = vld [vmem:[%s16766_s10 + $0x6c0] sm:$0xf]  ;;  %v15610_v3 = vld [vmem:[%s16766_s10 + $0x6cc] sm:$0xf0]  ;;  %v18398_v24 = vld [vmem:[%s16763_s17 + $0x8] sm:$0xff]  ;;  %v5602_v41 = vpop.f32.mrf.mxu0 }
 0x494   : > { %8957 = vmatpush.bf16.msra.mxu3 %v13148_v25  ;;  %8932 = vmatpush.bf16.msra.mxu1 %v12876_v56  ;;  %v13083_v25 = vld [vmem:[%s16766_s10 + $0x300] sm:$0xf]  ;;  %v12700_v56 = vor.u32 %v15394_v19, %v12699_v15  ;;  %v15542_v31 = vld [vmem:[%s16766_s10 + $0x4ac] sm:$0xf0]  ;;  %v13564_v53 = vor.u32 %v15610_v3, %v13563_v6 }
 0x495   : > { %v13084_v54 = vor.u32 %v15490_v33, %v13083_v25  ;;  %v13691_v7 = vld [vmem:[%s16766_s10 + $0x7c0] sm:$0xf]  ;;  %v15606_v40 = vld [vmem:[%s16766_s10 + $0x6ac] sm:$0xf0]  ;;  %v2389_v25 = vperm.slane %v18398_v24, 4 }
 0x496   : > { %8945 = vmatpush.bf16.msra.mxu2 %v13004_v0  ;;  %8920 = vmatpush.bf16.msra.mxu0 %v12732_v63  ;;  %v13707_v0 = vld [vmem:[%s16766_s10 + $0x7e0] sm:$0xf]  ;;  %v15538_v27 = vld [vmem:[%s16766_s10 + $0x48c] sm:$0xf0] }
 0x497   : > { %v13435_v63 = vld [vmem:[%s16766_s10 + $0x5c0] sm:$0xf]  ;;  %v15570_v36 = vld [vmem:[%s16766_s10 + $0x58c] sm:$0xf0] }
 0x498   : > { %8958 = vmatpush.bf16.msra.mxu3 %v13132_v59  ;;  %8933 = vmatpush.bf16.msra.mxu1 %v12860_v58  ;;  %v15646_v59 = vld [vmem:[%s16766_s10 + $0x7ec] sm:$0xf0]  ;;  %v13291_v52 = vld [vmem:[%s16766_s10 + $0x4a0] sm:$0xf] }
 0x499   : > { %v13708_v11 = vor.u32 %v15646_v59, %v13707_v0  ;;  %v15578_v58 = vld [vmem:[%s16766_s10 + $0x5cc] sm:$0xf0]  ;;  %v13547_v19 = vld [vmem:[%s16766_s10 + $0x6a0] sm:$0xf]  ;;  %v5615_v0 = vpop.f32.mrf.mxu1  ;;  %v5603_v59 = vadd.f32 %v5602_v41, %v2389_v25 }
 0x49a   : > { %8946 = vmatpush.bf16.msra.mxu2 %v12988_v51  ;;  %8921 = vmatpush.bf16.msra.mxu0 %v12716_v17  ;;  %v15642_v51 = vld [vmem:[%s16766_s10 + $0x7cc] sm:$0xf0]  ;;  %v13436_v14 = vor.u32 %v15578_v58, %v13435_v63  ;;  %v13419_v17 = vld [vmem:[%s16766_s10 + $0x5a0] sm:$0xf]  ;;  %v13548_v33 = vor.u32 %v15606_v40, %v13547_v19 }
 0x49b   : > { %v13692_v15 = vor.u32 %v15642_v51, %v13691_v7  ;;  %v13675_v20 = vld [vmem:[%s16766_s10 + $0x7a0] sm:$0xf]  ;;  %v15602_v4 = vld [vmem:[%s16766_s10 + $0x68c] sm:$0xf0]  ;;  %v5616_v60 = vadd.f32 %v5615_v0, %v5603_v59 }
 0x49c   : > { %8959 = vmatpush.bf16.msra.mxu3 %v13116_v8  ;;  %8934 = vmatpush.bf16.msra.mxu1 %v12844_v18  ;;  %v18377_v8 = vpack.c.bf16 %v5801_v45, %v5801_v45  ;;  %v15574_v18 = vld [vmem:[%s16766_s10 + $0x5ac] sm:$0xf0]  ;;  %v13275_v26 = vld [vmem:[%s16766_s10 + $0x480] sm:$0xf] }
 0x49d   : > { %v13420_v23 = vor.u32 %v15574_v18, %v13419_v17  ;;  %v13403_v35 = vld [vmem:[%s16766_s10 + $0x580] sm:$0xf]  ;;  %v13276_v45 = vor.u32 %v15538_v27, %v13275_v26  ;;  %v15630_v63 = vld [vmem:[%s16766_s10 + $0x76c] sm:$0xf0] }
 0x49e   : > { %8947 = vmatpush.bf16.msra.mxu2 %v12972_v21  ;;  %8922 = vmatpush.bf16.msra.mxu0 %v12700_v56  ;;  %v15638_v21 = vld [vmem:[%s16766_s10 + $0x7ac] sm:$0xf0]  ;;  %v13531_v37 = vld [vmem:[%s16766_s10 + $0x680] sm:$0xf]  ;;  %v13404_v46 = vor.u32 %v15570_v36, %v13403_v35 }
 0x49f   : > { %v13676_v34 = vor.u32 %v15638_v21, %v13675_v20  ;;  %v13659_v56 = vld [vmem:[%s16766_s10 + $0x780] sm:$0xf]  ;;  %v13532_v55 = vor.u32 %v15602_v4, %v13531_v37  ;;  %v15530_v7 = vld [vmem:[%s16766_s10 + $0x44c] sm:$0xf0]  ;;  %v5604_v20 = vpop.f32.mrf.mxu0 }
 0x4a0   : > { %8960 = vmatpush.bf16.msra.mxu3 %v13100_v22  ;;  %8935 = vmatpush.bf16.msra.mxu1 %v12828_v39  ;;  %v13292_v22 = vor.u32 %v15542_v31, %v13291_v52  ;;  %v15634_v39 = vld [vmem:[%s16766_s10 + $0x78c] sm:$0xf0]  ;;  %v13515_v10 = vld [vmem:[%s16766_s10 + $0x660] sm:$0xf] }
 0x4a1   : > { %8923 = vmatmul.bf16.vlgmr.msra.gmra.mxu0 %v18377_v8  ;;  %v13660_v9 = vor.u32 %v15634_v39, %v13659_v56  ;;  %v13243_v3 = vld [vmem:[%s16766_s10 + $0x440] sm:$0xf]  ;;  %v15562_v52 = vld [vmem:[%s16766_s10 + $0x54c] sm:$0xf0]  ;;  %v5617_v21 = vpop.f32.mrf.mxu1 }
 0x4a2   : > { %8948 = vmatpush.bf16.msra.mxu2 %v12956_v47  ;;  %8967 = vmatpush.bf16.msrb.mxu0 %v13324_v57  ;;  %v13259_v47 = vld [vmem:[%s16766_s10 + $0x460] sm:$0xf]  ;;  %v15594_v17 = vld [vmem:[%s16766_s10 + $0x64c] sm:$0xf0] }
 0x4a3   : > { %8936 = vmatmul.bf16.vlgmr.msra.gmra.mxu1 %v18379_v28  ;;  %v13387_v57 = vld [vmem:[%s16766_s10 + $0x560] sm:$0xf]  ;;  %v15626_v19 = vld [vmem:[%s16766_s10 + $0x74c] sm:$0xf0] }
 0x4a4   : > { %8961 = vmatpush.bf16.msra.mxu3 %v13084_v54  ;;  %8980 = vmatpush.bf16.msrb.mxu1 %v13452_v42  ;;  %v15534_v54 = vld [vmem:[%s16766_s10 + $0x46c] sm:$0xf0]  ;;  %v13499_v31 = vld [vmem:[%s16766_s10 + $0x640] sm:$0xf] }
 0x4a5   : > { %8949 = vmatmul.bf16.vlgmr.msra.gmra.mxu2 %v18381_v38  ;;  %v15566_v42 = vld [vmem:[%s16766_s10 + $0x56c] sm:$0xf0]  ;;  %v13260_v58 = vor.u32 %v15534_v54, %v13259_v47  ;;  %v13627_v18 = vld [vmem:[%s16766_s10 + $0x740] sm:$0xf] }
 0x4a6   : > { %8993 = vmatpush.bf16.msrb.mxu2 %v13580_v62  ;;  %8968 = vmatpush.bf16.msrb.mxu0 %v13308_v12  ;;  %v15598_v62 = vld [vmem:[%s16766_s10 + $0x66c] sm:$0xf0]  ;;  %v13388_v6 = vor.u32 %v15566_v42, %v13387_v57  ;;  %v13227_v25 = vld [vmem:[%s16766_s10 + $0x420] sm:$0xf] }
 0x4a7   : > { %8962 = vmatmul.bf16.vlgmr.msra.gmra.mxu3 %v18385_v29  ;;  %v13516_v51 = vor.u32 %v15598_v62, %v13515_v10  ;;  %v15526_v26 = vld [vmem:[%s16766_s10 + $0x42c] sm:$0xf0]  ;;  %v13355_v35 = vld [vmem:[%s16766_s10 + $0x520] sm:$0xf] }
 0x4a8   : > { %9006 = vmatpush.bf16.msrb.mxu3 %v13708_v11  ;;  %8981 = vmatpush.bf16.msrb.mxu1 %v13436_v14  ;;  %v13643_v11 = vld [vmem:[%s16766_s10 + $0x760] sm:$0xf]  ;;  %v15558_v36 = vld [vmem:[%s16766_s10 + $0x52c] sm:$0xf0]  ;;  %v13228_v0 = vor.u32 %v15526_v26, %v13227_v25 }
 0x4a9   : > { %v13644_v12 = vor.u32 %v15630_v63, %v13643_v11  ;;  %v13371_v14 = vld [vmem:[%s16766_s10 + $0x540] sm:$0xf]  ;;  %v15590_v4 = vld [vmem:[%s16766_s10 + $0x62c] sm:$0xf0]  ;;  %v13356_v59 = vor.u32 %v15558_v36, %v13355_v35 }
 0x4aa   : > { %8994 = vmatpush.bf16.msrb.mxu2 %v13564_v53  ;;  %8969 = vmatpush.bf16.msrb.mxu0 %v13292_v22  ;;  %v5628_v53 = vpop.f32.mrf.mxu2  ;;  %v13244_v22 = vor.u32 %v15530_v7, %v13243_v3  ;;  %v13483_v37 = vld [vmem:[%s16766_s10 + $0x620] sm:$0xf]  ;;  %v15622_v39 = vld [vmem:[%s16766_s10 + $0x72c] sm:$0xf0] }
 0x4ab   : > { %v5629_v40 = vadd.f32 %v5628_v53, %v5616_v60  ;;  %v13611_v56 = vld [vmem:[%s16766_s10 + $0x720] sm:$0xf]  ;;  %v15554_v47 = vld [vmem:[%s16766_s10 + $0x50c] sm:$0xf0]  ;;  %v13484_v54 = vor.u32 %v15590_v4, %v13483_v37  ;;  %v5806_v53 = vmax.f32 %v17912_v61, 0.0 }
 0x4ac   : > { %9007 = vmatpush.bf16.msrb.mxu3 %v13692_v15  ;;  %8982 = vmatpush.bf16.msrb.mxu1 %v13420_v23  ;;  %v5641_v15 = vpop.f32.mrf.mxu3  ;;  %v13372_v23 = vor.u32 %v15562_v52, %v13371_v14  ;;  %v13211_v41 = vld [vmem:[%s16766_s10 + $0x400] sm:$0xf]  ;;  %v15586_v57 = vld [vmem:[%s16766_s10 + $0x60c] sm:$0xf0] }
 0x4ad   : > { %v18427_v27 = vadd.f32 %v5641_v15, %v5629_v40  ;;  %v13595_v42 = vld [vmem:[%s16766_s10 + $0x700] sm:$0xf]  ;;  %v15618_v62 = vld [vmem:[%s16766_s10 + $0x70c] sm:$0xf0] }
 0x4ae   : > { %8995 = vmatpush.bf16.msrb.mxu2 %v13548_v33  ;;  %8970 = vmatpush.bf16.msrb.mxu0 %v13276_v45  ;;  %v13500_v33 = vor.u32 %v15594_v17, %v13499_v31  ;;  %v15522_v45 = vld [vmem:[%s16766_s10 + $0x40c] sm:$0xf0]  ;;  %v13835_v11 = vld [vmem:[%s16766_s10 + $0x8e0] sm:$0xf]  ;;  %v5805_v31 = vmax.f32 %v17838_v44, 0.0  ;;  %v13596_v17 = vor.u32 %v15618_v62, %v13595_v42 }
 0x4af   : > { %v15678_v63 = vld [vmem:[%s16766_s10 + $0x8ec] sm:$0xf0]  ;;  %v14091_v3 = vld [vmem:[%s16766_s10 + $0xae0] sm:$0xf]  ;;  %v13212_v7 = vor.u32 %v15522_v45, %v13211_v41 }
 0x4b0   : > { %9008 = vmatpush.bf16.msrb.mxu3 %v13676_v34  ;;  %8983 = vmatpush.bf16.msrb.mxu1 %v13404_v46  ;;  %v13628_v34 = vor.u32 %v15626_v19, %v13627_v18  ;;  %v13339_v46 = vld [vmem:[%s16766_s10 + $0x500] sm:$0xf]  ;;  %v15774_v52 = vld [vmem:[%s16766_s10 + $0xbec] sm:$0xf0]  ;;  %v5807_v18 = vmax.f32 %v17983_v32, 0.0  ;;  %v5808_v19 = vmax.f32 %v18054_v30, 0.0  ;;  %v13836_v40 = vor.u32 %v15678_v63, %v13835_v11 }
 0x4b1   : > { %v14219_v14 = vld [vmem:[%s16766_s10 + $0xbe0] sm:$0xf]  ;;  %v15706_v26 = vld [vmem:[%s16766_s10 + $0x9cc] sm:$0xf0]  ;;  %v18463_v36 = vpack.c.bf16 %v5805_v31, %v5805_v31  ;;  %v18465_v32 = vpack.c.bf16 %v5806_v53, %v5806_v53 }
 0x4b2   : > { %8996 = vmatpush.bf16.msrb.mxu2 %v13532_v55  ;;  %8971 = vmatpush.bf16.msrb.mxu0 %v13260_v58  ;;  %v13612_v55 = vor.u32 %v15622_v39, %v13611_v56  ;;  %v5630_v10 = vpop.f32.mrf.mxu2  ;;  %v13963_v58 = vld [vmem:[%s16766_s10 + $0x9e0] sm:$0xf]  ;;  %v14220_v44 = vor.u32 %v15774_v52, %v14219_v14  ;;  %v15770_v35 = vld [vmem:[%s16766_s10 + $0xbcc] sm:$0xf0]  ;;  %v18467_v30 = vpack.c.bf16 %v5807_v18, %v5807_v18  ;;  %v18493_v14 = vpop.f32.mrf.mxu1 }
 0x4b3   : > { %v13819_v21 = vld [vmem:[%s16766_s10 + $0x8c0] sm:$0xf]  ;;  %v15670_v39 = vld [vmem:[%s16766_s10 + $0x8ac] sm:$0xf0]  ;;  %v18471_v41 = vpack.c.bf16 %v5808_v19, %v5808_v19 }
 0x4b4   : > { %9009 = vmatpush.bf16.msrb.mxu3 %v13660_v9  ;;  %8984 = vmatpush.bf16.msrb.mxu1 %v13388_v6  ;;  %v13467_v9 = vld [vmem:[%s16766_s10 + $0x600] sm:$0xf]  ;;  %v5643_v60 = vpop.f32.mrf.mxu3  ;;  %v15710_v6 = vld [vmem:[%s16766_s10 + $0x9ec] sm:$0xf0] }
 0x4b5   : > { %v13468_v15 = vor.u32 %v15586_v57, %v13467_v9  ;;  %v13964_v20 = vor.u32 %v15710_v6, %v13963_v58  ;;  %v13947_v25 = vld [vmem:[%s16766_s10 + $0x9c0] sm:$0xf]  ;;  %v15766_v9 = vld [vmem:[%s16766_s10 + $0xbac] sm:$0xf0] }
 0x4b6   : > { %8997 = vmatpush.bf16.msrb.mxu2 %v13516_v51  ;;  %8972 = vmatpush.bf16.msrb.mxu0 %v13244_v22  ;;  %v13340_v51 = vor.u32 %v15554_v47, %v13339_v46  ;;  %v15674_v22 = vld [vmem:[%s16766_s10 + $0x8cc] sm:$0xf0]  ;;  %v14075_v61 = vld [vmem:[%s16766_s10 + $0xac0] sm:$0xf]  ;;  %v13948_v4 = vor.u32 %v15706_v26, %v13947_v25 }
 0x4b7   : > { %v13820_v37 = vor.u32 %v15674_v22, %v13819_v21  ;;  %v13803_v56 = vld [vmem:[%s16766_s10 + $0x8a0] sm:$0xf]  ;;  %v15702_v46 = vld [vmem:[%s16766_s10 + $0x9ac] sm:$0xf0] }
 0x4b8   : > { %9010 = vmatpush.bf16.msrb.mxu3 %v13644_v12  ;;  %8985 = vmatpush.bf16.msrb.mxu1 %v13372_v23  ;;  %v15742_v12 = vld [vmem:[%s16766_s10 + $0xaec] sm:$0xf0]  ;;  %v13931_v45 = vld [vmem:[%s16766_s10 + $0x9a0] sm:$0xf]  ;;  %v13804_v57 = vor.u32 %v15670_v39, %v13803_v56 }
 0x4b9   : > { %v14092_v23 = vor.u32 %v15742_v12, %v14091_v3  ;;  %v14059_v47 = vld [vmem:[%s16766_s10 + $0xaa0] sm:$0xf]  ;;  %v13932_v42 = vor.u32 %v15702_v46, %v13931_v45  ;;  %v15666_v60 = vld [vmem:[%s16766_s10 + $0x88c] sm:$0xf0]  ;;  %v18491_v12 = vpop.f32.mrf.mxu0 }
 0x4ba   : > { %8998 = vmatpush.bf16.msrb.mxu2 %v13500_v33  ;;  %8973 = vmatpush.bf16.msrb.mxu0 %v13228_v0  ;;  %v15738_v33 = vld [vmem:[%s16766_s10 + $0xacc] sm:$0xf0]  ;;  %v13787_v10 = vld [vmem:[%s16766_s10 + $0x880] sm:$0xf]  ;;  %v18508_v56 = vpop.f32.mrf.mxu2 }
 0x4bb   : > { %v14076_v0 = vor.u32 %v15738_v33, %v14075_v61  ;;  %v13915_v63 = vld [vmem:[%s16766_s10 + $0x980] sm:$0xf]  ;;  %v15698_v58 = vld [vmem:[%s16766_s10 + $0x98c] sm:$0xf0]  ;;  %v13788_v52 = vor.u32 %v15666_v60, %v13787_v10 }
 0x4bc   : > { %9011 = vmatpush.bf16.msrb.mxu3 %v13628_v34  ;;  %8986 = vmatpush.bf16.msrb.mxu1 %v13356_v59  ;;  %v14203_v34 = vld [vmem:[%s16766_s10 + $0xbc0] sm:$0xf]  ;;  %v15730_v3 = vld [vmem:[%s16766_s10 + $0xa8c] sm:$0xf0]  ;;  %v13916_v31 = vor.u32 %v15698_v58, %v13915_v63  ;;  %v18510_v39 = vpop.f32.mrf.mxu3 }
 0x4bd   : > { %v14204_v59 = vor.u32 %v15770_v35, %v14203_v34  ;;  %v14043_v6 = vld [vmem:[%s16766_s10 + $0xa80] sm:$0xf]  ;;  %v15726_v21 = vld [vmem:[%s16766_s10 + $0xa6c] sm:$0xf0] }
 0x4be   : > { %8999 = vmatpush.bf16.msrb.mxu2 %v13484_v54  ;;  %8974 = vmatpush.bf16.msrb.mxu0 %v13212_v7  ;;  %v15734_v54 = vld [vmem:[%s16766_s10 + $0xaac] sm:$0xf0]  ;;  %v14171_v7 = vld [vmem:[%s16766_s10 + $0xb80] sm:$0xf] }
 0x4bf   : > { %v14060_v62 = vor.u32 %v15734_v54, %v14059_v47  ;;  %v13771_v53 = vld [vmem:[%s16766_s10 + $0x860] sm:$0xf]  ;;  %v15658_v61 = vld [vmem:[%s16766_s10 + $0x84c] sm:$0xf0]  ;;  %v5669_v47 = vpop.f32.mrf.mxu1 }
 0x4c0   : > { %9012 = vmatpush.bf16.msrb.mxu3 %v13612_v55  ;;  %8987 = vmatpush.bf16.msrb.mxu1 %v13340_v51  ;;  %v14187_v55 = vld [vmem:[%s16766_s10 + $0xba0] sm:$0xf]  ;;  %v15762_v51 = vld [vmem:[%s16766_s10 + $0xb8c] sm:$0xf0]  ;;  %v5811_v47 = vmax.f32 %v18270_v43, 0.0 }
 0x4c1   : > { %8975 = vmatmul.bf16.vlgmr.msrb.gmra.mxu0 %v18463_v36  ;;  %v14188_v11 = vor.u32 %v15766_v9, %v14187_v55  ;;  %v14172_v18 = vor.u32 %v15762_v51, %v14171_v7  ;;  %v13899_v19 = vld [vmem:[%s16766_s10 + $0x960] sm:$0xf]  ;;  %v15754_v45 = vld [vmem:[%s16766_s10 + $0xb4c] sm:$0xf0]  ;;  %v5656_v46 = vpop.f32.mrf.mxu0 }
 0x4c2   : > { %9000 = vmatpush.bf16.msrb.mxu2 %v13468_v15  ;;  %9019 = vmatpush.bf16.msra.mxu0 %v13836_v40  ;;  %v15662_v15 = vld [vmem:[%s16766_s10 + $0x86c] sm:$0xf0]  ;;  %v14155_v22 = vld [vmem:[%s16766_s10 + $0xb60] sm:$0xf] }
 0x4c3   : > { %8988 = vmatmul.bf16.vlgmr.msrb.gmra.mxu1 %v18465_v32  ;;  %v15694_v40 = vld [vmem:[%s16766_s10 + $0x96c] sm:$0xf0]  ;;  %v13755_v26 = vld [vmem:[%s16766_s10 + $0x840] sm:$0xf] }
 0x4c4   : > { %9013 = vmatpush.bf16.msrb.mxu3 %v13596_v17  ;;  %9032 = vmatpush.bf16.msra.mxu1 %v13964_v20  ;;  %v14044_v17 = vor.u32 %v15730_v3, %v14043_v6  ;;  %v14027_v20 = vld [vmem:[%s16766_s10 + $0xa60] sm:$0xf]  ;;  %v13900_v25 = vor.u32 %v15694_v40, %v13899_v19  ;;  %v13756_v54 = vor.u32 %v15658_v61, %v13755_v26  ;;  %v15718_v63 = vld [vmem:[%s16766_s10 + $0xa2c] sm:$0xf0] }
 0x4c5   : > { %9001 = vmatmul.bf16.vlgmr.msrb.gmra.mxu2 %v18467_v30  ;;  %v14028_v33 = vor.u32 %v15726_v21, %v14027_v20  ;;  %v13883_v35 = vld [vmem:[%s16766_s10 + $0x940] sm:$0xf]  ;;  %v15750_v6 = vld [vmem:[%s16766_s10 + $0xb2c] sm:$0xf0]  ;;  %v5682_v20 = vpop.f32.mrf.mxu2  ;;  %v5695_v21 = vpop.f32.mrf.mxu3 }
 0x4c6   : > { %9045 = vmatpush.bf16.msra.mxu2 %v14092_v23  ;;  %9020 = vmatpush.bf16.msra.mxu0 %v13820_v37  ;;  %v15758_v23 = vld [vmem:[%s16766_s10 + $0xb6c] sm:$0xf0]  ;;  %v13739_v9 = vld [vmem:[%s16766_s10 + $0x820] sm:$0xf] }
 0x4c7   : > { %9014 = vmatmul.bf16.vlgmr.msrb.gmra.mxu3 %v18471_v41  ;;  %v14156_v34 = vor.u32 %v15758_v23, %v14155_v22  ;;  %v15690_v37 = vld [vmem:[%s16766_s10 + $0x94c] sm:$0xf0]  ;;  %v13867_v60 = vld [vmem:[%s16766_s10 + $0x920] sm:$0xf] }
 0x4c8   : > { %9058 = vmatpush.bf16.msra.mxu3 %v14220_v44  ;;  %9033 = vmatpush.bf16.msra.mxu1 %v13948_v4  ;;  %v13772_v44 = vor.u32 %v15662_v15, %v13771_v53  ;;  %v14011_v4 = vld [vmem:[%s16766_s10 + $0xa40] sm:$0xf]  ;;  %v13884_v55 = vor.u32 %v15690_v37, %v13883_v35  ;;  %v15682_v53 = vld [vmem:[%s16766_s10 + $0x90c] sm:$0xf0] }
 0x4c9   : > { %v14123_v58 = vld [vmem:[%s16766_s10 + $0xb20] sm:$0xf]  ;;  %v15714_v19 = vld [vmem:[%s16766_s10 + $0xa0c] sm:$0xf0] }
 0x4ca   : > { %9046 = vmatpush.bf16.msra.mxu2 %v14076_v0  ;;  %9021 = vmatpush.bf16.msra.mxu0 %v13804_v57  ;;  %v15722_v0 = vld [vmem:[%s16766_s10 + $0xa4c] sm:$0xf0]  ;;  %v13723_v3 = vld [vmem:[%s16766_s10 + $0x800] sm:$0xf] }
 0x4cb   : > { %v15654_v57 = vld [vmem:[%s16766_s10 + $0x82c] sm:$0xf0]  ;;  %v14107_v40 = vld [vmem:[%s16766_s10 + $0xb00] sm:$0xf] }
 0x4cc   : > { %9059 = vmatpush.bf16.msra.mxu3 %v14204_v59  ;;  %9034 = vmatpush.bf16.msra.mxu1 %v13932_v42  ;;  %v14139_v59 = vld [vmem:[%s16766_s10 + $0xb40] sm:$0xf]  ;;  %v14012_v42 = vor.u32 %v15722_v0, %v14011_v4  ;;  %v13740_v7 = vor.u32 %v15654_v57, %v13739_v9  ;;  %v15746_v22 = vld [vmem:[%s16766_s10 + $0xb0c] sm:$0xf0]  ;;  %v5809_v0 = vmax.f32 %v18128_v49, 0.0 }
 0x4cd   : > { %v14140_v10 = vor.u32 %v15754_v45, %v14139_v59  ;;  %v14347_v23 = vld [vmem:[%s16766_s10 + $0xce0] sm:$0xf]  ;;  %v15838_v26 = vld [vmem:[%s16766_s10 + $0xdec] sm:$0xf0]  ;;  %v5810_v59 = vmax.f32 %v18199_v16, 0.0  ;;  %v14108_v46 = vor.u32 %v15746_v22, %v14107_v40  ;;  %v2390_v22 = vperm.slane %v18398_v24, 5 }
 0x4ce   : > { %9047 = vmatpush.bf16.msra.mxu2 %v14060_v62  ;;  %9022 = vmatpush.bf16.msra.mxu0 %v13788_v52  ;;  %v15686_v62 = vld [vmem:[%s16766_s10 + $0x92c] sm:$0xf0]  ;;  %v14603_v61 = vld [vmem:[%s16766_s10 + $0xee0] sm:$0xf] }
 0x4cf   : > { %v13868_v51 = vor.u32 %v15686_v62, %v13867_v60  ;;  %v15650_v52 = vld [vmem:[%s16766_s10 + $0x80c] sm:$0xf0]  ;;  %v14731_v37 = vld [vmem:[%s16766_s10 + $0xfe0] sm:$0xf]  ;;  %v18553_v43 = vpack.c.bf16 %v5810_v59, %v5810_v59 }
 0x4d0   : > { %9060 = vmatpush.bf16.msra.mxu3 %v14188_v11  ;;  %9035 = vmatpush.bf16.msra.mxu1 %v13916_v31  ;;  %v13995_v11 = vld [vmem:[%s16766_s10 + $0xa20] sm:$0xf]  ;;  %v15870_v35 = vld [vmem:[%s16766_s10 + $0xeec] sm:$0xf0] }
 0x4d1   : > { %v13851_v31 = vld [vmem:[%s16766_s10 + $0x900] sm:$0xf]  ;;  %v13996_v15 = vor.u32 %v15718_v63, %v13995_v11  ;;  %v15902_v4 = vld [vmem:[%s16766_s10 + $0xfec] sm:$0xf0] }
 0x4d2   : > { %9048 = vmatpush.bf16.msra.mxu2 %v14044_v17  ;;  %9023 = vmatpush.bf16.msra.mxu0 %v13772_v44  ;;  %v14124_v17 = vor.u32 %v15750_v6, %v14123_v58  ;;  %v15806_v44 = vld [vmem:[%s16766_s10 + $0xcec] sm:$0xf0]  ;;  %v14331_v57 = vld [vmem:[%s16766_s10 + $0xcc0] sm:$0xf]  ;;  %v14732_v49 = vor.u32 %v15902_v4, %v14731_v37  ;;  %v18551_v6 = vpack.c.bf16 %v5809_v0, %v5809_v0 }
 0x4d3   : > { %v14459_v60 = vld [vmem:[%s16766_s10 + $0xdc0] sm:$0xf]  ;;  %v15834_v62 = vld [vmem:[%s16766_s10 + $0xdcc] sm:$0xf0] }
 0x4d4   : > { %9061 = vmatpush.bf16.msra.mxu3 %v14172_v18  ;;  %9036 = vmatpush.bf16.msra.mxu1 %v13900_v25  ;;  %v13979_v18 = vld [vmem:[%s16766_s10 + $0xa00] sm:$0xf]  ;;  %v15866_v11 = vld [vmem:[%s16766_s10 + $0xecc] sm:$0xf0] }
 0x4d5   : > { %v14475_v25 = vld [vmem:[%s16766_s10 + $0xde0] sm:$0xf]  ;;  %v13980_v45 = vor.u32 %v15714_v19, %v13979_v18  ;;  %v15898_v58 = vld [vmem:[%s16766_s10 + $0xfcc] sm:$0xf0] }
 0x4d6   : > { %9049 = vmatpush.bf16.msra.mxu2 %v14028_v33  ;;  %9024 = vmatpush.bf16.msra.mxu0 %v13756_v54  ;;  %v13724_v33 = vor.u32 %v15650_v52, %v13723_v3  ;;  %v5812_v54 = vmax.f32 %v18341_v50, 0.0  ;;  %v14476_v9 = vor.u32 %v15838_v26, %v14475_v25  ;;  %v14587_v16 = vld [vmem:[%s16766_s10 + $0xec0] sm:$0xf]  ;;  %v18555_v50 = vpack.c.bf16 %v5811_v47, %v5811_v47  ;;  %v15798_v52 = vld [vmem:[%s16766_s10 + $0xcac] sm:$0xf0] }
 0x4d7   : > { %v14715_v63 = vld [vmem:[%s16766_s10 + $0xfc0] sm:$0xf]  ;;  %v15830_v18 = vld [vmem:[%s16766_s10 + $0xdac] sm:$0xf0]  ;;  %v2391_v47 = vperm.slane %v18398_v24, 6 }
 0x4d8   : > { %9062 = vmatpush.bf16.msra.mxu3 %v14156_v34  ;;  %9037 = vmatpush.bf16.msra.mxu1 %v13884_v55  ;;  %v13852_v34 = vor.u32 %v15682_v53, %v13851_v31  ;;  %v14348_v55 = vor.u32 %v15806_v44, %v14347_v23  ;;  %v18559_v31 = vpack.c.bf16 %v5812_v54, %v5812_v54  ;;  %v14571_v19 = vld [vmem:[%s16766_s10 + $0xea0] sm:$0xf]  ;;  %v15862_v40 = vld [vmem:[%s16766_s10 + $0xeac] sm:$0xf0] }
 0x4d9   : > { %v14588_v53 = vor.u32 %v15866_v11, %v14587_v16  ;;  %v14699_v20 = vld [vmem:[%s16766_s10 + $0xfa0] sm:$0xf]  ;;  %v15894_v21 = vld [vmem:[%s16766_s10 + $0xfac] sm:$0xf0]  ;;  %v5655_v16 = vadd.f32 %v18491_v12, %v2390_v22 }
 0x4da   : > { %9050 = vmatpush.bf16.msra.mxu2 %v14012_v42  ;;  %9025 = vmatpush.bf16.msra.mxu0 %v13740_v7  ;;  %v15802_v42 = vld [vmem:[%s16766_s10 + $0xccc] sm:$0xf0]  ;;  %v14460_v7 = vor.u32 %v15834_v62, %v14459_v60  ;;  %v14299_v25 = vld [vmem:[%s16766_s10 + $0xc80] sm:$0xf] }
 0x4db   : > { %v14332_v3 = vor.u32 %v15802_v42, %v14331_v57  ;;  %v15794_v26 = vld [vmem:[%s16766_s10 + $0xc8c] sm:$0xf0]  ;;  %v14555_v37 = vld [vmem:[%s16766_s10 + $0xe80] sm:$0xf] }
 0x4dc   : > { %9063 = vmatpush.bf16.msra.mxu3 %v14140_v10  ;;  %9038 = vmatpush.bf16.msra.mxu1 %v13868_v51  ;;  %v14604_v10 = vor.u32 %v15870_v35, %v14603_v61  ;;  %v14315_v51 = vld [vmem:[%s16766_s10 + $0xca0] sm:$0xf]  ;;  %v14572_v61 = vor.u32 %v15862_v40, %v14571_v19  ;;  %v15826_v35 = vld [vmem:[%s16766_s10 + $0xd8c] sm:$0xf0]  ;;  %v14300_v54 = vor.u32 %v15794_v26, %v14299_v25 }
 0x4dd   : > { %v14316_v23 = vor.u32 %v15798_v52, %v14315_v51  ;;  %v15858_v4 = vld [vmem:[%s16766_s10 + $0xe8c] sm:$0xf0]  ;;  %v14683_v0 = vld [vmem:[%s16766_s10 + $0xf80] sm:$0xf]  ;;  %v5668_v40 = vadd.f32 %v18493_v14, %v5655_v16 }
 0x4de   : > { %9051 = vmatpush.bf16.msra.mxu2 %v13996_v15  ;;  %9026 = vmatpush.bf16.msra.mxu0 %v13724_v33  ;;  %v14716_v15 = vor.u32 %v15898_v58, %v14715_v63  ;;  %v14700_v33 = vor.u32 %v15894_v21, %v14699_v20  ;;  %v15890_v59 = vld [vmem:[%s16766_s10 + $0xf8c] sm:$0xf0]  ;;  %v14556_v42 = vor.u32 %v15858_v4, %v14555_v37  ;;  %v14539_v62 = vld [vmem:[%s16766_s10 + $0xe60] sm:$0xf] }
 0x4df   : > { %v15790_v57 = vld [vmem:[%s16766_s10 + $0xc6c] sm:$0xf0]  ;;  %v14667_v63 = vld [vmem:[%s16766_s10 + $0xf60] sm:$0xf] }
 0x4e0   : > { %9064 = vmatpush.bf16.msra.mxu3 %v14124_v17  ;;  %9039 = vmatpush.bf16.msra.mxu1 %v13852_v34  ;;  %v14443_v17 = vld [vmem:[%s16766_s10 + $0xda0] sm:$0xf]  ;;  %v15822_v60 = vld [vmem:[%s16766_s10 + $0xd6c] sm:$0xf0] }
 0x4e1   : > { %9027 = vmatmul.bf16.vlgmr.msra.gmra.mxu0 %v18551_v6  ;;  %v14444_v44 = vor.u32 %v15830_v18, %v14443_v17  ;;  %v14427_v34 = vld [vmem:[%s16766_s10 + $0xd80] sm:$0xf]  ;;  %v15854_v11 = vld [vmem:[%s16766_s10 + $0xe6c] sm:$0xf0]  ;;  %v5732_v20 = vpop.f32.mrf.mxu2 }
 0x4e2   : > { %9052 = vmatpush.bf16.msra.mxu2 %v13980_v45  ;;  %9071 = vmatpush.bf16.msrb.mxu0 %v14348_v55  ;;  %v5706_v45 = vpop.f32.mrf.mxu0  ;;  %v14428_v55 = vor.u32 %v15826_v35, %v14427_v34  ;;  %v15886_v58 = vld [vmem:[%s16766_s10 + $0xf6c] sm:$0xf0]  ;;  %v14267_v51 = vld [vmem:[%s16766_s10 + $0xc40] sm:$0xf] }
 0x4e3   : > { %9040 = vmatmul.bf16.vlgmr.msra.gmra.mxu1 %v18553_v43  ;;  %v15786_v52 = vld [vmem:[%s16766_s10 + $0xc4c] sm:$0xf0]  ;;  %v14668_v17 = vor.u32 %v15886_v58, %v14667_v63  ;;  %v14395_v12 = vld [vmem:[%s16766_s10 + $0xd40] sm:$0xf]  ;;  %v5745_v21 = vpop.f32.mrf.mxu3 }
 0x4e4   : > { %9065 = vmatpush.bf16.msra.mxu3 %v14108_v46  ;;  %9084 = vmatpush.bf16.msrb.mxu1 %v14476_v9  ;;  %v5719_v46 = vpop.f32.mrf.mxu1  ;;  %v14283_v9 = vld [vmem:[%s16766_s10 + $0xc60] sm:$0xf]  ;;  %v15818_v18 = vld [vmem:[%s16766_s10 + $0xd4c] sm:$0xf0] }
 0x4e5   : > { %9053 = vmatmul.bf16.vlgmr.msra.gmra.mxu2 %v18555_v50  ;;  %v14523_v19 = vld [vmem:[%s16766_s10 + $0xe40] sm:$0xf]  ;;  %v15850_v22 = vld [vmem:[%s16766_s10 + $0xe4c] sm:$0xf0]  ;;  %v14396_v14 = vor.u32 %v15818_v18, %v14395_v12  ;;  %v15452_v12 = vld [vmem:[%s16766_s10 + $0x1e4] sm:$0xf] }
 0x4e6   : > { %9097 = vmatpush.bf16.msrb.mxu2 %v14604_v10  ;;  %9072 = vmatpush.bf16.msrb.mxu0 %v14332_v3  ;;  %v14684_v10 = vor.u32 %v15890_v59, %v14683_v0  ;;  %v14284_v3 = vor.u32 %v15790_v57, %v14283_v9  ;;  %v14251_v34 = vld [vmem:[%s16766_s10 + $0xc20] sm:$0xf]  ;;  %v15782_v35 = vld [vmem:[%s16766_s10 + $0xc2c] sm:$0xf0]  ;;  %v14524_v4 = vor.u32 %v15850_v22, %v14523_v19  ;;  %v12941_v18 = vld [vmem:[%s16766_s10 + $0x1f0] sm:$0xf0] }
 0x4e7   : > { %9066 = vmatmul.bf16.vlgmr.msra.gmra.mxu3 %v18559_v31  ;;  %v14379_v59 = vld [vmem:[%s16766_s10 + $0xd20] sm:$0xf]  ;;  %v15842_v58 = vld [vmem:[%s16766_s10 + $0xe0c] sm:$0xf0]  ;;  %v15516_v22 = vld [vmem:[%s16766_s10 + $0x3e4] sm:$0xf] }
 0x4e8   : > { %9110 = vmatpush.bf16.msrb.mxu3 %v14732_v49  ;;  %9085 = vmatpush.bf16.msrb.mxu1 %v14460_v7  ;;  %v14411_v49 = vld [vmem:[%s16766_s10 + $0xd60] sm:$0xf] }
 0x4e9   : > { %v14412_v7 = vor.u32 %v15822_v60, %v14411_v49  ;;  %v14235_v57 = vld [vmem:[%s16766_s10 + $0xc00] sm:$0xf]  ;;  %v15810_v60 = vld [vmem:[%s16766_s10 + $0xd0c] sm:$0xf0] }
 0x4ea   : > { %9098 = vmatpush.bf16.msrb.mxu2 %v14588_v53  ;;  %9073 = vmatpush.bf16.msrb.mxu0 %v14316_v23  ;;  %v5707_v53 = vadd.f32 %v5706_v45, %v2391_v47  ;;  %v14651_v23 = vld [vmem:[%s16766_s10 + $0xf40] sm:$0xf]  ;;  %v5708_v25 = vpop.f32.mrf.mxu0  ;;  %v15814_v45 = vld [vmem:[%s16766_s10 + $0xd2c] sm:$0xf0] }
 0x4eb   : > { %v15846_v47 = vld [vmem:[%s16766_s10 + $0xe2c] sm:$0xf0]  ;;  %v14363_v49 = vld [vmem:[%s16766_s10 + $0xd00] sm:$0xf] }
 0x4ec   : > { %9111 = vmatpush.bf16.msrb.mxu3 %v14716_v15  ;;  %9086 = vmatpush.bf16.msrb.mxu1 %v14444_v44  ;;  %v14540_v15 = vor.u32 %v15854_v11, %v14539_v62  ;;  %v15882_v44 = vld [vmem:[%s16766_s10 + $0xf4c] sm:$0xf0]  ;;  %v5721_v26 = vpop.f32.mrf.mxu1  ;;  %v5720_v37 = vadd.f32 %v5719_v46, %v5707_v53  ;;  %v14252_v46 = vor.u32 %v15782_v35, %v14251_v34  ;;  %v14491_v63 = vld [vmem:[%s16766_s10 + $0xe00] sm:$0xf]  ;;  %v15420_v53 = vld [vmem:[%s16766_s10 + $0xe4] sm:$0xf] }
 0x4ed   : > { %v14652_v0 = vor.u32 %v15882_v44, %v14651_v23  ;;  %v13197_v23 = vld [vmem:[%s16766_s10 + $0x3f0] sm:$0xf0]  ;;  %v5813_v44 = vmax.f32 %v18427_v27, 0.0  ;;  %v15448_v35 = vld [vmem:[%s16766_s10 + $0x1c4] sm:$0xf] }
 0x4ee   : > { %9099 = vmatpush.bf16.msrb.mxu2 %v14572_v61  ;;  %9074 = vmatpush.bf16.msrb.mxu0 %v14300_v54  ;;  %v5681_v61 = vadd.f32 %v18508_v56, %v5668_v40  ;;  %v14507_v56 = vld [vmem:[%s16766_s10 + $0xe20] sm:$0xf]  ;;  %v5733_v9 = vadd.f32 %v5732_v20, %v5720_v37  ;;  %v14364_v40 = vor.u32 %v15810_v60, %v14363_v49  ;;  %v13069_v20 = vld [vmem:[%s16766_s10 + $0x2f0] sm:$0xf0]  ;;  %v15480_v27 = vld [vmem:[%s16766_s10 + $0x2c4] sm:$0xf] }
 0x4ef   : > { %v14635_v54 = vld [vmem:[%s16766_s10 + $0xf20] sm:$0xf]  ;;  %v14508_v16 = vor.u32 %v15846_v47, %v14507_v56  ;;  %v12797_v34 = vld [vmem:[%s16766_s10 + $0xd0] sm:$0xf0]  ;;  %v15512_v56 = vld [vmem:[%s16766_s10 + $0x3c4] sm:$0xf] }
 0x4f0   : > { %9112 = vmatpush.bf16.msrb.mxu3 %v14700_v33  ;;  %9087 = vmatpush.bf16.msrb.mxu1 %v14428_v55  ;;  %v14268_v33 = vor.u32 %v15786_v52, %v14267_v51  ;;  %v15878_v55 = vld [vmem:[%s16766_s10 + $0xf2c] sm:$0xf0]  ;;  %v5694_v62 = vadd.f32 %v18510_v39, %v5681_v61  ;;  %v5747_v51 = vpop.f32.mrf.mxu3  ;;  %v15484_v39 = vld [vmem:[%s16766_s10 + $0x2e4] sm:$0xf]  ;;  %v13181_v47 = vld [vmem:[%s16766_s10 + $0x3d0] sm:$0xf0] }
 0x4f1   : > { %v14636_v11 = vor.u32 %v15878_v55, %v14635_v54  ;;  %v15874_v52 = vld [vmem:[%s16766_s10 + $0xf0c] sm:$0xf0]  ;;  %v18634_v54 = vpack.c.bf16 %v5813_v44, %v5813_v44  ;;  %v13184_v60 = vor.u32 %v15512_v56, %v13181_v47  ;;  %v15400_v56 = vld [vmem:[%s16766_s10 + $0x44] sm:$0xf]  ;;  %v12733_v47 = vld [vmem:[%s16766_s10 + $0x50] sm:$0xf0] }
 0x4f2   : > { %9100 = vmatpush.bf16.msrb.mxu2 %v14556_v42  ;;  %9075 = vmatpush.bf16.msrb.mxu0 %v14284_v3  ;;  %v14380_v42 = vor.u32 %v15814_v45, %v14379_v59  ;;  %v14619_v3 = vld [vmem:[%s16766_s10 + $0xf00] sm:$0xf]  ;;  %v5814_v25 = vmax.f32 %v5694_v62, 0.0  ;;  %v12925_v59 = vld [vmem:[%s16766_s10 + $0x1d0] sm:$0xf0] }
 0x4f3   : > { %v14620_v26 = vor.u32 %v15874_v52, %v14619_v3  ;;  %v13053_v45 = vld [vmem:[%s16766_s10 + $0x2d0] sm:$0xf0]  ;;  %v15444_v62 = vld [vmem:[%s16766_s10 + $0x1a4] sm:$0xf]  ;;  %v2392_v52 = vperm.slane %v18398_v24, 7 }
 0x4f4   : > { %9113 = vmatpush.bf16.msrb.mxu3 %v14684_v10  ;;  %9088 = vmatpush.bf16.msrb.mxu1 %v14412_v7  ;;  %v15778_v10 = vld [vmem:[%s16766_s10 + $0xc0c] sm:$0xf0]  ;;  %v5734_v7 = vpop.f32.mrf.mxu2  ;;  %v18636_v55 = vpack.c.bf16 %v5814_v25, %v5814_v25  ;;  %v13056_v49 = vor.u32 %v15480_v27, %v13053_v45  ;;  %v13165_v3 = vld [vmem:[%s16766_s10 + $0x3b0] sm:$0xf0] }
 0x4f5   : > { %v14236_v19 = vor.u32 %v15778_v10, %v14235_v57  ;;  %v12928_v57 = vor.u32 %v15448_v35, %v12925_v59  ;;  %v12877_v35 = vld [vmem:[%s16766_s10 + $0x170] sm:$0xf0] }
 0x4f6   : > { %9101 = vmatpush.bf16.msrb.mxu2 %v14540_v15  ;;  %9076 = vmatpush.bf16.msrb.mxu0 %v14268_v33  ;;  %v12813_v15 = vld [vmem:[%s16766_s10 + $0xf0] sm:$0xf0]  ;;  %v12944_v33 = vor.u32 %v15452_v12, %v12941_v18  ;;  %v15440_v18 = vld [vmem:[%s16766_s10 + $0x184] sm:$0xf] }
 0x4f7   : > { %v12816_v61 = vor.u32 %v15420_v53, %v12813_v15  ;;  %v15408_v53 = vld [vmem:[%s16766_s10 + $0x84] sm:$0xf]  ;;  %v12765_v15 = vld [vmem:[%s16766_s10 + $0x90] sm:$0xf0] }
 0x4f8   : > { %9114 = vmatpush.bf16.msrb.mxu3 %v14668_v17  ;;  %9089 = vmatpush.bf16.msrb.mxu1 %v14396_v14  ;;  %v5746_v17 = vadd.f32 %v5745_v21, %v5733_v9  ;;  %v14492_v21 = vor.u32 %v15842_v58, %v14491_v63  ;;  %v15416_v14 = vld [vmem:[%s16766_s10 + $0xc4] sm:$0xf]  ;;  %v13037_v63 = vld [vmem:[%s16766_s10 + $0x2b0] sm:$0xf0]  ;;  %v12768_v44 = vor.u32 %v15408_v53, %v12765_v15 }
 0x4f9   : > { %v12800_v9 = vor.u32 %v15416_v14, %v12797_v34  ;;  %v15508_v58 = vld [vmem:[%s16766_s10 + $0x3a4] sm:$0xf]  ;;  %v13133_v59 = vld [vmem:[%s16766_s10 + $0x370] sm:$0xf0] }
 0x4fa   : > { %9102 = vmatpush.bf16.msrb.mxu2 %v14524_v4  ;;  %9077 = vmatpush.bf16.msrb.mxu0 %v14252_v46  ;;  %v5815_v37 = vmax.f32 %v5746_v17, 0.0  ;;  %v13072_v4 = vor.u32 %v15484_v39, %v13069_v20  ;;  %v15412_v46 = vld [vmem:[%s16766_s10 + $0xa4] sm:$0xf]  ;;  %v13168_v12 = vor.u32 %v15508_v58, %v13165_v3  ;;  %v12893_v39 = vld [vmem:[%s16766_s10 + $0x190] sm:$0xf0] }
 0x4fb   : > { %v15504_v20 = vld [vmem:[%s16766_s10 + $0x384] sm:$0xf]  ;;  %v12896_v25 = vor.u32 %v15440_v18, %v12893_v39  ;;  %v13117_v58 = vld [vmem:[%s16766_s10 + $0x350] sm:$0xf0] }
 0x4fc   : > { %9115 = vmatpush.bf16.msrb.mxu3 %v14652_v0  ;;  %9090 = vmatpush.bf16.msrb.mxu1 %v14380_v42  ;;  %v13200_v0 = vor.u32 %v15516_v22, %v13197_v23  ;;  %v12781_v42 = vld [vmem:[%s16766_s10 + $0xb0] sm:$0xf0]  ;;  %v18640_v10 = vpack.c.bf16 %v5815_v37, %v5815_v37  ;;  %v15436_v34 = vld [vmem:[%s16766_s10 + $0x164] sm:$0xf] }
 0x4fd   : > { %v12784_v7 = vor.u32 %v15412_v46, %v12781_v42  ;;  %v13149_v22 = vld [vmem:[%s16766_s10 + $0x390] sm:$0xf0]  ;;  %v15468_v37 = vld [vmem:[%s16766_s10 + $0x264] sm:$0xf]  ;;  %v12880_v45 = vor.u32 %v15436_v34, %v12877_v35 }
 0x4fe   : > { %9103 = vmatpush.bf16.msrb.mxu2 %v14508_v16  ;;  %9078 = vmatpush.bf16.msrb.mxu0 %v14236_v19  ;;  %v12909_v16 = vld [vmem:[%s16766_s10 + $0x1b0] sm:$0xf0]  ;;  %v15472_v19 = vld [vmem:[%s16766_s10 + $0x284] sm:$0xf]  ;;  %v5758_v23 = vpop.f32.mrf.mxu0  ;;  %v13152_v14 = vor.u32 %v15504_v20, %v13149_v22 }
 0x4ff   : > { %v12912_v51 = vor.u32 %v15444_v62, %v12909_v16  ;;  %v15432_v42 = vld [vmem:[%s16766_s10 + $0x144] sm:$0xf]  ;;  %v12973_v22 = vld [vmem:[%s16766_s10 + $0x230] sm:$0xf0] }
 0x500   : > { %9116 = vmatpush.bf16.msrb.mxu3 %v14636_v11  ;;  %9091 = vmatpush.bf16.msrb.mxu1 %v14364_v40  ;;  %v15476_v11 = vld [vmem:[%s16766_s10 + $0x2a4] sm:$0xf]  ;;  %v13021_v40 = vld [vmem:[%s16766_s10 + $0x290] sm:$0xf0]  ;;  %v5771_v24 = vpop.f32.mrf.mxu1 }
 0x501   : > { %9079 = vmatmul.bf16.vlgmr.msrb.gmra.mxu0 %v18634_v54  ;;  %v13040_v17 = vor.u32 %v15476_v11, %v13037_v63  ;;  %v12989_v11 = vld [vmem:[%s16766_s10 + $0x250] sm:$0xf0]  ;;  %v15496_v63 = vld [vmem:[%s16766_s10 + $0x344] sm:$0xf] }
 0x502   : > { %9104 = vmatpush.bf16.msrb.mxu2 %v14492_v21  ;;  %9123 = vmatpush.bf16.msra.mxu0 %v12816_v61  ;;  %v15404_v21 = vld [vmem:[%s16766_s10 + $0x64] sm:$0xf]  ;;  %v5759_v61 = vadd.f32 %v5758_v23, %v2392_v52  ;;  %v12736_v52 = vor.u32 %v15400_v56, %v12733_v47  ;;  %v13120_v39 = vor.u32 %v15496_v63, %v13117_v58  ;;  %v13085_v56 = vld [vmem:[%s16766_s10 + $0x310] sm:$0xf0] }
 0x503   : > { %9092 = vmatmul.bf16.vlgmr.msrb.gmra.mxu1 %v18636_v55  ;;  %v15396_v15 = vld [vmem:[%s16766_s10 + $0x24] sm:$0xf] }
 0x504   : > { %9117 = vmatpush.bf16.msrb.mxu3 %v14620_v26  ;;  %9136 = vmatpush.bf16.msra.mxu1 %v12944_v33  ;;  %v12749_v26 = vld [vmem:[%s16766_s10 + $0x70] sm:$0xf0]  ;;  %v13024_v33 = vor.u32 %v15472_v19, %v13021_v40  ;;  %v15428_v19 = vld [vmem:[%s16766_s10 + $0x124] sm:$0xf] }
 0x505   : > { %9105 = vmatmul.bf16.vlgmr.msrb.gmra.mxu2 %v18640_v10  ;;  %v12752_v27 = vor.u32 %v15404_v21, %v12749_v26  ;;  %v12845_v40 = vld [vmem:[%s16766_s10 + $0x130] sm:$0xf0]  ;;  %v15460_v20 = vld [vmem:[%s16766_s10 + $0x224] sm:$0xf] }
 0x506   : > { %9149 = vmatpush.bf16.msra.mxu2 %v13072_v4  ;;  %9124 = vmatpush.bf16.msra.mxu0 %v12800_v9  ;;  %v13005_v4 = vld [vmem:[%s16766_s10 + $0x270] sm:$0xf0]  ;;  %v5772_v9 = vadd.f32 %v5771_v24, %v5759_v61  ;;  %v15492_v23 = vld [vmem:[%s16766_s10 + $0x324] sm:$0xf]  ;;  %v12848_v26 = vor.u32 %v15428_v19, %v12845_v40  ;;  %v12976_v35 = vor.u32 %v15460_v20, %v12973_v22 }
 0x507   : > { %v13101_v24 = vld [vmem:[%s16766_s10 + $0x330] sm:$0xf0]  ;;  %v15548_v47 = vld [vmem:[%s16766_s10 + $0x4e4] sm:$0xf] }
 0x508   : > { %9162 = vmatpush.bf16.msra.mxu3 %v13200_v0  ;;  %9137 = vmatpush.bf16.msra.mxu1 %v12928_v57  ;;  %v15500_v0 = vld [vmem:[%s16766_s10 + $0x364] sm:$0xf]  ;;  %v13008_v57 = vor.u32 %v15468_v37, %v13005_v4  ;;  %v5784_v62 = vpop.f32.mrf.mxu2  ;;  %v12701_v61 = vld [vmem:[%s16766_s10 + $0x10] sm:$0xf0]  ;;  %v13104_v37 = vor.u32 %v15492_v23, %v13101_v24 }
 0x509   : > { %v13136_v46 = vor.u32 %v15500_v0, %v13133_v59  ;;  %v5785_v3 = vadd.f32 %v5784_v62, %v5772_v9  ;;  %v15456_v4 = vld [vmem:[%s16766_s10 + $0x204] sm:$0xf]  ;;  %v12957_v0 = vld [vmem:[%s16766_s10 + $0x210] sm:$0xf0] }
 0x50a   : > { %9150 = vmatpush.bf16.msra.mxu2 %v13056_v49  ;;  %9125 = vmatpush.bf16.msra.mxu0 %v12784_v7  ;;  %v12861_v49 = vld [vmem:[%s16766_s10 + $0x150] sm:$0xf0]  ;;  %v5797_v16 = vpop.f32.mrf.mxu3  ;;  %v5760_v7 = vpop.f32.mrf.mxu0  ;;  %v15488_v59 = vld [vmem:[%s16766_s10 + $0x304] sm:$0xf]  ;;  %v12960_v63 = vor.u32 %v15456_v4, %v12957_v0 }
 0x50b   : > { %v12864_v53 = vor.u32 %v15432_v42, %v12861_v49  ;;  %v13325_v9 = vld [vmem:[%s16766_s10 + $0x4f0] sm:$0xf0]  ;;  %v15612_v42 = vld [vmem:[%s16766_s10 + $0x6e4] sm:$0xf]  ;;  %v13088_v58 = vor.u32 %v15488_v59, %v13085_v56 }
 0x50c   : > { %9163 = vmatpush.bf16.msra.mxu3 %v13184_v60  ;;  %9138 = vmatpush.bf16.msra.mxu1 %v12912_v51  ;;  %v15464_v60 = vld [vmem:[%s16766_s10 + $0x244] sm:$0xf]  ;;  %v5773_v51 = vpop.f32.mrf.mxu1  ;;  %v13581_v62 = vld [vmem:[%s16766_s10 + $0x6f0] sm:$0xf0] }
 0x50d   : > { %v12992_v18 = vor.u32 %v15464_v60, %v12989_v11  ;;  %v13709_v11 = vld [vmem:[%s16766_s10 + $0x7f0] sm:$0xf0]  ;;  %v15544_v51 = vld [vmem:[%s16766_s10 + $0x4c4] sm:$0xf] }
 0x50e   : > { %9151 = vmatpush.bf16.msra.mxu2 %v13040_v17  ;;  %9126 = vmatpush.bf16.msra.mxu0 %v12768_v44  ;;  %v12717_v17 = vld [vmem:[%s16766_s10 + $0x30] sm:$0xf0]  ;;  %v15640_v19 = vld [vmem:[%s16766_s10 + $0x7c4] sm:$0xf] }
 0x50f   : > { %v12720_v21 = vor.u32 %v15396_v15, %v12717_v17  ;;  %v15576_v17 = vld [vmem:[%s16766_s10 + $0x5c4] sm:$0xf]  ;;  %v13693_v40 = vld [vmem:[%s16766_s10 + $0x7d0] sm:$0xf0] }
 0x510   : > { %9164 = vmatpush.bf16.msra.mxu3 %v13168_v12  ;;  %9139 = vmatpush.bf16.msra.mxu1 %v12896_v25  ;;  %v5798_v12 = vadd.f32 %v5797_v16, %v5785_v3  ;;  %v15392_v25 = vld [vmem:[%s16766_s10 + $0x4] sm:$0xf]  ;;  %v13328_v3 = vor.u32 %v15548_v47, %v13325_v9  ;;  %v13293_v24 = vld [vmem:[%s16766_s10 + $0x4b0] sm:$0xf0] }
 0x511   : > { %v12704_v49 = vor.u32 %v15392_v25, %v12701_v61  ;;  %v15644_v16 = vld [vmem:[%s16766_s10 + $0x7e4] sm:$0xf] }
 0x512   : > { %9152 = vmatpush.bf16.msra.mxu2 %v13024_v33  ;;  %9127 = vmatpush.bf16.msra.mxu0 %v12752_v27  ;;  %v5816_v44 = vmax.f32 %v5798_v12, 0.0  ;;  %v15424_v33 = vld [vmem:[%s16766_s10 + $0x104] sm:$0xf]  ;;  %v5786_v27 = vpop.f32.mrf.mxu2  ;;  %v13712_v15 = vor.u32 %v15644_v16, %v13709_v11  ;;  %v13437_v12 = vld [vmem:[%s16766_s10 + $0x5d0] sm:$0xf0] }
 0x513   : > { %v13440_v22 = vor.u32 %v15576_v17, %v13437_v12  ;;  %v15540_v23 = vld [vmem:[%s16766_s10 + $0x4a4] sm:$0xf] }
 0x514   : > { %9165 = vmatpush.bf16.msra.mxu3 %v13152_v14  ;;  %9140 = vmatpush.bf16.msra.mxu1 %v12880_v45  ;;  %v12829_v14 = vld [vmem:[%s16766_s10 + $0x110] sm:$0xf0]  ;;  %v18688_v34 = vpack.c.bf16 %v5816_v44, %v5816_v44  ;;  %v5799_v45 = vpop.f32.mrf.mxu3  ;;  %v15572_v44 = vld [vmem:[%s16766_s10 + $0x5a4] sm:$0xf]  ;;  %v13296_v4 = vor.u32 %v15540_v23, %v13293_v24 }
 0x515   : > { %v12832_v60 = vor.u32 %v15424_v33, %v12829_v14  ;;  %v15604_v61 = vld [vmem:[%s16766_s10 + $0x6a4] sm:$0xf]  ;;  %v13549_v14 = vld [vmem:[%s16766_s10 + $0x6b0] sm:$0xf0] }
 0x516   : > { %9153 = vmatpush.bf16.msra.mxu2 %v13008_v57  ;;  %9128 = vmatpush.bf16.msra.mxu0 %v12736_v52  ;;  %v15580_v57 = vld [vmem:[%s16766_s10 + $0x5e4] sm:$0xf]  ;;  %v13309_v52 = vld [vmem:[%s16766_s10 + $0x4d0] sm:$0xf0]  ;;  %v13552_v56 = vor.u32 %v15604_v61, %v13549_v14 }
 0x517   : > { %9118 = vmatmul.bf16.vlgmr.msrb.gmra.mxu3 %v18688_v34  ;;  %v13312_v20 = vor.u32 %v15544_v51, %v13309_v52  ;;  %v6345_v33 = vld [vmem:[%s16773_s1] sm:$0xf]  ;;  %v13277_v45 = vld [vmem:[%s16766_s10 + $0x490] sm:$0xf0] }
 0x518   : > { %9166 = vmatpush.bf16.msra.mxu3 %v13136_v46  ;;  %9141 = vmatpush.bf16.msra.mxu1 %v12864_v53  ;;  %v13453_v46 = vld [vmem:[%s16766_s10 + $0x5f0] sm:$0xf0]  ;;  %v13584_v53 = vor.u32 %v15612_v42, %v13581_v62  ;;  %v6347_v59 = vperm.slane %v6345_v33, 0  ;;  %v15536_v27 = vld [vmem:[%s16766_s10 + $0x484] sm:$0xf] }
 0x519   : > { %v13456_v7 = vor.u32 %v15580_v57, %v13453_v46  ;;  %v15568_v9 = vld [vmem:[%s16766_s10 + $0x584] sm:$0xf]  ;;  %v13405_v57 = vld [vmem:[%s16766_s10 + $0x590] sm:$0xf0] }
 0x51a   : > { %9154 = vmatpush.bf16.msra.mxu2 %v12992_v18  ;;  %9129 = vmatpush.bf16.msra.mxu0 %v12720_v21  ;;  %v15608_v18 = vld [vmem:[%s16766_s10 + $0x6c4] sm:$0xf]  ;;  %v13696_v21 = vor.u32 %v15640_v19, %v13693_v40  ;;  %v13533_v42 = vld [vmem:[%s16766_s10 + $0x690] sm:$0xf0] }
 0x51b   : > { %v15600_v46 = vld [vmem:[%s16766_s10 + $0x684] sm:$0xf]  ;;  %v13645_v19 = vld [vmem:[%s16766_s10 + $0x770] sm:$0xf0] }
 0x51c   : > { %9167 = vmatpush.bf16.msra.mxu3 %v13120_v39  ;;  %9142 = vmatpush.bf16.msra.mxu1 %v12848_v26  ;;  %v13565_v39 = vld [vmem:[%s16766_s10 + $0x6d0] sm:$0xf0]  ;;  %v13536_v51 = vor.u32 %v15600_v46, %v13533_v42  ;;  %v15596_v17 = vld [vmem:[%s16766_s10 + $0x664] sm:$0xf] }
 0x51d   : > { %v13568_v25 = vor.u32 %v15608_v18, %v13565_v39  ;;  %v13421_v26 = vld [vmem:[%s16766_s10 + $0x5b0] sm:$0xf0]  ;;  %v15628_v39 = vld [vmem:[%s16766_s10 + $0x764] sm:$0xf] }
 0x51e   : > { %9155 = vmatpush.bf16.msra.mxu2 %v12976_v35  ;;  %9130 = vmatpush.bf16.msra.mxu0 %v12704_v49  ;;  %v15636_v35 = vld [vmem:[%s16766_s10 + $0x7a4] sm:$0xf]  ;;  %v13424_v0 = vor.u32 %v15572_v44, %v13421_v26  ;;  %v8924_v62 = vpop.f32.mrf.mxu0  ;;  %v13517_v18 = vld [vmem:[%s16766_s10 + $0x670] sm:$0xf0]  ;;  %v13648_v44 = vor.u32 %v15628_v39, %v13645_v19 }
 0x51f   : > { %v15632_v49 = vld [vmem:[%s16766_s10 + $0x784] sm:$0xf]  ;;  %v8925_v11 = vadd.f32 %v8924_v62, %v6347_v59  ;;  %v13245_v23 = vld [vmem:[%s16766_s10 + $0x450] sm:$0xf0]  ;;  %v13520_v24 = vor.u32 %v15596_v17, %v13517_v18 }
 0x520   : > { %9168 = vmatpush.bf16.msra.mxu3 %v13104_v37  ;;  %9143 = vmatpush.bf16.msra.mxu1 %v12832_v60  ;;  %v13677_v37 = vld [vmem:[%s16766_s10 + $0x7b0] sm:$0xf0]  ;;  %v8937_v16 = vpop.f32.mrf.mxu1  ;;  %v15592_v26 = vld [vmem:[%s16766_s10 + $0x644] sm:$0xf] }
 0x521   : > { %9131 = vmatmul.bf16.vlgmr.msra.gmra.mxu0 %v18377_v8  ;;  %v13680_v47 = vor.u32 %v15636_v35, %v13677_v37  ;;  %v13661_v60 = vld [vmem:[%s16766_s10 + $0x790] sm:$0xf0]  ;;  %v8938_v12 = vadd.f32 %v8937_v16, %v8925_v11  ;;  %v15624_v35 = vld [vmem:[%s16766_s10 + $0x744] sm:$0xf] }
 0x522   : > { %9156 = vmatpush.bf16.msra.mxu2 %v12960_v63  ;;  %9175 = vmatpush.bf16.msrb.mxu0 %v13328_v3  ;;  %v13280_v63 = vor.u32 %v15536_v27, %v13277_v45  ;;  %v15532_v3 = vld [vmem:[%s16766_s10 + $0x464] sm:$0xf]  ;;  %v13664_v52 = vor.u32 %v15632_v49, %v13661_v60  ;;  %v13501_v14 = vld [vmem:[%s16766_s10 + $0x650] sm:$0xf0] }
 0x523   : > { %9144 = vmatmul.bf16.vlgmr.msra.gmra.mxu1 %v18379_v28  ;;  %v13629_v37 = vld [vmem:[%s16766_s10 + $0x750] sm:$0xf0]  ;;  %v15556_v42 = vld [vmem:[%s16766_s10 + $0x524] sm:$0xf] }
 0x524   : > { %9169 = vmatpush.bf16.msra.mxu3 %v13088_v58  ;;  %9188 = vmatpush.bf16.msrb.mxu1 %v13456_v7  ;;  %v13408_v58 = vor.u32 %v15568_v9, %v13405_v57  ;;  %v13261_v7 = vld [vmem:[%s16766_s10 + $0x470] sm:$0xf0]  ;;  %v13504_v57 = vor.u32 %v15592_v26, %v13501_v14  ;;  %v13632_v46 = vor.u32 %v15624_v35, %v13629_v37  ;;  %v15588_v60 = vld [vmem:[%s16766_s10 + $0x624] sm:$0xf] }
 0x525   : > { %9157 = vmatmul.bf16.vlgmr.msra.gmra.mxu2 %v18381_v38  ;;  %v13264_v40 = vor.u32 %v15532_v3, %v13261_v7  ;;  %v13357_v49 = vld [vmem:[%s16766_s10 + $0x530] sm:$0xf0]  ;;  %v15620_v16 = vld [vmem:[%s16766_s10 + $0x724] sm:$0xf] }
 0x526   : > { %9201 = vmatpush.bf16.msrb.mxu2 %v13584_v53  ;;  %9176 = vmatpush.bf16.msrb.mxu0 %v13312_v20  ;;  %v15564_v53 = vld [vmem:[%s16766_s10 + $0x564] sm:$0xf]  ;;  %v13485_v62 = vld [vmem:[%s16766_s10 + $0x630] sm:$0xf0]  ;;  %v13360_v3 = vor.u32 %v15556_v42, %v13357_v49 }
 0x527   : > { %9170 = vmatmul.bf16.vlgmr.msra.gmra.mxu3 %v18385_v29  ;;  %v13613_v11 = vld [vmem:[%s16766_s10 + $0x730] sm:$0xf0]  ;;  %v15584_v17 = vld [vmem:[%s16766_s10 + $0x604] sm:$0xf] }
 0x528   : > { %9214 = vmatpush.bf16.msrb.mxu3 %v13712_v15  ;;  %9189 = vmatpush.bf16.msrb.mxu1 %v13440_v22  ;;  %v13389_v15 = vld [vmem:[%s16766_s10 + $0x570] sm:$0xf0]  ;;  %v15528_v22 = vld [vmem:[%s16766_s10 + $0x444] sm:$0xf]  ;;  %v8950_v61 = vpop.f32.mrf.mxu2  ;;  %v8939_v59 = vpop.f32.mrf.mxu1 }
 0x529   : > { %v13392_v20 = vor.u32 %v15564_v53, %v13389_v15  ;;  %v13248_v27 = vor.u32 %v15528_v22, %v13245_v23  ;;  %v13213_v7 = vld [vmem:[%s16766_s10 + $0x410] sm:$0xf0]  ;;  %v13488_v53 = vor.u32 %v15588_v60, %v13485_v62  ;;  %v13616_v15 = vor.u32 %v15620_v16, %v13613_v11  ;;  %v15616_v18 = vld [vmem:[%s16766_s10 + $0x704] sm:$0xf] }
 0x52a   : > { %9202 = vmatpush.bf16.msrb.mxu2 %v13568_v25  ;;  %9177 = vmatpush.bf16.msrb.mxu0 %v13296_v4  ;;  %v15560_v25 = vld [vmem:[%s16766_s10 + $0x544] sm:$0xf]  ;;  %v8963_v33 = vpop.f32.mrf.mxu3  ;;  %v8951_v4 = vadd.f32 %v8950_v61, %v8938_v12  ;;  %v13469_v12 = vld [vmem:[%s16766_s10 + $0x610] sm:$0xf0] }
 0x52b   : > { %v13837_v22 = vld [vmem:[%s16766_s10 + $0x8f0] sm:$0xf0]  ;;  %v15708_v23 = vld [vmem:[%s16766_s10 + $0x9e4] sm:$0xf]  ;;  %v13472_v14 = vor.u32 %v15584_v17, %v13469_v12 }
 0x52c   : > { %9215 = vmatpush.bf16.msrb.mxu3 %v13696_v21  ;;  %9190 = vmatpush.bf16.msrb.mxu1 %v13424_v0  ;;  %v13373_v21 = vld [vmem:[%s16766_s10 + $0x550] sm:$0xf0]  ;;  %v8926_v0 = vpop.f32.mrf.mxu0  ;;  %v18750_v9 = vadd.f32 %v8963_v33, %v8951_v4  ;;  %v15772_v61 = vld [vmem:[%s16766_s10 + $0xbe4] sm:$0xf] }
 0x52d   : > { %v13376_v45 = vor.u32 %v15560_v25, %v13373_v21  ;;  %v14093_v26 = vld [vmem:[%s16766_s10 + $0xaf0] sm:$0xf0]  ;;  %v15672_v0 = vld [vmem:[%s16766_s10 + $0x8c4] sm:$0xf] }
 0x52e   : > { %9203 = vmatpush.bf16.msrb.mxu2 %v13552_v56  ;;  %9178 = vmatpush.bf16.msrb.mxu0 %v13280_v63  ;;  %v15524_v56 = vld [vmem:[%s16766_s10 + $0x424] sm:$0xf]  ;;  %v14221_v33 = vld [vmem:[%s16766_s10 + $0xbf0] sm:$0xf0] }
 0x52f   : > { %v15520_v63 = vld [vmem:[%s16766_s10 + $0x404] sm:$0xf]  ;;  %v13821_v59 = vld [vmem:[%s16766_s10 + $0x8d0] sm:$0xf0] }
 0x530   : > { %9216 = vmatpush.bf16.msrb.mxu3 %v13680_v47  ;;  %9191 = vmatpush.bf16.msrb.mxu1 %v13408_v58  ;;  %v13229_v47 = vld [vmem:[%s16766_s10 + $0x430] sm:$0xf0]  ;;  %v8952_v39 = vpop.f32.mrf.mxu2  ;;  %v13216_v25 = vor.u32 %v15520_v63, %v13213_v7  ;;  %v15768_v42 = vld [vmem:[%s16766_s10 + $0xbc4] sm:$0xf]  ;;  %v13824_v60 = vor.u32 %v15672_v0, %v13821_v59 }
 0x531   : > { %v13232_v58 = vor.u32 %v15524_v56, %v13229_v47  ;;  %v15704_v56 = vld [vmem:[%s16766_s10 + $0x9c4] sm:$0xf]  ;;  %v13949_v47 = vld [vmem:[%s16766_s10 + $0x9d0] sm:$0xf0] }
 0x532   : > { %9204 = vmatpush.bf16.msrb.mxu2 %v13536_v51  ;;  %9179 = vmatpush.bf16.msrb.mxu0 %v13264_v40  ;;  %v15552_v51 = vld [vmem:[%s16766_s10 + $0x504] sm:$0xf]  ;;  %v8965_v19 = vpop.f32.mrf.mxu3  ;;  %v13597_v40 = vld [vmem:[%s16766_s10 + $0x710] sm:$0xf0]  ;;  %v13952_v62 = vor.u32 %v15704_v56, %v13949_v47 }
 0x533   : > { %v13600_v35 = vor.u32 %v15616_v18, %v13597_v40  ;;  %v14205_v49 = vld [vmem:[%s16766_s10 + $0xbd0] sm:$0xf0]  ;;  %v15668_v16 = vld [vmem:[%s16766_s10 + $0x8a4] sm:$0xf] }
 0x534   : > { %9217 = vmatpush.bf16.msrb.mxu3 %v13664_v52  ;;  %9192 = vmatpush.bf16.msrb.mxu1 %v13392_v20  ;;  %v13341_v52 = vld [vmem:[%s16766_s10 + $0x510] sm:$0xf0]  ;;  %v15676_v20 = vld [vmem:[%s16766_s10 + $0x8e4] sm:$0xf] }
 0x535   : > { %v13344_v21 = vor.u32 %v15552_v51, %v13341_v52  ;;  %v13840_v37 = vor.u32 %v15676_v20, %v13837_v22  ;;  %v13805_v11 = vld [vmem:[%s16766_s10 + $0x8b0] sm:$0xf0]  ;;  %v15732_v51 = vld [vmem:[%s16766_s10 + $0xaa4] sm:$0xf] }
 0x536   : > { %9205 = vmatpush.bf16.msrb.mxu2 %v13520_v24  ;;  %9180 = vmatpush.bf16.msrb.mxu0 %v13248_v27  ;;  %v13965_v24 = vld [vmem:[%s16766_s10 + $0x9f0] sm:$0xf0]  ;;  %v13808_v17 = vor.u32 %v15668_v16, %v13805_v11  ;;  %v15664_v18 = vld [vmem:[%s16766_s10 + $0x884] sm:$0xf] }
 0x537   : > { %v13968_v4 = vor.u32 %v15708_v23, %v13965_v24  ;;  %v13933_v7 = vld [vmem:[%s16766_s10 + $0x9b0] sm:$0xf0]  ;;  %v15696_v20 = vld [vmem:[%s16766_s10 + $0x984] sm:$0xf] }
 0x538   : > { %9218 = vmatpush.bf16.msrb.mxu3 %v13648_v44  ;;  %9193 = vmatpush.bf16.msrb.mxu1 %v13376_v45  ;;  %v15740_v44 = vld [vmem:[%s16766_s10 + $0xae4] sm:$0xf]  ;;  %v14224_v45 = vor.u32 %v15772_v61, %v14221_v33  ;;  %v14061_v52 = vld [vmem:[%s16766_s10 + $0xab0] sm:$0xf0] }
 0x539   : > { %v14096_v27 = vor.u32 %v15740_v44, %v14093_v26  ;;  %v13789_v39 = vld [vmem:[%s16766_s10 + $0x890] sm:$0xf0]  ;;  %v14064_v19 = vor.u32 %v15732_v51, %v14061_v52  ;;  %v15728_v23 = vld [vmem:[%s16766_s10 + $0xa84] sm:$0xf] }
 0x53a   : > { %9206 = vmatpush.bf16.msrb.mxu2 %v13504_v57  ;;  %9181 = vmatpush.bf16.msrb.mxu0 %v13232_v58  ;;  %v15736_v57 = vld [vmem:[%s16766_s10 + $0xac4] sm:$0xf]  ;;  %v14208_v58 = vor.u32 %v15768_v42, %v14205_v49  ;;  %v13917_v22 = vld [vmem:[%s16766_s10 + $0x990] sm:$0xf0]  ;;  %v13792_v33 = vor.u32 %v15664_v18, %v13789_v39 }
 0x53b   : > { %v14045_v24 = vld [vmem:[%s16766_s10 + $0xa90] sm:$0xf0]  ;;  %v15760_v44 = vld [vmem:[%s16766_s10 + $0xb84] sm:$0xf] }
 0x53c   : > { %9219 = vmatpush.bf16.msrb.mxu3 %v13632_v46  ;;  %9194 = vmatpush.bf16.msrb.mxu1 %v13360_v3  ;;  %v14077_v46 = vld [vmem:[%s16766_s10 + $0xad0] sm:$0xf0]  ;;  %v15700_v3 = vld [vmem:[%s16766_s10 + $0x9a4] sm:$0xf] }
 0x53d   : > { %v14080_v63 = vor.u32 %v15736_v57, %v14077_v46  ;;  %v13936_v12 = vor.u32 %v15700_v3, %v13933_v7  ;;  %v15692_v59 = vld [vmem:[%s16766_s10 + $0x964] sm:$0xf]  ;;  %v14029_v47 = vld [vmem:[%s16766_s10 + $0xa70] sm:$0xf0] }
 0x53e   : > { %9207 = vmatpush.bf16.msrb.mxu2 %v13488_v53  ;;  %9182 = vmatpush.bf16.msrb.mxu0 %v13216_v25  ;;  %v15764_v53 = vld [vmem:[%s16766_s10 + $0xba4] sm:$0xf]  ;;  %v14173_v25 = vld [vmem:[%s16766_s10 + $0xb90] sm:$0xf0] }
 0x53f   : > { %v14176_v0 = vor.u32 %v15760_v44, %v14173_v25  ;;  %v15756_v57 = vld [vmem:[%s16766_s10 + $0xb64] sm:$0xf]  ;;  %v14013_v51 = vld [vmem:[%s16766_s10 + $0xa50] sm:$0xf0] }
 0x540   : > { %9220 = vmatpush.bf16.msrb.mxu3 %v13616_v15  ;;  %9195 = vmatpush.bf16.msrb.mxu1 %v13344_v21  ;;  %v14189_v15 = vld [vmem:[%s16766_s10 + $0xbb0] sm:$0xf0]  ;;  %v8976_v21 = vpop.f32.mrf.mxu0  ;;  %v8989_v26 = vpop.f32.mrf.mxu1  ;;  %v15656_v49 = vld [vmem:[%s16766_s10 + $0x844] sm:$0xf] }
 0x541   : > { %9183 = vmatmul.bf16.vlgmr.msrb.gmra.mxu0 %v18463_v36  ;;  %v14192_v40 = vor.u32 %v15764_v53, %v14189_v15  ;;  %v8977_v61 = vadd.f32 %v8976_v21, %v18750_v9  ;;  %v14157_v9 = vld [vmem:[%s16766_s10 + $0xb70] sm:$0xf0]  ;;  %v15688_v11 = vld [vmem:[%s16766_s10 + $0x944] sm:$0xf] }
 0x542   : > { %9208 = vmatpush.bf16.msrb.mxu2 %v13472_v14  ;;  %9227 = vmatpush.bf16.msra.mxu0 %v13840_v37  ;;  %v13920_v14 = vor.u32 %v15696_v20, %v13917_v22  ;;  %v13773_v37 = vld [vmem:[%s16766_s10 + $0x870] sm:$0xf0]  ;;  %v14160_v16 = vor.u32 %v15756_v57, %v14157_v9  ;;  %v15752_v52 = vld [vmem:[%s16766_s10 + $0xb44] sm:$0xf] }
 0x543   : > { %9196 = vmatmul.bf16.vlgmr.msrb.gmra.mxu1 %v18465_v32  ;;  %v8990_v56 = vadd.f32 %v8989_v26, %v8977_v61  ;;  %v14141_v53 = vld [vmem:[%s16766_s10 + $0xb50] sm:$0xf0]  ;;  %v15716_v25 = vld [vmem:[%s16766_s10 + $0xa24] sm:$0xf] }
 0x544   : > { %9221 = vmatpush.bf16.msrb.mxu3 %v13600_v35  ;;  %9240 = vmatpush.bf16.msra.mxu1 %v13968_v4  ;;  %v15660_v35 = vld [vmem:[%s16766_s10 + $0x864] sm:$0xf]  ;;  %v14048_v4 = vor.u32 %v15728_v23, %v14045_v24  ;;  %v14144_v23 = vor.u32 %v15752_v52, %v14141_v53  ;;  %v13869_v44 = vld [vmem:[%s16766_s10 + $0x930] sm:$0xf0] }
 0x545   : > { %9209 = vmatmul.bf16.vlgmr.msrb.gmra.mxu2 %v18467_v30  ;;  %v13776_v46 = vor.u32 %v15660_v35, %v13773_v37  ;;  %v15684_v24 = vld [vmem:[%s16766_s10 + $0x924] sm:$0xf]  ;;  %v13997_v21 = vld [vmem:[%s16766_s10 + $0xa30] sm:$0xf0] }
 0x546   : > { %9253 = vmatpush.bf16.msra.mxu2 %v14096_v27  ;;  %9228 = vmatpush.bf16.msra.mxu0 %v13824_v60  ;;  %v13901_v27 = vld [vmem:[%s16766_s10 + $0x970] sm:$0xf0]  ;;  %v15748_v26 = vld [vmem:[%s16766_s10 + $0xb24] sm:$0xf]  ;;  %v13872_v35 = vor.u32 %v15684_v24, %v13869_v44 }
 0x547   : > { %9222 = vmatmul.bf16.vlgmr.msrb.gmra.mxu3 %v18471_v41  ;;  %v13904_v42 = vor.u32 %v15692_v59, %v13901_v27  ;;  %v13757_v60 = vld [vmem:[%s16766_s10 + $0x850] sm:$0xf0]  ;;  %v14000_v59 = vor.u32 %v15716_v25, %v13997_v21  ;;  %v15896_v24 = vld [vmem:[%s16766_s10 + $0xfc4] sm:$0xf] }
 0x548   : > { %9266 = vmatpush.bf16.msra.mxu3 %v14224_v45  ;;  %9241 = vmatpush.bf16.msra.mxu1 %v13952_v62  ;;  %v15724_v45 = vld [vmem:[%s16766_s10 + $0xa64] sm:$0xf]  ;;  %v9002_v3 = vpop.f32.mrf.mxu2  ;;  %v13760_v18 = vor.u32 %v15656_v49, %v13757_v60  ;;  %v14125_v61 = vld [vmem:[%s16766_s10 + $0xb30] sm:$0xf0] }
 0x549   : > { %v14032_v62 = vor.u32 %v15724_v45, %v14029_v47  ;;  %v9003_v15 = vadd.f32 %v9002_v3, %v8990_v56  ;;  %v13725_v37 = vld [vmem:[%s16766_s10 + $0x810] sm:$0xf0]  ;;  %v14128_v27 = vor.u32 %v15748_v26, %v14125_v61  ;;  %v15712_v45 = vld [vmem:[%s16766_s10 + $0xa04] sm:$0xf] }
 0x54a   : > { %9254 = vmatpush.bf16.msra.mxu2 %v14080_v63  ;;  %9229 = vmatpush.bf16.msra.mxu0 %v13808_v17  ;;  %v13885_v63 = vld [vmem:[%s16766_s10 + $0x950] sm:$0xf0]  ;;  %v9015_v7 = vpop.f32.mrf.mxu3  ;;  %v8978_v17 = vpop.f32.mrf.mxu0  ;;  %v15744_v47 = vld [vmem:[%s16766_s10 + $0xb04] sm:$0xf] }
 0x54b   : > { %v13888_v39 = vor.u32 %v15688_v11, %v13885_v63  ;;  %v18821_v20 = vadd.f32 %v9015_v7, %v9003_v15  ;;  %v13981_v56 = vld [vmem:[%s16766_s10 + $0xa10] sm:$0xf0]  ;;  %v15836_v60 = vld [vmem:[%s16766_s10 + $0xde4] sm:$0xf] }
 0x54c   : > { %9267 = vmatpush.bf16.msra.mxu3 %v14208_v58  ;;  %9242 = vmatpush.bf16.msra.mxu1 %v13936_v12  ;;  %v15720_v58 = vld [vmem:[%s16766_s10 + $0xa44] sm:$0xf]  ;;  %v8991_v12 = vpop.f32.mrf.mxu1  ;;  %v14349_v49 = vld [vmem:[%s16766_s10 + $0xcf0] sm:$0xf0] }
 0x54d   : > { %v14016_v22 = vor.u32 %v15720_v58, %v14013_v51  ;;  %v14605_v58 = vld [vmem:[%s16766_s10 + $0xef0] sm:$0xf0]  ;;  %v15900_v3 = vld [vmem:[%s16766_s10 + $0xfe4] sm:$0xf]  ;;  %v13984_v51 = vor.u32 %v15712_v45, %v13981_v56 }
 0x54e   : > { %9255 = vmatpush.bf16.msra.mxu2 %v14064_v19  ;;  %9230 = vmatpush.bf16.msra.mxu0 %v13792_v33  ;;  %v15652_v19 = vld [vmem:[%s16766_s10 + $0x824] sm:$0xf]  ;;  %v14733_v7 = vld [vmem:[%s16766_s10 + $0xff0] sm:$0xf0] }
 0x54f   : > { %v15648_v33 = vld [vmem:[%s16766_s10 + $0x804] sm:$0xf]  ;;  %v14333_v12 = vld [vmem:[%s16766_s10 + $0xcd0] sm:$0xf0] }
 0x550   : > { %9268 = vmatpush.bf16.msra.mxu3 %v14192_v40  ;;  %9243 = vmatpush.bf16.msra.mxu1 %v13920_v14  ;;  %v13741_v40 = vld [vmem:[%s16766_s10 + $0x830] sm:$0xf0]  ;;  %v9004_v57 = vpop.f32.mrf.mxu2  ;;  %v13728_v11 = vor.u32 %v15648_v33, %v13725_v37  ;;  %v15800_v17 = vld [vmem:[%s16766_s10 + $0xcc4] sm:$0xf] }
 0x551   : > { %v13744_v14 = vor.u32 %v15652_v19, %v13741_v40  ;;  %v15832_v19 = vld [vmem:[%s16766_s10 + $0xdc4] sm:$0xf]  ;;  %v14461_v40 = vld [vmem:[%s16766_s10 + $0xdd0] sm:$0xf0]  ;;  %v14336_v25 = vor.u32 %v15800_v17, %v14333_v12 }
 0x552   : > { %9256 = vmatpush.bf16.msra.mxu2 %v14048_v4  ;;  %9231 = vmatpush.bf16.msra.mxu0 %v13776_v46  ;;  %v15680_v4 = vld [vmem:[%s16766_s10 + $0x904] sm:$0xf]  ;;  %v9017_v9 = vpop.f32.mrf.mxu3  ;;  %v14109_v46 = vld [vmem:[%s16766_s10 + $0xb10] sm:$0xf0]  ;;  %v14464_v21 = vor.u32 %v15832_v19, %v14461_v40 }
 0x553   : > { %v14112_v52 = vor.u32 %v15744_v47, %v14109_v46  ;;  %v14717_v44 = vld [vmem:[%s16766_s10 + $0xfd0] sm:$0xf0]  ;;  %v15796_v26 = vld [vmem:[%s16766_s10 + $0xca4] sm:$0xf] }
 0x554   : > { %9269 = vmatpush.bf16.msra.mxu3 %v14176_v0  ;;  %9244 = vmatpush.bf16.msra.mxu1 %v13904_v42  ;;  %v13853_v0 = vld [vmem:[%s16766_s10 + $0x910] sm:$0xf0]  ;;  %v15804_v42 = vld [vmem:[%s16766_s10 + $0xce4] sm:$0xf] }
 0x555   : > { %v13856_v63 = vor.u32 %v15680_v4, %v13853_v0  ;;  %v14352_v53 = vor.u32 %v15804_v42, %v14349_v49  ;;  %v14317_v61 = vld [vmem:[%s16766_s10 + $0xcb0] sm:$0xf0]  ;;  %v15860_v4 = vld [vmem:[%s16766_s10 + $0xea4] sm:$0xf] }
 0x556   : > { %9257 = vmatpush.bf16.msra.mxu2 %v14032_v62  ;;  %9232 = vmatpush.bf16.msra.mxu0 %v13760_v18  ;;  %v14477_v62 = vld [vmem:[%s16766_s10 + $0xdf0] sm:$0xf0]  ;;  %v14320_v45 = vor.u32 %v15796_v26, %v14317_v61  ;;  %v15792_v47 = vld [vmem:[%s16766_s10 + $0xc84] sm:$0xf] }
 0x557   : > { %v14480_v15 = vor.u32 %v15836_v60, %v14477_v62  ;;  %v14445_v37 = vld [vmem:[%s16766_s10 + $0xdb0] sm:$0xf0]  ;;  %v15824_v42 = vld [vmem:[%s16766_s10 + $0xd84] sm:$0xf] }
 0x558   : > { %9270 = vmatpush.bf16.msra.mxu3 %v14160_v16  ;;  %9245 = vmatpush.bf16.msra.mxu1 %v13888_v39  ;;  %v15868_v16 = vld [vmem:[%s16766_s10 + $0xee4] sm:$0xf]  ;;  %v14736_v39 = vor.u32 %v15900_v3, %v14733_v7  ;;  %v14573_v0 = vld [vmem:[%s16766_s10 + $0xeb0] sm:$0xf0] }
 0x559   : > { %v14608_v18 = vor.u32 %v15868_v16, %v14605_v58  ;;  %v14301_v57 = vld [vmem:[%s16766_s10 + $0xc90] sm:$0xf0]  ;;  %v14576_v9 = vor.u32 %v15860_v4, %v14573_v0  ;;  %v15856_v60 = vld [vmem:[%s16766_s10 + $0xe84] sm:$0xf] }
 0x55a   : > { %9258 = vmatpush.bf16.msra.mxu2 %v14016_v22  ;;  %9233 = vmatpush.bf16.msra.mxu0 %v13744_v14  ;;  %v15864_v22 = vld [vmem:[%s16766_s10 + $0xec4] sm:$0xf]  ;;  %v14720_v14 = vor.u32 %v15896_v24, %v14717_v44  ;;  %v14429_v49 = vld [vmem:[%s16766_s10 + $0xd90] sm:$0xf0]  ;;  %v14304_v7 = vor.u32 %v15792_v47, %v14301_v57 }
 0x55b   : > { %v14557_v62 = vld [vmem:[%s16766_s10 + $0xe90] sm:$0xf0]  ;;  %v15888_v16 = vld [vmem:[%s16766_s10 + $0xf84] sm:$0xf] }
 0x55c   : > { %9271 = vmatpush.bf16.msra.mxu3 %v14144_v23  ;;  %9246 = vmatpush.bf16.msra.mxu1 %v13872_v35  ;;  %v14589_v23 = vld [vmem:[%s16766_s10 + $0xed0] sm:$0xf0]  ;;  %v15828_v35 = vld [vmem:[%s16766_s10 + $0xda4] sm:$0xf] }
 0x55d   : > { %v14592_v33 = vor.u32 %v15864_v22, %v14589_v23  ;;  %v14448_v56 = vor.u32 %v15828_v35, %v14445_v37  ;;  %v15820_v12 = vld [vmem:[%s16766_s10 + $0xd64] sm:$0xf]  ;;  %v14541_v40 = vld [vmem:[%s16766_s10 + $0xe70] sm:$0xf0] }
 0x55e   : > { %9259 = vmatpush.bf16.msra.mxu2 %v14000_v59  ;;  %9234 = vmatpush.bf16.msra.mxu0 %v13728_v11  ;;  %v15892_v59 = vld [vmem:[%s16766_s10 + $0xfa4] sm:$0xf]  ;;  %v14685_v11 = vld [vmem:[%s16766_s10 + $0xf90] sm:$0xf0] }
 0x55f   : > { %v14688_v17 = vor.u32 %v15888_v16, %v14685_v11  ;;  %v15884_v22 = vld [vmem:[%s16766_s10 + $0xf64] sm:$0xf]  ;;  %v14525_v4 = vld [vmem:[%s16766_s10 + $0xe50] sm:$0xf0] }
 0x560   : > { %9272 = vmatpush.bf16.msra.mxu3 %v14128_v27  ;;  %9247 = vmatpush.bf16.msra.mxu1 %v13856_v63  ;;  %v14701_v27 = vld [vmem:[%s16766_s10 + $0xfb0] sm:$0xf0]  ;;  %v9028_v63 = vpop.f32.mrf.mxu0  ;;  %v9041_v58 = vpop.f32.mrf.mxu1  ;;  %v15784_v44 = vld [vmem:[%s16766_s10 + $0xc44] sm:$0xf] }
 0x561   : > { %9235 = vmatmul.bf16.vlgmr.msra.gmra.mxu0 %v18551_v6  ;;  %v14704_v46 = vor.u32 %v15892_v59, %v14701_v27  ;;  %v9029_v3 = vadd.f32 %v9028_v63, %v18821_v20  ;;  %v14669_v20 = vld [vmem:[%s16766_s10 + $0xf70] sm:$0xf0]  ;;  %v15816_v61 = vld [vmem:[%s16766_s10 + $0xd44] sm:$0xf] }
 0x562   : > { %9260 = vmatpush.bf16.msra.mxu2 %v13984_v51  ;;  %9279 = vmatpush.bf16.msrb.mxu0 %v14352_v53  ;;  %v14432_v51 = vor.u32 %v15824_v42, %v14429_v49  ;;  %v14285_v53 = vld [vmem:[%s16766_s10 + $0xc70] sm:$0xf0]  ;;  %v14672_v26 = vor.u32 %v15884_v22, %v14669_v20  ;;  %v15880_v0 = vld [vmem:[%s16766_s10 + $0xf44] sm:$0xf] }
 0x563   : > { %9248 = vmatmul.bf16.vlgmr.msra.gmra.mxu1 %v18553_v43  ;;  %v9042_v19 = vadd.f32 %v9041_v58, %v9029_v3  ;;  %v14653_v59 = vld [vmem:[%s16766_s10 + $0xf50] sm:$0xf0]  ;;  %v15844_v11 = vld [vmem:[%s16766_s10 + $0xe24] sm:$0xf] }
 0x564   : > { %9273 = vmatpush.bf16.msra.mxu3 %v14112_v52  ;;  %9292 = vmatpush.bf16.msrb.mxu1 %v14480_v15  ;;  %v15788_v52 = vld [vmem:[%s16766_s10 + $0xc64] sm:$0xf]  ;;  %v14560_v15 = vor.u32 %v15856_v60, %v14557_v62  ;;  %v14656_v60 = vor.u32 %v15880_v0, %v14653_v59  ;;  %v14381_v16 = vld [vmem:[%s16766_s10 + $0xd30] sm:$0xf0] }
 0x565   : > { %9261 = vmatmul.bf16.vlgmr.msra.gmra.mxu2 %v18555_v50  ;;  %v14288_v23 = vor.u32 %v15788_v52, %v14285_v53  ;;  %v15812_v62 = vld [vmem:[%s16766_s10 + $0xd24] sm:$0xf]  ;;  %v14509_v63 = vld [vmem:[%s16766_s10 + $0xe30] sm:$0xf0] }
 0x566   : > { %9305 = vmatpush.bf16.msrb.mxu2 %v14608_v18  ;;  %9280 = vmatpush.bf16.msrb.mxu0 %v14336_v25  ;;  %v14413_v18 = vld [vmem:[%s16766_s10 + $0xd70] sm:$0xf0]  ;;  %v15876_v58 = vld [vmem:[%s16766_s10 + $0xf24] sm:$0xf]  ;;  %v14384_v52 = vor.u32 %v15812_v62, %v14381_v16  ;;  %v13187_v62 = vld [vmem:[%s16766_s10 + $0x3c8] sm:$0xf] }
 0x567   : > { %9274 = vmatmul.bf16.vlgmr.msra.gmra.mxu3 %v18559_v31  ;;  %v14416_v24 = vor.u32 %v15820_v12, %v14413_v18  ;;  %v14269_v25 = vld [vmem:[%s16766_s10 + $0xc50] sm:$0xf0]  ;;  %v14512_v12 = vor.u32 %v15844_v11, %v14509_v63  ;;  %v15515_v16 = vld [vmem:[%s16766_s10 + $0x3d4] sm:$0xf0] }
 0x568   : > { %9318 = vmatpush.bf16.msrb.mxu3 %v14736_v39  ;;  %9293 = vmatpush.bf16.msrb.mxu1 %v14464_v21  ;;  %v15852_v39 = vld [vmem:[%s16766_s10 + $0xe64] sm:$0xf]  ;;  %v9054_v35 = vpop.f32.mrf.mxu2  ;;  %v14272_v47 = vor.u32 %v15784_v44, %v14269_v25  ;;  %v14637_v3 = vld [vmem:[%s16766_s10 + $0xf30] sm:$0xf0]  ;;  %v15423_v44 = vld [vmem:[%s16766_s10 + $0xf4] sm:$0xf0] }
 0x569   : > { %v14544_v21 = vor.u32 %v15852_v39, %v14541_v40  ;;  %v9055_v27 = vadd.f32 %v9054_v35, %v9042_v19  ;;  %v14237_v53 = vld [vmem:[%s16766_s10 + $0xc10] sm:$0xf0]  ;;  %v14640_v18 = vor.u32 %v15876_v58, %v14637_v3  ;;  %v15840_v39 = vld [vmem:[%s16766_s10 + $0xe04] sm:$0xf]  ;;  %v12947_v25 = vld [vmem:[%s16766_s10 + $0x1e8] sm:$0xf] }
 0x56a   : > { %9306 = vmatpush.bf16.msrb.mxu2 %v14592_v33  ;;  %9281 = vmatpush.bf16.msrb.mxu0 %v14320_v45  ;;  %v14397_v33 = vld [vmem:[%s16766_s10 + $0xd50] sm:$0xf0]  ;;  %v9067_v37 = vpop.f32.mrf.mxu3  ;;  %v9030_v45 = vpop.f32.mrf.mxu0  ;;  %v15872_v40 = vld [vmem:[%s16766_s10 + $0xf04] sm:$0xf]  ;;  %v13203_v35 = vld [vmem:[%s16766_s10 + $0x3e8] sm:$0xf] }
 0x56b   : > { %v14400_v57 = vor.u32 %v15816_v61, %v14397_v33  ;;  %v18892_v42 = vadd.f32 %v9067_v37, %v9055_v27  ;;  %v14493_v19 = vld [vmem:[%s16766_s10 + $0xe10] sm:$0xf0]  ;;  %v15519_v37 = vld [vmem:[%s16766_s10 + $0x3f4] sm:$0xf0]  ;;  %v12803_v45 = vld [vmem:[%s16766_s10 + $0xc8] sm:$0xf] }
 0x56c   : > { %9319 = vmatpush.bf16.msrb.mxu3 %v14720_v14  ;;  %9294 = vmatpush.bf16.msrb.mxu1 %v14448_v56  ;;  %v15848_v14 = vld [vmem:[%s16766_s10 + $0xe44] sm:$0xf]  ;;  %v9043_v56 = vpop.f32.mrf.mxu1  ;;  %v12787_v58 = vld [vmem:[%s16766_s10 + $0xa8] sm:$0xf]  ;;  %v15415_v3 = vld [vmem:[%s16766_s10 + $0xb4] sm:$0xf0] }
 0x56d   : > { %v14528_v49 = vor.u32 %v15848_v14, %v14525_v4  ;;  %v15487_v14 = vld [vmem:[%s16766_s10 + $0x2f4] sm:$0xf0]  ;;  %v14496_v4 = vor.u32 %v15840_v39, %v14493_v19  ;;  %v12788_v39 = vor.u32 %v15415_v3, %v12787_v58  ;;  %v12867_v3 = vld [vmem:[%s16766_s10 + $0x148] sm:$0xf] }
 0x56e   : > { %9307 = vmatpush.bf16.msrb.mxu2 %v14576_v9  ;;  %9282 = vmatpush.bf16.msrb.mxu0 %v14304_v7  ;;  %v15780_v9 = vld [vmem:[%s16766_s10 + $0xc24] sm:$0xf]  ;;  %v15419_v56 = vld [vmem:[%s16766_s10 + $0xd4] sm:$0xf0] }
 0x56f   : > { %v15776_v7 = vld [vmem:[%s16766_s10 + $0xc04] sm:$0xf]  ;;  %v12804_v11 = vor.u32 %v15419_v56, %v12803_v45  ;;  %v12883_v56 = vld [vmem:[%s16766_s10 + $0x168] sm:$0xf] }
 0x570   : > { %9320 = vmatpush.bf16.msrb.mxu3 %v14704_v46  ;;  %9295 = vmatpush.bf16.msrb.mxu1 %v14432_v51  ;;  %v14253_v46 = vld [vmem:[%s16766_s10 + $0xc30] sm:$0xf0]  ;;  %v9056_v22 = vpop.f32.mrf.mxu2  ;;  %v14240_v61 = vor.u32 %v15776_v7, %v14237_v53  ;;  %v15447_v53 = vld [vmem:[%s16766_s10 + $0x1b4] sm:$0xf0] }
 0x571   : > { %v14256_v51 = vor.u32 %v15780_v9, %v14253_v46  ;;  %v12931_v9 = vld [vmem:[%s16766_s10 + $0x1c8] sm:$0xf]  ;;  %v15451_v46 = vld [vmem:[%s16766_s10 + $0x1d4] sm:$0xf0] }
 0x572   : > { %9308 = vmatpush.bf16.msrb.mxu2 %v14560_v15  ;;  %9283 = vmatpush.bf16.msrb.mxu0 %v14288_v23  ;;  %v15808_v15 = vld [vmem:[%s16766_s10 + $0xd04] sm:$0xf]  ;;  %v9069_v20 = vpop.f32.mrf.mxu3  ;;  %v14621_v23 = vld [vmem:[%s16766_s10 + $0xf10] sm:$0xf0]  ;;  %v12932_v63 = vor.u32 %v15451_v46, %v12931_v9  ;;  %v15411_v22 = vld [vmem:[%s16766_s10 + $0x94] sm:$0xf0] }
 0x573   : > { %v14624_v0 = vor.u32 %v15872_v40, %v14621_v23  ;;  %v12771_v40 = vld [vmem:[%s16766_s10 + $0x88] sm:$0xf]  ;;  %v15471_v46 = vld [vmem:[%s16766_s10 + $0x274] sm:$0xf0] }
 0x574   : > { %9321 = vmatpush.bf16.msrb.mxu3 %v14688_v17  ;;  %9296 = vmatpush.bf16.msrb.mxu1 %v14416_v24  ;;  %v14365_v17 = vld [vmem:[%s16766_s10 + $0xd10] sm:$0xf0]  ;;  %v12819_v24 = vld [vmem:[%s16766_s10 + $0xe8] sm:$0xf] }
 0x575   : > { %v14368_v33 = vor.u32 %v15808_v15, %v14365_v17  ;;  %v12820_v59 = vor.u32 %v15423_v44, %v12819_v24  ;;  %v13043_v15 = vld [vmem:[%s16766_s10 + $0x2a8] sm:$0xf]  ;;  %v15479_v17 = vld [vmem:[%s16766_s10 + $0x2b4] sm:$0xf0] }
 0x576   : > { %9309 = vmatpush.bf16.msrb.mxu2 %v14544_v21  ;;  %9284 = vmatpush.bf16.msrb.mxu0 %v14272_v47  ;;  %v15455_v21 = vld [vmem:[%s16766_s10 + $0x1f4] sm:$0xf0]  ;;  %v13044_v20 = vor.u32 %v15479_v17, %v13043_v15  ;;  %v12899_v24 = vld [vmem:[%s16766_s10 + $0x188] sm:$0xf] }
 0x577   : > { %v12948_v27 = vor.u32 %v15455_v21, %v12947_v25  ;;  %v15443_v44 = vld [vmem:[%s16766_s10 + $0x194] sm:$0xf0]  ;;  %v13027_v25 = vld [vmem:[%s16766_s10 + $0x288] sm:$0xf] }
 0x578   : > { %9322 = vmatpush.bf16.msrb.mxu3 %v14672_v26  ;;  %9297 = vmatpush.bf16.msrb.mxu1 %v14400_v57  ;;  %v13075_v26 = vld [vmem:[%s16766_s10 + $0x2e8] sm:$0xf]  ;;  %v13204_v57 = vor.u32 %v15519_v37, %v13203_v35  ;;  %v15475_v21 = vld [vmem:[%s16766_s10 + $0x294] sm:$0xf0]  ;;  %v12772_v37 = vor.u32 %v15411_v22, %v12771_v40 }
 0x579   : > { %v13076_v47 = vor.u32 %v15487_v14, %v13075_v26  ;;  %v13155_v26 = vld [vmem:[%s16766_s10 + $0x388] sm:$0xf]  ;;  %v15499_v17 = vld [vmem:[%s16766_s10 + $0x354] sm:$0xf0] }
 0x57a   : > { %9310 = vmatpush.bf16.msrb.mxu2 %v14528_v49  ;;  %9285 = vmatpush.bf16.msrb.mxu0 %v14256_v51  ;;  %v13059_v49 = vld [vmem:[%s16766_s10 + $0x2c8] sm:$0xf]  ;;  %v13188_v51 = vor.u32 %v15515_v16, %v13187_v62 }
 0x57b   : > { %v12739_v16 = vld [vmem:[%s16766_s10 + $0x48] sm:$0xf] }
 0x57c   : > { %9323 = vmatpush.bf16.msrb.mxu3 %v14656_v60  ;;  %9298 = vmatpush.bf16.msrb.mxu1 %v14384_v52  ;;  %v15483_v60 = vld [vmem:[%s16766_s10 + $0x2d4] sm:$0xf0]  ;;  %v12915_v52 = vld [vmem:[%s16766_s10 + $0x1a8] sm:$0xf] }
 0x57d   : > { %v13060_v7 = vor.u32 %v15483_v60, %v13059_v49  ;;  %v12916_v19 = vor.u32 %v15447_v53, %v12915_v52  ;;  %v13139_v49 = vld [vmem:[%s16766_s10 + $0x368] sm:$0xf]  ;;  %v15467_v53 = vld [vmem:[%s16766_s10 + $0x254] sm:$0xf0] }
 0x57e   : > { %9311 = vmatpush.bf16.msrb.mxu2 %v14512_v12  ;;  %9286 = vmatpush.bf16.msrb.mxu0 %v14240_v61  ;;  %v13171_v12 = vld [vmem:[%s16766_s10 + $0x3a8] sm:$0xf]  ;;  %v15507_v61 = vld [vmem:[%s16766_s10 + $0x394] sm:$0xf0] }
 0x57f   : > { %v13156_v45 = vor.u32 %v15507_v61, %v13155_v26  ;;  %v13123_v15 = vld [vmem:[%s16766_s10 + $0x348] sm:$0xf]  ;;  %v15463_v26 = vld [vmem:[%s16766_s10 + $0x234] sm:$0xf0] }
 0x580   : > { %9324 = vmatpush.bf16.msrb.mxu3 %v14640_v18  ;;  %9299 = vmatpush.bf16.msrb.mxu1 %v14368_v33  ;;  %v15511_v18 = vld [vmem:[%s16766_s10 + $0x3b4] sm:$0xf0]  ;;  %v9080_v33 = vpop.f32.mrf.mxu0  ;;  %v9093_v14 = vpop.f32.mrf.mxu1  ;;  %v12723_v22 = vld [vmem:[%s16766_s10 + $0x28] sm:$0xf] }
 0x581   : > { %9287 = vmatmul.bf16.vlgmr.msrb.gmra.mxu0 %v18634_v54  ;;  %v13172_v23 = vor.u32 %v15511_v18, %v13171_v12  ;;  %v9081_v35 = vadd.f32 %v9080_v33, %v18892_v42  ;;  %v15503_v42 = vld [vmem:[%s16766_s10 + $0x374] sm:$0xf0]  ;;  %v13107_v61 = vld [vmem:[%s16766_s10 + $0x328] sm:$0xf] }
 0x582   : > { %9312 = vmatpush.bf16.msrb.mxu2 %v14496_v4  ;;  %9331 = vmatpush.bf16.msra.mxu0 %v12820_v59  ;;  %v12900_v4 = vor.u32 %v15443_v44, %v12899_v24  ;;  %v15407_v59 = vld [vmem:[%s16766_s10 + $0x74] sm:$0xf0]  ;;  %v13140_v58 = vor.u32 %v15503_v42, %v13139_v49  ;;  %v13124_v24 = vor.u32 %v15499_v17, %v13123_v15  ;;  %v12851_v44 = vld [vmem:[%s16766_s10 + $0x128] sm:$0xf] }
 0x583   : > { %9300 = vmatmul.bf16.vlgmr.msrb.gmra.mxu1 %v18636_v55  ;;  %v9094_v9 = vadd.f32 %v9093_v14, %v9081_v35  ;;  %v15495_v33 = vld [vmem:[%s16766_s10 + $0x334] sm:$0xf0]  ;;  %v12707_v14 = vld [vmem:[%s16766_s10 + $0x8] sm:$0xf] }
 0x584   : > { %9325 = vmatpush.bf16.msrb.mxu3 %v14624_v0  ;;  %9344 = vmatpush.bf16.msra.mxu1 %v12948_v27  ;;  %v12755_v0 = vld [vmem:[%s16766_s10 + $0x68] sm:$0xf]  ;;  %v13028_v27 = vor.u32 %v15475_v21, %v13027_v25  ;;  %v15431_v25 = vld [vmem:[%s16766_s10 + $0x134] sm:$0xf0] }
 0x585   : > { %9313 = vmatmul.bf16.vlgmr.msrb.gmra.mxu2 %v18640_v10  ;;  %v12756_v60 = vor.u32 %v15407_v59, %v12755_v0  ;;  %v12979_v21 = vld [vmem:[%s16766_s10 + $0x228] sm:$0xf]  ;;  %v15427_v59 = vld [vmem:[%s16766_s10 + $0x114] sm:$0xf0] }
 0x586   : > { %9357 = vmatpush.bf16.msra.mxu2 %v13076_v47  ;;  %9332 = vmatpush.bf16.msra.mxu0 %v12804_v11  ;;  %v15439_v47 = vld [vmem:[%s16766_s10 + $0x174] sm:$0xf0]  ;;  %v12835_v0 = vld [vmem:[%s16766_s10 + $0x108] sm:$0xf] }
 0x587   : > { %9326 = vmatmul.bf16.vlgmr.msrb.gmra.mxu3 %v18688_v34  ;;  %v12884_v62 = vor.u32 %v15439_v47, %v12883_v56  ;;  %v15403_v11 = vld [vmem:[%s16766_s10 + $0x54] sm:$0xf0]  ;;  %v12963_v56 = vld [vmem:[%s16766_s10 + $0x208] sm:$0xf] }
 0x588   : > { %9370 = vmatpush.bf16.msra.mxu3 %v13204_v57  ;;  %9345 = vmatpush.bf16.msra.mxu1 %v12932_v63  ;;  %v13011_v57 = vld [vmem:[%s16766_s10 + $0x268] sm:$0xf]  ;;  %v9106_v52 = vpop.f32.mrf.mxu2  ;;  %v9082_v18 = vpop.f32.mrf.mxu0  ;;  %v15459_v47 = vld [vmem:[%s16766_s10 + $0x214] sm:$0xf0] }
 0x589   : > { %v13012_v63 = vor.u32 %v15471_v46, %v13011_v57  ;;  %v18961_v12 = vadd.f32 %v9106_v52, %v9094_v9  ;;  %v13091_v57 = vld [vmem:[%s16766_s10 + $0x308] sm:$0xf]  ;;  %v15491_v46 = vld [vmem:[%s16766_s10 + $0x314] sm:$0xf0] }
 0x58a   : > { %9358 = vmatpush.bf16.msra.mxu2 %v13060_v7  ;;  %9333 = vmatpush.bf16.msra.mxu0 %v12788_v39  ;;  %v15435_v7 = vld [vmem:[%s16766_s10 + $0x154] sm:$0xf0]  ;;  %v9095_v39 = vpop.f32.mrf.mxu1  ;;  %v13331_v49 = vld [vmem:[%s16766_s10 + $0x4e8] sm:$0xf]  ;;  %v13092_v52 = vor.u32 %v15491_v46, %v13091_v57 }
 0x58b   : > { %v12868_v40 = vor.u32 %v15435_v7, %v12867_v3  ;;  %v15551_v42 = vld [vmem:[%s16766_s10 + $0x4f4] sm:$0xf0]  ;;  %v13715_v3 = vld [vmem:[%s16766_s10 + $0x7e8] sm:$0xf] }
 0x58c   : > { %9371 = vmatpush.bf16.msra.mxu3 %v13188_v51  ;;  %9346 = vmatpush.bf16.msra.mxu1 %v12916_v19  ;;  %v12995_v51 = vld [vmem:[%s16766_s10 + $0x248] sm:$0xf]  ;;  %v12740_v19 = vor.u32 %v15403_v11, %v12739_v16  ;;  %v15647_v7 = vld [vmem:[%s16766_s10 + $0x7f4] sm:$0xf0] }
 0x58d   : > { %v13587_v16 = vld [vmem:[%s16766_s10 + $0x6e8] sm:$0xf]  ;;  %v15547_v18 = vld [vmem:[%s16766_s10 + $0x4d4] sm:$0xf0] }
 0x58e   : > { %9359 = vmatpush.bf16.msra.mxu2 %v13044_v20  ;;  %9334 = vmatpush.bf16.msra.mxu0 %v12772_v37  ;;  %v15399_v20 = vld [vmem:[%s16766_s10 + $0x34] sm:$0xf0]  ;;  %v12852_v37 = vor.u32 %v15431_v25, %v12851_v44  ;;  %v13315_v17 = vld [vmem:[%s16766_s10 + $0x4c8] sm:$0xf] }
 0x58f   : > { %v12724_v35 = vor.u32 %v15399_v20, %v12723_v22  ;;  %v15579_v22 = vld [vmem:[%s16766_s10 + $0x5d4] sm:$0xf0]  ;;  %v13571_v20 = vld [vmem:[%s16766_s10 + $0x6c8] sm:$0xf]  ;;  %v13316_v25 = vor.u32 %v15547_v18, %v13315_v17 }
 0x590   : > { %9372 = vmatpush.bf16.msra.mxu3 %v13172_v23  ;;  %9347 = vmatpush.bf16.msra.mxu1 %v12900_v4  ;;  %v12996_v23 = vor.u32 %v15467_v53, %v12995_v51  ;;  %v15395_v4 = vld [vmem:[%s16766_s10 + $0x14] sm:$0xf0]  ;;  %v9108_v9 = vpop.f32.mrf.mxu2  ;;  %v12964_v51 = vor.u32 %v15459_v47, %v12963_v56  ;;  %v13332_v53 = vor.u32 %v15551_v42, %v13331_v49  ;;  %v16035_v47 = vld [vmem:[%s16773_s1] sm:$0xf]  ;;  %v13283_v46 = vld [vmem:[%s16766_s10 + $0x488] sm:$0xf] }
 0x591   : > { %v12708_v11 = vor.u32 %v15395_v4, %v12707_v14  ;;  %v15643_v44 = vld [vmem:[%s16766_s10 + $0x7d4] sm:$0xf0]  ;;  %v13555_v4 = vld [vmem:[%s16766_s10 + $0x6a8] sm:$0xf]  ;;  %v6348_v57 = vperm.slane %v16035_v47, 1 }
 0x592   : > { %9360 = vmatpush.bf16.msra.mxu2 %v13028_v27  ;;  %9335 = vmatpush.bf16.msra.mxu0 %v12756_v60  ;;  %v12980_v27 = vor.u32 %v15463_v26, %v12979_v21  ;;  %v13459_v60 = vld [vmem:[%s16766_s10 + $0x5e8] sm:$0xf]  ;;  %v15539_v49 = vld [vmem:[%s16766_s10 + $0x494] sm:$0xf0] }
 0x593   : > { %v13299_v26 = vld [vmem:[%s16766_s10 + $0x4a8] sm:$0xf]  ;;  %v15535_v18 = vld [vmem:[%s16766_s10 + $0x474] sm:$0xf0] }
 0x594   : > { %9373 = vmatpush.bf16.msra.mxu3 %v13156_v45  ;;  %9348 = vmatpush.bf16.msra.mxu1 %v12884_v62  ;;  %v13108_v45 = vor.u32 %v15495_v33, %v13107_v61  ;;  %v15583_v62 = vld [vmem:[%s16766_s10 + $0x5f4] sm:$0xf0]  ;;  %v13267_v17 = vld [vmem:[%s16766_s10 + $0x468] sm:$0xf] }
 0x595   : > { %v13460_v15 = vor.u32 %v15583_v62, %v13459_v60  ;;  %v15543_v61 = vld [vmem:[%s16766_s10 + $0x4b4] sm:$0xf0] }
 0x596   : > { %9361 = vmatpush.bf16.msra.mxu2 %v13012_v63  ;;  %9336 = vmatpush.bf16.msra.mxu0 %v12740_v19  ;;  %v12836_v63 = vor.u32 %v15427_v59, %v12835_v0  ;;  %v13716_v19 = vor.u32 %v15647_v7, %v13715_v3  ;;  %v15607_v0 = vld [vmem:[%s16766_s10 + $0x6b4] sm:$0xf0]  ;;  %v13683_v59 = vld [vmem:[%s16766_s10 + $0x7a8] sm:$0xf] }
 0x597   : > { %v13556_v42 = vor.u32 %v15607_v0, %v13555_v4  ;;  %v13667_v3 = vld [vmem:[%s16766_s10 + $0x788] sm:$0xf]  ;;  %v15635_v7 = vld [vmem:[%s16766_s10 + $0x794] sm:$0xf0] }
 0x598   : > { %9374 = vmatpush.bf16.msra.mxu3 %v13140_v58  ;;  %9349 = vmatpush.bf16.msra.mxu1 %v12868_v40  ;;  %v15615_v58 = vld [vmem:[%s16766_s10 + $0x6f4] sm:$0xf0]  ;;  %v13443_v40 = vld [vmem:[%s16766_s10 + $0x5c8] sm:$0xf] }
 0x599   : > { %v13588_v39 = vor.u32 %v15615_v58, %v13587_v16  ;;  %v13444_v21 = vor.u32 %v15579_v22, %v13443_v40  ;;  %v13411_v16 = vld [vmem:[%s16766_s10 + $0x588] sm:$0xf]  ;;  %v15603_v58 = vld [vmem:[%s16766_s10 + $0x694] sm:$0xf0] }
 0x59a   : > { %9362 = vmatpush.bf16.msra.mxu2 %v12996_v23  ;;  %9337 = vmatpush.bf16.msra.mxu0 %v12724_v35  ;;  %v15611_v23 = vld [vmem:[%s16766_s10 + $0x6d4] sm:$0xf0]  ;;  %v13427_v35 = vld [vmem:[%s16766_s10 + $0x5a8] sm:$0xf]  ;;  %v9119_v9 = vpop.f32.mrf.mxu3 }
 0x59b   : > { %v13572_v33 = vor.u32 %v15611_v23, %v13571_v20  ;;  %v19011_v62 = vadd.f32 %v9119_v9, %v18961_v12  ;;  %v13395_v40 = vld [vmem:[%s16766_s10 + $0x568] sm:$0xf]  ;;  %v15567_v22 = vld [vmem:[%s16766_s10 + $0x574] sm:$0xf0] }
 0x59c   : > { %9375 = vmatpush.bf16.msra.mxu3 %v13124_v24  ;;  %9350 = vmatpush.bf16.msra.mxu1 %v12852_v37  ;;  %v13699_v24 = vld [vmem:[%s16766_s10 + $0x7c8] sm:$0xf]  ;;  %v15575_v37 = vld [vmem:[%s16766_s10 + $0x5b4] sm:$0xf0] }
 0x59d   : > { %v13700_v14 = vor.u32 %v15643_v44, %v13699_v24  ;;  %v13428_v56 = vor.u32 %v15575_v37, %v13427_v35  ;;  %v13523_v20 = vld [vmem:[%s16766_s10 + $0x668] sm:$0xf]  ;;  %v15599_v24 = vld [vmem:[%s16766_s10 + $0x674] sm:$0xf0] }
 0x59e   : > { %9363 = vmatpush.bf16.msra.mxu2 %v12980_v27  ;;  %9338 = vmatpush.bf16.msra.mxu0 %v12708_v11  ;;  %v15639_v27 = vld [vmem:[%s16766_s10 + $0x7b4] sm:$0xf0]  ;;  %v13651_v44 = vld [vmem:[%s16766_s10 + $0x768] sm:$0xf]  ;;  %v13524_v35 = vor.u32 %v15599_v24, %v13523_v20 }
 0x59f   : > { %v13684_v60 = vor.u32 %v15639_v27, %v13683_v59  ;;  %v15571_v11 = vld [vmem:[%s16766_s10 + $0x594] sm:$0xf0]  ;;  %v13379_v4 = vld [vmem:[%s16766_s10 + $0x548] sm:$0xf] }
 0x5a0   : > { %9376 = vmatpush.bf16.msra.mxu3 %v13108_v45  ;;  %9351 = vmatpush.bf16.msra.mxu1 %v12836_v63  ;;  %v13300_v45 = vor.u32 %v15543_v61, %v13299_v26  ;;  %v13539_v63 = vld [vmem:[%s16766_s10 + $0x688] sm:$0xf]  ;;  %v13412_v12 = vor.u32 %v15571_v11, %v13411_v16  ;;  %v13396_v26 = vor.u32 %v15567_v22, %v13395_v40  ;;  %v15563_v0 = vld [vmem:[%s16766_s10 + $0x554] sm:$0xf0] }
 0x5a1   : > { %9339 = vmatmul.bf16.vlgmr.msra.gmra.mxu0 %v18377_v8  ;;  %v13507_v59 = vld [vmem:[%s16766_s10 + $0x648] sm:$0xf]  ;;  %v15627_v47 = vld [vmem:[%s16766_s10 + $0x754] sm:$0xf0] }
 0x5a2   : > { %9364 = vmatpush.bf16.msra.mxu2 %v12964_v51  ;;  %9383 = vmatpush.bf16.msrb.mxu0 %v13332_v53  ;;  %v9132_v51 = vpop.f32.mrf.mxu0  ;;  %v9121_v61 = vpop.f32.mrf.mxu3  ;;  %v15527_v16 = vld [vmem:[%s16766_s10 + $0x434] sm:$0xf0] }
 0x5a3   : > { %9352 = vmatmul.bf16.vlgmr.msra.gmra.mxu1 %v18379_v28  ;;  %v9133_v53 = vadd.f32 %v9132_v51, %v6348_v57  ;;  %v15591_v51 = vld [vmem:[%s16766_s10 + $0x634] sm:$0xf0]  ;;  %v13843_v61 = vld [vmem:[%s16766_s10 + $0x8e8] sm:$0xf] }
 0x5a4   : > { %9377 = vmatpush.bf16.msra.mxu3 %v13092_v52  ;;  %9396 = vmatpush.bf16.msrb.mxu1 %v13460_v15  ;;  %v9145_v52 = vpop.f32.mrf.mxu1  ;;  %v13284_v15 = vor.u32 %v15539_v49, %v13283_v46  ;;  %v15587_v24 = vld [vmem:[%s16766_s10 + $0x614] sm:$0xf0] }
 0x5a5   : > { %9365 = vmatmul.bf16.vlgmr.msra.gmra.mxu2 %v18381_v38  ;;  %v9146_v23 = vadd.f32 %v9145_v52, %v9133_v53  ;;  %v13619_v52 = vld [vmem:[%s16766_s10 + $0x728] sm:$0xf]  ;;  %v15623_v53 = vld [vmem:[%s16766_s10 + $0x734] sm:$0xf0] }
 0x5a6   : > { %9409 = vmatpush.bf16.msrb.mxu2 %v13588_v39  ;;  %9384 = vmatpush.bf16.msrb.mxu0 %v13316_v25  ;;  %v13540_v39 = vor.u32 %v15603_v58, %v13539_v63  ;;  %v15631_v25 = vld [vmem:[%s16766_s10 + $0x774] sm:$0xf0]  ;;  %v13363_v58 = vld [vmem:[%s16766_s10 + $0x528] sm:$0xf]  ;;  %v13620_v22 = vor.u32 %v15623_v53, %v13619_v52 }
 0x5a7   : > { %9378 = vmatmul.bf16.vlgmr.msra.gmra.mxu3 %v18385_v29  ;;  %v13652_v37 = vor.u32 %v15631_v25, %v13651_v44  ;;  %v13603_v44 = vld [vmem:[%s16766_s10 + $0x708] sm:$0xf] }
 0x5a8   : > { %9422 = vmatpush.bf16.msrb.mxu3 %v13716_v19  ;;  %9397 = vmatpush.bf16.msrb.mxu1 %v13444_v21  ;;  %v13668_v19 = vor.u32 %v15635_v7, %v13667_v3  ;;  %v13268_v21 = vor.u32 %v15535_v18, %v13267_v17  ;;  %v9158_v27 = vpop.f32.mrf.mxu2  ;;  %v15559_v3 = vld [vmem:[%s16766_s10 + $0x534] sm:$0xf0]  ;;  %v13491_v7 = vld [vmem:[%s16766_s10 + $0x628] sm:$0xf] }
 0x5a9   : > { %v9159_v57 = vadd.f32 %v9158_v27, %v9146_v23  ;;  %v13364_v17 = vor.u32 %v15559_v3, %v13363_v58  ;;  %v15523_v18 = vld [vmem:[%s16766_s10 + $0x414] sm:$0xf0]  ;;  %v13492_v40 = vor.u32 %v15591_v51, %v13491_v7  ;;  %v13475_v23 = vld [vmem:[%s16766_s10 + $0x608] sm:$0xf] }
 0x5aa   : > { %9410 = vmatpush.bf16.msrb.mxu2 %v13572_v33  ;;  %9385 = vmatpush.bf16.msrb.mxu0 %v13300_v45  ;;  %v13251_v33 = vld [vmem:[%s16766_s10 + $0x448] sm:$0xf]  ;;  %v15595_v45 = vld [vmem:[%s16766_s10 + $0x654] sm:$0xf0]  ;;  %v9134_v9 = vpop.f32.mrf.mxu0  ;;  %v9171_v20 = vpop.f32.mrf.mxu3 }
 0x5ab   : > { %v13508_v11 = vor.u32 %v15595_v45, %v13507_v59  ;;  %v15743_v59 = vld [vmem:[%s16766_s10 + $0xaf4] sm:$0xf0]  ;;  %v14227_v27 = vld [vmem:[%s16766_s10 + $0xbe8] sm:$0xf] }
 0x5ac   : > { %9423 = vmatpush.bf16.msrb.mxu3 %v13700_v14  ;;  %9398 = vmatpush.bf16.msrb.mxu1 %v13428_v56  ;;  %v15531_v14 = vld [vmem:[%s16766_s10 + $0x454] sm:$0xf0]  ;;  %v13635_v56 = vld [vmem:[%s16766_s10 + $0x748] sm:$0xf]  ;;  %v9147_v46 = vpop.f32.mrf.mxu1 }
 0x5ad   : > { %v13252_v49 = vor.u32 %v15531_v14, %v13251_v33  ;;  %v13636_v63 = vor.u32 %v15627_v47, %v13635_v56  ;;  %v15679_v33 = vld [vmem:[%s16766_s10 + $0x8f4] sm:$0xf0]  ;;  %v13971_v14 = vld [vmem:[%s16766_s10 + $0x9e8] sm:$0xf]  ;;  %v13476_v56 = vor.u32 %v15587_v24, %v13475_v23 }
 0x5ae   : > { %9411 = vmatpush.bf16.msrb.mxu2 %v13556_v42  ;;  %9386 = vmatpush.bf16.msrb.mxu0 %v13284_v15  ;;  %v13380_v42 = vor.u32 %v15563_v0, %v13379_v4  ;;  %v13219_v15 = vld [vmem:[%s16766_s10 + $0x408] sm:$0xf]  ;;  %v15775_v45 = vld [vmem:[%s16766_s10 + $0xbf4] sm:$0xf0] }
 0x5af   : > { %v13220_v4 = vor.u32 %v15523_v18, %v13219_v15  ;;  %v13827_v46 = vld [vmem:[%s16766_s10 + $0x8c8] sm:$0xf]  ;;  %v15739_v58 = vld [vmem:[%s16766_s10 + $0xad4] sm:$0xf0] }
 0x5b0   : > { %9424 = vmatpush.bf16.msrb.mxu3 %v13684_v60  ;;  %9399 = vmatpush.bf16.msrb.mxu1 %v13412_v12  ;;  %v13235_v60 = vld [vmem:[%s16766_s10 + $0x428] sm:$0xf]  ;;  %v9160_v25 = vpop.f32.mrf.mxu2  ;;  %v15771_v7 = vld [vmem:[%s16766_s10 + $0xbd4] sm:$0xf0] }
 0x5b1   : > { %v13236_v12 = vor.u32 %v15527_v16, %v13235_v60  ;;  %v14228_v60 = vor.u32 %v15775_v45, %v14227_v27  ;;  %v13955_v16 = vld [vmem:[%s16766_s10 + $0x9c8] sm:$0xf]  ;;  %v15767_v23 = vld [vmem:[%s16766_s10 + $0xbb4] sm:$0xf0] }
 0x5b2   : > { %9412 = vmatpush.bf16.msrb.mxu2 %v13540_v39  ;;  %9387 = vmatpush.bf16.msrb.mxu0 %v13268_v21  ;;  %v13347_v39 = vld [vmem:[%s16766_s10 + $0x508] sm:$0xf]  ;;  %v19050_v21 = vadd.f32 %v9171_v20, %v9159_v57  ;;  %v13844_v57 = vor.u32 %v15679_v33, %v13843_v61  ;;  %v9173_v51 = vpop.f32.mrf.mxu3 }
 0x5b3   : > { %v14211_v3 = vld [vmem:[%s16766_s10 + $0xbc8] sm:$0xf] }
 0x5b4   : > { %9425 = vmatpush.bf16.msrb.mxu3 %v13668_v19  ;;  %9400 = vmatpush.bf16.msrb.mxu1 %v13396_v26  ;;  %v15555_v19 = vld [vmem:[%s16766_s10 + $0x514] sm:$0xf0]  ;;  %v13811_v15 = vld [vmem:[%s16766_s10 + $0x8a8] sm:$0xf]  ;;  %v14212_v18 = vor.u32 %v15771_v7, %v14211_v3 }
 0x5b5   : > { %v15619_v26 = vld [vmem:[%s16766_s10 + $0x714] sm:$0xf0]  ;;  %v13348_v0 = vor.u32 %v15555_v19, %v13347_v39  ;;  %v13939_v39 = vld [vmem:[%s16766_s10 + $0x9a8] sm:$0xf] }
 0x5b6   : > { %9413 = vmatpush.bf16.msrb.mxu2 %v13524_v35  ;;  %9388 = vmatpush.bf16.msrb.mxu0 %v13252_v49  ;;  %v15711_v35 = vld [vmem:[%s16766_s10 + $0x9f4] sm:$0xf0]  ;;  %v13604_v47 = vor.u32 %v15619_v26, %v13603_v44  ;;  %v14195_v20 = vld [vmem:[%s16766_s10 + $0xba8] sm:$0xf] }
 0x5b7   : > { %v13972_v9 = vor.u32 %v15711_v35, %v13971_v14  ;;  %v15675_v49 = vld [vmem:[%s16766_s10 + $0x8d4] sm:$0xf0]  ;;  %v13795_v25 = vld [vmem:[%s16766_s10 + $0x888] sm:$0xf]  ;;  %v14196_v33 = vor.u32 %v15767_v23, %v14195_v20 }
 0x5b8   : > { %9426 = vmatpush.bf16.msrb.mxu3 %v13652_v37  ;;  %9401 = vmatpush.bf16.msrb.mxu1 %v13380_v42  ;;  %v14099_v37 = vld [vmem:[%s16766_s10 + $0xae8] sm:$0xf]  ;;  %v13828_v52 = vor.u32 %v15675_v49, %v13827_v46  ;;  %v15703_v19 = vld [vmem:[%s16766_s10 + $0x9b4] sm:$0xf0] }
 0x5b9   : > { %v14100_v42 = vor.u32 %v15743_v59, %v14099_v37  ;;  %v13940_v44 = vor.u32 %v15703_v19, %v13939_v39  ;;  %v15667_v26 = vld [vmem:[%s16766_s10 + $0x894] sm:$0xf0]  ;;  %v13923_v14 = vld [vmem:[%s16766_s10 + $0x988] sm:$0xf] }
 0x5ba   : > { %9414 = vmatpush.bf16.msrb.mxu2 %v13508_v11  ;;  %9389 = vmatpush.bf16.msrb.mxu0 %v13236_v12  ;;  %v15707_v11 = vld [vmem:[%s16766_s10 + $0x9d4] sm:$0xf0]  ;;  %v14051_v37 = vld [vmem:[%s16766_s10 + $0xa88] sm:$0xf] }
 0x5bb   : > { %v13956_v53 = vor.u32 %v15707_v11, %v13955_v16  ;;  %v15671_v12 = vld [vmem:[%s16766_s10 + $0x8b4] sm:$0xf0]  ;;  %v14035_v11 = vld [vmem:[%s16766_s10 + $0xa68] sm:$0xf] }
 0x5bc   : > { %9427 = vmatpush.bf16.msrb.mxu3 %v13636_v63  ;;  %9402 = vmatpush.bf16.msrb.mxu1 %v13364_v17  ;;  %v14083_v63 = vld [vmem:[%s16766_s10 + $0xac8] sm:$0xf]  ;;  %v13812_v24 = vor.u32 %v15671_v12, %v13811_v15  ;;  %v15699_v35 = vld [vmem:[%s16766_s10 + $0x994] sm:$0xf0] }
 0x5bd   : > { %v14084_v17 = vor.u32 %v15739_v58, %v14083_v63  ;;  %v15763_v59 = vld [vmem:[%s16766_s10 + $0xb94] sm:$0xf0]  ;;  %v14163_v3 = vld [vmem:[%s16766_s10 + $0xb68] sm:$0xf] }
 0x5be   : > { %9415 = vmatpush.bf16.msrb.mxu2 %v13492_v40  ;;  %9390 = vmatpush.bf16.msrb.mxu0 %v13220_v4  ;;  %v14067_v40 = vld [vmem:[%s16766_s10 + $0xaa8] sm:$0xf]  ;;  %v15731_v4 = vld [vmem:[%s16766_s10 + $0xa94] sm:$0xf0]  ;;  %v9184_v27 = vpop.f32.mrf.mxu0 }
 0x5bf   : > { %v15663_v46 = vld [vmem:[%s16766_s10 + $0x874] sm:$0xf0]  ;;  %v14052_v49 = vor.u32 %v15731_v4, %v14051_v37  ;;  %v14019_v39 = vld [vmem:[%s16766_s10 + $0xa48] sm:$0xf] }
 0x5c0   : > { %9428 = vmatpush.bf16.msrb.mxu3 %v13620_v22  ;;  %9403 = vmatpush.bf16.msrb.mxu1 %v13348_v0  ;;  %v15735_v22 = vld [vmem:[%s16766_s10 + $0xab4] sm:$0xf0]  ;;  %v14179_v0 = vld [vmem:[%s16766_s10 + $0xb88] sm:$0xf]  ;;  %v9197_v45 = vpop.f32.mrf.mxu1 }
 0x5c1   : > { %9391 = vmatmul.bf16.vlgmr.msrb.gmra.mxu0 %v18463_v36  ;;  %v14068_v61 = vor.u32 %v15735_v22, %v14067_v40  ;;  %v15695_v16 = vld [vmem:[%s16766_s10 + $0x974] sm:$0xf0]  ;;  %v14147_v20 = vld [vmem:[%s16766_s10 + $0xb48] sm:$0xf] }
 0x5c2   : > { %9416 = vmatpush.bf16.msrb.mxu2 %v13476_v56  ;;  %9435 = vmatpush.bf16.msra.mxu0 %v13844_v57  ;;  %v9185_v56 = vadd.f32 %v9184_v27, %v19050_v21  ;;  %v13924_v57 = vor.u32 %v15699_v35, %v13923_v14  ;;  %v15727_v58 = vld [vmem:[%s16766_s10 + $0xa74] sm:$0xf0]  ;;  %v14003_v27 = vld [vmem:[%s16766_s10 + $0xa28] sm:$0xf] }
 0x5c3   : > { %9404 = vmatmul.bf16.vlgmr.msrb.gmra.mxu1 %v18465_v32  ;;  %v15759_v21 = vld [vmem:[%s16766_s10 + $0xb74] sm:$0xf0]  ;;  %v14036_v15 = vor.u32 %v15727_v58, %v14035_v11 }
 0x5c4   : > { %9429 = vmatpush.bf16.msrb.mxu3 %v13604_v47  ;;  %9448 = vmatpush.bf16.msra.mxu1 %v13972_v9  ;;  %v13796_v47 = vor.u32 %v15667_v26, %v13795_v25  ;;  %v13779_v9 = vld [vmem:[%s16766_s10 + $0x868] sm:$0xf]  ;;  %v9198_v63 = vadd.f32 %v9197_v45, %v9185_v56  ;;  %v14164_v12 = vor.u32 %v15759_v21, %v14163_v3  ;;  %v15723_v22 = vld [vmem:[%s16766_s10 + $0xa54] sm:$0xf0] }
 0x5c5   : > { %9417 = vmatmul.bf16.vlgmr.msrb.gmra.mxu2 %v18467_v30  ;;  %v13780_v7 = vor.u32 %v15663_v46, %v13779_v9  ;;  %v15755_v23 = vld [vmem:[%s16766_s10 + $0xb54] sm:$0xf0]  ;;  %v14020_v37 = vor.u32 %v15723_v22, %v14019_v39  ;;  %v14131_v56 = vld [vmem:[%s16766_s10 + $0xb28] sm:$0xf] }
 0x5c6   : > { %9461 = vmatpush.bf16.msra.mxu2 %v14100_v42  ;;  %9436 = vmatpush.bf16.msra.mxu0 %v13828_v52  ;;  %v14180_v42 = vor.u32 %v15763_v59, %v14179_v0  ;;  %v13763_v52 = vld [vmem:[%s16766_s10 + $0x848] sm:$0xf]  ;;  %v15655_v14 = vld [vmem:[%s16766_s10 + $0x834] sm:$0xf0]  ;;  %v14148_v4 = vor.u32 %v15755_v23, %v14147_v20 }
 0x5c7   : > { %9430 = vmatmul.bf16.vlgmr.msrb.gmra.mxu3 %v18471_v41  ;;  %v13875_v0 = vld [vmem:[%s16766_s10 + $0x928] sm:$0xf]  ;;  %v15687_v59 = vld [vmem:[%s16766_s10 + $0x934] sm:$0xf0] }
 0x5c8   : > { %9474 = vmatpush.bf16.msra.mxu3 %v14228_v60  ;;  %9449 = vmatpush.bf16.msra.mxu1 %v13956_v53  ;;  %v13907_v60 = vld [vmem:[%s16766_s10 + $0x968] sm:$0xf]  ;;  %v15659_v53 = vld [vmem:[%s16766_s10 + $0x854] sm:$0xf0]  ;;  %v9210_v19 = vpop.f32.mrf.mxu2  ;;  %v9199_v25 = vpop.f32.mrf.mxu1  ;;  %v13876_v46 = vor.u32 %v15687_v59, %v13875_v0 }
 0x5c9   : > { %v13908_v51 = vor.u32 %v15695_v16, %v13907_v60  ;;  %v13764_v26 = vor.u32 %v15659_v53, %v13763_v52  ;;  %v15719_v45 = vld [vmem:[%s16766_s10 + $0xa34] sm:$0xf0]  ;;  %v14115_v3 = vld [vmem:[%s16766_s10 + $0xb08] sm:$0xf] }
 0x5ca   : > { %9462 = vmatpush.bf16.msra.mxu2 %v14084_v17  ;;  %9437 = vmatpush.bf16.msra.mxu0 %v13812_v24  ;;  %v13891_v17 = vld [vmem:[%s16766_s10 + $0x948] sm:$0xf]  ;;  %v9223_v40 = vpop.f32.mrf.mxu3  ;;  %v9211_v24 = vadd.f32 %v9210_v19, %v9198_v63  ;;  %v15683_v60 = vld [vmem:[%s16766_s10 + $0x914] sm:$0xf0]  ;;  %v14004_v16 = vor.u32 %v15719_v45, %v14003_v27 }
 0x5cb   : > { %v13987_v63 = vld [vmem:[%s16766_s10 + $0xa08] sm:$0xf]  ;;  %v15715_v58 = vld [vmem:[%s16766_s10 + $0xa14] sm:$0xf0] }
 0x5cc   : > { %9475 = vmatpush.bf16.msra.mxu3 %v14212_v18  ;;  %9450 = vmatpush.bf16.msra.mxu1 %v13940_v44  ;;  %v15691_v18 = vld [vmem:[%s16766_s10 + $0x954] sm:$0xf0]  ;;  %v9186_v44 = vpop.f32.mrf.mxu0  ;;  %v19108_v35 = vadd.f32 %v9223_v40, %v9211_v24  ;;  %v14355_v52 = vld [vmem:[%s16766_s10 + $0xce8] sm:$0xf]  ;;  %v13988_v20 = vor.u32 %v15715_v58, %v13987_v63 }
 0x5cd   : > { %v15807_v53 = vld [vmem:[%s16766_s10 + $0xcf4] sm:$0xf0]  ;;  %v14739_v40 = vld [vmem:[%s16766_s10 + $0xfe8] sm:$0xf] }
 0x5ce   : > { %9463 = vmatpush.bf16.msra.mxu2 %v14068_v61  ;;  %9438 = vmatpush.bf16.msra.mxu0 %v13796_v47  ;;  %v13892_v61 = vor.u32 %v15691_v18, %v13891_v17  ;;  %v15751_v47 = vld [vmem:[%s16766_s10 + $0xb34] sm:$0xf0]  ;;  %v14611_v17 = vld [vmem:[%s16766_s10 + $0xee8] sm:$0xf]  ;;  %v14356_v24 = vor.u32 %v15807_v53, %v14355_v52 }
 0x5cf   : > { %v14132_v11 = vor.u32 %v15751_v47, %v14131_v56  ;;  %v15871_v19 = vld [vmem:[%s16766_s10 + $0xef4] sm:$0xf0]  ;;  %v14339_v25 = vld [vmem:[%s16766_s10 + $0xcc8] sm:$0xf] }
 0x5d0   : > { %9476 = vmatpush.bf16.msra.mxu3 %v14196_v33  ;;  %9451 = vmatpush.bf16.msra.mxu1 %v13924_v57  ;;  %v13747_v33 = vld [vmem:[%s16766_s10 + $0x828] sm:$0xf]  ;;  %v9212_v21 = vpop.f32.mrf.mxu2  ;;  %v15903_v22 = vld [vmem:[%s16766_s10 + $0xff4] sm:$0xf0] }
 0x5d1   : > { %v13731_v57 = vld [vmem:[%s16766_s10 + $0x808] sm:$0xf]  ;;  %v13748_v9 = vor.u32 %v15655_v14, %v13747_v33  ;;  %v14740_v33 = vor.u32 %v15903_v22, %v14739_v40  ;;  %v15867_v0 = vld [vmem:[%s16766_s10 + $0xed4] sm:$0xf0] }
 0x5d2   : > { %9464 = vmatpush.bf16.msra.mxu2 %v14052_v49  ;;  %9439 = vmatpush.bf16.msra.mxu0 %v13780_v7  ;;  %v15651_v49 = vld [vmem:[%s16766_s10 + $0x814] sm:$0xf0]  ;;  %v9225_v7 = vpop.f32.mrf.mxu3  ;;  %v14467_v14 = vld [vmem:[%s16766_s10 + $0xdc8] sm:$0xf] }
 0x5d3   : > { %v13732_v18 = vor.u32 %v15651_v49, %v13731_v57  ;;  %v14723_v59 = vld [vmem:[%s16766_s10 + $0xfc8] sm:$0xf]  ;;  %v15899_v27 = vld [vmem:[%s16766_s10 + $0xfd4] sm:$0xf0] }
 0x5d4   : > { %9477 = vmatpush.bf16.msra.mxu3 %v14180_v42  ;;  %9452 = vmatpush.bf16.msra.mxu1 %v13908_v51  ;;  %v13859_v42 = vld [vmem:[%s16766_s10 + $0x908] sm:$0xf]  ;;  %v15747_v51 = vld [vmem:[%s16766_s10 + $0xb14] sm:$0xf0] }
 0x5d5   : > { %v13860_v39 = vor.u32 %v15683_v60, %v13859_v42  ;;  %v14116_v23 = vor.u32 %v15747_v51, %v14115_v3  ;;  %v14323_v47 = vld [vmem:[%s16766_s10 + $0xca8] sm:$0xf]  ;;  %v15799_v57 = vld [vmem:[%s16766_s10 + $0xcb4] sm:$0xf0] }
 0x5d6   : > { %9465 = vmatpush.bf16.msra.mxu2 %v14036_v15  ;;  %9440 = vmatpush.bf16.msra.mxu0 %v13764_v26  ;;  %v14483_v15 = vld [vmem:[%s16766_s10 + $0xde8] sm:$0xf]  ;;  %v15803_v26 = vld [vmem:[%s16766_s10 + $0xcd4] sm:$0xf0]  ;;  %v14324_v58 = vor.u32 %v15799_v57, %v14323_v47 }
 0x5d7   : > { %v14340_v45 = vor.u32 %v15803_v26, %v14339_v25  ;;  %v14451_v49 = vld [vmem:[%s16766_s10 + $0xda8] sm:$0xf]  ;;  %v15831_v42 = vld [vmem:[%s16766_s10 + $0xdb4] sm:$0xf0] }
 0x5d8   : > { %9478 = vmatpush.bf16.msra.mxu3 %v14164_v12  ;;  %9453 = vmatpush.bf16.msra.mxu1 %v13892_v61  ;;  %v15839_v12 = vld [vmem:[%s16766_s10 + $0xdf4] sm:$0xf0]  ;;  %v14612_v61 = vor.u32 %v15871_v19, %v14611_v17  ;;  %v14579_v60 = vld [vmem:[%s16766_s10 + $0xea8] sm:$0xf]  ;;  %v14452_v3 = vor.u32 %v15831_v42, %v14451_v49 }
 0x5d9   : > { %v14484_v44 = vor.u32 %v15839_v12, %v14483_v15  ;;  %v15895_v63 = vld [vmem:[%s16766_s10 + $0xfb4] sm:$0xf0]  ;;  %v14307_v21 = vld [vmem:[%s16766_s10 + $0xc88] sm:$0xf] }
 0x5da   : > { %9466 = vmatpush.bf16.msra.mxu2 %v14020_v37  ;;  %9441 = vmatpush.bf16.msra.mxu0 %v13748_v9  ;;  %v15835_v37 = vld [vmem:[%s16766_s10 + $0xdd4] sm:$0xf0]  ;;  %v14435_v53 = vld [vmem:[%s16766_s10 + $0xd88] sm:$0xf] }
 0x5db   : > { %v14468_v56 = vor.u32 %v15835_v37, %v14467_v14  ;;  %v15795_v7 = vld [vmem:[%s16766_s10 + $0xc94] sm:$0xf0]  ;;  %v14563_v12 = vld [vmem:[%s16766_s10 + $0xe88] sm:$0xf] }
 0x5dc   : > { %9479 = vmatpush.bf16.msra.mxu3 %v14148_v4  ;;  %9454 = vmatpush.bf16.msra.mxu1 %v13876_v46  ;;  %v14595_v4 = vld [vmem:[%s16766_s10 + $0xec8] sm:$0xf]  ;;  %v14724_v46 = vor.u32 %v15899_v27, %v14723_v59  ;;  %v15827_v15 = vld [vmem:[%s16766_s10 + $0xd94] sm:$0xf0] }
 0x5dd   : > { %v14596_v9 = vor.u32 %v15867_v0, %v14595_v4  ;;  %v15859_v17 = vld [vmem:[%s16766_s10 + $0xe94] sm:$0xf0]  ;;  %v14547_v14 = vld [vmem:[%s16766_s10 + $0xe68] sm:$0xf] }
 0x5de   : > { %9467 = vmatpush.bf16.msra.mxu2 %v14004_v16  ;;  %9442 = vmatpush.bf16.msra.mxu0 %v13732_v18  ;;  %v15863_v16 = vld [vmem:[%s16766_s10 + $0xeb4] sm:$0xf0]  ;;  %v14691_v18 = vld [vmem:[%s16766_s10 + $0xf88] sm:$0xf]  ;;  %v9236_v19 = vpop.f32.mrf.mxu0  ;;  %v14564_v25 = vor.u32 %v15859_v17, %v14563_v12 }
 0x5df   : > { %v14580_v51 = vor.u32 %v15863_v16, %v14579_v60  ;;  %v9237_v22 = vadd.f32 %v9236_v19, %v19108_v35  ;;  %v15855_v4 = vld [vmem:[%s16766_s10 + $0xe74] sm:$0xf0]  ;;  %v14675_v0 = vld [vmem:[%s16766_s10 + $0xf68] sm:$0xf] }
 0x5e0   : > { %9480 = vmatpush.bf16.msra.mxu3 %v14132_v11  ;;  %9455 = vmatpush.bf16.msra.mxu1 %v13860_v39  ;;  %v14707_v11 = vld [vmem:[%s16766_s10 + $0xfa8] sm:$0xf]  ;;  %v15891_v39 = vld [vmem:[%s16766_s10 + $0xf94] sm:$0xf0]  ;;  %v9249_v40 = vpop.f32.mrf.mxu1  ;;  %v14548_v47 = vor.u32 %v15855_v4, %v14547_v14 }
 0x5e1   : > { %9443 = vmatmul.bf16.vlgmr.msra.gmra.mxu0 %v18551_v6  ;;  %v14708_v52 = vor.u32 %v15895_v63, %v14707_v11  ;;  %v14692_v26 = vor.u32 %v15891_v39, %v14691_v18  ;;  %v9250_v37 = vadd.f32 %v9249_v40, %v9237_v22  ;;  %v15887_v35 = vld [vmem:[%s16766_s10 + $0xf74] sm:$0xf0]  ;;  %v14531_v49 = vld [vmem:[%s16766_s10 + $0xe48] sm:$0xf] }
 0x5e2   : > { %9468 = vmatpush.bf16.msra.mxu2 %v13988_v20  ;;  %9487 = vmatpush.bf16.msrb.mxu0 %v14356_v24  ;;  %v14308_v20 = vor.u32 %v15795_v7, %v14307_v21  ;;  %v14291_v24 = vld [vmem:[%s16766_s10 + $0xc68] sm:$0xf]  ;;  %v14676_v57 = vor.u32 %v15887_v35, %v14675_v0  ;;  %v15851_v16 = vld [vmem:[%s16766_s10 + $0xe54] sm:$0xf0] }
 0x5e3   : > { %9456 = vmatmul.bf16.vlgmr.msra.gmra.mxu1 %v18553_v43  ;;  %v14659_v11 = vld [vmem:[%s16766_s10 + $0xf48] sm:$0xf]  ;;  %v15883_v63 = vld [vmem:[%s16766_s10 + $0xf54] sm:$0xf0]  ;;  %v14532_v12 = vor.u32 %v15851_v16, %v14531_v49  ;;  %v13205_v16 = vld [vmem:[%s16766_s10 + $0x3f8] sm:$0xf0] }
 0x5e4   : > { %9481 = vmatpush.bf16.msra.mxu3 %v14116_v23  ;;  %9500 = vmatpush.bf16.msrb.mxu1 %v14484_v44  ;;  %v14436_v23 = vor.u32 %v15827_v15, %v14435_v53  ;;  %v15791_v44 = vld [vmem:[%s16766_s10 + $0xc74] sm:$0xf0]  ;;  %v14660_v17 = vor.u32 %v15883_v63, %v14659_v11  ;;  %v14387_v18 = vld [vmem:[%s16766_s10 + $0xd28] sm:$0xf] }
 0x5e5   : > { %9469 = vmatmul.bf16.vlgmr.msra.gmra.mxu2 %v18555_v50  ;;  %v14292_v59 = vor.u32 %v15791_v44, %v14291_v24  ;;  %v15783_v53 = vld [vmem:[%s16766_s10 + $0xc34] sm:$0xf0]  ;;  %v14515_v19 = vld [vmem:[%s16766_s10 + $0xe28] sm:$0xf] }
 0x5e6   : > { %9513 = vmatpush.bf16.msrb.mxu2 %v14612_v61  ;;  %9488 = vmatpush.bf16.msrb.mxu0 %v14340_v45  ;;  %v14419_v61 = vld [vmem:[%s16766_s10 + $0xd68] sm:$0xf]  ;;  %v15815_v39 = vld [vmem:[%s16766_s10 + $0xd34] sm:$0xf0] }
 0x5e7   : > { %9482 = vmatmul.bf16.vlgmr.msra.gmra.mxu3 %v18559_v31  ;;  %v14275_v45 = vld [vmem:[%s16766_s10 + $0xc48] sm:$0xf]  ;;  %v15847_v40 = vld [vmem:[%s16766_s10 + $0xe34] sm:$0xf0]  ;;  %v14388_v44 = vor.u32 %v15815_v39, %v14387_v18  ;;  %v13061_v18 = vld [vmem:[%s16766_s10 + $0x2d8] sm:$0xf0] }
 0x5e8   : > { %9526 = vmatpush.bf16.msrb.mxu3 %v14740_v33  ;;  %9501 = vmatpush.bf16.msrb.mxu1 %v14468_v56  ;;  %v15823_v33 = vld [vmem:[%s16766_s10 + $0xd74] sm:$0xf0]  ;;  %v9262_v42 = vpop.f32.mrf.mxu2  ;;  %v9251_v21 = vpop.f32.mrf.mxu1  ;;  %v14643_v22 = vld [vmem:[%s16766_s10 + $0xf28] sm:$0xf]  ;;  %v15513_v39 = vld [vmem:[%s16766_s10 + $0x3cc] sm:$0xf] }
 0x5e9   : > { %v14420_v27 = vor.u32 %v15823_v33, %v14419_v61  ;;  %v15787_v56 = vld [vmem:[%s16766_s10 + $0xc54] sm:$0xf0]  ;;  %v14516_v33 = vor.u32 %v15847_v40, %v14515_v19  ;;  %v14627_v0 = vld [vmem:[%s16766_s10 + $0xf08] sm:$0xf]  ;;  %v15417_v21 = vld [vmem:[%s16766_s10 + $0xcc] sm:$0xf] }
 0x5ea   : > { %9514 = vmatpush.bf16.msrb.mxu2 %v14596_v9  ;;  %9489 = vmatpush.bf16.msrb.mxu0 %v14324_v58  ;;  %v14403_v9 = vld [vmem:[%s16766_s10 + $0xd48] sm:$0xf]  ;;  %v9275_v60 = vpop.f32.mrf.mxu3  ;;  %v9263_v58 = vadd.f32 %v9262_v42, %v9250_v37  ;;  %v14276_v7 = vor.u32 %v15787_v56, %v14275_v45  ;;  %v15811_v61 = vld [vmem:[%s16766_s10 + $0xd14] sm:$0xf0]  ;;  %v15421_v45 = vld [vmem:[%s16766_s10 + $0xec] sm:$0xf] }
 0x5eb   : > { %v14499_v37 = vld [vmem:[%s16766_s10 + $0xe08] sm:$0xf]  ;;  %v15843_v4 = vld [vmem:[%s16766_s10 + $0xe14] sm:$0xf0]  ;;  %v12821_v56 = vld [vmem:[%s16766_s10 + $0xf8] sm:$0xf0] }
 0x5ec   : > { %9527 = vmatpush.bf16.msrb.mxu3 %v14724_v46  ;;  %9502 = vmatpush.bf16.msrb.mxu1 %v14452_v3  ;;  %v15819_v46 = vld [vmem:[%s16766_s10 + $0xd54] sm:$0xf0]  ;;  %v9238_v3 = vpop.f32.mrf.mxu0  ;;  %v19179_v15 = vadd.f32 %v9275_v60, %v9263_v58  ;;  %v13077_v42 = vld [vmem:[%s16766_s10 + $0x2f8] sm:$0xf0]  ;;  %v15517_v60 = vld [vmem:[%s16766_s10 + $0x3ec] sm:$0xf]  ;;  %v14500_v11 = vor.u32 %v15843_v4, %v14499_v37  ;;  %v12824_v58 = vor.u32 %v15421_v45, %v12821_v56 }
 0x5ed   : > { %v13189_v19 = vld [vmem:[%s16766_s10 + $0x3d8] sm:$0xf0]  ;;  %v15441_v56 = vld [vmem:[%s16766_s10 + $0x18c] sm:$0xf] }
 0x5ee   : > { %9515 = vmatpush.bf16.msrb.mxu2 %v14580_v51  ;;  %9490 = vmatpush.bf16.msrb.mxu0 %v14308_v20  ;;  %v14404_v51 = vor.u32 %v15819_v46, %v14403_v9  ;;  %v15879_v20 = vld [vmem:[%s16766_s10 + $0xf34] sm:$0xf0]  ;;  %v15485_v9 = vld [vmem:[%s16766_s10 + $0x2ec] sm:$0xf]  ;;  %v13173_v37 = vld [vmem:[%s16766_s10 + $0x3b8] sm:$0xf0] }
 0x5ef   : > { %v14644_v14 = vor.u32 %v15879_v20, %v14643_v22  ;;  %v15413_v20 = vld [vmem:[%s16766_s10 + $0xac] sm:$0xf] }
 0x5f0   : > { %9528 = vmatpush.bf16.msrb.mxu3 %v14708_v52  ;;  %9503 = vmatpush.bf16.msrb.mxu1 %v14436_v23  ;;  %v14259_v52 = vld [vmem:[%s16766_s10 + $0xc28] sm:$0xf]  ;;  %v9264_v35 = vpop.f32.mrf.mxu2 }
 0x5f1   : > { %v14243_v23 = vld [vmem:[%s16766_s10 + $0xc08] sm:$0xf]  ;;  %v14260_v24 = vor.u32 %v15783_v53, %v14259_v52  ;;  %v13208_v52 = vor.u32 %v15517_v60, %v13205_v16  ;;  %v15449_v53 = vld [vmem:[%s16766_s10 + $0x1cc] sm:$0xf] }
 0x5f2   : > { %9516 = vmatpush.bf16.msrb.mxu2 %v14564_v25  ;;  %9491 = vmatpush.bf16.msrb.mxu0 %v14292_v59  ;;  %v15779_v25 = vld [vmem:[%s16766_s10 + $0xc14] sm:$0xf0]  ;;  %v9277_v59 = vpop.f32.mrf.mxu3  ;;  %v15409_v35 = vld [vmem:[%s16766_s10 + $0x8c] sm:$0xf] }
 0x5f3   : > { %v14244_v46 = vor.u32 %v15779_v25, %v14243_v23  ;;  %v12789_v23 = vld [vmem:[%s16766_s10 + $0xb8] sm:$0xf0]  ;;  %v15445_v25 = vld [vmem:[%s16766_s10 + $0x1ac] sm:$0xf] }
 0x5f4   : > { %9529 = vmatpush.bf16.msrb.mxu3 %v14692_v26  ;;  %9504 = vmatpush.bf16.msrb.mxu1 %v14420_v27  ;;  %v14371_v26 = vld [vmem:[%s16766_s10 + $0xd08] sm:$0xf]  ;;  %v15875_v27 = vld [vmem:[%s16766_s10 + $0xf14] sm:$0xf0]  ;;  %v12792_v4 = vor.u32 %v15413_v20, %v12789_v23  ;;  %v12773_v59 = vld [vmem:[%s16766_s10 + $0x98] sm:$0xf0] }
 0x5f5   : > { %v14372_v49 = vor.u32 %v15811_v61, %v14371_v26  ;;  %v14628_v63 = vor.u32 %v15875_v27, %v14627_v0  ;;  %v12917_v26 = vld [vmem:[%s16766_s10 + $0x1b8] sm:$0xf0]  ;;  %v15477_v61 = vld [vmem:[%s16766_s10 + $0x2ac] sm:$0xf] }
 0x5f6   : > { %9517 = vmatpush.bf16.msrb.mxu2 %v14548_v47  ;;  %9492 = vmatpush.bf16.msrb.mxu0 %v14276_v7  ;;  %v15453_v47 = vld [vmem:[%s16766_s10 + $0x1ec] sm:$0xf]  ;;  %v12805_v7 = vld [vmem:[%s16766_s10 + $0xd8] sm:$0xf0]  ;;  %v12920_v0 = vor.u32 %v15445_v25, %v12917_v26 }
 0x5f7   : > { %v12808_v40 = vor.u32 %v15417_v21, %v12805_v7  ;;  %v15465_v25 = vld [vmem:[%s16766_s10 + $0x24c] sm:$0xf] }
 0x5f8   : > { %9530 = vmatpush.bf16.msrb.mxu3 %v14676_v57  ;;  %9505 = vmatpush.bf16.msrb.mxu1 %v14404_v51  ;;  %v12949_v57 = vld [vmem:[%s16766_s10 + $0x1f8] sm:$0xf0]  ;;  %v13080_v51 = vor.u32 %v15485_v9, %v13077_v42 }
 0x5f9   : > { %v12952_v3 = vor.u32 %v15453_v47, %v12949_v57  ;;  %v12901_v47 = vld [vmem:[%s16766_s10 + $0x198] sm:$0xf0]  ;;  %v15473_v57 = vld [vmem:[%s16766_s10 + $0x28c] sm:$0xf] }
 0x5fa   : > { %9518 = vmatpush.bf16.msrb.mxu2 %v14532_v12  ;;  %9493 = vmatpush.bf16.msrb.mxu0 %v14260_v24  ;;  %v12933_v12 = vld [vmem:[%s16766_s10 + $0x1d8] sm:$0xf0] }
 0x5fb   : > { %v12936_v22 = vor.u32 %v15449_v53, %v12933_v12  ;;  %v13029_v9 = vld [vmem:[%s16766_s10 + $0x298] sm:$0xf0]  ;;  %v15469_v53 = vld [vmem:[%s16766_s10 + $0x26c] sm:$0xf] }
 0x5fc   : > { %9531 = vmatpush.bf16.msrb.mxu3 %v14660_v17  ;;  %9506 = vmatpush.bf16.msrb.mxu1 %v14388_v44  ;;  %v15481_v17 = vld [vmem:[%s16766_s10 + $0x2cc] sm:$0xf]  ;;  %v13192_v44 = vor.u32 %v15513_v39, %v13189_v19  ;;  %v13032_v21 = vor.u32 %v15473_v57, %v13029_v9 }
 0x5fd   : > { %v13064_v24 = vor.u32 %v15481_v17, %v13061_v18  ;;  %v13013_v17 = vld [vmem:[%s16766_s10 + $0x278] sm:$0xf0]  ;;  %v15501_v18 = vld [vmem:[%s16766_s10 + $0x36c] sm:$0xf] }
 0x5fe   : > { %9519 = vmatpush.bf16.msrb.mxu2 %v14516_v33  ;;  %9494 = vmatpush.bf16.msrb.mxu0 %v14244_v46  ;;  %v13045_v33 = vld [vmem:[%s16766_s10 + $0x2b8] sm:$0xf0]  ;;  %v15505_v46 = vld [vmem:[%s16766_s10 + $0x38c] sm:$0xf]  ;;  %v9288_v42 = vpop.f32.mrf.mxu0  ;;  %v13016_v20 = vor.u32 %v15469_v53, %v13013_v17 }
 0x5ff   : > { %v13048_v27 = vor.u32 %v15477_v61, %v13045_v33  ;;  %v9289_v16 = vadd.f32 %v9288_v42, %v19179_v15  ;;  %v13141_v15 = vld [vmem:[%s16766_s10 + $0x378] sm:$0xf0]  ;;  %v15461_v42 = vld [vmem:[%s16766_s10 + $0x22c] sm:$0xf] }
 0x600   : > { %9532 = vmatpush.bf16.msrb.mxu3 %v14644_v14  ;;  %9507 = vmatpush.bf16.msrb.mxu1 %v14372_v49  ;;  %v15509_v14 = vld [vmem:[%s16766_s10 + $0x3ac] sm:$0xf]  ;;  %v13157_v49 = vld [vmem:[%s16766_s10 + $0x398] sm:$0xf0]  ;;  %v9301_v60 = vpop.f32.mrf.mxu1  ;;  %v13144_v23 = vor.u32 %v15501_v18, %v13141_v15 }
 0x601   : > { %9495 = vmatmul.bf16.vlgmr.msrb.gmra.mxu0 %v18634_v54  ;;  %v13176_v45 = vor.u32 %v15509_v14, %v13173_v37  ;;  %v13160_v7 = vor.u32 %v15505_v46, %v13157_v49  ;;  %v9302_v12 = vadd.f32 %v9301_v60, %v9289_v16  ;;  %v12997_v33 = vld [vmem:[%s16766_s10 + $0x258] sm:$0xf0]  ;;  %v15497_v14 = vld [vmem:[%s16766_s10 + $0x34c] sm:$0xf] }
 0x602   : > { %9520 = vmatpush.bf16.msrb.mxu2 %v14500_v11  ;;  %9539 = vmatpush.bf16.msra.mxu0 %v12824_v58  ;;  %v12776_v11 = vor.u32 %v15409_v35, %v12773_v59  ;;  %v15405_v58 = vld [vmem:[%s16766_s10 + $0x6c] sm:$0xf]  ;;  %v13125_v37 = vld [vmem:[%s16766_s10 + $0x358] sm:$0xf0]  ;;  %v13000_v57 = vor.u32 %v15465_v25, %v12997_v33 }
 0x603   : > { %9508 = vmatmul.bf16.vlgmr.msrb.gmra.mxu1 %v18636_v55  ;;  %v13128_v9 = vor.u32 %v15497_v14, %v13125_v37  ;;  %v15429_v46 = vld [vmem:[%s16766_s10 + $0x12c] sm:$0xf]  ;;  %v12853_v49 = vld [vmem:[%s16766_s10 + $0x138] sm:$0xf0] }
 0x604   : > { %9533 = vmatpush.bf16.msrb.mxu3 %v14628_v63  ;;  %9552 = vmatpush.bf16.msra.mxu1 %v12952_v3  ;;  %v12904_v63 = vor.u32 %v15441_v56, %v12901_v47  ;;  %v12757_v3 = vld [vmem:[%s16766_s10 + $0x78] sm:$0xf0]  ;;  %v15493_v16 = vld [vmem:[%s16766_s10 + $0x32c] sm:$0xf] }
 0x605   : > { %9521 = vmatmul.bf16.vlgmr.msrb.gmra.mxu2 %v18640_v10  ;;  %v12760_v39 = vor.u32 %v15405_v58, %v12757_v3  ;;  %v12725_v56 = vld [vmem:[%s16766_s10 + $0x38] sm:$0xf0]  ;;  %v12856_v3 = vor.u32 %v15429_v46, %v12853_v49  ;;  %v15489_v18 = vld [vmem:[%s16766_s10 + $0x30c] sm:$0xf] }
 0x606   : > { %9565 = vmatpush.bf16.msra.mxu2 %v13080_v51  ;;  %9540 = vmatpush.bf16.msra.mxu0 %v12808_v40  ;;  %v15437_v51 = vld [vmem:[%s16766_s10 + $0x16c] sm:$0xf]  ;;  %v12981_v60 = vld [vmem:[%s16766_s10 + $0x238] sm:$0xf0] }
 0x607   : > { %9534 = vmatmul.bf16.vlgmr.msrb.gmra.mxu3 %v18688_v34  ;;  %v15401_v40 = vld [vmem:[%s16766_s10 + $0x4c] sm:$0xf]  ;;  %v12965_v17 = vld [vmem:[%s16766_s10 + $0x218] sm:$0xf0] }
 0x608   : > { %9578 = vmatpush.bf16.msra.mxu3 %v13208_v52  ;;  %9553 = vmatpush.bf16.msra.mxu1 %v12936_v22  ;;  %v12885_v52 = vld [vmem:[%s16766_s10 + $0x178] sm:$0xf0]  ;;  %v9314_v26 = vpop.f32.mrf.mxu2  ;;  %v9303_v35 = vpop.f32.mrf.mxu1  ;;  %v15641_v49 = vld [vmem:[%s16766_s10 + $0x7cc] sm:$0xf] }
 0x609   : > { %v12888_v19 = vor.u32 %v15437_v51, %v12885_v52  ;;  %v12741_v22 = vld [vmem:[%s16766_s10 + $0x58] sm:$0xf0]  ;;  %v12984_v52 = vor.u32 %v15461_v42, %v12981_v60  ;;  %v15545_v35 = vld [vmem:[%s16766_s10 + $0x4cc] sm:$0xf] }
 0x60a   : > { %9566 = vmatpush.bf16.msra.mxu2 %v13064_v24  ;;  %9541 = vmatpush.bf16.msra.mxu0 %v12792_v4  ;;  %v15433_v24 = vld [vmem:[%s16766_s10 + $0x14c] sm:$0xf]  ;;  %v9327_v61 = vpop.f32.mrf.mxu3  ;;  %v9315_v4 = vadd.f32 %v9314_v26, %v9302_v12  ;;  %v12744_v59 = vor.u32 %v15401_v40, %v12741_v22  ;;  %v12837_v51 = vld [vmem:[%s16766_s10 + $0x118] sm:$0xf0] }
 0x60b   : > { %v15457_v12 = vld [vmem:[%s16766_s10 + $0x20c] sm:$0xf]  ;;  %v13333_v22 = vld [vmem:[%s16766_s10 + $0x4f8] sm:$0xf0] }
 0x60c   : > { %9579 = vmatpush.bf16.msra.mxu3 %v13192_v44  ;;  %9554 = vmatpush.bf16.msra.mxu1 %v12920_v0  ;;  %v12869_v44 = vld [vmem:[%s16766_s10 + $0x158] sm:$0xf0]  ;;  %v9290_v0 = vpop.f32.mrf.mxu0  ;;  %v19250_v47 = vadd.f32 %v9327_v61, %v9315_v4  ;;  %v15549_v40 = vld [vmem:[%s16766_s10 + $0x4ec] sm:$0xf]  ;;  %v12968_v14 = vor.u32 %v15457_v12, %v12965_v17 }
 0x60d   : > { %v13589_v26 = vld [vmem:[%s16766_s10 + $0x6f8] sm:$0xf0]  ;;  %v15645_v61 = vld [vmem:[%s16766_s10 + $0x7ec] sm:$0xf]  ;;  %v13336_v4 = vor.u32 %v15549_v40, %v13333_v22 }
 0x60e   : > { %9567 = vmatpush.bf16.msra.mxu2 %v13048_v27  ;;  %9542 = vmatpush.bf16.msra.mxu0 %v12776_v11  ;;  %v12872_v27 = vor.u32 %v15433_v24, %v12869_v44  ;;  %v13109_v11 = vld [vmem:[%s16766_s10 + $0x338] sm:$0xf0]  ;;  %v15613_v24 = vld [vmem:[%s16766_s10 + $0x6ec] sm:$0xf] }
 0x60f   : > { %v13112_v53 = vor.u32 %v15493_v16, %v13109_v11  ;;  %v13717_v33 = vld [vmem:[%s16766_s10 + $0x7f8] sm:$0xf0]  ;;  %v15541_v11 = vld [vmem:[%s16766_s10 + $0x4ac] sm:$0xf] }
 0x610   : > { %9580 = vmatpush.bf16.msra.mxu3 %v13176_v45  ;;  %9555 = vmatpush.bf16.msra.mxu1 %v12904_v63  ;;  %v15397_v45 = vld [vmem:[%s16766_s10 + $0x2c] sm:$0xf]  ;;  %v9316_v15 = vpop.f32.mrf.mxu2  ;;  %v13573_v46 = vld [vmem:[%s16766_s10 + $0x6d8] sm:$0xf0] }
 0x611   : > { %v15393_v63 = vld [vmem:[%s16766_s10 + $0xc] sm:$0xf]  ;;  %v12728_v58 = vor.u32 %v15397_v45, %v12725_v56  ;;  %v13720_v45 = vor.u32 %v15645_v61, %v13717_v33  ;;  %v13701_v42 = vld [vmem:[%s16766_s10 + $0x7d8] sm:$0xf0] }
 0x612   : > { %9568 = vmatpush.bf16.msra.mxu2 %v13032_v21  ;;  %9543 = vmatpush.bf16.msra.mxu0 %v12760_v39  ;;  %v12709_v21 = vld [vmem:[%s16766_s10 + $0x18] sm:$0xf0]  ;;  %v9329_v39 = vpop.f32.mrf.mxu3  ;;  %v15577_v56 = vld [vmem:[%s16766_s10 + $0x5cc] sm:$0xf] }
 0x613   : > { %v12712_v44 = vor.u32 %v15393_v63, %v12709_v21  ;;  %v13301_v63 = vld [vmem:[%s16766_s10 + $0x4b8] sm:$0xf0]  ;;  %v15573_v21 = vld [vmem:[%s16766_s10 + $0x5ac] sm:$0xf] }
 0x614   : > { %9581 = vmatpush.bf16.msra.mxu3 %v13160_v7  ;;  %9556 = vmatpush.bf16.msra.mxu1 %v12888_v19  ;;  %v15425_v7 = vld [vmem:[%s16766_s10 + $0x10c] sm:$0xf]  ;;  %v13093_v19 = vld [vmem:[%s16766_s10 + $0x318] sm:$0xf0]  ;;  %v13304_v17 = vor.u32 %v15541_v11, %v13301_v63 }
 0x615   : > { %v12840_v25 = vor.u32 %v15425_v7, %v12837_v51  ;;  %v13096_v37 = vor.u32 %v15489_v18, %v13093_v19  ;;  %v13429_v7 = vld [vmem:[%s16766_s10 + $0x5b8] sm:$0xf0]  ;;  %v15605_v51 = vld [vmem:[%s16766_s10 + $0x6ac] sm:$0xf] }
 0x616   : > { %9569 = vmatpush.bf16.msra.mxu2 %v13016_v20  ;;  %9544 = vmatpush.bf16.msra.mxu0 %v12744_v59  ;;  %v15581_v20 = vld [vmem:[%s16766_s10 + $0x5ec] sm:$0xf]  ;;  %v13317_v59 = vld [vmem:[%s16766_s10 + $0x4d8] sm:$0xf0]  ;;  %v13432_v18 = vor.u32 %v15573_v21, %v13429_v7 }
 0x617   : > { %v13320_v60 = vor.u32 %v15545_v35, %v13317_v59  ;;  %v13685_v12 = vld [vmem:[%s16766_s10 + $0x7b8] sm:$0xf0]  ;;  %v15537_v15 = vld [vmem:[%s16766_s10 + $0x48c] sm:$0xf] }
 0x618   : > { %9582 = vmatpush.bf16.msra.mxu3 %v13144_v23  ;;  %9557 = vmatpush.bf16.msra.mxu1 %v12872_v27  ;;  %v13461_v23 = vld [vmem:[%s16766_s10 + $0x5f8] sm:$0xf0]  ;;  %v13592_v27 = vor.u32 %v15613_v24, %v13589_v26  ;;  %v15601_v22 = vld [vmem:[%s16766_s10 + $0x68c] sm:$0xf] }
 0x619   : > { %v13464_v0 = vor.u32 %v15581_v20, %v13461_v23  ;;  %v13285_v39 = vld [vmem:[%s16766_s10 + $0x498] sm:$0xf0]  ;;  %v15633_v23 = vld [vmem:[%s16766_s10 + $0x78c] sm:$0xf] }
 0x61a   : > { %9570 = vmatpush.bf16.msra.mxu2 %v13000_v57  ;;  %9545 = vmatpush.bf16.msra.mxu0 %v12728_v58  ;;  %v13445_v57 = vld [vmem:[%s16766_s10 + $0x5d8] sm:$0xf0]  ;;  %v13288_v61 = vor.u32 %v15537_v15, %v13285_v39  ;;  %v15565_v35 = vld [vmem:[%s16766_s10 + $0x56c] sm:$0xf] }
 0x61b   : > { %v13448_v16 = vor.u32 %v15577_v56, %v13445_v57  ;;  %v13413_v40 = vld [vmem:[%s16766_s10 + $0x598] sm:$0xf0]  ;;  %v15629_v57 = vld [vmem:[%s16766_s10 + $0x76c] sm:$0xf] }
 0x61c   : > { %9583 = vmatpush.bf16.msra.mxu3 %v13128_v9  ;;  %9558 = vmatpush.bf16.msra.mxu1 %v12856_v3  ;;  %v15609_v9 = vld [vmem:[%s16766_s10 + $0x6cc] sm:$0xf]  ;;  %v13704_v3 = vor.u32 %v15641_v49, %v13701_v42  ;;  %v13541_v20 = vld [vmem:[%s16766_s10 + $0x698] sm:$0xf0] }
 0x61d   : > { %v13576_v58 = vor.u32 %v15609_v9, %v13573_v46  ;;  %v13669_v24 = vld [vmem:[%s16766_s10 + $0x798] sm:$0xf0]  ;;  %v15529_v42 = vld [vmem:[%s16766_s10 + $0x44c] sm:$0xf] }
 0x61e   : > { %9571 = vmatpush.bf16.msra.mxu2 %v12984_v52  ;;  %9546 = vmatpush.bf16.msra.mxu0 %v12712_v44  ;;  %v13557_v52 = vld [vmem:[%s16766_s10 + $0x6b8] sm:$0xf0]  ;;  %v9340_v44 = vpop.f32.mrf.mxu0  ;;  %v15561_v63 = vld [vmem:[%s16766_s10 + $0x54c] sm:$0xf] }
 0x61f   : > { %v13397_v59 = vld [vmem:[%s16766_s10 + $0x578] sm:$0xf0]  ;;  %v15525_v39 = vld [vmem:[%s16766_s10 + $0x42c] sm:$0xf] }
 0x620   : > { %9584 = vmatpush.bf16.msra.mxu3 %v13112_v53  ;;  %9559 = vmatpush.bf16.msra.mxu1 %v12840_v25  ;;  %v15637_v53 = vld [vmem:[%s16766_s10 + $0x7ac] sm:$0xf]  ;;  %v9353_v25 = vpop.f32.mrf.mxu1  ;;  %v13525_v56 = vld [vmem:[%s16766_s10 + $0x678] sm:$0xf0]  ;;  %v13400_v49 = vor.u32 %v15565_v35, %v13397_v59 }
 0x621   : > { %9547 = vmatmul.bf16.vlgmr.msra.gmra.mxu0 %v18377_v8  ;;  %v19295_v8 = vld [vmem:[%s16773_s1] sm:$0xf]  ;;  %v13688_v19 = vor.u32 %v15637_v53, %v13685_v12  ;;  %v13653_v9 = vld [vmem:[%s16766_s10 + $0x778] sm:$0xf0]  ;;  %v15585_v59 = vld [vmem:[%s16766_s10 + $0x60c] sm:$0xf] }
 0x622   : > { %9572 = vmatpush.bf16.msra.mxu2 %v12968_v14  ;;  %9591 = vmatpush.bf16.msrb.mxu0 %v13336_v4  ;;  %v15533_v14 = vld [vmem:[%s16766_s10 + $0x46c] sm:$0xf]  ;;  %v13544_v4 = vor.u32 %v15601_v22, %v13541_v20  ;;  %v13656_v11 = vor.u32 %v15629_v57, %v13653_v9  ;;  %v13637_v53 = vld [vmem:[%s16766_s10 + $0x758] sm:$0xf0] }
 0x623   : > { %9560 = vmatmul.bf16.vlgmr.msra.gmra.mxu1 %v18379_v28  ;;  %v6349_v28 = vperm.slane %v19295_v8, 2  ;;  %v15557_v22 = vld [vmem:[%s16766_s10 + $0x52c] sm:$0xf]  ;;  %v13365_v20 = vld [vmem:[%s16766_s10 + $0x538] sm:$0xf0] }
 0x624   : > { %9585 = vmatpush.bf16.msra.mxu3 %v13096_v37  ;;  %9604 = vmatpush.bf16.msrb.mxu1 %v13464_v0  ;;  %v13269_v37 = vld [vmem:[%s16766_s10 + $0x478] sm:$0xf0]  ;;  %v13672_v0 = vor.u32 %v15633_v23, %v13669_v24  ;;  %v15589_v23 = vld [vmem:[%s16766_s10 + $0x62c] sm:$0xf] }
 0x625   : > { %9573 = vmatmul.bf16.vlgmr.msra.gmra.mxu2 %v18381_v38  ;;  %v13560_v38 = vor.u32 %v15605_v51, %v13557_v52  ;;  %v9341_v26 = vadd.f32 %v9340_v44, %v6349_v28  ;;  %v13272_v46 = vor.u32 %v15533_v14, %v13269_v37  ;;  %v13509_v51 = vld [vmem:[%s16766_s10 + $0x658] sm:$0xf0]  ;;  %v15625_v52 = vld [vmem:[%s16766_s10 + $0x74c] sm:$0xf] }
 0x626   : > { %9617 = vmatpush.bf16.msrb.mxu2 %v13592_v27  ;;  %9592 = vmatpush.bf16.msrb.mxu0 %v13320_v60  ;;  %v15597_v27 = vld [vmem:[%s16766_s10 + $0x66c] sm:$0xf]  ;;  %v13253_v60 = vld [vmem:[%s16766_s10 + $0x458] sm:$0xf0] }
 0x627   : > { %9586 = vmatmul.bf16.vlgmr.msra.gmra.mxu3 %v18385_v29  ;;  %v15569_v29 = vld [vmem:[%s16766_s10 + $0x58c] sm:$0xf]  ;;  %v13256_v28 = vor.u32 %v15529_v42, %v13253_v60  ;;  %v13493_v24 = vld [vmem:[%s16766_s10 + $0x638] sm:$0xf0] }
 0x628   : > { %9630 = vmatpush.bf16.msrb.mxu3 %v13720_v45  ;;  %9605 = vmatpush.bf16.msrb.mxu1 %v13448_v16  ;;  %v13416_v33 = vor.u32 %v15569_v29, %v13413_v40  ;;  %v9354_v45 = vadd.f32 %v9353_v25, %v9341_v26  ;;  %v13528_v16 = vor.u32 %v15597_v27, %v13525_v56  ;;  %v9366_v21 = vpop.f32.mrf.mxu2  ;;  %v15621_v44 = vld [vmem:[%s16766_s10 + $0x72c] sm:$0xf]  ;;  %v13621_v25 = vld [vmem:[%s16766_s10 + $0x738] sm:$0xf0] }
 0x629   : > { %v13640_v40 = vor.u32 %v15625_v52, %v13637_v53  ;;  %v15521_v26 = vld [vmem:[%s16766_s10 + $0x40c] sm:$0xf]  ;;  %v13221_v14 = vld [vmem:[%s16766_s10 + $0x418] sm:$0xf0]  ;;  %v13624_v35 = vor.u32 %v15621_v44, %v13621_v25 }
 0x62a   : > { %9618 = vmatpush.bf16.msrb.mxu2 %v13576_v58  ;;  %9593 = vmatpush.bf16.msrb.mxu0 %v13304_v17  ;;  %v13381_v58 = vld [vmem:[%s16766_s10 + $0x558] sm:$0xf0]  ;;  %v9379_v7 = vpop.f32.mrf.mxu3  ;;  %v9367_v12 = vadd.f32 %v9366_v21, %v9354_v45  ;;  %v9342_v17 = vpop.f32.mrf.mxu0  ;;  %v15553_v37 = vld [vmem:[%s16766_s10 + $0x50c] sm:$0xf] }
 0x62b   : > { %v13384_v15 = vor.u32 %v15561_v63, %v13381_v58  ;;  %v13477_v27 = vld [vmem:[%s16766_s10 + $0x618] sm:$0xf0]  ;;  %v15617_v45 = vld [vmem:[%s16766_s10 + $0x70c] sm:$0xf] }
 0x62c   : > { %9631 = vmatpush.bf16.msrb.mxu3 %v13704_v3  ;;  %9606 = vmatpush.bf16.msrb.mxu1 %v13432_v18  ;;  %v15593_v3 = vld [vmem:[%s16766_s10 + $0x64c] sm:$0xf]  ;;  %v9355_v18 = vpop.f32.mrf.mxu1  ;;  %v13605_v9 = vld [vmem:[%s16766_s10 + $0x718] sm:$0xf0] }
 0x62d   : > { %v13512_v29 = vor.u32 %v15593_v3, %v13509_v51  ;;  %v15709_v42 = vld [vmem:[%s16766_s10 + $0x9ec] sm:$0xf]  ;;  %v13973_v60 = vld [vmem:[%s16766_s10 + $0x9f8] sm:$0xf0]  ;;  %v13608_v51 = vor.u32 %v15617_v45, %v13605_v9 }
 0x62e   : > { %9619 = vmatpush.bf16.msrb.mxu2 %v13560_v38  ;;  %9594 = vmatpush.bf16.msrb.mxu0 %v13288_v61  ;;  %v13237_v38 = vld [vmem:[%s16766_s10 + $0x438] sm:$0xf0]  ;;  %v15773_v3 = vld [vmem:[%s16766_s10 + $0xbec] sm:$0xf]  ;;  %v13976_v53 = vor.u32 %v15709_v42, %v13973_v60 }
 0x62f   : > { %v13240_v61 = vor.u32 %v15525_v39, %v13237_v38  ;;  %v14101_v58 = vld [vmem:[%s16766_s10 + $0xaf8] sm:$0xf0]  ;;  %v15737_v38 = vld [vmem:[%s16766_s10 + $0xacc] sm:$0xf] }
 0x630   : > { %9632 = vmatpush.bf16.msrb.mxu3 %v13688_v19  ;;  %9607 = vmatpush.bf16.msrb.mxu1 %v13416_v33  ;;  %v19324_v19 = vadd.f32 %v9379_v7, %v9367_v12  ;;  %v13368_v33 = vor.u32 %v15557_v22, %v13365_v20  ;;  %v9368_v56 = vpop.f32.mrf.mxu2  ;;  %v14229_v21 = vld [vmem:[%s16766_s10 + $0xbf8] sm:$0xf0]  ;;  %v13480_v7 = vor.u32 %v15585_v59, %v13477_v27  ;;  %v15673_v12 = vld [vmem:[%s16766_s10 + $0x8cc] sm:$0xf] }
 0x631   : > { %v13829_v17 = vld [vmem:[%s16766_s10 + $0x8d8] sm:$0xf0]  ;;  %v15697_v56 = vld [vmem:[%s16766_s10 + $0x98c] sm:$0xf] }
 0x632   : > { %9620 = vmatpush.bf16.msrb.mxu2 %v13544_v4  ;;  %9595 = vmatpush.bf16.msrb.mxu0 %v13272_v46  ;;  %v13349_v4 = vld [vmem:[%s16766_s10 + $0x518] sm:$0xf0]  ;;  %v9381_v57 = vpop.f32.mrf.mxu3  ;;  %v15677_v46 = vld [vmem:[%s16766_s10 + $0x8ec] sm:$0xf]  ;;  %v13832_v20 = vor.u32 %v15673_v12, %v13829_v17 }
 0x633   : > { %v13352_v63 = vor.u32 %v15553_v37, %v13349_v4  ;;  %v13957_v39 = vld [vmem:[%s16766_s10 + $0x9d8] sm:$0xf0]  ;;  %v15765_v4 = vld [vmem:[%s16766_s10 + $0xbac] sm:$0xf] }
 0x634   : > { %9633 = vmatpush.bf16.msrb.mxu3 %v13672_v0  ;;  %9608 = vmatpush.bf16.msrb.mxu1 %v13400_v49  ;;  %v13496_v0 = vor.u32 %v15589_v23, %v13493_v24  ;;  %v13845_v49 = vld [vmem:[%s16766_s10 + $0x8f8] sm:$0xf0]  ;;  %v15669_v24 = vld [vmem:[%s16766_s10 + $0x8ac] sm:$0xf] }
 0x635   : > { %v13848_v52 = vor.u32 %v15677_v46, %v13845_v49  ;;  %v14213_v22 = vld [vmem:[%s16766_s10 + $0xbd8] sm:$0xf0]  ;;  %v15729_v9 = vld [vmem:[%s16766_s10 + $0xa8c] sm:$0xf] }
 0x636   : > { %9621 = vmatpush.bf16.msrb.mxu2 %v13528_v16  ;;  %9596 = vmatpush.bf16.msrb.mxu0 %v13256_v28  ;;  %v15741_v16 = vld [vmem:[%s16766_s10 + $0xaec] sm:$0xf]  ;;  %v14232_v28 = vor.u32 %v15773_v3, %v14229_v21  ;;  %v13813_v44 = vld [vmem:[%s16766_s10 + $0x8b8] sm:$0xf0] }
 0x637   : > { %v14104_v18 = vor.u32 %v15741_v16, %v14101_v58  ;;  %v14069_v37 = vld [vmem:[%s16766_s10 + $0xab8] sm:$0xf0]  ;;  %v15761_v46 = vld [vmem:[%s16766_s10 + $0xb8c] sm:$0xf] }
 0x638   : > { %9634 = vmatpush.bf16.msrb.mxu3 %v13656_v11  ;;  %9609 = vmatpush.bf16.msrb.mxu1 %v13384_v15  ;;  %v13224_v11 = vor.u32 %v15521_v26, %v13221_v14  ;;  %v15705_v15 = vld [vmem:[%s16766_s10 + $0x9cc] sm:$0xf]  ;;  %v13797_v27 = vld [vmem:[%s16766_s10 + $0x898] sm:$0xf0] }
 0x639   : > { %v13960_v23 = vor.u32 %v15705_v15, %v13957_v39  ;;  %v15733_v14 = vld [vmem:[%s16766_s10 + $0xaac] sm:$0xf]  ;;  %v13925_v57 = vld [vmem:[%s16766_s10 + $0x998] sm:$0xf0] }
 0x63a   : > { %9622 = vmatpush.bf16.msrb.mxu2 %v13512_v29  ;;  %9597 = vmatpush.bf16.msrb.mxu0 %v13240_v61  ;;  %v14085_v29 = vld [vmem:[%s16766_s10 + $0xad8] sm:$0xf0]  ;;  %v15701_v61 = vld [vmem:[%s16766_s10 + $0x9ac] sm:$0xf] }
 0x63b   : > { %v14088_v25 = vor.u32 %v15737_v38, %v14085_v29  ;;  %v13781_v58 = vld [vmem:[%s16766_s10 + $0x878] sm:$0xf0]  ;;  %v15757_v17 = vld [vmem:[%s16766_s10 + $0xb6c] sm:$0xf] }
 0x63c   : > { %9635 = vmatpush.bf16.msrb.mxu3 %v13640_v40  ;;  %9610 = vmatpush.bf16.msrb.mxu1 %v13368_v33  ;;  %v15769_v40 = vld [vmem:[%s16766_s10 + $0xbcc] sm:$0xf]  ;;  %v13941_v33 = vld [vmem:[%s16766_s10 + $0x9b8] sm:$0xf0] }
 0x63d   : > { %v14216_v26 = vor.u32 %v15769_v40, %v14213_v22  ;;  %v13944_v59 = vor.u32 %v15701_v61, %v13941_v33  ;;  %v14037_v12 = vld [vmem:[%s16766_s10 + $0xa78] sm:$0xf0]  ;;  %v15657_v15 = vld [vmem:[%s16766_s10 + $0x84c] sm:$0xf] }
 0x63e   : > { %9623 = vmatpush.bf16.msrb.mxu2 %v13496_v0  ;;  %9598 = vmatpush.bf16.msrb.mxu0 %v13224_v11  ;;  %v14197_v0 = vld [vmem:[%s16766_s10 + $0xbb8] sm:$0xf0]  ;;  %v9392_v49 = vpop.f32.mrf.mxu0  ;;  %v13928_v11 = vor.u32 %v15697_v56, %v13925_v57  ;;  %v15689_v40 = vld [vmem:[%s16766_s10 + $0x94c] sm:$0xf] }
 0x63f   : > { %v14200_v45 = vor.u32 %v15765_v4, %v14197_v0  ;;  %v9393_v60 = vadd.f32 %v9392_v49, %v19324_v19  ;;  %v14165_v19 = vld [vmem:[%s16766_s10 + $0xb78] sm:$0xf0]  ;;  %v15653_v0 = vld [vmem:[%s16766_s10 + $0x82c] sm:$0xf] }
 0x640   : > { %9636 = vmatpush.bf16.msrb.mxu3 %v13624_v35  ;;  %9611 = vmatpush.bf16.msrb.mxu1 %v13352_v63  ;;  %v13816_v35 = vor.u32 %v15669_v24, %v13813_v44  ;;  %v9405_v42 = vpop.f32.mrf.mxu1  ;;  %v15661_v63 = vld [vmem:[%s16766_s10 + $0x86c] sm:$0xf]  ;;  %v13765_v39 = vld [vmem:[%s16766_s10 + $0x858] sm:$0xf0]  ;;  %v14168_v29 = vor.u32 %v15757_v17, %v14165_v19 }
 0x641   : > { %9599 = vmatmul.bf16.vlgmr.msrb.gmra.mxu0 %v18463_v36  ;;  %v15665_v36 = vld [vmem:[%s16766_s10 + $0x88c] sm:$0xf]  ;;  %v13893_v22 = vld [vmem:[%s16766_s10 + $0x958] sm:$0xf0] }
 0x642   : > { %9624 = vmatpush.bf16.msrb.mxu2 %v13480_v7  ;;  %9643 = vmatpush.bf16.msra.mxu0 %v13848_v52  ;;  %v13800_v16 = vor.u32 %v15665_v36, %v13797_v27  ;;  %v15693_v7 = vld [vmem:[%s16766_s10 + $0x96c] sm:$0xf]  ;;  %v14021_v44 = vld [vmem:[%s16766_s10 + $0xa58] sm:$0xf0]  ;;  %v13896_v4 = vor.u32 %v15689_v40, %v13893_v22 }
 0x643   : > { %9612 = vmatmul.bf16.vlgmr.msrb.gmra.mxu1 %v18465_v32  ;;  %v14072_v32 = vor.u32 %v15733_v14, %v14069_v37  ;;  %v15725_v52 = vld [vmem:[%s16766_s10 + $0xa6c] sm:$0xf]  ;;  %v13768_v37 = vor.u32 %v15657_v15, %v13765_v39  ;;  %v14005_v57 = vld [vmem:[%s16766_s10 + $0xa38] sm:$0xf0] }
 0x644   : > { %9637 = vmatpush.bf16.msrb.mxu3 %v13608_v51  ;;  %9656 = vmatpush.bf16.msra.mxu1 %v13976_v53  ;;  %v13909_v51 = vld [vmem:[%s16766_s10 + $0x978] sm:$0xf0]  ;;  %v9406_v53 = vadd.f32 %v9405_v42, %v9393_v60  ;;  %v14040_v38 = vor.u32 %v15725_v52, %v14037_v12  ;;  %v15717_v56 = vld [vmem:[%s16766_s10 + $0xa2c] sm:$0xf] }
 0x645   : > { %9625 = vmatmul.bf16.vlgmr.msrb.gmra.mxu2 %v18467_v30  ;;  %v14053_v30 = vld [vmem:[%s16766_s10 + $0xa98] sm:$0xf0]  ;;  %v15681_v60 = vld [vmem:[%s16766_s10 + $0x90c] sm:$0xf] }
 0x646   : > { %9669 = vmatpush.bf16.msra.mxu2 %v14104_v18  ;;  %9644 = vmatpush.bf16.msra.mxu0 %v13832_v20  ;;  %v14056_v3 = vor.u32 %v15729_v9, %v14053_v30  ;;  %v13784_v18 = vor.u32 %v15661_v63, %v13781_v58  ;;  %v15721_v20 = vld [vmem:[%s16766_s10 + $0xa4c] sm:$0xf]  ;;  %v9394_v33 = vpop.f32.mrf.mxu0  ;;  %v14133_v30 = vld [vmem:[%s16766_s10 + $0xb38] sm:$0xf0] }
 0x647   : > { %9638 = vmatmul.bf16.vlgmr.msrb.gmra.mxu3 %v18471_v41  ;;  %v14181_v41 = vld [vmem:[%s16766_s10 + $0xb98] sm:$0xf0]  ;;  %v14024_v36 = vor.u32 %v15721_v20, %v14021_v44  ;;  %v15749_v9 = vld [vmem:[%s16766_s10 + $0xb2c] sm:$0xf] }
 0x648   : > { %9682 = vmatpush.bf16.msra.mxu3 %v14232_v28  ;;  %9657 = vmatpush.bf16.msra.mxu1 %v13960_v23  ;;  %v14184_v21 = vor.u32 %v15761_v46, %v14181_v41  ;;  %v13912_v28 = vor.u32 %v15693_v7, %v13909_v51  ;;  %v9418_v23 = vpop.f32.mrf.mxu2  ;;  %v9407_v14 = vpop.f32.mrf.mxu1  ;;  %v15649_v46 = vld [vmem:[%s16766_s10 + $0x80c] sm:$0xf]  ;;  %v13733_v42 = vld [vmem:[%s16766_s10 + $0x818] sm:$0xf0]  ;;  %v14136_v63 = vor.u32 %v15749_v9, %v14133_v30 }
 0x649   : > { %v9419_v61 = vadd.f32 %v9418_v23, %v9406_v53  ;;  %v15713_v58 = vld [vmem:[%s16766_s10 + $0xa0c] sm:$0xf]  ;;  %v14117_v52 = vld [vmem:[%s16766_s10 + $0xb18] sm:$0xf0] }
 0x64a   : > { %9670 = vmatpush.bf16.msra.mxu2 %v14088_v25  ;;  %9645 = vmatpush.bf16.msra.mxu0 %v13816_v35  ;;  %v9431_v24 = vpop.f32.mrf.mxu3  ;;  %v15753_v25 = vld [vmem:[%s16766_s10 + $0xb4c] sm:$0xf]  ;;  %v13749_v35 = vld [vmem:[%s16766_s10 + $0x838] sm:$0xf0] }
 0x64b   : > { %v13752_v41 = vor.u32 %v15653_v0, %v13749_v35  ;;  %v15805_v53 = vld [vmem:[%s16766_s10 + $0xcec] sm:$0xf]  ;;  %v14357_v12 = vld [vmem:[%s16766_s10 + $0xcf8] sm:$0xf0] }
 0x64c   : > { %9683 = vmatpush.bf16.msra.mxu3 %v14216_v26  ;;  %9658 = vmatpush.bf16.msra.mxu1 %v13944_v59  ;;  %v14149_v26 = vld [vmem:[%s16766_s10 + $0xb58] sm:$0xf0]  ;;  %v19395_v59 = vadd.f32 %v9431_v24, %v9419_v61  ;;  %v15837_v17 = vld [vmem:[%s16766_s10 + $0xdec] sm:$0xf]  ;;  %v14360_v20 = vor.u32 %v15805_v53, %v14357_v12 }
 0x64d   : > { %v14152_v27 = vor.u32 %v15753_v25, %v14149_v26  ;;  %v14485_v19 = vld [vmem:[%s16766_s10 + $0xdf8] sm:$0xf0]  ;;  %v15801_v24 = vld [vmem:[%s16766_s10 + $0xccc] sm:$0xf] }
 0x64e   : > { %9671 = vmatpush.bf16.msra.mxu2 %v14072_v32  ;;  %9646 = vmatpush.bf16.msra.mxu0 %v13800_v16  ;;  %v15685_v32 = vld [vmem:[%s16766_s10 + $0x92c] sm:$0xf]  ;;  %v13861_v16 = vld [vmem:[%s16766_s10 + $0x918] sm:$0xf0]  ;;  %v14488_v23 = vor.u32 %v15837_v17, %v14485_v19 }
 0x64f   : > { %v13864_v15 = vor.u32 %v15681_v60, %v13861_v16  ;;  %v14613_v39 = vld [vmem:[%s16766_s10 + $0xef8] sm:$0xf0]  ;;  %v15833_v61 = vld [vmem:[%s16766_s10 + $0xdcc] sm:$0xf] }
 0x650   : > { %9684 = vmatpush.bf16.msra.mxu3 %v14200_v45  ;;  %9659 = vmatpush.bf16.msra.mxu1 %v13928_v11  ;;  %v13877_v45 = vld [vmem:[%s16766_s10 + $0x938] sm:$0xf0]  ;;  %v14008_v11 = vor.u32 %v15717_v56, %v14005_v57  ;;  %v9420_v7 = vpop.f32.mrf.mxu2  ;;  %v15865_v14 = vld [vmem:[%s16766_s10 + $0xecc] sm:$0xf] }
 0x651   : > { %v13880_v49 = vor.u32 %v15685_v32, %v13877_v45  ;;  %v14341_v44 = vld [vmem:[%s16766_s10 + $0xcd8] sm:$0xf0]  ;;  %v15829_v57 = vld [vmem:[%s16766_s10 + $0xdac] sm:$0xf] }
 0x652   : > { %9672 = vmatpush.bf16.msra.mxu2 %v14056_v3  ;;  %9647 = vmatpush.bf16.msra.mxu0 %v13784_v18  ;;  %v13989_v3 = vld [vmem:[%s16766_s10 + $0xa18] sm:$0xf0]  ;;  %v9433_v51 = vpop.f32.mrf.mxu3  ;;  %v15869_v18 = vld [vmem:[%s16766_s10 + $0xeec] sm:$0xf]  ;;  %v14344_v35 = vor.u32 %v15801_v24, %v14341_v44 }
 0x653   : > { %v13992_v40 = vor.u32 %v15713_v58, %v13989_v3  ;;  %v14616_v25 = vor.u32 %v15869_v18, %v14613_v39  ;;  %v14469_v33 = vld [vmem:[%s16766_s10 + $0xdd8] sm:$0xf0]  ;;  %v15861_v30 = vld [vmem:[%s16766_s10 + $0xeac] sm:$0xf] }
 0x654   : > { %9685 = vmatpush.bf16.msra.mxu3 %v14184_v21  ;;  %9660 = vmatpush.bf16.msra.mxu1 %v13912_v28  ;;  %v15745_v21 = vld [vmem:[%s16766_s10 + $0xb0c] sm:$0xf]  ;;  %v13736_v28 = vor.u32 %v15649_v46, %v13733_v42  ;;  %v14725_v0 = vld [vmem:[%s16766_s10 + $0xfd8] sm:$0xf0] }
 0x655   : > { %v14120_v22 = vor.u32 %v15745_v21, %v14117_v52  ;;  %v14325_v32 = vld [vmem:[%s16766_s10 + $0xcb8] sm:$0xf0]  ;;  %v15857_v3 = vld [vmem:[%s16766_s10 + $0xe8c] sm:$0xf] }
 0x656   : > { %9673 = vmatpush.bf16.msra.mxu2 %v14040_v38  ;;  %9648 = vmatpush.bf16.msra.mxu0 %v13768_v37  ;;  %v15901_v38 = vld [vmem:[%s16766_s10 + $0xfec] sm:$0xf]  ;;  %v14597_v37 = vld [vmem:[%s16766_s10 + $0xed8] sm:$0xf0] }
 0x657   : > { %v14600_v45 = vor.u32 %v15865_v14, %v14597_v37  ;;  %v14453_v9 = vld [vmem:[%s16766_s10 + $0xdb8] sm:$0xf0]  ;;  %v15889_v21 = vld [vmem:[%s16766_s10 + $0xf8c] sm:$0xf] }
 0x658   : > { %9686 = vmatpush.bf16.msra.mxu3 %v14168_v29  ;;  %9661 = vmatpush.bf16.msra.mxu1 %v13896_v4  ;;  %v14741_v29 = vld [vmem:[%s16766_s10 + $0xff8] sm:$0xf0]  ;;  %v15897_v4 = vld [vmem:[%s16766_s10 + $0xfcc] sm:$0xf]  ;;  %v14456_v60 = vor.u32 %v15829_v57, %v14453_v9 }
 0x659   : > { %v14744_v26 = vor.u32 %v15901_v38, %v14741_v29  ;;  %v14728_v56 = vor.u32 %v15897_v4, %v14725_v0  ;;  %v14581_v46 = vld [vmem:[%s16766_s10 + $0xeb8] sm:$0xf0]  ;;  %v15789_v17 = vld [vmem:[%s16766_s10 + $0xc6c] sm:$0xf] }
 0x65a   : > { %9674 = vmatpush.bf16.msra.mxu2 %v14024_v36  ;;  %9649 = vmatpush.bf16.msra.mxu0 %v13752_v41  ;;  %v14472_v36 = vor.u32 %v15833_v61, %v14469_v33  ;;  %v15893_v41 = vld [vmem:[%s16766_s10 + $0xfac] sm:$0xf]  ;;  %v14309_v16 = vld [vmem:[%s16766_s10 + $0xc98] sm:$0xf0] }
 0x65b   : > { %v14437_v58 = vld [vmem:[%s16766_s10 + $0xd98] sm:$0xf0]  ;;  %v15853_v38 = vld [vmem:[%s16766_s10 + $0xe6c] sm:$0xf] }
 0x65c   : > { %9687 = vmatpush.bf16.msra.mxu3 %v14152_v27  ;;  %9662 = vmatpush.bf16.msra.mxu1 %v13880_v49  ;;  %v15797_v27 = vld [vmem:[%s16766_s10 + $0xcac] sm:$0xf]  ;;  %v14709_v49 = vld [vmem:[%s16766_s10 + $0xfb8] sm:$0xf0] }
 0x65d   : > { %v14328_v42 = vor.u32 %v15797_v27, %v14325_v32  ;;  %v14293_v19 = vld [vmem:[%s16766_s10 + $0xc78] sm:$0xf0]  ;;  %v15785_v24 = vld [vmem:[%s16766_s10 + $0xc4c] sm:$0xf] }
 0x65e   : > { %9675 = vmatpush.bf16.msra.mxu2 %v14008_v11  ;;  %9650 = vmatpush.bf16.msra.mxu0 %v13736_v28  ;;  %v14712_v11 = vor.u32 %v15893_v41, %v14709_v49  ;;  %v9444_v7 = vpop.f32.mrf.mxu0  ;;  %v14421_v39 = vld [vmem:[%s16766_s10 + $0xd78] sm:$0xf0]  ;;  %v15817_v61 = vld [vmem:[%s16766_s10 + $0xd4c] sm:$0xf] }
 0x65f   : > { %v9445_v52 = vadd.f32 %v9444_v7, %v19395_v59  ;;  %v14677_v59 = vld [vmem:[%s16766_s10 + $0xf78] sm:$0xf0]  ;;  %v15849_v14 = vld [vmem:[%s16766_s10 + $0xe4c] sm:$0xf] }
 0x660   : > { %9688 = vmatpush.bf16.msra.mxu3 %v14136_v63  ;;  %9663 = vmatpush.bf16.msra.mxu1 %v13864_v15  ;;  %v15825_v63 = vld [vmem:[%s16766_s10 + $0xd8c] sm:$0xf]  ;;  %v9457_v51 = vpop.f32.mrf.mxu1  ;;  %v14277_v44 = vld [vmem:[%s16766_s10 + $0xc58] sm:$0xf0] }
 0x661   : > { %9651 = vmatmul.bf16.vlgmr.msra.gmra.mxu0 %v18551_v6  ;;  %v15793_v6 = vld [vmem:[%s16766_s10 + $0xc8c] sm:$0xf]  ;;  %v14440_v12 = vor.u32 %v15825_v63, %v14437_v58  ;;  %v9458_v29 = vadd.f32 %v9457_v51, %v9445_v52  ;;  %v14405_v33 = vld [vmem:[%s16766_s10 + $0xd58] sm:$0xf0] }
 0x662   : > { %9676 = vmatpush.bf16.msra.mxu2 %v13992_v40  ;;  %9695 = vmatpush.bf16.msrb.mxu0 %v14360_v20  ;;  %v14312_v53 = vor.u32 %v15793_v6, %v14309_v16  ;;  %v15821_v15 = vld [vmem:[%s16766_s10 + $0xd6c] sm:$0xf]  ;;  %v14549_v40 = vld [vmem:[%s16766_s10 + $0xe78] sm:$0xf0]  ;;  %v14296_v20 = vor.u32 %v15789_v17, %v14293_v19  ;;  %v14408_v57 = vor.u32 %v15817_v61, %v14405_v33 }
 0x663   : > { %9664 = vmatmul.bf16.vlgmr.msra.gmra.mxu1 %v18553_v43  ;;  %v14584_v43 = vor.u32 %v15861_v30, %v14581_v46  ;;  %v14533_v0 = vld [vmem:[%s16766_s10 + $0xe58] sm:$0xf0]  ;;  %v15781_v9 = vld [vmem:[%s16766_s10 + $0xc2c] sm:$0xf] }
 0x664   : > { %9689 = vmatpush.bf16.msra.mxu3 %v14120_v22  ;;  %9708 = vmatpush.bf16.msrb.mxu1 %v14488_v23  ;;  %v15885_v22 = vld [vmem:[%s16766_s10 + $0xf6c] sm:$0xf]  ;;  %v14424_v23 = vor.u32 %v15821_v15, %v14421_v39  ;;  %v14261_v30 = vld [vmem:[%s16766_s10 + $0xc38] sm:$0xf0]  ;;  %v14536_v41 = vor.u32 %v15849_v14, %v14533_v0 }
 0x665   : > { %9677 = vmatmul.bf16.vlgmr.msra.gmra.mxu2 %v18555_v50  ;;  %v14565_v50 = vld [vmem:[%s16766_s10 + $0xe98] sm:$0xf0]  ;;  %v15845_v6 = vld [vmem:[%s16766_s10 + $0xe2c] sm:$0xf]  ;;  %v14264_v63 = vor.u32 %v15781_v9, %v14261_v30 }
 0x666   : > { %9721 = vmatpush.bf16.msrb.mxu2 %v14616_v25  ;;  %9696 = vmatpush.bf16.msrb.mxu0 %v14344_v35  ;;  %v14568_v18 = vor.u32 %v15857_v3, %v14565_v50  ;;  %v14552_v25 = vor.u32 %v15853_v38, %v14549_v40  ;;  %v15881_v35 = vld [vmem:[%s16766_s10 + $0xf4c] sm:$0xf]  ;;  %v9446_v32 = vpop.f32.mrf.mxu0  ;;  %v14517_v16 = vld [vmem:[%s16766_s10 + $0xe38] sm:$0xf0] }
 0x667   : > { %9690 = vmatmul.bf16.vlgmr.msra.gmra.mxu3 %v18559_v31  ;;  %v14693_v31 = vld [vmem:[%s16766_s10 + $0xf98] sm:$0xf0]  ;;  %v15777_v3 = vld [vmem:[%s16766_s10 + $0xc0c] sm:$0xf] }
 0x668   : > { %9734 = vmatpush.bf16.msrb.mxu3 %v14744_v26  ;;  %9709 = vmatpush.bf16.msrb.mxu1 %v14472_v36  ;;  %v14696_v28 = vor.u32 %v15889_v21, %v14693_v31  ;;  %v14680_v26 = vor.u32 %v15885_v22, %v14677_v59  ;;  %v9470_v37 = vpop.f32.mrf.mxu2  ;;  %v14661_v36 = vld [vmem:[%s16766_s10 + $0xf58] sm:$0xf0]  ;;  %v14520_v21 = vor.u32 %v15845_v6, %v14517_v16  ;;  %v15809_v7 = vld [vmem:[%s16766_s10 + $0xd0c] sm:$0xf] }
 0x669   : > { %v9471_v27 = vadd.f32 %v9470_v37, %v9458_v29  ;;  %v14664_v49 = vor.u32 %v15881_v35, %v14661_v36  ;;  %v14245_v50 = vld [vmem:[%s16766_s10 + $0xc18] sm:$0xf0]  ;;  %v15841_v52 = vld [vmem:[%s16766_s10 + $0xe0c] sm:$0xf] }
 0x66a   : > { %9722 = vmatpush.bf16.msrb.mxu2 %v14600_v45  ;;  %9697 = vmatpush.bf16.msrb.mxu0 %v14328_v42  ;;  %v9483_v4 = vpop.f32.mrf.mxu3  ;;  %v9459_v45 = vpop.f32.mrf.mxu1  ;;  %v15813_v42 = vld [vmem:[%s16766_s10 + $0xd2c] sm:$0xf]  ;;  %v14373_v51 = vld [vmem:[%s16766_s10 + $0xd18] sm:$0xf0] }
 0x66b   : > { %v9484_v46 = vadd.f32 %v9483_v4, %v9471_v27  ;;  %v14501_v17 = vld [vmem:[%s16766_s10 + $0xe18] sm:$0xf0]  ;;  %v15873_v19 = vld [vmem:[%s16766_s10 + $0xf0c] sm:$0xf]  ;;  %v14376_v15 = vor.u32 %v15809_v7, %v14373_v51 }
 0x66c   : > { %9735 = vmatpush.bf16.msrb.mxu3 %v14728_v56  ;;  %9710 = vmatpush.bf16.msrb.mxu1 %v14456_v60  ;;  %v14280_v56 = vor.u32 %v15785_v24, %v14277_v44  ;;  %v14389_v60 = vld [vmem:[%s16766_s10 + $0xd38] sm:$0xf0]  ;;  %v14504_v39 = vor.u32 %v15841_v52, %v14501_v17 }
 0x66d   : > { %v14392_v58 = vor.u32 %v15813_v42, %v14389_v60 }
 0x66e   : > { %9723 = vmatpush.bf16.msrb.mxu2 %v14584_v43  ;;  %9698 = vmatpush.bf16.msrb.mxu0 %v14312_v53  ;;  %v15877_v43 = vld [vmem:[%s16766_s10 + $0xf2c] sm:$0xf] }
 0x670   : > { %9736 = vmatpush.bf16.msrb.mxu3 %v14712_v11  ;;  %9711 = vmatpush.bf16.msrb.mxu1 %v14440_v12  ;;  %v14645_v11 = vld [vmem:[%s16766_s10 + $0xf38] sm:$0xf0]  ;;  %v9472_v53 = vpop.f32.mrf.mxu2 }
 0x671   : > { %v14648_v31 = vor.u32 %v15877_v43, %v14645_v11 }
 0x672   : > { %9724 = vmatpush.bf16.msrb.mxu2 %v14568_v18  ;;  %9699 = vmatpush.bf16.msrb.mxu0 %v14296_v20  ;;  %v9485_v12 = vpop.f32.mrf.mxu3  ;;  %v14629_v18 = vld [vmem:[%s16766_s10 + $0xf18] sm:$0xf0] }
 0x673   : > { %v14632_v38 = vor.u32 %v15873_v19, %v14629_v18  ;;  %v9748_v18 = vadd.f32 %v19250_v47, %v17271_v1 }
 0x674   : > { %9737 = vmatpush.bf16.msrb.mxu3 %v14696_v28  ;;  %9712 = vmatpush.bf16.msrb.mxu1 %v14424_v23  ;;  %v14248_v28 = vor.u32 %v15777_v3, %v14245_v50 }
 0x676   : > { %9725 = vmatpush.bf16.msrb.mxu2 %v14552_v25  ;;  %9700 = vmatpush.bf16.msrb.mxu0 %v14280_v56 }
 0x678   : > { %9738 = vmatpush.bf16.msrb.mxu3 %v14680_v26  ;;  %9713 = vmatpush.bf16.msrb.mxu1 %v14408_v57 }
 0x67a   : > { %9726 = vmatpush.bf16.msrb.mxu2 %v14536_v41  ;;  %9701 = vmatpush.bf16.msrb.mxu0 %v14264_v63 }
 0x67c   : > { %9739 = vmatpush.bf16.msrb.mxu3 %v14664_v49  ;;  %9714 = vmatpush.bf16.msrb.mxu1 %v14392_v58 }
 0x67e   : > { %9727 = vmatpush.bf16.msrb.mxu2 %v14520_v21  ;;  %9702 = vmatpush.bf16.msrb.mxu0 %v14248_v28  ;;  %v9496_v29 = vpop.f32.mrf.mxu0 }
 0x67f   : > { %v9497_v22 = vadd.f32 %v9496_v29, %v9484_v46 }
 0x680   : > { %9740 = vmatpush.bf16.msrb.mxu3 %v14648_v31  ;;  %9715 = vmatpush.bf16.msrb.mxu1 %v14376_v15  ;;  %v9509_v40 = vpop.f32.mrf.mxu1 }
 0x681   : > { %9703 = vmatmul.bf16.vlgmr.msrb.gmra.mxu0 %v18634_v54  ;;  %v9510_v59 = vadd.f32 %v9509_v40, %v9497_v22  ;;  %v6350_v54 = vperm.slane %v19295_v8, 3 }
 0x682   : > { %9728 = vmatpush.bf16.msrb.mxu2 %v14504_v39 }
 0x683   : > { %9716 = vmatmul.bf16.vlgmr.msrb.gmra.mxu1 %v18636_v55 }
 0x684   : > { %9741 = vmatpush.bf16.msrb.mxu3 %v14632_v38  ;;  %v9747_v38 = vadd.f32 %v19011_v62, %v17269_v5 }
 0x685   : > { %9729 = vmatmul.bf16.vlgmr.msrb.gmra.mxu2 %v18640_v10 }
 0x686   : > { %v9498_v44 = vpop.f32.mrf.mxu0 }
 0x687   : > { %9742 = vmatmul.bf16.vlgmr.msrb.gmra.mxu3 %v18688_v34 }
 0x688   : > { %v9522_v20 = vpop.f32.mrf.mxu2  ;;  %v9511_v25 = vpop.f32.mrf.mxu1 }
 0x689   : > { %v9523_v24 = vadd.f32 %v9522_v20, %v9510_v59 }
 0x68a   : > { %v9535_v23 = vpop.f32.mrf.mxu3 }
 0x68b   : > { %v9536_v26 = vadd.f32 %v9535_v23, %v9523_v24  ;;  %v9751_v23 = vadd.f32 %v9748_v18, %v9747_v38 }
 0x68d   : > { %v9749_v29 = vadd.f32 %v9536_v26, %v17273_v2 }
 0x68f   : > { %v9752_v44 = vadd.f32 %v9751_v23, %v9749_v29 }
 0x690   : > { %v9524_v61 = vpop.f32.mrf.mxu2 }
 0x692   : > { %v9537_v33 = vpop.f32.mrf.mxu3 }
 0x69e   : > { %v9548_v14 = vpop.f32.mrf.mxu0 }
 0x69f   : > { %v9549_v37 = vadd.f32 %v9548_v14, %v6350_v54 }
 0x6a0   : > { %v9561_v55 = vpop.f32.mrf.mxu1 }
 0x6a1   : > { %v9562_v10 = vadd.f32 %v9561_v55, %v9549_v37 }
 0x6a6   : > { %v9550_v35 = vpop.f32.mrf.mxu0 }
 0x6a8   : > { %v9574_v4 = vpop.f32.mrf.mxu2  ;;  %v9563_v36 = vpop.f32.mrf.mxu1 }
 0x6a9   : > { %v9575_v0 = vadd.f32 %v9574_v4, %v9562_v10 }
 0x6aa   : > { %v9587_v34 = vpop.f32.mrf.mxu3 }
 0x6ab   : > { %v9588_v27 = vadd.f32 %v9587_v34, %v9575_v0 }
 0x6b0   : > { %v9576_v32 = vpop.f32.mrf.mxu2 }
 0x6b2   : > { %v9589_v45 = vpop.f32.mrf.mxu3 }
 0x6be   : > { %v9600_v56 = vpop.f32.mrf.mxu0 }
 0x6bf   : > { %v9601_v6 = vadd.f32 %v9600_v56, %v9588_v27  ;;  %v9786_v56 = vld [vmem:[%s687_s19] sm:$0xf] }
 0x6c0   : > { %v9613_v57 = vpop.f32.mrf.mxu1 }
 0x6c1   : > { %v9614_v58 = vadd.f32 %v9613_v57, %v9601_v6 }
 0x6c6   : > { %v9602_v46 = vpop.f32.mrf.mxu0 }
 0x6c7   : > { %v9788_v46 = vperm.slane %v9786_v56, 0 }
 0x6c8   : > { %v9626_v9 = vpop.f32.mrf.mxu2  ;;  %v9615_v41 = vpop.f32.mrf.mxu1 }
 0x6c9   : > { %v9627_v3 = vadd.f32 %v9626_v9, %v9614_v58  ;;  %v9800_v9 = vld [vmem:[%s697_s12] sm:$0xf]  ;;  %v9789_v41 = vperm.slane %v9786_v56, 1 }
 0x6ca   : > { %v9639_v30 = vpop.f32.mrf.mxu3  ;;  %v9804_v6 = vperm.slane %v9800_v9, 2  ;;  %v9805_v58 = vperm.slane %v9800_v9, 3 }
 0x6cb   : > { %v9640_v31 = vadd.f32 %v9639_v30, %v9627_v3 }
 0x6d0   : > { %v9628_v49 = vpop.f32.mrf.mxu2 }
 0x6d1   : > { %v9790_v49 = vperm.slane %v9786_v56, 2 }
 0x6d2   : > { %v9641_v8 = vpop.f32.mrf.mxu3 }
 0x6d3   : > { %v9791_v8 = vperm.slane %v9786_v56, 3 }
 0x6de   : > { %v9652_v42 = vpop.f32.mrf.mxu0 }
 0x6df   : > { %v9653_v7 = vadd.f32 %v9652_v42, %v9640_v31  ;;  %v9802_v42 = vperm.slane %v9800_v9, 0 }
 0x6e0   : > { %v9665_v60 = vpop.f32.mrf.mxu1 }
 0x6e1   : > { %v9666_v51 = vadd.f32 %v9665_v60, %v9653_v7  ;;  %v9803_v60 = vperm.slane %v9800_v9, 1 }
 0x6e6   : > { %v9654_v11 = vpop.f32.mrf.mxu0 }
 0x6e8   : > { %v9678_v16 = vpop.f32.mrf.mxu2  ;;  %v9667_v63 = vpop.f32.mrf.mxu1 }
 0x6e9   : > { %v9679_v52 = vadd.f32 %v9678_v16, %v9666_v51 }
 0x6ea   : > { %v9691_v43 = vpop.f32.mrf.mxu3 }
 0x6eb   : > { %v9692_v53 = vadd.f32 %v9691_v43, %v9679_v52 }
 0x6f0   : > { %v9680_v50 = vpop.f32.mrf.mxu2 }
 0x6f2   : > { %v9693_v21 = vpop.f32.mrf.mxu3 }
 0x6fe   : > { %v9704_v12 = vpop.f32.mrf.mxu0 }
 0x6ff   : > { %v9705_v19 = vadd.f32 %v9704_v12, %v9692_v53 }
 0x700   : > { %v9717_v17 = vpop.f32.mrf.mxu1 }
 0x701   : > { %v9718_v28 = vadd.f32 %v9717_v17, %v9705_v19 }
 0x706   : > { %v9706_v22 = vpop.f32.mrf.mxu0 }
 0x708   : > { %v9730_v15 = vpop.f32.mrf.mxu2  ;;  %v9719_v59 = vpop.f32.mrf.mxu1 }
 0x709   : > { %v9731_v40 = vadd.f32 %v9730_v15, %v9718_v28 }
 0x70a   : > { %v9743_v39 = vpop.f32.mrf.mxu3 }
 0x70b   : > { %v9744_v20 = vadd.f32 %v9743_v39, %v9731_v40 }
 0x70d   : > { %v9750_v24 = vadd.f32 %v9744_v20, %v17275_v13 }
 0x70f   : > { %v9753_v25 = vadd.f32 %v9752_v44, %v9750_v24 }
 0x710   : > { %v9732_v61 = vpop.f32.mrf.mxu2 }
 0x711   : > { %9754 = vadd.xlane.f32.xlu1 %v9753_v25 }
 0x712   : > { %v9745_v33 = vpop.f32.mrf.mxu3 }
 0x784   : > { %v9755_v1 = vpop.xlane.xlu1 %9754 }
 0x785   : > { %v9756_v47 = vmul.f32 %v9755_v1, %v17146_v48 }
 0x787   : > { %v9757_v54 = vsub.f32 %v9747_v38, %v9756_v47  ;;  %v9758_v14 = vsub.f32 %v9748_v18, %v9756_v47  ;;  %v9759_v5 = vsub.f32 %v9749_v29, %v9756_v47  ;;  %v9760_v62 = vsub.f32 %v9750_v24, %v9756_v47 }
 0x789   : > { %v9761_v2 = vmul.f32 %v9757_v54, %v9757_v54  ;;  %v9762_v26 = vmul.f32 %v9758_v14, %v9758_v14  ;;  %v9763_v55 = vmul.f32 %v9759_v5, %v9759_v5  ;;  %v9764_v10 = vmul.f32 %v9760_v62, %v9760_v62 }
 0x78b   : > { %v9765_v37 = vadd.f32 %v9762_v26, %v9761_v2 }
 0x78d   : > { %v9766_v13 = vadd.f32 %v9765_v37, %v9763_v55 }
 0x78f   : > { %v9767_v4 = vadd.f32 %v9766_v13, %v9764_v10 }
 0x791   : > { %9768 = vadd.xlane.f32.xlu1 %v9767_v4 }
 0x804   : > { %v9769_v34 = vpop.xlane.xlu1 %9768 }
 0x805   : > { %v9770_v0 = vmul.f32 %v9769_v34, %v17146_v48 }
 0x807   : > { %v9771_v35 = vadd.f32 1e-05, %v9770_v0 }
 0x809   : > { %16031 = vrsqrt.f32 %v9771_v35  ;;  %vm9778_vm5 = vweird.f32 %v9771_v35 }
 0x80f   : > { %v16032_v36 = vpop.eup %16031 }
 0x810   : > { %v9773_v27 = vmul.f32 %v16032_v36, %v9771_v35  ;;  %vm9779_vm4 = vweird.f32 %v16032_v36 }
 0x811   : > { %vm9780_vm6 = vmor %vm9778_vm5, %vm9779_vm4 }
 0x812   : > { %v9774_v32 = vmul.f32 %v16032_v36, %v9773_v27 }
 0x814   : > { %v9775_v45 = vmul.f32 0.5, %v9774_v32 }
 0x816   : > { %v9776_v57 = vsub.f32 1.5, %v9775_v45 }
 0x818   : > { %v9777_v30 = vmul.f32 %v16032_v36, %v9776_v57 }
 0x81a   : > { %v9781_v48 = vsel %vm9780_vm6, %v16032_v36, %v9777_v30 }
 0x81b   : > { %v9782_v16 = vmul.f32 %v9781_v48, %v9757_v54  ;;  %v9783_v43 = vmul.f32 %v9781_v48, %v9758_v14  ;;  %v9784_v11 = vmul.f32 %v9781_v48, %v9759_v5  ;;  %v9785_v63 = vmul.f32 %v9781_v48, %v9760_v62 }
 0x81d   : > { %v9796_v3 = vmul.f32 %v9788_v46, %v9782_v16  ;;  %v9797_v50 = vmul.f32 %v9789_v41, %v9783_v43  ;;  %v9798_v21 = vmul.f32 %v9790_v49, %v9784_v11  ;;  %v9799_v31 = vmul.f32 %v9791_v8, %v9785_v63 }
 0x81f   : > { %v9810_v7 = vadd.f32 %v9802_v42, %v9796_v3  ;;  %v9811_v51 = vadd.f32 %v9803_v60, %v9797_v50  ;;  %v9812_v52 = vadd.f32 %v9804_v6, %v9798_v21  ;;  %v9813_v53 = vadd.f32 %v9805_v58, %v9799_v31 }
 0x821   : > { %9814 = vst [vmem:[#allocation20] sm:$0xff] %v9810_v7 }
 0x822   : > { %9815 = vst [vmem:[#allocation20 + $0x8] sm:$0xff] %v9811_v51 }
 0x823   : > { %9816 = vst [vmem:[#allocation20 + $0x10] sm:$0xff] %v9812_v52 }
 0x824   : > { %9817 = vst [vmem:[#allocation20 + $0x18] sm:$0xff] %v9813_v53 }
 0x825   : > { %15929 = dma.vmem_to_hbm [thread:$0]  (%p15970_p2), %s9828_s0, 512, %s9830_s27, [#allocation4]  }
 0x826   : > { %16444 = dma.done.wait (%p15970_p2), [#allocation4], 512  }
 0x827   : > { %16446 = vsyncadd (%p15970_p2), [#allocation4], 4294966784 }
 0x828 PF: > { %s38_s22 = sadd.s32 1, %s16469_s22   ;;  %s19572_s2 = sld [smem:[#allocation28_spill]] }
 0x829   : > { %p35_p3 = scmp.ge.s32.totalorder %s38_s22, 4   ;;  %s19573_s19 = sld [smem:[#allocation31_spill]] }
 0x82a   : > { %s19574_s4 = sld [smem:[#allocation30_spill]]  ;;  %s19575_s17 = smov %s16453_s18 }
 0x82b   : > { %s19577_s20 = smov %s16465_s21 }
 0x82c   :  { %37 = sbr.rel (!%p35_p3) target bundleno = 23 (0x17), region = 219 }
 0x82e   : > { %s19576_s18 = smov %s19572_s2 }
 0x830   : > { %s19578_s21 = smov %s19574_s4 }
 0x831   :  { %9843 = vsyncpa [#allocation3], 1 }
 0x832   :  { %9845 = vsyncpa [#allocation3 + $0x1], 1 }
 0x833   :  { %9846 = vsyncpa [#allocation6], 1 }
 0x834   :  { %9848 = vsyncpa [#allocation6 + $0x1], 1 }
 0x835   :  { %9849 = vsyncpa [#allocation9], 1 }
 0x836   :  { %9851 = vsyncpa [#allocation9 + $0x1], 1 }
 0x837   :  { %9852 = vsyncpa [#allocation12], 1 }
 0x838   :  { %9854 = vsyncpa [#allocation12 + $0x1], 1 }
 0x839   :  { %9855 = vsyncpa [#allocation15], 1 }
 0x83a   :  { %9857 = vsyncpa [#allocation15 + $0x1], 1 }
 0x83b   :  { %9858 = vsyncpa [#allocation18], 1 }
 0x83c   :  { %9860 = vsyncpa [#allocation18 + $0x1], 1 }
 0x83d   :  { %9861 = vsyncpa [#allocation4], 1 }
 0x83e   :  { %9863 = vsyncpa [#allocation4 + $0x1], 1 }

</bundles_post_ra>
